<compile_context>
chip_gen: v7x
topology: tpu7x:2x2x1
jax: 0.10.0
libtpu: 0.0.40
codegen_flags: <defaults>
</compile_context>

<pallas_src>
import functools

import numpy as np

import jax
import jax.numpy as jnp
from jax.experimental import pallas as pl
from jax.experimental.pallas import tpu as pltpu

H = 13              # spatial size fixed by current_state_shape = (B, 7, 13, 13)
W = 13
WP = 16             # width padded to a sublane/lane friendly 16 columns
ROWS = H + 2        # per-sample packed rows: 1 top border + 13 image + 1 bottom border
IN_C = 7            # input channels fixed by the module
FC1, FC2, NOUT = 64, 128, 4
NOUT_PAD = 128      # output logits padded to a full 128-lane store


# --------------------------------------------------------------------------
# Pallas kernel (one grid step == one batch tile of TB samples)
# --------------------------------------------------------------------------
def _prednet_kernel(x_ref, cw_ref, cb_ref, rmask_ref, pa_ref, ps_ref,
                    f1w_ref, f1b_ref, f2w_ref, f2b_ref, f3w_ref, f3b_ref,
                    out_ref, *, n_blocks, dot_dtype):
    r, lp = x_ref.shape                       # (TB*15, 16*chan)
    rmask = rmask_ref[...]                    # (r, 1) f32, 1.0 on image rows, 0.0 on borders

    def conv(c, layer, mask_rows=True):
        """3x3 'same' conv on the packed (r, lp) slab as 3 banded matmuls.

        Column taps / column padding live inside the banded weights + packed
        bias (so padded columns stay exactly zero); the ky row taps are two
        +-1 row shifts.  Weights arrive pre-cast to `dot_dtype` (bf16 by
        default); accumulation is always f32.
        """
        cd = c.astype(dot_dtype)
        zrow = jnp.zeros((1, lp), dot_dtype)
        dn = jnp.concatenate([zrow, cd[:r - 1, :]], axis=0)   # row g holds c[g-1]
        up = jnp.concatenate([cd[1:, :], zrow], axis=0)       # row g holds c[g+1]
        y = (jnp.dot(dn, cw_ref[layer, 0, :, :], preferred_element_type=jnp.float32)
             + jnp.dot(cd, cw_ref[layer, 1, :, :], preferred_element_type=jnp.float32)
             + jnp.dot(up, cw_ref[layer, 2, :, :], preferred_element_type=jnp.float32))
        y = y + cb_ref[layer:layer + 1, :]
        # Border rows must be re-zeroed before the value feeds the next conv.
        return y * rmask if mask_rows else y

    # conv_1 (7 -> chan), no activation before the residual stack (as in forward()).
    cur = conv(x_ref[...], 0)

    # residual blocks: conv -> relu -> conv -> +skip -> relu (assumed, see TODO).
    layer = 1
    for _ in range(n_blocks):
        t = jnp.maximum(conv(cur, layer), 0.0)
        t = conv(t, layer + 1)
        cur = jnp.maximum(t + cur, 0.0)
        layer += 2

    # conv_2 + relu.  No row mask needed: the pooling matrix ignores border rows
    # and padded columns are already exactly zero by construction of the band.
    y = jnp.maximum(conv(cur, layer, mask_rows=False), 0.0)

    # Global spatial mean as two small matmuls: pa selects the 13 image rows of
    # each sample, ps sums the 13 valid column blocks and applies 1/(13*13).
    pooled = jnp.dot(jnp.dot(pa_ref[...], y, preferred_element_type=jnp.float32),
                     ps_ref[...], preferred_element_type=jnp.float32)      # (TB, chan)

    # MLP head (kept in f32 - negligible work).
    h = jnp.maximum(jnp.dot(pooled, f1w_ref[...],
                            preferred_element_type=jnp.float32) + f1b_ref[...], 0.0)
    h = jnp.maximum(jnp.dot(h, f2w_ref[...],
                            preferred_element_type=jnp.float32) + f2b_ref[...], 0.0)
    h = jnp.maximum(jnp.dot(h, f3w_ref[...],
                            preferred_element_type=jnp.float32) + f3b_ref[...], 0.0)  # (TB,128)

    # Softmax over the 4 real logits; lanes >= NOUT are zero-padded (relu'd
    # logits are >= 0, so the max over 128 lanes equals the max over the 4).
    lane = jax.lax.broadcasted_iota(jnp.int32, (1, NOUT_PAD), 1)
    live = (lane < NOUT).astype(jnp.float32)
    m = jnp.max(h, axis=-1, keepdims=True)
    e = jnp.exp(h - m) * live
    out_ref[...] = e / jnp.sum(e, axis=-1, keepdims=True)


# --------------------------------------------------------------------------
# Wrapper helpers (pure-JAX / numpy layout plumbing)
# --------------------------------------------------------------------------
def _round_up(v, m):
    return ((v + m - 1) // m) * m


def _full_spec(shape):
    return pl.BlockSpec(shape, lambda *_: (0,) * len(shape))


def _vmem_limit_bytes():
    # v5e/v6e: 128 MiB physical -> allow 64 MiB scoped; v7x: 64 MiB -> <= 48 MiB.
    try:
        cap = pltpu.get_tpu_info().vmem_capacity_bytes
        return int(min(64 * 1024 * 1024, (cap * 3) // 4))
    except Exception:
        return 48 * 1024 * 1024


def _col_shift_mats():
    mats = []
    for kx in range(3):
        s = np.zeros((WP, WP), np.float32)
        for i in range(W):          # output column block
            j = i + kx - 1          # input column block read by this tap
            if 0 <= j < W:
                s[j, i] = 1.0
        mats.append(s)
    return mats


_SHIFTS = _col_shift_mats()


def _banded_weights(w_hwio, cin_pad):
    """(3,3,cin,cout) HWIO conv weights -> (3, WP*cin_pad, WP*cout) banded mats.

    band[ky][j*cin_pad:, i*cout:] = w[ky, j-i+1] for valid |j-i|<=1 and i,j < 13,
    so (packed_row @ band[ky]) performs all kx taps at once; output column
    blocks >= 13 are exactly zero and input column blocks >= 13 are ignored.
    """
    cin, cout = int(w_hwio.shape[2]), int(w_hwio.shape[3])
    w = jnp.zeros((3, 3, cin_pad, cout), jnp.float32).at[:, :, :cin, :].set(
        w_hwio.astype(jnp.float32))
    bands = []
    for ky in range(3):
        acc = jnp.zeros((WP * cin_pad, WP * cout), jnp.float32)
        for kx in range(3):
            acc = acc + jnp.kron(jnp.asarray(_SHIFTS[kx]), w[ky, kx])
        bands.append(acc)
    return jnp.stack(bands)


def _packed_bias(b):
    cout = int(b.shape[0])
    bp = jnp.zeros((WP, cout), jnp.float32).at[:W, :].set(
        jnp.broadcast_to(b.astype(jnp.float32), (W, cout)))
    return bp.reshape(WP * cout)


def prednet_pallas(x_nchw, params, *, n_blocks, chan,
                   batch_tile=None, conv_dtype=jnp.bfloat16):
    """PredNet forward as one Pallas TPU kernel.

    conv_dtype: dtype of the conv matmul inputs (bf16 = native MXU input on
      v6e/v7x; accumulation is always f32).  Use jnp.float32 for tight checks.
    batch_tile: samples per grid step (multiple of 8) - the main tuning knob.
    """
    assert chan >= IN_C and chan % 8 == 0, "packed layout needs out_channels >= 7, % 8 == 0"
    B = x_nchw.shape[0]
    if batch_tile is None:
        TB = min(64, _round_up(B, 8))
        # Keep >= 2 grid steps when possible so the 'parallel' batch axis can
        # span both v7x TensorCores (neutral on single-core v5e/v6e).
        if B > 8 and _round_up(B, TB) // TB < 2:
            TB = max(8, _round_up(TB // 2, 8))
    else:
        TB = batch_tile
    if TB % 8 != 0:
        raise ValueError("batch_tile must be a multiple of 8")
    Bp = _round_up(B, TB)
    LP = WP * chan                  # packed (column, channel) lane width
    R = TB * ROWS                   # packed rows per grid step

    # ---- pack the input into the lane-dense canvas layout ----
    x = jnp.transpose(x_nchw, (0, 2, 3, 1)).astype(jnp.float32)           # (B,13,13,7)
    x = jnp.pad(x, ((0, Bp - B), (0, 0), (0, WP - W), (0, chan - IN_C)))   # (Bp,13,16,chan)
    x = x.reshape(Bp, H, LP)
    x = jnp.pad(x, ((0, 0), (1, 1), (0, 0)))                               # zero border rows
    x = x.reshape(Bp * ROWS, LP)

    # ---- conv layers as banded matrices, stacked into one VMEM-resident array ----
    w_list = [_banded_weights(params["c1w"], chan)]
    b_list = [_packed_bias(params["c1b"])]
    for i in range(n_blocks):
        w_list += [_banded_weights(params["rw1"][i], chan),
                   _banded_weights(params["rw2"][i], chan)]
        b_list += [_packed_bias(params["rb1"][i]), _packed_bias(params["rb2"][i])]
    w_list.append(_banded_weights(params["c2w"], chan))
    b_list.append(_packed_bias(params["c2b"]))
    cw = jnp.stack(w_list).astype(conv_dtype)     # (n_layers, 3, LP, LP)
    cb = jnp.stack(b_list)                        # (n_layers, LP), f32
    n_layers = cw.shape[0]

    # ---- per-tile constants: row-validity mask and pooling matrices ----
    rm = np.zeros((R, 1), np.float32)
    pa = np.zeros((TB, R), np.float32)
    for b in range(TB):
        rm[b * ROWS + 1: b * ROWS + 1 + H, 0] = 1.0
        pa[b, b * ROWS + 1: b * ROWS + 1 + H] = 1.0
    rmask = jnp.asarray(rm)
    pool_rows = jnp.asarray(pa)
    colsel = np.zeros((WP, 1), np.float32)
    colsel[:W, 0] = 1.0
    pool_cols = jnp.asarray(np.kron(colsel, np.eye(chan, dtype=np.float32)) / float(H * W))

    # ---- MLP head; fc3 / output padded to 128 lanes for a lane-dense store ----
    f1w = params["f1w"].astype(jnp.float32)
    f1b = params["f1b"].reshape(1, FC1).astype(jnp.float32)
    f2w = params["f2w"].astype(jnp.float32)
    f2b = params["f2b"].reshape(1, FC2).astype(jnp.float32)
    f3w = jnp.zeros((FC2, NOUT_PAD), jnp.float32).at[:, :NOUT].set(
        params["f3w"].astype(jnp.float32))
    f3b = jnp.zeros((1, NOUT_PAD), jnp.float32).at[0, :NOUT].set(
        params["f3b"].astype(jnp.float32))

    kernel = functools.partial(_prednet_kernel, n_blocks=n_blocks, dot_dtype=conv_dtype)

    out = pl.pallas_call(
        kernel,
        out_shape=jax.ShapeDtypeStruct((Bp, NOUT_PAD), jnp.float32),
        grid=(Bp // TB,),
        in_specs=[
            pl.BlockSpec((R, LP), lambda b: (b, 0)),      # packed input tile
            # constant index maps -> weights/constants stay VMEM resident
            _full_spec((n_layers, 3, LP, LP)),
            _full_spec((n_layers, LP)),
            _full_spec((R, 1)),
            _full_spec((TB, R)),
            _full_spec((LP, chan)),
            _full_spec((chan, FC1)), _full_spec((1, FC1)),
            _full_spec((FC1, FC2)), _full_spec((1, FC2)),
            _full_spec((FC2, NOUT_PAD)), _full_spec((1, NOUT_PAD)),
        ],
        out_specs=pl.BlockSpec((TB, NOUT_PAD), lambda b: (b, 0)),
        compiler_params=pltpu.CompilerParams(
            dimension_semantics=("parallel",),
            vmem_limit_bytes=_vmem_limit_bytes()),
    )(x, cw, cb, rmask, pool_rows, pool_cols, f1w, f1b, f2w, f2b, f3w, f3b)
    return out[:B, :NOUT]


# --------------------------------------------------------------------------
# Pure-JAX reference (for correctness check)
# --------------------------------------------------------------------------
def prednet_ref(x_nchw, params, *, n_blocks):
    hp = jax.lax.Precision.HIGHEST
    x = jnp.transpose(x_nchw, (0, 2, 3, 1)).astype(jnp.float32)

    def conv(v, w, b):
        y = jax.lax.conv_general_dilated(
            v, w, window_strides=(1, 1), padding="SAME",
            dimension_numbers=("NHWC", "HWIO", "NHWC"),
            precision=hp, preferred_element_type=jnp.float32)
        return y + b

    y = conv(x, params["c1w"], params["c1b"])
    for i in range(n_blocks):
        t = jax.nn.relu(conv(y, params["rw1"][i], params["rb1"][i]))
        t = conv(t, params["rw2"][i], params["rb2"][i])
        y = jax.nn.relu(t + y)
    y = jax.nn.relu(conv(y, params["c2w"], params["c2b"]))
    p = jnp.mean(y, axis=(1, 2))
    h = jax.nn.relu(jnp.dot(p, params["f1w"], precision=hp) + params["f1b"])
    h = jax.nn.relu(jnp.dot(h, params["f2w"], precision=hp) + params["f2b"])
    h = jax.nn.relu(jnp.dot(h, params["f3w"], precision=hp) + params["f3b"])
    return jax.nn.softmax(h, axis=1)


# --------------------------------------------------------------------------
# Deterministic synthetic parameters (no checkpoint loading)
# --------------------------------------------------------------------------
def init_params(key, n_blocks, chan):
    ks = jax.random.split(key, 14)

    def w(k, shape, fan_in):
        return jax.random.normal(k, shape, dtype=jnp.float32) * (0.5 / jnp.sqrt(fan_in))

    return {
        "c1w": w(ks[0], (3, 3, IN_C, chan), 9 * IN_C),
        "c1b": w(ks[1], (chan,), chan),
        "rw1": w(ks[2], (n_blocks, 3, 3, chan, chan), 9 * chan),
        "rb1": w(ks[3], (n_blocks, chan), chan),
        "rw2": w(ks[4], (n_blocks, 3, 3, chan, chan), 9 * chan),
        "rb2": w(ks[5], (n_blocks, chan), chan),
        "c2w": w(ks[6], (3, 3, chan, chan), 9 * chan),
        "c2b": w(ks[7], (chan,), chan),
        "f1w": w(ks[8], (chan, FC1), chan),
        "f1b": w(ks[9], (FC1,), FC1),
        "f2w": w(ks[10], (FC1, FC2), FC1),
        "f2b": w(ks[11], (FC2,), FC2),
        "f3w": w(ks[12], (FC2, NOUT), FC2),
        "f3b": w(ks[13], (NOUT,), NOUT),
    }


if __name__ == "__main__":
    B, N_RES, C = 2, 2, 16   # Batch=2, ResidualBlocks=2, out_channels=16
    key = jax.random.PRNGKey(0)
    kx, kp = jax.random.split(key)

    x = jax.random.normal(kx, (B, IN_C, H, W), dtype=jnp.float32)   # NCHW, as in PyTorch
    params = init_params(kp, N_RES, C)

    ref = prednet_ref(x, params, n_blocks=N_RES)

    # f32 matmul path: tight check against the high-precision XLA reference.
    out32 = jax.block_until_ready(
        prednet_pallas(x, params, n_blocks=N_RES, chan=C, conv_dtype=jnp.float32))
    assert out32.shape == (B, NOUT)
    err32 = float(jnp.max(jnp.abs(out32 - ref)))
    if err32 > 1e-3:
        raise AssertionError(f"f32 kernel/ref mismatch, max abs err = {err32}")

    # Default bf16 MXU path (native input dtype on v6e/v7x); looser tolerance.
    out_bf = jax.block_until_ready(prednet_pallas(x, params, n_blocks=N_RES, chan=C))
    err_bf = float(jnp.max(jnp.abs(out_bf - ref)))
    if err_bf > 5e-2:
        raise AssertionError(f"bf16 kernel/ref mismatch, max abs err = {err_bf}")

    print("KERNEL_OK")
</pallas_src>

<mosaic_0001>
module attributes {stable_mosaic.version = 11 : i64} {
  func.func @_prednet_kernel(%arg0: i32, %arg1: memref<120x256xf32, #tpu.memory_space<vmem>>, %arg2: memref<6x3x256x256xf32, #tpu.memory_space<vmem>>, %arg3: memref<6x256xf32, #tpu.memory_space<vmem>>, %arg4: memref<120x1xf32, #tpu.memory_space<vmem>>, %arg5: memref<8x120xf32, #tpu.memory_space<vmem>>, %arg6: memref<256x16xf32, #tpu.memory_space<vmem>>, %arg7: memref<16x64xf32, #tpu.memory_space<vmem>>, %arg8: memref<1x64xf32, #tpu.memory_space<vmem>>, %arg9: memref<64x128xf32, #tpu.memory_space<vmem>>, %arg10: memref<1x128xf32, #tpu.memory_space<vmem>>, %arg11: memref<128x128xf32, #tpu.memory_space<vmem>>, %arg12: memref<1x128xf32, #tpu.memory_space<vmem>>, %arg13: memref<8x128xf32, #tpu.memory_space<vmem>>) attributes {dimension_semantics = [#tpu.dimension_semantics<parallel>], iteration_bounds = array<i64: 1>, scalar_prefetch = 0 : i64, scratch_operands = 0 : i64, tpu.core_type = #tpu.core_type<tc>, window_params = [{transform_indices = @transform_0, window_bounds = array<i64: 120, 256>}, {pipeline_mode = #tpu.pipeline_mode<synchronous>, transform_indices = @transform_1, window_bounds = array<i64: 6, 3, 256, 256>}, {pipeline_mode = #tpu.pipeline_mode<synchronous>, transform_indices = @transform_2, window_bounds = array<i64: 6, 256>}, {pipeline_mode = #tpu.pipeline_mode<synchronous>, transform_indices = @transform_3, window_bounds = array<i64: 120, 1>}, {pipeline_mode = #tpu.pipeline_mode<synchronous>, transform_indices = @transform_4, window_bounds = array<i64: 8, 120>}, {pipeline_mode = #tpu.pipeline_mode<synchronous>, transform_indices = @transform_5, window_bounds = array<i64: 256, 16>}, {pipeline_mode = #tpu.pipeline_mode<synchronous>, transform_indices = @transform_6, window_bounds = array<i64: 16, 64>}, {pipeline_mode = #tpu.pipeline_mode<synchronous>, transform_indices = @transform_7, window_bounds = array<i64: 1, 64>}, {pipeline_mode = #tpu.pipeline_mode<synchronous>, transform_indices = @transform_8, window_bounds = array<i64: 64, 128>}, {pipeline_mode = #tpu.pipeline_mode<synchronous>, transform_indices = @transform_9, window_bounds = array<i64: 1, 128>}, {pipeline_mode = #tpu.pipeline_mode<synchronous>, transform_indices = @transform_10, window_bounds = array<i64: 128, 128>}, {pipeline_mode = #tpu.pipeline_mode<synchronous>, transform_indices = @transform_11, window_bounds = array<i64: 1, 128>}, {transform_indices = @transform_12, window_bounds = array<i64: 8, 128>}]} {
    %c0 = arith.constant 0 : index
    %c0_0 = arith.constant 0 : index
    %0 = vector.load %arg4[%c0, %c0_0] : memref<120x1xf32, #tpu.memory_space<vmem>>, vector<120x1xf32>
    %c0_1 = arith.constant 0 : index
    %c0_2 = arith.constant 0 : index
    %1 = vector.load %arg1[%c0_1, %c0_2] : memref<120x256xf32, #tpu.memory_space<vmem>>, vector<120x256xf32>
    %cst = arith.constant 0.000000e+00 : f32
    %2 = vector.broadcast %cst : f32 to vector<1x256xf32>
    %3 = vector.extract_strided_slice %1 {offsets = [0, 0], sizes = [119, 256], strides = [1, 1]} : vector<120x256xf32> to vector<119x256xf32>
    %4 = tpu.concatenate %2, %3 in 0 : vector<1x256xf32>, vector<119x256xf32> -> vector<120x256xf32>
    %5 = vector.extract_strided_slice %1 {offsets = [1, 0], sizes = [119, 256], strides = [1, 1]} : vector<120x256xf32> to vector<119x256xf32>
    %6 = tpu.concatenate %5, %2 in 0 : vector<119x256xf32>, vector<1x256xf32> -> vector<120x256xf32>
    %c0_3 = arith.constant 0 : index
    %c0_4 = arith.constant 0 : index
    %c0_5 = arith.constant 0 : index
    %c0_6 = arith.constant 0 : index
    %7 = vector.load %arg2[%c0_3, %c0_4, %c0_5, %c0_6] : memref<6x3x256x256xf32, #tpu.memory_space<vmem>>, vector<1x1x256x256xf32>
    %8 = vector.shape_cast %7 : vector<1x1x256x256xf32> to vector<256x256xf32>
    %cst_7 = arith.constant dense<0.000000e+00> : vector<120x256xf32>
    %9 = tpu.matmul %4, %8, %cst_7 {dimension_numbers = #tpu.dot_dimension_numbers<[1], [0], [0], [1], [0, 0, 1, 1], [], []>} : vector<120x256xf32>, vector<256x256xf32>, vector<120x256xf32> -> vector<120x256xf32>
    %c0_8 = arith.constant 0 : index
    %c1 = arith.constant 1 : index
    %c0_9 = arith.constant 0 : index
    %c0_10 = arith.constant 0 : index
    %10 = vector.load %arg2[%c0_8, %c1, %c0_9, %c0_10] : memref<6x3x256x256xf32, #tpu.memory_space<vmem>>, vector<1x1x256x256xf32>
    %11 = vector.shape_cast %10 : vector<1x1x256x256xf32> to vector<256x256xf32>
    %cst_11 = arith.constant dense<0.000000e+00> : vector<120x256xf32>
    %12 = tpu.matmul %1, %11, %cst_11 {dimension_numbers = #tpu.dot_dimension_numbers<[1], [0], [0], [1], [0, 0, 1, 1], [], []>} : vector<120x256xf32>, vector<256x256xf32>, vector<120x256xf32> -> vector<120x256xf32>
    %13 = arith.addf %9, %12 : vector<120x256xf32>
    %c0_12 = arith.constant 0 : index
    %c2 = arith.constant 2 : index
    %c0_13 = arith.constant 0 : index
    %c0_14 = arith.constant 0 : index
    %14 = vector.load %arg2[%c0_12, %c2, %c0_13, %c0_14] : memref<6x3x256x256xf32, #tpu.memory_space<vmem>>, vector<1x1x256x256xf32>
    %15 = vector.shape_cast %14 : vector<1x1x256x256xf32> to vector<256x256xf32>
    %cst_15 = arith.constant dense<0.000000e+00> : vector<120x256xf32>
    %16 = tpu.matmul %6, %15, %cst_15 {dimension_numbers = #tpu.dot_dimension_numbers<[1], [0], [0], [1], [0, 0, 1, 1], [], []>} : vector<120x256xf32>, vector<256x256xf32>, vector<120x256xf32> -> vector<120x256xf32>
    %17 = arith.addf %13, %16 : vector<120x256xf32>
    %c0_16 = arith.constant 0 : index
    %c0_17 = arith.constant 0 : index
    %18 = vector.load %arg3[%c0_16, %c0_17] : memref<6x256xf32, #tpu.memory_space<vmem>>, vector<1x256xf32>
    %19 = vector.broadcast %18 : vector<1x256xf32> to vector<120x256xf32>
    %20 = arith.addf %17, %19 : vector<120x256xf32>
    %21 = vector.broadcast %0 : vector<120x1xf32> to vector<120x256xf32>
    %22 = arith.mulf %20, %21 : vector<120x256xf32>
    %cst_18 = arith.constant 0.000000e+00 : f32
    %23 = vector.broadcast %cst_18 : f32 to vector<1x256xf32>
    %24 = vector.extract_strided_slice %22 {offsets = [0, 0], sizes = [119, 256], strides = [1, 1]} : vector<120x256xf32> to vector<119x256xf32>
    %25 = tpu.concatenate %23, %24 in 0 : vector<1x256xf32>, vector<119x256xf32> -> vector<120x256xf32>
    %26 = vector.extract_strided_slice %22 {offsets = [1, 0], sizes = [119, 256], strides = [1, 1]} : vector<120x256xf32> to vector<119x256xf32>
    %27 = tpu.concatenate %26, %23 in 0 : vector<119x256xf32>, vector<1x256xf32> -> vector<120x256xf32>
    %c1_19 = arith.constant 1 : index
    %c0_20 = arith.constant 0 : index
    %c0_21 = arith.constant 0 : index
    %c0_22 = arith.constant 0 : index
    %28 = vector.load %arg2[%c1_19, %c0_20, %c0_21, %c0_22] : memref<6x3x256x256xf32, #tpu.memory_space<vmem>>, vector<1x1x256x256xf32>
    %29 = vector.shape_cast %28 : vector<1x1x256x256xf32> to vector<256x256xf32>
    %cst_23 = arith.constant dense<0.000000e+00> : vector<120x256xf32>
    %30 = tpu.matmul %25, %29, %cst_23 {dimension_numbers = #tpu.dot_dimension_numbers<[1], [0], [0], [1], [0, 0, 1, 1], [], []>} : vector<120x256xf32>, vector<256x256xf32>, vector<120x256xf32> -> vector<120x256xf32>
    %c1_24 = arith.constant 1 : index
    %c1_25 = arith.constant 1 : index
    %c0_26 = arith.constant 0 : index
    %c0_27 = arith.constant 0 : index
    %31 = vector.load %arg2[%c1_24, %c1_25, %c0_26, %c0_27] : memref<6x3x256x256xf32, #tpu.memory_space<vmem>>, vector<1x1x256x256xf32>
    %32 = vector.shape_cast %31 : vector<1x1x256x256xf32> to vector<256x256xf32>
    %cst_28 = arith.constant dense<0.000000e+00> : vector<120x256xf32>
    %33 = tpu.matmul %22, %32, %cst_28 {dimension_numbers = #tpu.dot_dimension_numbers<[1], [0], [0], [1], [0, 0, 1, 1], [], []>} : vector<120x256xf32>, vector<256x256xf32>, vector<120x256xf32> -> vector<120x256xf32>
    %34 = arith.addf %30, %33 : vector<120x256xf32>
    %c1_29 = arith.constant 1 : index
    %c2_30 = arith.constant 2 : index
    %c0_31 = arith.constant 0 : index
    %c0_32 = arith.constant 0 : index
    %35 = vector.load %arg2[%c1_29, %c2_30, %c0_31, %c0_32] : memref<6x3x256x256xf32, #tpu.memory_space<vmem>>, vector<1x1x256x256xf32>
    %36 = vector.shape_cast %35 : vector<1x1x256x256xf32> to vector<256x256xf32>
    %cst_33 = arith.constant dense<0.000000e+00> : vector<120x256xf32>
    %37 = tpu.matmul %27, %36, %cst_33 {dimension_numbers = #tpu.dot_dimension_numbers<[1], [0], [0], [1], [0, 0, 1, 1], [], []>} : vector<120x256xf32>, vector<256x256xf32>, vector<120x256xf32> -> vector<120x256xf32>
    %38 = arith.addf %34, %37 : vector<120x256xf32>
    %c1_34 = arith.constant 1 : index
    %c0_35 = arith.constant 0 : index
    %39 = vector.load %arg3[%c1_34, %c0_35] : memref<6x256xf32, #tpu.memory_space<vmem>>, vector<1x256xf32>
    %40 = vector.broadcast %39 : vector<1x256xf32> to vector<120x256xf32>
    %41 = arith.addf %38, %40 : vector<120x256xf32>
    %42 = vector.broadcast %0 : vector<120x1xf32> to vector<120x256xf32>
    %43 = arith.mulf %41, %42 : vector<120x256xf32>
    %cst_36 = arith.constant 0.000000e+00 : f32
    %44 = vector.broadcast %cst_36 : f32 to vector<120x256xf32>
    %45 = arith.maximumf %43, %44 : vector<120x256xf32>
    %cst_37 = arith.constant 0.000000e+00 : f32
    %46 = vector.broadcast %cst_37 : f32 to vector<1x256xf32>
    %47 = vector.extract_strided_slice %45 {offsets = [0, 0], sizes = [119, 256], strides = [1, 1]} : vector<120x256xf32> to vector<119x256xf32>
    %48 = tpu.concatenate %46, %47 in 0 : vector<1x256xf32>, vector<119x256xf32> -> vector<120x256xf32>
    %49 = vector.extract_strided_slice %45 {offsets = [1, 0], sizes = [119, 256], strides = [1, 1]} : vector<120x256xf32> to vector<119x256xf32>
    %50 = tpu.concatenate %49, %46 in 0 : vector<119x256xf32>, vector<1x256xf32> -> vector<120x256xf32>
    %c2_38 = arith.constant 2 : index
    %c0_39 = arith.constant 0 : index
    %c0_40 = arith.constant 0 : index
    %c0_41 = arith.constant 0 : index
    %51 = vector.load %arg2[%c2_38, %c0_39, %c0_40, %c0_41] : memref<6x3x256x256xf32, #tpu.memory_space<vmem>>, vector<1x1x256x256xf32>
    %52 = vector.shape_cast %51 : vector<1x1x256x256xf32> to vector<256x256xf32>
    %cst_42 = arith.constant dense<0.000000e+00> : vector<120x256xf32>
    %53 = tpu.matmul %48, %52, %cst_42 {dimension_numbers = #tpu.dot_dimension_numbers<[1], [0], [0], [1], [0, 0, 1, 1], [], []>} : vector<120x256xf32>, vector<256x256xf32>, vector<120x256xf32> -> vector<120x256xf32>
    %c2_43 = arith.constant 2 : index
    %c1_44 = arith.constant 1 : index
    %c0_45 = arith.constant 0 : index
    %c0_46 = arith.constant 0 : index
    %54 = vector.load %arg2[%c2_43, %c1_44, %c0_45, %c0_46] : memref<6x3x256x256xf32, #tpu.memory_space<vmem>>, vector<1x1x256x256xf32>
    %55 = vector.shape_cast %54 : vector<1x1x256x256xf32> to vector<256x256xf32>
    %cst_47 = arith.constant dense<0.000000e+00> : vector<120x256xf32>
    %56 = tpu.matmul %45, %55, %cst_47 {dimension_numbers = #tpu.dot_dimension_numbers<[1], [0], [0], [1], [0, 0, 1, 1], [], []>} : vector<120x256xf32>, vector<256x256xf32>, vector<120x256xf32> -> vector<120x256xf32>
    %57 = arith.addf %53, %56 : vector<120x256xf32>
    %c2_48 = arith.constant 2 : index
    %c2_49 = arith.constant 2 : index
    %c0_50 = arith.constant 0 : index
    %c0_51 = arith.constant 0 : index
    %58 = vector.load %arg2[%c2_48, %c2_49, %c0_50, %c0_51] : memref<6x3x256x256xf32, #tpu.memory_space<vmem>>, vector<1x1x256x256xf32>
    %59 = vector.shape_cast %58 : vector<1x1x256x256xf32> to vector<256x256xf32>
    %cst_52 = arith.constant dense<0.000000e+00> : vector<120x256xf32>
    %60 = tpu.matmul %50, %59, %cst_52 {dimension_numbers = #tpu.dot_dimension_numbers<[1], [0], [0], [1], [0, 0, 1, 1], [], []>} : vector<120x256xf32>, vector<256x256xf32>, vector<120x256xf32> -> vector<120x256xf32>
    %61 = arith.addf %57, %60 : vector<120x256xf32>
    %c2_53 = arith.constant 2 : index
    %c0_54 = arith.constant 0 : index
    %62 = vector.load %arg3[%c2_53, %c0_54] : memref<6x256xf32, #tpu.memory_space<vmem>>, vector<1x256xf32>
    %63 = vector.broadcast %62 : vector<1x256xf32> to vector<120x256xf32>
    %64 = arith.addf %61, %63 : vector<120x256xf32>
    %65 = vector.broadcast %0 : vector<120x1xf32> to vector<120x256xf32>
    %66 = arith.mulf %64, %65 : vector<120x256xf32>
    %67 = arith.addf %66, %22 : vector<120x256xf32>
    %cst_55 = arith.constant 0.000000e+00 : f32
    %68 = vector.broadcast %cst_55 : f32 to vector<120x256xf32>
    %69 = arith.maximumf %67, %68 : vector<120x256xf32>
    %cst_56 = arith.constant 0.000000e+00 : f32
    %70 = vector.broadcast %cst_56 : f32 to vector<1x256xf32>
    %71 = vector.extract_strided_slice %69 {offsets = [0, 0], sizes = [119, 256], strides = [1, 1]} : vector<120x256xf32> to vector<119x256xf32>
    %72 = tpu.concatenate %70, %71 in 0 : vector<1x256xf32>, vector<119x256xf32> -> vector<120x256xf32>
    %73 = vector.extract_strided_slice %69 {offsets = [1, 0], sizes = [119, 256], strides = [1, 1]} : vector<120x256xf32> to vector<119x256xf32>
    %74 = tpu.concatenate %73, %70 in 0 : vector<119x256xf32>, vector<1x256xf32> -> vector<120x256xf32>
    %c3 = arith.constant 3 : index
    %c0_57 = arith.constant 0 : index
    %c0_58 = arith.constant 0 : index
    %c0_59 = arith.constant 0 : index
    %75 = vector.load %arg2[%c3, %c0_57, %c0_58, %c0_59] : memref<6x3x256x256xf32, #tpu.memory_space<vmem>>, vector<1x1x256x256xf32>
    %76 = vector.shape_cast %75 : vector<1x1x256x256xf32> to vector<256x256xf32>
    %cst_60 = arith.constant dense<0.000000e+00> : vector<120x256xf32>
    %77 = tpu.matmul %72, %76, %cst_60 {dimension_numbers = #tpu.dot_dimension_numbers<[1], [0], [0], [1], [0, 0, 1, 1], [], []>} : vector<120x256xf32>, vector<256x256xf32>, vector<120x256xf32> -> vector<120x256xf32>
    %c3_61 = arith.constant 3 : index
    %c1_62 = arith.constant 1 : index
    %c0_63 = arith.constant 0 : index
    %c0_64 = arith.constant 0 : index
    %78 = vector.load %arg2[%c3_61, %c1_62, %c0_63, %c0_64] : memref<6x3x256x256xf32, #tpu.memory_space<vmem>>, vector<1x1x256x256xf32>
    %79 = vector.shape_cast %78 : vector<1x1x256x256xf32> to vector<256x256xf32>
    %cst_65 = arith.constant dense<0.000000e+00> : vector<120x256xf32>
    %80 = tpu.matmul %69, %79, %cst_65 {dimension_numbers = #tpu.dot_dimension_numbers<[1], [0], [0], [1], [0, 0, 1, 1], [], []>} : vector<120x256xf32>, vector<256x256xf32>, vector<120x256xf32> -> vector<120x256xf32>
    %81 = arith.addf %77, %80 : vector<120x256xf32>
    %c3_66 = arith.constant 3 : index
    %c2_67 = arith.constant 2 : index
    %c0_68 = arith.constant 0 : index
    %c0_69 = arith.constant 0 : index
    %82 = vector.load %arg2[%c3_66, %c2_67, %c0_68, %c0_69] : memref<6x3x256x256xf32, #tpu.memory_space<vmem>>, vector<1x1x256x256xf32>
    %83 = vector.shape_cast %82 : vector<1x1x256x256xf32> to vector<256x256xf32>
    %cst_70 = arith.constant dense<0.000000e+00> : vector<120x256xf32>
    %84 = tpu.matmul %74, %83, %cst_70 {dimension_numbers = #tpu.dot_dimension_numbers<[1], [0], [0], [1], [0, 0, 1, 1], [], []>} : vector<120x256xf32>, vector<256x256xf32>, vector<120x256xf32> -> vector<120x256xf32>
    %85 = arith.addf %81, %84 : vector<120x256xf32>
    %c3_71 = arith.constant 3 : index
    %c0_72 = arith.constant 0 : index
    %86 = vector.load %arg3[%c3_71, %c0_72] : memref<6x256xf32, #tpu.memory_space<vmem>>, vector<1x256xf32>
    %87 = vector.broadcast %86 : vector<1x256xf32> to vector<120x256xf32>
    %88 = arith.addf %85, %87 : vector<120x256xf32>
    %89 = vector.broadcast %0 : vector<120x1xf32> to vector<120x256xf32>
    %90 = arith.mulf %88, %89 : vector<120x256xf32>
    %cst_73 = arith.constant 0.000000e+00 : f32
    %91 = vector.broadcast %cst_73 : f32 to vector<120x256xf32>
    %92 = arith.maximumf %90, %91 : vector<120x256xf32>
    %cst_74 = arith.constant 0.000000e+00 : f32
    %93 = vector.broadcast %cst_74 : f32 to vector<1x256xf32>
    %94 = vector.extract_strided_slice %92 {offsets = [0, 0], sizes = [119, 256], strides = [1, 1]} : vector<120x256xf32> to vector<119x256xf32>
    %95 = tpu.concatenate %93, %94 in 0 : vector<1x256xf32>, vector<119x256xf32> -> vector<120x256xf32>
    %96 = vector.extract_strided_slice %92 {offsets = [1, 0], sizes = [119, 256], strides = [1, 1]} : vector<120x256xf32> to vector<119x256xf32>
    %97 = tpu.concatenate %96, %93 in 0 : vector<119x256xf32>, vector<1x256xf32> -> vector<120x256xf32>
    %c4 = arith.constant 4 : index
    %c0_75 = arith.constant 0 : index
    %c0_76 = arith.constant 0 : index
    %c0_77 = arith.constant 0 : index
    %98 = vector.load %arg2[%c4, %c0_75, %c0_76, %c0_77] : memref<6x3x256x256xf32, #tpu.memory_space<vmem>>, vector<1x1x256x256xf32>
    %99 = vector.shape_cast %98 : vector<1x1x256x256xf32> to vector<256x256xf32>
    %cst_78 = arith.constant dense<0.000000e+00> : vector<120x256xf32>
    %100 = tpu.matmul %95, %99, %cst_78 {dimension_numbers = #tpu.dot_dimension_numbers<[1], [0], [0], [1], [0, 0, 1, 1], [], []>} : vector<120x256xf32>, vector<256x256xf32>, vector<120x256xf32> -> vector<120x256xf32>
    %c4_79 = arith.constant 4 : index
    %c1_80 = arith.constant 1 : index
    %c0_81 = arith.constant 0 : index
    %c0_82 = arith.constant 0 : index
    %101 = vector.load %arg2[%c4_79, %c1_80, %c0_81, %c0_82] : memref<6x3x256x256xf32, #tpu.memory_space<vmem>>, vector<1x1x256x256xf32>
    %102 = vector.shape_cast %101 : vector<1x1x256x256xf32> to vector<256x256xf32>
    %cst_83 = arith.constant dense<0.000000e+00> : vector<120x256xf32>
    %103 = tpu.matmul %92, %102, %cst_83 {dimension_numbers = #tpu.dot_dimension_numbers<[1], [0], [0], [1], [0, 0, 1, 1], [], []>} : vector<120x256xf32>, vector<256x256xf32>, vector<120x256xf32> -> vector<120x256xf32>
    %104 = arith.addf %100, %103 : vector<120x256xf32>
    %c4_84 = arith.constant 4 : index
    %c2_85 = arith.constant 2 : index
    %c0_86 = arith.constant 0 : index
    %c0_87 = arith.constant 0 : index
    %105 = vector.load %arg2[%c4_84, %c2_85, %c0_86, %c0_87] : memref<6x3x256x256xf32, #tpu.memory_space<vmem>>, vector<1x1x256x256xf32>
    %106 = vector.shape_cast %105 : vector<1x1x256x256xf32> to vector<256x256xf32>
    %cst_88 = arith.constant dense<0.000000e+00> : vector<120x256xf32>
    %107 = tpu.matmul %97, %106, %cst_88 {dimension_numbers = #tpu.dot_dimension_numbers<[1], [0], [0], [1], [0, 0, 1, 1], [], []>} : vector<120x256xf32>, vector<256x256xf32>, vector<120x256xf32> -> vector<120x256xf32>
    %108 = arith.addf %104, %107 : vector<120x256xf32>
    %c4_89 = arith.constant 4 : index
    %c0_90 = arith.constant 0 : index
    %109 = vector.load %arg3[%c4_89, %c0_90] : memref<6x256xf32, #tpu.memory_space<vmem>>, vector<1x256xf32>
    %110 = vector.broadcast %109 : vector<1x256xf32> to vector<120x256xf32>
    %111 = arith.addf %108, %110 : vector<120x256xf32>
    %112 = vector.broadcast %0 : vector<120x1xf32> to vector<120x256xf32>
    %113 = arith.mulf %111, %112 : vector<120x256xf32>
    %114 = arith.addf %113, %69 : vector<120x256xf32>
    %cst_91 = arith.constant 0.000000e+00 : f32
    %115 = vector.broadcast %cst_91 : f32 to vector<120x256xf32>
    %116 = arith.maximumf %114, %115 : vector<120x256xf32>
    %cst_92 = arith.constant 0.000000e+00 : f32
    %117 = vector.broadcast %cst_92 : f32 to vector<1x256xf32>
    %118 = vector.extract_strided_slice %116 {offsets = [0, 0], sizes = [119, 256], strides = [1, 1]} : vector<120x256xf32> to vector<119x256xf32>
    %119 = tpu.concatenate %117, %118 in 0 : vector<1x256xf32>, vector<119x256xf32> -> vector<120x256xf32>
    %120 = vector.extract_strided_slice %116 {offsets = [1, 0], sizes = [119, 256], strides = [1, 1]} : vector<120x256xf32> to vector<119x256xf32>
    %121 = tpu.concatenate %120, %117 in 0 : vector<119x256xf32>, vector<1x256xf32> -> vector<120x256xf32>
    %c5 = arith.constant 5 : index
    %c0_93 = arith.constant 0 : index
    %c0_94 = arith.constant 0 : index
    %c0_95 = arith.constant 0 : index
    %122 = vector.load %arg2[%c5, %c0_93, %c0_94, %c0_95] : memref<6x3x256x256xf32, #tpu.memory_space<vmem>>, vector<1x1x256x256xf32>
    %123 = vector.shape_cast %122 : vector<1x1x256x256xf32> to vector<256x256xf32>
    %cst_96 = arith.constant dense<0.000000e+00> : vector<120x256xf32>
    %124 = tpu.matmul %119, %123, %cst_96 {dimension_numbers = #tpu.dot_dimension_numbers<[1], [0], [0], [1], [0, 0, 1, 1], [], []>} : vector<120x256xf32>, vector<256x256xf32>, vector<120x256xf32> -> vector<120x256xf32>
    %c5_97 = arith.constant 5 : index
    %c1_98 = arith.constant 1 : index
    %c0_99 = arith.constant 0 : index
    %c0_100 = arith.constant 0 : index
    %125 = vector.load %arg2[%c5_97, %c1_98, %c0_99, %c0_100] : memref<6x3x256x256xf32, #tpu.memory_space<vmem>>, vector<1x1x256x256xf32>
    %126 = vector.shape_cast %125 : vector<1x1x256x256xf32> to vector<256x256xf32>
    %cst_101 = arith.constant dense<0.000000e+00> : vector<120x256xf32>
    %127 = tpu.matmul %116, %126, %cst_101 {dimension_numbers = #tpu.dot_dimension_numbers<[1], [0], [0], [1], [0, 0, 1, 1], [], []>} : vector<120x256xf32>, vector<256x256xf32>, vector<120x256xf32> -> vector<120x256xf32>
    %128 = arith.addf %124, %127 : vector<120x256xf32>
    %c5_102 = arith.constant 5 : index
    %c2_103 = arith.constant 2 : index
    %c0_104 = arith.constant 0 : index
    %c0_105 = arith.constant 0 : index
    %129 = vector.load %arg2[%c5_102, %c2_103, %c0_104, %c0_105] : memref<6x3x256x256xf32, #tpu.memory_space<vmem>>, vector<1x1x256x256xf32>
    %130 = vector.shape_cast %129 : vector<1x1x256x256xf32> to vector<256x256xf32>
    %cst_106 = arith.constant dense<0.000000e+00> : vector<120x256xf32>
    %131 = tpu.matmul %121, %130, %cst_106 {dimension_numbers = #tpu.dot_dimension_numbers<[1], [0], [0], [1], [0, 0, 1, 1], [], []>} : vector<120x256xf32>, vector<256x256xf32>, vector<120x256xf32> -> vector<120x256xf32>
    %132 = arith.addf %128, %131 : vector<120x256xf32>
    %c5_107 = arith.constant 5 : index
    %c0_108 = arith.constant 0 : index
    %133 = vector.load %arg3[%c5_107, %c0_108] : memref<6x256xf32, #tpu.memory_space<vmem>>, vector<1x256xf32>
    %134 = vector.broadcast %133 : vector<1x256xf32> to vector<120x256xf32>
    %135 = arith.addf %132, %134 : vector<120x256xf32>
    %cst_109 = arith.constant 0.000000e+00 : f32
    %136 = vector.broadcast %cst_109 : f32 to vector<120x256xf32>
    %137 = arith.maximumf %135, %136 : vector<120x256xf32>
    %c0_110 = arith.constant 0 : index
    %c0_111 = arith.constant 0 : index
    %138 = vector.load %arg5[%c0_110, %c0_111] : memref<8x120xf32, #tpu.memory_space<vmem>>, vector<8x120xf32>
    %cst_112 = arith.constant dense<0.000000e+00> : vector<8x256xf32>
    %139 = tpu.matmul %138, %137, %cst_112 {dimension_numbers = #tpu.dot_dimension_numbers<[1], [0], [0], [1], [0, 0, 1, 1], [], []>} : vector<8x120xf32>, vector<120x256xf32>, vector<8x256xf32> -> vector<8x256xf32>
    %c0_113 = arith.constant 0 : index
    %c0_114 = arith.constant 0 : index
    %140 = vector.load %arg6[%c0_113, %c0_114] : memref<256x16xf32, #tpu.memory_space<vmem>>, vector<256x16xf32>
    %cst_115 = arith.constant dense<0.000000e+00> : vector<8x16xf32>
    %141 = tpu.matmul %139, %140, %cst_115 {dimension_numbers = #tpu.dot_dimension_numbers<[1], [0], [0], [1], [0, 0, 1, 1], [], []>} : vector<8x256xf32>, vector<256x16xf32>, vector<8x16xf32> -> vector<8x16xf32>
    %c0_116 = arith.constant 0 : index
    %c0_117 = arith.constant 0 : index
    %142 = vector.load %arg7[%c0_116, %c0_117] : memref<16x64xf32, #tpu.memory_space<vmem>>, vector<16x64xf32>
    %cst_118 = arith.constant dense<0.000000e+00> : vector<8x64xf32>
    %143 = tpu.matmul %141, %142, %cst_118 {dimension_numbers = #tpu.dot_dimension_numbers<[1], [0], [0], [1], [0, 0, 1, 1], [], []>} : vector<8x16xf32>, vector<16x64xf32>, vector<8x64xf32> -> vector<8x64xf32>
    %c0_119 = arith.constant 0 : index
    %c0_120 = arith.constant 0 : index
    %144 = vector.load %arg8[%c0_119, %c0_120] : memref<1x64xf32, #tpu.memory_space<vmem>>, vector<1x64xf32>
    %145 = vector.broadcast %144 : vector<1x64xf32> to vector<8x64xf32>
    %146 = arith.addf %143, %145 : vector<8x64xf32>
    %cst_121 = arith.constant 0.000000e+00 : f32
    %147 = vector.broadcast %cst_121 : f32 to vector<8x64xf32>
    %148 = arith.maximumf %146, %147 : vector<8x64xf32>
    %c0_122 = arith.constant 0 : index
    %c0_123 = arith.constant 0 : index
    %149 = vector.load %arg9[%c0_122, %c0_123] : memref<64x128xf32, #tpu.memory_space<vmem>>, vector<64x128xf32>
    %cst_124 = arith.constant dense<0.000000e+00> : vector<8x128xf32>
    %150 = tpu.matmul %148, %149, %cst_124 {dimension_numbers = #tpu.dot_dimension_numbers<[1], [0], [0], [1], [0, 0, 1, 1], [], []>} : vector<8x64xf32>, vector<64x128xf32>, vector<8x128xf32> -> vector<8x128xf32>
    %c0_125 = arith.constant 0 : index
    %c0_126 = arith.constant 0 : index
    %151 = vector.load %arg10[%c0_125, %c0_126] : memref<1x128xf32, #tpu.memory_space<vmem>>, vector<1x128xf32>
    %152 = vector.broadcast %151 : vector<1x128xf32> to vector<8x128xf32>
    %153 = arith.addf %150, %152 : vector<8x128xf32>
    %cst_127 = arith.constant 0.000000e+00 : f32
    %154 = vector.broadcast %cst_127 : f32 to vector<8x128xf32>
    %155 = arith.maximumf %153, %154 : vector<8x128xf32>
    %c0_128 = arith.constant 0 : index
    %c0_129 = arith.constant 0 : index
    %156 = vector.load %arg11[%c0_128, %c0_129] : memref<128x128xf32, #tpu.memory_space<vmem>>, vector<128x128xf32>
    %cst_130 = arith.constant dense<0.000000e+00> : vector<8x128xf32>
    %157 = tpu.matmul %155, %156, %cst_130 {dimension_numbers = #tpu.dot_dimension_numbers<[1], [0], [0], [1], [0, 0, 1, 1], [], []>} : vector<8x128xf32>, vector<128x128xf32>, vector<8x128xf32> -> vector<8x128xf32>
    %c0_131 = arith.constant 0 : index
    %c0_132 = arith.constant 0 : index
    %158 = vector.load %arg12[%c0_131, %c0_132] : memref<1x128xf32, #tpu.memory_space<vmem>>, vector<1x128xf32>
    %159 = vector.broadcast %158 : vector<1x128xf32> to vector<8x128xf32>
    %160 = arith.addf %157, %159 : vector<8x128xf32>
    %cst_133 = arith.constant 0.000000e+00 : f32
    %161 = vector.broadcast %cst_133 : f32 to vector<8x128xf32>
    %162 = arith.maximumf %160, %161 : vector<8x128xf32>
    %163 = tpu.iota {dimensions = array<i32: 1>} : vector<1x128xi32>
    %c4_i32 = arith.constant 4 : i32
    %164 = vector.broadcast %c4_i32 : i32 to vector<1x128xi32>
    %165 = arith.cmpi slt, %163, %164 : vector<1x128xi32>
    %166 = arith.extui %165 : vector<1x128xi1> to vector<1x128xi32>
    %167 = arith.sitofp %166 : vector<1x128xi32> to vector<1x128xf32>
    %cst_134 = arith.constant dense<0xFF800000> : vector<8xf32>
    %168 = vector.multi_reduction <maximumf>, %162, %cst_134 [1] : vector<8x128xf32> to vector<8xf32>
    %169 = vector.shape_cast %168 : vector<8xf32> to vector<8x1xf32>
    %170 = vector.broadcast %169 : vector<8x1xf32> to vector<8x128xf32>
    %171 = arith.subf %162, %170 : vector<8x128xf32>
    %172 = math.exp %171 : vector<8x128xf32>
    %173 = vector.broadcast %167 : vector<1x128xf32> to vector<8x128xf32>
    %174 = arith.mulf %172, %173 : vector<8x128xf32>
    %cst_135 = arith.constant dense<0.000000e+00> : vector<8xf32>
    %175 = vector.multi_reduction <add>, %174, %cst_135 [1] : vector<8x128xf32> to vector<8xf32>
    %176 = vector.shape_cast %175 : vector<8xf32> to vector<8x1xf32>
    %177 = vector.broadcast %176 : vector<8x1xf32> to vector<8x128xf32>
    %178 = arith.divf %174, %177 : vector<8x128xf32>
    %c0_136 = arith.constant 0 : index
    %c0_137 = arith.constant 0 : index
    %179 = vector.load %arg13[%c0_136, %c0_137] : memref<8x128xf32, #tpu.memory_space<vmem>>, vector<8x128xf32>
    tpu.vector_store %arg13[%c0_136, %c0_137], %178 {strides = array<i32>} : memref<8x128xf32, #tpu.memory_space<vmem>>, vector<8x128xf32>,
    return
  }
  func.func @transform_0(%arg0: i32) -> (i32, i32) {
    %c0_i32 = arith.constant 0 : i32
    %c0_i32_0 = arith.constant 0 : i32
    return %arg0, %c0_i32 : i32, i32
  }
  func.func @transform_1(%arg0: i32) -> (i32, i32, i32, i32) {
    %c0_i32 = arith.constant 0 : i32
    %c0_i32_0 = arith.constant 0 : i32
    %c0_i32_1 = arith.constant 0 : i32
    %c0_i32_2 = arith.constant 0 : i32
    %c0_i32_3 = arith.constant 0 : i32
    return %c0_i32, %c0_i32_0, %c0_i32_1, %c0_i32_2 : i32, i32, i32, i32
  }
  func.func @transform_2(%arg0: i32) -> (i32, i32) {
    %c0_i32 = arith.constant 0 : i32
    %c0_i32_0 = arith.constant 0 : i32
    %c0_i32_1 = arith.constant 0 : i32
    return %c0_i32, %c0_i32_0 : i32, i32
  }
  func.func @transform_3(%arg0: i32) -> (i32, i32) {
    %c0_i32 = arith.constant 0 : i32
    %c0_i32_0 = arith.constant 0 : i32
    %c0_i32_1 = arith.constant 0 : i32
    return %c0_i32, %c0_i32_0 : i32, i32
  }
  func.func @transform_4(%arg0: i32) -> (i32, i32) {
    %c0_i32 = arith.constant 0 : i32
    %c0_i32_0 = arith.constant 0 : i32
    %c0_i32_1 = arith.constant 0 : i32
    return %c0_i32, %c0_i32_0 : i32, i32
  }
  func.func @transform_5(%arg0: i32) -> (i32, i32) {
    %c0_i32 = arith.constant 0 : i32
    %c0_i32_0 = arith.constant 0 : i32
    %c0_i32_1 = arith.constant 0 : i32
    return %c0_i32, %c0_i32_0 : i32, i32
  }
  func.func @transform_6(%arg0: i32) -> (i32, i32) {
    %c0_i32 = arith.constant 0 : i32
    %c0_i32_0 = arith.constant 0 : i32
    %c0_i32_1 = arith.constant 0 : i32
    return %c0_i32, %c0_i32_0 : i32, i32
  }
  func.func @transform_7(%arg0: i32) -> (i32, i32) {
    %c0_i32 = arith.constant 0 : i32
    %c0_i32_0 = arith.constant 0 : i32
    %c0_i32_1 = arith.constant 0 : i32
    return %c0_i32, %c0_i32_0 : i32, i32
  }
  func.func @transform_8(%arg0: i32) -> (i32, i32) {
    %c0_i32 = arith.constant 0 : i32
    %c0_i32_0 = arith.constant 0 : i32
    %c0_i32_1 = arith.constant 0 : i32
    return %c0_i32, %c0_i32_0 : i32, i32
  }
  func.func @transform_9(%arg0: i32) -> (i32, i32) {
    %c0_i32 = arith.constant 0 : i32
    %c0_i32_0 = arith.constant 0 : i32
    %c0_i32_1 = arith.constant 0 : i32
    return %c0_i32, %c0_i32_0 : i32, i32
  }
  func.func @transform_10(%arg0: i32) -> (i32, i32) {
    %c0_i32 = arith.constant 0 : i32
    %c0_i32_0 = arith.constant 0 : i32
    %c0_i32_1 = arith.constant 0 : i32
    return %c0_i32, %c0_i32_0 : i32, i32
  }
  func.func @transform_11(%arg0: i32) -> (i32, i32) {
    %c0_i32 = arith.constant 0 : i32
    %c0_i32_0 = arith.constant 0 : i32
    %c0_i32_1 = arith.constant 0 : i32
    return %c0_i32, %c0_i32_0 : i32, i32
  }
  func.func @transform_12(%arg0: i32) -> (i32, i32) {
    %c0_i32 = arith.constant 0 : i32
    %c0_i32_0 = arith.constant 0 : i32
    return %arg0, %c0_i32 : i32, i32
  }
}

</mosaic_0001>

<bundles_post_ra>
// kernel: tpu_custom_call.1
= control target key start
LH: loop header
LB: loop body
LE: loop exit
PB: predicated region body
PF: predicated region fallthrough
CT: control target
= control target key end

     0   :  { %17 = vsyncpa [#allocation3], 0  ;;  %s11465_s0 = inlined_call_operand.hbm [shape: f32[120,256], index: 0, kind: input, shape index: {}]   ;;  %s11466_s1 = inlined_call_operand.hbm [shape: f32[6,3,256,256], index: 1, kind: input, shape index: {}]   ;;  %s11467_s2 = inlined_call_operand.hbm [shape: f32[6,256], index: 2, kind: input, shape index: {}]   ;;  %s11468_s3 = inlined_call_operand.vmem [shape: f32[120,1], index: 3, kind: input, shape index: {}]   ;;  %s11469_s4 = inlined_call_operand.hbm [shape: f32[8,120], index: 4, kind: input, shape index: {}]   ;;  %s11470_s5 = inlined_call_operand.vmem [shape: f32[256,16], index: 5, kind: input, shape index: {}]   ;;  %s11471_s6 = inlined_call_operand.hbm [shape: f32[16,64], index: 6, kind: input, shape index: {}]   ;;  %s11472_s7 = inlined_call_operand.hbm [shape: f32[1,64], index: 7, kind: input, shape index: {}]   ;;  %s11473_s8 = inlined_call_operand.hbm [shape: f32[64,128], index: 8, kind: input, shape index: {}]   ;;  %s11474_s9 = inlined_call_operand.hbm [shape: f32[1,128], index: 9, kind: input, shape index: {}]   ;;  %s11475_s10 = inlined_call_operand.hbm [shape: f32[128,128], index: 10, kind: input, shape index: {}]   ;;  %s11476_s11 = inlined_call_operand.hbm [shape: f32[1,128], index: 11, kind: input, shape index: {}]   ;;  %s11477_s12 = inlined_call_operand.hbm [shape: f32[8,128], index: 12, kind: output, shape index: {}]  }
   0x1   :  { %18 = vsyncpa [#allocation6], 0 }
   0x2   :  { %19 = vsyncpa [#allocation9], 0 }
   0x3   :  { %20 = vsyncpa [#allocation12], 0 }
   0x4   :  { %21 = vsyncpa [#allocation15], 0 }
   0x5   :  { %22 = vsyncpa [#allocation18], 0 }
   0x6   :  { %23 = vsyncpa [#allocation4], 0  ;;  %s8848_s21 = smov [#allocation5]   ;;  %s8849_s23 = smov [#allocation8]  }
   0x7   :  { %s41_s22 = sshll.u32 %s8848_s21, 4  ;;  %s66_s24 = sshll.u32 %s8849_s23, 4  ;;  %s42_s22 = int_to_ptr.vmem [resolvable:$true] %s41_s22  ;;  %s67_s24 = int_to_ptr.vmem [resolvable:$true] %s66_s24 }
   0x8   :  { %s8592_s27 = scalar_lea.hbm %s11466_s1, 147456 }
   0x9   :  { %p8593_p0 = scmp.ne.s32.totalorder %s11466_s1, %s8592_s27  ;;  %p8596_p1 = scmp.lt.u32.totalorder %s8592_s27, %s11466_s1 }
   0xb   :  { %p8598_p2 = pnand %p8596_p1, %p8593_p0 }
   0xd   :  { %8601 = shalt.err (!%p8598_p2)
}
   0xe   :  { %s8602_s14 = scalar_lea.vmem %s42_s22, 147456  ;;  %p8607_p4 = scmp.lt.s32.totalorder %s42_s22, %s42_s22 }
   0xf   :  { %p8603_p3 = scmp.ne.s32.totalorder %s42_s22, %s8602_s14  ;;  %p8608_p5 = scmp.lt.s32.totalorder %s8602_s14, %s8602_s14 }
  0x11   :  { %p8609_p6 = por %p8608_p5, %p8607_p4 }
  0x13   :  { %p8610_p7 = pnand %p8609_p6, %p8603_p3 }
  0x15   :  { %8613 = shalt.err (!%p8610_p7)
}
  0x16   :  { %s8850_s15 = smov 256   ;;  %s8851_s16 = smov 16  }
  0x17   :  { %47 = dma.hbm_to_vmem [thread:$0]  %s11466_s1, 147456, %s42_s22, [#allocation6], %s8850_s15, %s8850_s15, %s8851_s16  }
  0x18   :  { %s8614_s21 = scalar_lea.hbm %s11469_s4, 128 }
  0x19   :  { %p8615_p8 = scmp.ne.s32.totalorder %s11469_s4, %s8614_s21  ;;  %p8618_p9 = scmp.lt.u32.totalorder %s8614_s21, %s11469_s4 }
  0x1b   :  { %p8620_p10 = pnand %p8618_p9, %p8615_p8 }
  0x1d   :  { %8623 = shalt.err (!%p8620_p10)
}
  0x1e   :  { %s8624_s28 = scalar_lea.vmem %s67_s24, 128  ;;  %p8629_p12 = scmp.lt.s32.totalorder %s67_s24, %s67_s24 }
  0x1f   :  { %p8625_p11 = scmp.ne.s32.totalorder %s67_s24, %s8624_s28  ;;  %p8630_p13 = scmp.lt.s32.totalorder %s8624_s28, %s8624_s28 }
  0x21   :  { %p8631_p0 = por %p8630_p13, %p8629_p12 }
  0x23   :  { %p8632_p1 = pnand %p8631_p0, %p8625_p11 }
  0x25   :  { %8635 = shalt.err (!%p8632_p1)
}
  0x26   :  { %69 = dma.hbm_to_vmem [thread:$0]  %s11469_s4, 128, %s67_s24, [#allocation9]  }
  0x27   :  { %s8852_s29 = smov [#allocation11]   ;;  %s8853_s13 = smov [#allocation14]  }
  0x28   :  { %s90_s30 = sshll.u32 %s8852_s29, 4  ;;  %s112_s14 = sshll.u32 %s8853_s13, 4  ;;  %s91_s30 = int_to_ptr.vmem [resolvable:$true] %s90_s30  ;;  %s113_s14 = int_to_ptr.vmem [resolvable:$true] %s112_s14 }
  0x29   :  { %s8636_s19 = scalar_lea.hbm %s11472_s7, 16 }
  0x2a   :  { %p8637_p2 = scmp.ne.s32.totalorder %s11472_s7, %s8636_s19  ;;  %p8640_p3 = scmp.lt.u32.totalorder %s8636_s19, %s11472_s7 }
  0x2c   :  { %p8642_p4 = pnand %p8640_p3, %p8637_p2 }
  0x2e   :  { %8645 = shalt.err (!%p8642_p4)
}
  0x2f   :  { %s8646_s4 = scalar_lea.vmem %s91_s30, 16  ;;  %s8650_s24 = scalar_lea.vmem %s91_s30, 32 }
  0x30   :  { %p8647_p5 = scmp.ne.s32.totalorder %s91_s30, %s8646_s4  ;;  %p8651_p6 = scmp.lt.s32.totalorder %s91_s30, %s91_s30 }
  0x31   :  { %p8652_p7 = scmp.lt.s32.totalorder %s8650_s24, %s8646_s4 }
  0x33   :  { %p8653_p8 = por %p8652_p7, %p8651_p6 }
  0x35   :  { %p8654_p9 = pnand %p8653_p8, %p8647_p5 }
  0x37   :  { %8657 = shalt.err (!%p8654_p9)
}
  0x38   :  { %93 = dma.hbm_to_vmem [thread:$0]  %s11472_s7, 16, %s91_s30, [#allocation12]  }
  0x39   :  { %s8658_s22 = scalar_lea.hbm %s11474_s9, 16 }
  0x3a   :  { %p8659_p10 = scmp.ne.s32.totalorder %s11474_s9, %s8658_s22  ;;  %p8662_p11 = scmp.lt.u32.totalorder %s8658_s22, %s11474_s9 }
  0x3c   :  { %p8664_p12 = pnand %p8662_p11, %p8659_p10 }
  0x3e   :  { %8667 = shalt.err (!%p8664_p12)
}
  0x3f   :  { %s8668_s19 = scalar_lea.vmem %s113_s14, 16  ;;  %s8672_s20 = scalar_lea.vmem %s113_s14, 32 }
  0x40   :  { %p8669_p13 = scmp.ne.s32.totalorder %s113_s14, %s8668_s19  ;;  %p8673_p0 = scmp.lt.s32.totalorder %s113_s14, %s113_s14 }
  0x41   :  { %p8674_p1 = scmp.lt.s32.totalorder %s8672_s20, %s8668_s19 }
  0x43   :  { %p8675_p2 = por %p8674_p1, %p8673_p0 }
  0x45   :  { %p8676_p3 = pnand %p8675_p2, %p8669_p13 }
  0x47   :  { %8679 = shalt.err (!%p8676_p3)
}
  0x48   :  { %115 = dma.hbm_to_vmem [thread:$0]  %s11474_s9, 16, %s113_s14, [#allocation15]  }
  0x49   :  { %s8854_s21 = smov [#allocation2]   ;;  %s8855_s25 = smov [#allocation7]  }
  0x4a   :  { %s29_s23 = sshll.u32 %s8854_s21, 4  ;;  %s54_s4 = sshll.u32 %s8855_s25, 4  ;;  %s30_s23 = int_to_ptr.vmem [resolvable:$true] %s29_s23  ;;  %s55_s4 = int_to_ptr.vmem [resolvable:$true] %s54_s4 }
  0x4b   :  { %s8680_s27 = scalar_lea.hbm %s11465_s0, 3840 }
  0x4c   :  { %p8681_p4 = scmp.ne.s32.totalorder %s11465_s0, %s8680_s27  ;;  %p8684_p5 = scmp.lt.u32.totalorder %s8680_s27, %s11465_s0 }
  0x4e   :  { %p8686_p6 = pnand %p8684_p5, %p8681_p4 }
  0x50   :  { %8689 = shalt.err (!%p8686_p6)
}
  0x51   :  { %s8690_s9 = scalar_lea.vmem %s30_s23, 3840  ;;  %p8695_p8 = scmp.lt.s32.totalorder %s30_s23, %s30_s23 }
  0x52   :  { %p8691_p7 = scmp.ne.s32.totalorder %s30_s23, %s8690_s9  ;;  %p8696_p9 = scmp.lt.s32.totalorder %s8690_s9, %s8690_s9 }
  0x54   :  { %p8697_p10 = por %p8696_p9, %p8695_p8 }
  0x56   :  { %p8698_p11 = pnand %p8697_p10, %p8691_p7 }
  0x58   :  { %8701 = shalt.err (!%p8698_p11)
}
  0x59   :  { %35 = dma.hbm_to_vmem [thread:$0]  %s11465_s0, 3840, %s30_s23, [#allocation3], %s8850_s15, %s8850_s15, %s8851_s16  }
  0x5a   :  { %s8702_s19 = scalar_lea.hbm %s11467_s2, 256 }
  0x5b   :  { %p8703_p12 = scmp.ne.s32.totalorder %s11467_s2, %s8702_s19  ;;  %p8706_p13 = scmp.lt.u32.totalorder %s8702_s19, %s11467_s2 }
  0x5d   :  { %p8708_p0 = pnand %p8706_p13, %p8703_p12 }
  0x5f   :  { %8711 = shalt.err (!%p8708_p0)
}
  0x60   :  { %s8712_s25 = scalar_lea.vmem %s55_s4, 256  ;;  %p8717_p2 = scmp.lt.s32.totalorder %s55_s4, %s55_s4 }
  0x61   :  { %p8713_p1 = scmp.ne.s32.totalorder %s55_s4, %s8712_s25  ;;  %p8718_p3 = scmp.lt.s32.totalorder %s8712_s25, %s8712_s25 }
  0x63   :  { %p8719_p4 = por %p8718_p3, %p8717_p2 }
  0x65   :  { %p8720_p5 = pnand %p8719_p4, %p8713_p1 }
  0x67   :  { %8723 = shalt.err (!%p8720_p5)
}
  0x68   :  { %57 = dma.hbm_to_vmem [thread:$0]  %s11467_s2, 256, %s55_s4, [#allocation6]  }
  0x69   :  { %s8856_s16 = smov [#allocation10]   ;;  %s8724_s27 = scalar_lea.hbm %s11471_s6, 256 }
  0x6a   :  { %s77_s23 = sshll.u32 %s8856_s16, 4  ;;  %p8725_p6 = scmp.ne.s32.totalorder %s11471_s6, %s8724_s27  ;;  %s78_s23 = int_to_ptr.vmem [resolvable:$true] %s77_s23 }
  0x6b   :  { %p8728_p7 = scmp.lt.u32.totalorder %s8724_s27, %s11471_s6 }
  0x6d   :  { %p8730_p8 = pnand %p8728_p7, %p8725_p6 }
  0x6f   :  { %8733 = shalt.err (!%p8730_p8)
}
  0x70   :  { %s8734_s9 = scalar_lea.vmem %s78_s23, 256  ;;  %p8739_p10 = scmp.lt.s32.totalorder %s78_s23, %s78_s23 }
  0x71   :  { %p8735_p9 = scmp.ne.s32.totalorder %s78_s23, %s8734_s9  ;;  %p8740_p11 = scmp.lt.s32.totalorder %s8734_s9, %s8734_s9 }
  0x73   :  { %p8741_p12 = por %p8740_p11, %p8739_p10 }
  0x75   :  { %p8742_p13 = pnand %p8741_p12, %p8735_p9 }
  0x77   :  { %8745 = shalt.err (!%p8742_p13)
}
  0x78   :  { %s8857_s2 = smov 128   ;;  %s8858_s4 = smov 8  }
  0x79   :  { %83 = dma.hbm_to_vmem [thread:$0]  %s11471_s6, 256, %s78_s23, [#allocation9], %s8857_s2, %s8857_s2, %s8858_s4  }
  0x7a   :  { %s8859_s17 = smov [#allocation13]   ;;  %s8860_s19 = smov [#allocation16]  }
  0x7b   :  { %s99_s18 = sshll.u32 %s8859_s17, 4  ;;  %s121_s20 = sshll.u32 %s8860_s19, 4  ;;  %s100_s18 = int_to_ptr.vmem [resolvable:$true] %s99_s18  ;;  %s122_s20 = int_to_ptr.vmem [resolvable:$true] %s121_s20 }
  0x7c   :  { %s8746_s21 = scalar_lea.hbm %s11473_s8, 1024 }
  0x7d   :  { %p8747_p0 = scmp.ne.s32.totalorder %s11473_s8, %s8746_s21  ;;  %p8750_p1 = scmp.lt.u32.totalorder %s8746_s21, %s11473_s8 }
  0x7f   :  { %p8752_p2 = pnand %p8750_p1, %p8747_p0 }
  0x81   :  { %8755 = shalt.err (!%p8752_p2)
}
  0x82   :  { %s8756_s6 = scalar_lea.vmem %s100_s18, 1024  ;;  %p8761_p4 = scmp.lt.s32.totalorder %s100_s18, %s100_s18 }
  0x83   :  { %p8757_p3 = scmp.ne.s32.totalorder %s100_s18, %s8756_s6  ;;  %p8762_p5 = scmp.lt.s32.totalorder %s8756_s6, %s8756_s6 }
  0x85   :  { %p8763_p6 = por %p8762_p5, %p8761_p4 }
  0x87   :  { %p8764_p7 = pnand %p8763_p6, %p8757_p3 }
  0x89   :  { %8767 = shalt.err (!%p8764_p7)
}
  0x8a   :  { %105 = dma.hbm_to_vmem [thread:$0]  %s11473_s8, 1024, %s100_s18, [#allocation12], %s8857_s2, %s8857_s2, %s8858_s4  }
  0x8b   :  { %s8768_s28 = scalar_lea.hbm %s11475_s10, 2048 }
  0x8c   :  { %p8769_p8 = scmp.ne.s32.totalorder %s11475_s10, %s8768_s28  ;;  %p8772_p9 = scmp.lt.u32.totalorder %s8768_s28, %s11475_s10 }
  0x8e   :  { %p8774_p10 = pnand %p8772_p9, %p8769_p8 }
  0x90   :  { %8777 = shalt.err (!%p8774_p10)
}
  0x91   :  { %s8778_s14 = scalar_lea.vmem %s122_s20, 2048  ;;  %p8783_p12 = scmp.lt.s32.totalorder %s122_s20, %s122_s20 }
  0x92   :  { %p8779_p11 = scmp.ne.s32.totalorder %s122_s20, %s8778_s14  ;;  %p8784_p13 = scmp.lt.s32.totalorder %s8778_s14, %s8778_s14 }
  0x94   :  { %p8785_p0 = por %p8784_p13, %p8783_p12 }
  0x96   :  { %p8786_p1 = pnand %p8785_p0, %p8779_p11 }
  0x98   :  { %8789 = shalt.err (!%p8786_p1)
}
  0x99   :  { %127 = dma.hbm_to_vmem [thread:$0]  %s11475_s10, 2048, %s122_s20, [#allocation15], %s8857_s2, %s8857_s2, %s8858_s4  }
  0x9a   :  { %s8861_s17 = smov [#allocation17]   ;;  %s8790_s30 = scalar_lea.hbm %s11476_s11, 16 }
  0x9b   :  { %s134_s18 = sshll.u32 %s8861_s17, 4  ;;  %p8791_p2 = scmp.ne.s32.totalorder %s11476_s11, %s8790_s30  ;;  %s135_s18 = int_to_ptr.vmem [resolvable:$true] %s134_s18 }
  0x9c   :  { %p8794_p3 = scmp.lt.u32.totalorder %s8790_s30, %s11476_s11 }
  0x9e   :  { %p8796_p4 = pnand %p8794_p3, %p8791_p2 }
  0xa0   :  { %8799 = shalt.err (!%p8796_p4)
}
  0xa1   :  { %s8800_s16 = scalar_lea.vmem %s135_s18, 16  ;;  %s8804_s10 = scalar_lea.vmem %s135_s18, 32 }
  0xa2   :  { %p8801_p5 = scmp.ne.s32.totalorder %s135_s18, %s8800_s16  ;;  %p8805_p6 = scmp.lt.s32.totalorder %s135_s18, %s135_s18 }
  0xa3   :  { %p8806_p7 = scmp.lt.s32.totalorder %s8804_s10, %s8800_s16 }
  0xa5   :  { %p8807_p8 = por %p8806_p7, %p8805_p6 }
  0xa7   :  { %p8808_p9 = pnand %p8807_p8, %p8801_p5 }
  0xa9   :  { %8811 = shalt.err (!%p8808_p9)
}
  0xaa   :  { %137 = dma.hbm_to_vmem [thread:$0]  %s11476_s11, 16, %s135_s18, [#allocation18]  }
  0xab   :  { %8834 = dma.done.wait [#allocation3], 3840  }
  0xac   :  { %8835 = vsyncadd [#allocation3], 4294963456 }
  0xad   :  { %8836 = dma.done.wait [#allocation6], 147712  }
  0xae   :  { %8837 = vsyncadd [#allocation6], 4294819584 }
  0xaf   :  { %8838 = dma.done.wait [#allocation9], 384  }
  0xb0   :  { %8839 = vsyncadd [#allocation9], 4294966912 }
  0xb1   :  { %8840 = dma.done.wait [#allocation12], 1040  }
  0xb2   :  { %8841 = vsyncadd [#allocation12], 4294966256 }
  0xb3   :  { %8842 = dma.done.wait [#allocation15], 2064  }
  0xb4   :  { %8843 = vsyncadd [#allocation15], 4294965232 }
  0xb5   :  { %8844 = dma.done.wait [#allocation18], 16  }
  0xb6   :  { %8845 = vsyncadd [#allocation18], 4294967280  ;;  %v491_v0 = vld [vmem:[#allocation5 + $0x208] sm:$0xff]  ;;  %v493_v1 = vld [vmem:[#allocation5 + $0x218] sm:$0xff]  ;;  %vm334_vm0 = vcmask 1046528   ;;  %vm243_vm1 = vcmask 1040384  }
  0xb7   :  { %v490_v2 = vld [vmem:[#allocation5 + $0x200] sm:$0xff]  ;;  %v6956_v3 = vpack.c.bf16 %v493_v1, %v491_v0  ;;  %v492_v4 = vld [vmem:[#allocation5 + $0x210] sm:$0xff]  ;;  %v495_v5 = vld [vmem:[#allocation5 + $0x228] sm:$0xff]  ;;  %vm6307_vm3 = vcmask 982016   ;;  %vm8865_vm4 = vmmov 0   ;;  %vm6493_vm5 = vcmask 130048  }
  0xb8   :  { %v497_v6 = vld [vmem:[#allocation5 + $0x238] sm:$0xff]  ;;  %v6958_v7 = vpack.c.bf16 %v492_v4, %v490_v2  ;;  %v494_v9 = vld [vmem:[#allocation5 + $0x220] sm:$0xff]  ;;  %v496_v10 = vld [vmem:[#allocation5 + $0x230] sm:$0xff]  ;;  %vm6583_vm6 = vcmask 523264  }
  0xb9   :  { %v6960_v8 = vpack.c.bf16 %v497_v6, %v495_v5  ;;  %v499_v11 = vld [vmem:[#allocation5 + $0x248] sm:$0xff]  ;;  %6957 = vmatprep.subr.bf16.mxu0 %v6956_v3  ;;  %v501_v12 = vld [vmem:[#allocation5 + $0x258] sm:$0xff]  ;;  %v6962_v13 = vpack.c.bf16 %v496_v10, %v494_v9  ;;  %v498_v15 = vld [vmem:[#allocation5 + $0x240] sm:$0xff] }
  0xba   :  { %6959 = vmatpush1.bf16.msra.mxu0 %v6958_v7  ;;  %v6964_v14 = vpack.c.bf16 %v501_v12, %v499_v11  ;;  %v500_v16 = vld [vmem:[#allocation5 + $0x250] sm:$0xff]  ;;  %v503_v17 = vld [vmem:[#allocation5 + $0x268] sm:$0xff]  ;;  %v505_v18 = vld [vmem:[#allocation5 + $0x278] sm:$0xff] }
  0xbb   :  { %6961 = vmatprep.subr.bf16.mxu0 %v6960_v8  ;;  %v6966_v19 = vpack.c.bf16 %v500_v16, %v498_v15  ;;  %v6968_v20 = vpack.c.bf16 %v505_v18, %v503_v17  ;;  %v502_v21 = vld [vmem:[#allocation5 + $0x260] sm:$0xff]  ;;  %v504_v22 = vld [vmem:[#allocation5 + $0x270] sm:$0xff]  ;;  %v507_v23 = vld [vmem:[#allocation5 + $0x288] sm:$0xff] }
  0xbc   :  { %v509_v24 = vld [vmem:[#allocation5 + $0x298] sm:$0xff]  ;;  %v6970_v25 = vpack.c.bf16 %v504_v22, %v502_v21  ;;  %v506_v27 = vld [vmem:[#allocation5 + $0x280] sm:$0xff]  ;;  %v508_v28 = vld [vmem:[#allocation5 + $0x290] sm:$0xff] }
  0xbd   :  { %v6972_v26 = vpack.c.bf16 %v509_v24, %v507_v23  ;;  %v511_v29 = vld [vmem:[#allocation5 + $0x2a8] sm:$0xff]  ;;  %v513_v30 = vld [vmem:[#allocation5 + $0x2b8] sm:$0xff]  ;;  %v6974_v31 = vpack.c.bf16 %v508_v28, %v506_v27  ;;  %v510_v33 = vld [vmem:[#allocation5 + $0x2a0] sm:$0xff] }
  0xbe   :  { %6963 = vmatpush1.bf16.msra.mxu0 %v6962_v13  ;;  %v6976_v32 = vpack.c.bf16 %v513_v30, %v511_v29  ;;  %v512_v34 = vld [vmem:[#allocation5 + $0x2b0] sm:$0xff]  ;;  %v515_v35 = vld [vmem:[#allocation5 + $0x2c8] sm:$0xff]  ;;  %v517_v36 = vld [vmem:[#allocation5 + $0x2d8] sm:$0xff] }
  0xbf   :  { %6965 = vmatprep.subr.bf16.mxu0 %v6964_v14  ;;  %v6978_v37 = vpack.c.bf16 %v512_v34, %v510_v33  ;;  %v6980_v38 = vpack.c.bf16 %v517_v36, %v515_v35  ;;  %v514_v39 = vld [vmem:[#allocation5 + $0x2c0] sm:$0xff]  ;;  %v516_v40 = vld [vmem:[#allocation5 + $0x2d0] sm:$0xff]  ;;  %v9067_v41 = vld [vmem:[#allocation2 + $0x8] sm:$0xff] }
  0xc0   :  { %v519_v42 = vld [vmem:[#allocation5 + $0x2e8] sm:$0xff]  ;;  %v521_v43 = vld [vmem:[#allocation5 + $0x2f8] sm:$0xff]  ;;  %618 = vmatprep.mubr.f32.mxu0 %v9067_v41  ;;  %v6982_v44 = vpack.c.bf16 %v516_v40, %v514_v39  ;;  %v518_v46 = vld [vmem:[#allocation5 + $0x2e0] sm:$0xff]  ;;  %v338_v35 = vrot.slane %v9067_v41, 1 }
  0xc1   :  { %v6984_v45 = vpack.c.bf16 %v521_v43, %v519_v42  ;;  %v520_v47 = vld [vmem:[#allocation5 + $0x2f0] sm:$0xff]  ;;  %v523_v48 = vld [vmem:[#allocation5 + $0x308] sm:$0xff]  ;;  %v525_v49 = vld [vmem:[#allocation5 + $0x318] sm:$0xff] }
  0xc2   :  { %6967 = vmatpush1.bf16.msra.mxu0 %v6966_v19  ;;  %v6986_v50 = vpack.c.bf16 %v520_v47, %v518_v46  ;;  %v6988_v51 = vpack.c.bf16 %v525_v49, %v523_v48  ;;  %v522_v52 = vld [vmem:[#allocation5 + $0x300] sm:$0xff]  ;;  %v524_v53 = vld [vmem:[#allocation5 + $0x310] sm:$0xff]  ;;  %v527_v54 = vld [vmem:[#allocation5 + $0x328] sm:$0xff] }
  0xc3   :  { %6969 = vmatprep.subr.bf16.mxu0 %v6968_v20  ;;  %v529_v55 = vld [vmem:[#allocation5 + $0x338] sm:$0xff]  ;;  %v6990_v56 = vpack.c.bf16 %v524_v53, %v522_v52  ;;  %v526_v58 = vld [vmem:[#allocation5 + $0x320] sm:$0xff]  ;;  %v528_v59 = vld [vmem:[#allocation5 + $0x330] sm:$0xff] }
  0xc4   :  { %v6992_v57 = vpack.c.bf16 %v529_v55, %v527_v54  ;;  %v531_v60 = vld [vmem:[#allocation5 + $0x348] sm:$0xff]  ;;  %v533_v61 = vld [vmem:[#allocation5 + $0x358] sm:$0xff]  ;;  %v6994_v62 = vpack.c.bf16 %v528_v59, %v526_v58  ;;  %v530_v0 = vld [vmem:[#allocation5 + $0x340] sm:$0xff] }
  0xc5   :  { %v6996_v63 = vpack.c.bf16 %v533_v61, %v531_v60  ;;  %v532_v1 = vld [vmem:[#allocation5 + $0x350] sm:$0xff]  ;;  %v535_v2 = vld [vmem:[#allocation5 + $0x368] sm:$0xff]  ;;  %v537_v3 = vld [vmem:[#allocation5 + $0x378] sm:$0xff] }
  0xc6   :  { %6971 = vmatpush1.bf16.msra.mxu0 %v6970_v25  ;;  %v6998_v4 = vpack.c.bf16 %v532_v1, %v530_v0  ;;  %v7000_v5 = vpack.c.bf16 %v537_v3, %v535_v2  ;;  %v534_v6 = vld [vmem:[#allocation5 + $0x360] sm:$0xff]  ;;  %v536_v7 = vld [vmem:[#allocation5 + $0x370] sm:$0xff]  ;;  %v539_v8 = vld [vmem:[#allocation5 + $0x388] sm:$0xff] }
  0xc7   :  { %6973 = vmatprep.subr.bf16.mxu0 %v6972_v26  ;;  %v541_v9 = vld [vmem:[#allocation5 + $0x398] sm:$0xff]  ;;  %v7002_v10 = vpack.c.bf16 %v536_v7, %v534_v6  ;;  %v538_v12 = vld [vmem:[#allocation5 + $0x380] sm:$0xff]  ;;  %v540_v13 = vld [vmem:[#allocation5 + $0x390] sm:$0xff] }
  0xc8   :  { %v7004_v11 = vpack.c.bf16 %v541_v9, %v539_v8  ;;  %v543_v14 = vld [vmem:[#allocation5 + $0x3a8] sm:$0xff]  ;;  %v545_v15 = vld [vmem:[#allocation5 + $0x3b8] sm:$0xff]  ;;  %v7006_v16 = vpack.c.bf16 %v540_v13, %v538_v12  ;;  %v542_v18 = vld [vmem:[#allocation5 + $0x3a0] sm:$0xff] }
  0xc9   :  { %v7008_v17 = vpack.c.bf16 %v545_v15, %v543_v14  ;;  %v544_v19 = vld [vmem:[#allocation5 + $0x3b0] sm:$0xff]  ;;  %v547_v20 = vld [vmem:[#allocation5 + $0x3c8] sm:$0xff]  ;;  %v549_v21 = vld [vmem:[#allocation5 + $0x3d8] sm:$0xff] }
  0xca   :  { %6975 = vmatpush1.bf16.msra.mxu0 %v6974_v31  ;;  %v7010_v22 = vpack.c.bf16 %v544_v19, %v542_v18  ;;  %v7012_v23 = vpack.c.bf16 %v549_v21, %v547_v20  ;;  %v546_v24 = vld [vmem:[#allocation5 + $0x3c0] sm:$0xff]  ;;  %v548_v25 = vld [vmem:[#allocation5 + $0x3d0] sm:$0xff]  ;;  %v551_v26 = vld [vmem:[#allocation5 + $0x3e8] sm:$0xff] }
  0xcb   :  { %6977 = vmatprep.subr.bf16.mxu0 %v6976_v32  ;;  %v553_v27 = vld [vmem:[#allocation5 + $0x3f8] sm:$0xff]  ;;  %v7014_v28 = vpack.c.bf16 %v548_v25, %v546_v24  ;;  %v550_v30 = vld [vmem:[#allocation5 + $0x3e0] sm:$0xff]  ;;  %v552_v31 = vld [vmem:[#allocation5 + $0x3f0] sm:$0xff] }
  0xcc   :  { %v7016_v29 = vpack.c.bf16 %v553_v27, %v551_v26  ;;  %v426_v32 = vld [vmem:[#allocation5 + $0x8] sm:$0xff]  ;;  %v428_v33 = vld [vmem:[#allocation5 + $0x18] sm:$0xff]  ;;  %v7018_v34 = vpack.c.bf16 %v552_v31, %v550_v30  ;;  %v9071_v36 = vld [vmem:[#allocation2] sm:$0xff] }
  0xcd   :  { %v7020_v39 = vpack.c.bf16 %v428_v33, %v426_v32  ;;  %v335_v40 = vrot.slane %v9071_v36, 1  ;;  %v425_v42 = vld [vmem:[#allocation5] sm:$0xff]  ;;  %v427_v43 = vld [vmem:[#allocation5 + $0x10] sm:$0xff]  ;;  %v430_v46 = vld [vmem:[#allocation5 + $0x28] sm:$0xff] }
  0xce   :  { %6979 = vmatpush1.bf16.msra.mxu0 %v6978_v37  ;;  %v9073_v37 = vld [vmem:[#allocation2 + $0x18] sm:$0xff]  ;;  %v432_v47 = vld [vmem:[#allocation5 + $0x38] sm:$0xff]  ;;  %v429_v54 = vld [vmem:[#allocation5 + $0x20] sm:$0xff] }
  0xcf   :  { %6981 = vmatprep.subr.bf16.mxu0 %v6980_v38  ;;  %v9075_v38 = vld [vmem:[#allocation2 + $0x10] sm:$0xff]  ;;  %v9080_v48 = vld [vmem:[#allocation2 + $0x28] sm:$0xff]  ;;  %v7024_v53 = vpack.c.bf16 %v432_v47, %v430_v46  ;;  %v431_v55 = vld [vmem:[#allocation5 + $0x30] sm:$0xff] }
  0xd0   :  { %v343_v49 = vrot.slane %v9080_v48, 1  ;;  %v434_v58 = vld [vmem:[#allocation5 + $0x48] sm:$0xff]  ;;  %v436_v59 = vld [vmem:[#allocation5 + $0x58] sm:$0xff]  ;;  %v7026_v0 = vpack.c.bf16 %v431_v55, %v429_v54  ;;  %vm9248_vm2 = vmneg %vm243_vm1 }
  0xd1   :  { %v9092_v60 = vld [vmem:[#allocation2 + $0x38] sm:$0xff]  ;;  %v7028_v3 = vpack.c.bf16 %v436_v59, %v434_v58  ;;  %v440_v7 = vld [vmem:[#allocation5 + $0x78] sm:$0xff] }
  0xd2   :  { %6983 = vmatpush1.bf16.msra.mxu0 %v6982_v44  ;;  %v339_v44 = vrot.slane %v9073_v37, 1  ;;  %v347_v61 = vrot.slane %v9092_v60, 1  ;;  %v438_v6 = vld [vmem:[#allocation5 + $0x68] sm:$0xff]  ;;  %v9106_v8 = vld [vmem:[#allocation2 + $0x48] sm:$0xff] }
  0xd3   :  { %6985 = vmatprep.subr.bf16.mxu0 %v6984_v45  ;;  %v336_v45 = vrot.slane %v9075_v38, 1  ;;  %v351_v9 = vrot.slane %v9106_v8, 1  ;;  %v7032_v15 = vpack.c.bf16 %v440_v7, %v438_v6  ;;  %v442_v18 = vld [vmem:[#allocation5 + $0x88] sm:$0xff]  ;;  %v444_v19 = vld [vmem:[#allocation5 + $0x98] sm:$0xff]  ;;  %v9166_v6 = vld [vmem:[#allocation2 + $0x80] sm:$0xff] }
  0xd4   :  { %v9120_v20 = vld [vmem:[#allocation2 + $0x58] sm:$0xff]  ;;  %v7036_v27 = vpack.c.bf16 %v444_v19, %v442_v18  ;;  %v448_v31 = vld [vmem:[#allocation5 + $0xb8] sm:$0xff] }
  0xd5   :  { %v355_v21 = vrot.slane %v9120_v20, 1  ;;  %v446_v30 = vld [vmem:[#allocation5 + $0xa8] sm:$0xff]  ;;  %v9134_v32 = vld [vmem:[#allocation2 + $0x68] sm:$0xff] }
  0xd6   :  { %6987 = vmatpush1.bf16.msra.mxu0 %v6986_v50  ;;  %v9083_v50 = vld [vmem:[#allocation2 + $0x20] sm:$0xff]  ;;  %v359_v33 = vrot.slane %v9134_v32, 1  ;;  %v450_v46 = vld [vmem:[#allocation5 + $0xc8] sm:$0xff]  ;;  %v452_v47 = vld [vmem:[#allocation5 + $0xd8] sm:$0xff] }
  0xd7   :  { %6989 = vmatprep.subr.bf16.mxu0 %v6988_v51  ;;  %v7022_v51 = vpack.c.bf16 %v427_v43, %v425_v42  ;;  %v341_v52 = vrot.slane %v9083_v50, 1  ;;  %v7040_v43 = vpack.c.bf16 %v448_v31, %v446_v30  ;;  %v7044_v59 = vpack.c.bf16 %v452_v47, %v450_v46  ;;  %v458_v18 = vld [vmem:[#allocation5 + $0x108] sm:$0xff]  ;;  %v460_v19 = vld [vmem:[#allocation5 + $0x118] sm:$0xff]  ;;  %v9194_v46 = vld [vmem:[#allocation2 + $0xa0] sm:$0xff] }
  0xd8   :  { %v7052_v31 = vpack.c.bf16 %v460_v19, %v458_v18  ;;  %v465_v18 = vld [vmem:[#allocation5 + $0x140] sm:$0xff]  ;;  %v467_v19 = vld [vmem:[#allocation5 + $0x150] sm:$0xff] }
  0xd9   :  { %v9104_v2 = vsel %vm334_vm0, %v336_v45, %v341_v52 }
  0xda   :  { %6991 = vmatpush1.bf16.msra.mxu0 %v6990_v56  ;;  %v9087_v56 = vsel %vm334_vm0, %v338_v35, %v339_v44  ;;  %v9141_v35 = vsel %vm334_vm0, %v351_v9, %v355_v21 }
  0xdb   :  { %6993 = vmatprep.subr.bf16.mxu0 %v6992_v57  ;;  %v9090_v57 = vsel %vm334_vm0, %v335_v40, %v336_v45  ;;  %v447_v45 = vld [vmem:[#allocation5 + $0xb0] sm:$0xff] }
  0xde   :  { %6995 = vmatpush1.bf16.msra.mxu0 %v6994_v62  ;;  %v9096_v62 = vld [vmem:[#allocation2 + $0x30] sm:$0xff] }
  0xdf   :  { %6997 = vmatprep.subr.bf16.mxu0 %v6996_v63  ;;  %v9099_v63 = vsel %vm334_vm0, %v339_v44, %v343_v49  ;;  %v345_v1 = vrot.slane %v9096_v62, 1  ;;  %v445_v44 = vld [vmem:[#allocation5 + $0xa0] sm:$0xff] }
  0xe0   :  { %v7042_v54 = vpack.c.bf16 %v447_v45, %v445_v44  ;;  %v9190_v44 = vld [vmem:[#allocation2 + $0xa8] sm:$0xff] }
  0xe1   :  { %v9118_v14 = vsel %vm334_vm0, %v341_v52, %v345_v1  ;;  %v9152_v52 = vld [vmem:[#allocation2 + $0x70] sm:$0xff]  ;;  %v375_v45 = vrot.slane %v9190_v44, 1 }
  0xe2   :  { %6999 = vmatpush1.bf16.msra.mxu0 %v6998_v4  ;;  %v433_v4 = vld [vmem:[#allocation5 + $0x40] sm:$0xff]  ;;  %v361_v55 = vrot.slane %v9152_v52, 1 }
  0xe3   :  { %7001 = vmatprep.subr.bf16.mxu0 %v7000_v5  ;;  %v435_v5 = vld [vmem:[#allocation5 + $0x50] sm:$0xff] }
  0xe4   :  { %v7030_v12 = vpack.c.bf16 %v435_v5, %v433_v4  ;;  %v9162_v4 = vld [vmem:[#allocation2 + $0x88] sm:$0xff] }
  0xe5   :  { %v367_v5 = vrot.slane %v9162_v4, 1 }
  0xe6   :  { %7003 = vmatpush1.bf16.msra.mxu0 %v7002_v10  ;;  %v9110_v10 = vld [vmem:[#allocation2 + $0x40] sm:$0xff] }
  0xe7   :  { %7005 = vmatprep.subr.bf16.mxu0 %v7004_v11  ;;  %v9113_v11 = vsel %vm334_vm0, %v343_v49, %v347_v61  ;;  %v349_v13 = vrot.slane %v9110_v10, 1  ;;  %v9148_v49 = vld [vmem:[#allocation2 + $0x78] sm:$0xff] }
  0xe9   :  { %v9132_v26 = vsel %vm334_vm0, %v345_v1, %v349_v13  ;;  %v454_v1 = vld [vmem:[#allocation5 + $0xe8] sm:$0xff] }
  0xea   :  { %7007 = vmatpush1.bf16.msra.mxu0 %v7006_v16  ;;  %v437_v16 = vld [vmem:[#allocation5 + $0x60] sm:$0xff] }
  0xeb   :  { %7009 = vmatprep.subr.bf16.mxu0 %v7008_v17  ;;  %v439_v17 = vld [vmem:[#allocation5 + $0x70] sm:$0xff] }
  0xec   :  { %v7034_v24 = vpack.c.bf16 %v439_v17, %v437_v16  ;;  %v453_v16 = vld [vmem:[#allocation5 + $0xe0] sm:$0xff]  ;;  %v455_v17 = vld [vmem:[#allocation5 + $0xf0] sm:$0xff] }
  0xee   :  { %7011 = vmatpush1.bf16.msra.mxu0 %v7010_v22  ;;  %v9124_v22 = vld [vmem:[#allocation2 + $0x50] sm:$0xff] }
  0xef   :  { %7013 = vmatprep.subr.bf16.mxu0 %v7012_v23  ;;  %v9127_v23 = vsel %vm334_vm0, %v347_v61, %v351_v9  ;;  %v353_v25 = vrot.slane %v9124_v22, 1  ;;  %v449_v61 = vld [vmem:[#allocation5 + $0xc0] sm:$0xff] }
  0xf1   :  { %v9146_v42 = vsel %vm334_vm0, %v349_v13, %v353_v25 }
  0xf2   :  { %7015 = vmatpush1.bf16.msra.mxu0 %v7014_v28  ;;  %v441_v28 = vld [vmem:[#allocation5 + $0x80] sm:$0xff]  ;;  %11646 = vst [vmem:[#allocation27_spill] sm:$0xff] %v9146_v42  ;;  %v1542_v42 = vld [vmem:[#allocation5 + $0x828] sm:$0xff] }
  0xf3   :  { %7017 = vmatprep.subr.bf16.mxu0 %v7016_v29  ;;  %v443_v29 = vld [vmem:[#allocation5 + $0x90] sm:$0xff] }
  0xf6   :  { %7019 = vmatpush1.bf16.msra.mxu0 %v7018_v34  ;;  %v9138_v34 = vld [vmem:[#allocation2 + $0x60] sm:$0xff] }
  0xf7   :  { %7021 = vmatprep.subr.bf16.mxu0 %v7020_v39  ;;  %v7038_v39 = vpack.c.bf16 %v443_v29, %v441_v28  ;;  %v357_v40 = vrot.slane %v9138_v34, 1  ;;  %v7050_v28 = vpack.c.bf16 %v455_v17, %v453_v16 }
  0xf9   :  { %619 = vmatmul.mubr.f32.vlgmr.msra.gmra.mrb[0].mxu0 %v9071_v36  ;;  %v9160_v58 = vsel %vm334_vm0, %v353_v25, %v357_v40  ;;  %v9174_v13 = vsel %vm334_vm0, %v357_v40, %v361_v55  ;;  %v9180_v25 = vld [vmem:[#allocation2 + $0x90] sm:$0xff]  ;;  %v462_v40 = vld [vmem:[#allocation5 + $0x128] sm:$0xff] }
  0xfa   :  { %7023 = vmatpush1.bf16.msra.mxu0 %v7022_v51  ;;  %624 = vmatprep.mubr.f32.mxu0 %v9073_v37  ;;  %v363_v51 = vrot.slane %v9148_v49, 1  ;;  %11648 = vst [vmem:[#allocation29_spill] sm:$0xff] %v9160_v58  ;;  %11650 = vst [vmem:[#allocation31_spill] sm:$0xff] %v9174_v13  ;;  %v369_v29 = vrot.slane %v9180_v25, 1  ;;  %v874_v13 = vld [vmem:[#allocation5 + $0x448] sm:$0xff]  ;;  %v876_v58 = vld [vmem:[#allocation5 + $0x458] sm:$0xff] }
  0xfb   :  { %7025 = vmatprep.subr.bf16.mxu0 %v7024_v53  ;;  %v9155_v53 = vsel %vm334_vm0, %v355_v21, %v359_v33  ;;  %v9176_v21 = vld [vmem:[#allocation2 + $0x98] sm:$0xff] }
  0xfc   :  { %11647 = vst [vmem:[#allocation28_spill] sm:$0xff] %v9155_v53  ;;  %v9169_v7 = vsel %vm334_vm0, %v359_v33, %v363_v51  ;;  %v457_v33 = vld [vmem:[#allocation5 + $0x100] sm:$0xff] }
  0xfd   :  { %625 = vmatmul.mubr.f32.gmra.mrb[2].mxu0 %v9075_v38  ;;  %11649 = vst [vmem:[#allocation30_spill] sm:$0xff] %v9169_v7  ;;  %v1539_v7 = vld [vmem:[#allocation5 + $0x810] sm:$0xff] }
  0xfe   :  { %7027 = vmatpush1.bf16.msra.mxu0 %v7026_v0  ;;  %630 = vmatprep.mubr.f32.mxu0 %v9080_v48  ;;  %v451_v0 = vld [vmem:[#allocation5 + $0xd0] sm:$0xff] }
  0xff   :  { %7029 = vmatprep.subr.bf16.mxu0 %v7028_v3  ;;  %v456_v3 = vld [vmem:[#allocation5 + $0xf8] sm:$0xff]  ;;  %v7046_v9 = vpack.c.bf16 %v451_v0, %v449_v61  ;;  %v461_v61 = vld [vmem:[#allocation5 + $0x120] sm:$0xff]  ;;  %v463_v0 = vld [vmem:[#allocation5 + $0x130] sm:$0xff] }
 0x100   :  { %v7058_v16 = vpack.c.bf16 %v463_v0, %v461_v61  ;;  %v9226_v61 = vld [vmem:[#allocation2 + $0xb0] sm:$0xff] }
 0x101   :  { %631 = vmatmul.mubr.f32.gmra.mrb[4].mxu0 %v9083_v50  ;;  %v473_v0 = vld [vmem:[#allocation5 + $0x180] sm:$0xff] }
 0x102   :  { %7031 = vmatpush1.bf16.msra.mxu0 %v7030_v12  ;;  %636 = vmatprep.mubr.f32.mxu0 %v9092_v60  ;;  %v365_v12 = vrot.slane %v9166_v6, 1 }
 0x103   :  { %7033 = vmatprep.subr.bf16.mxu0 %v7032_v15  ;;  %v7048_v15 = vpack.c.bf16 %v456_v3, %v454_v1  ;;  %v466_v1 = vld [vmem:[#allocation5 + $0x148] sm:$0xff]  ;;  %v468_v3 = vld [vmem:[#allocation5 + $0x158] sm:$0xff] }
 0x104   :  { %v9188_v30 = vsel %vm334_vm0, %v361_v55, %v365_v12  ;;  %v9202_v55 = vsel %vm334_vm0, %v365_v12, %v369_v29  ;;  %v7060_v17 = vpack.c.bf16 %v468_v3, %v466_v1  ;;  %v475_v1 = vld [vmem:[#allocation5 + $0x190] sm:$0xff]  ;;  %v9228_v3 = vld [vmem:[#allocation2 + $0xc8] sm:$0xff] }
 0x105   :  { %637 = vmatmul.mubr.f32.gmra.mrb[6].mxu0 %v9096_v62  ;;  %11652 = vst [vmem:[#allocation33_spill] sm:$0xff] %v9188_v30  ;;  %11654 = vst [vmem:[#allocation35_spill] sm:$0xff] %v9202_v55  ;;  %v872_v55 = vld [vmem:[#allocation5 + $0x438] sm:$0xff]  ;;  %v871_v30 = vld [vmem:[#allocation5 + $0x430] sm:$0xff] }
 0x106   :  { %7035 = vmatpush1.bf16.msra.mxu0 %v7034_v24  ;;  %642 = vmatprep.mubr.f32.mxu0 %v9106_v8  ;;  %v371_v24 = vrot.slane %v9176_v21, 1 }
 0x107   :  { %7037 = vmatprep.subr.bf16.mxu0 %v7036_v27  ;;  %v9183_v27 = vsel %vm334_vm0, %v363_v51, %v367_v5 }
 0x108   :  { %11651 = vst [vmem:[#allocation32_spill] sm:$0xff] %v9183_v27  ;;  %v9197_v47 = vsel %vm334_vm0, %v367_v5, %v371_v24 }
 0x109   :  { %643 = vmatmul.mubr.f32.gmra.mrb[8].mxu0 %v9110_v10  ;;  %11653 = vst [vmem:[#allocation34_spill] sm:$0xff] %v9197_v47  ;;  %v1540_v47 = vld [vmem:[#allocation5 + $0x818] sm:$0xff] }
 0x10a   :  { %7039 = vmatpush1.bf16.msra.mxu0 %v7038_v39  ;;  %648 = vmatprep.mubr.f32.mxu0 %v9120_v20  ;;  %v459_v39 = vld [vmem:[#allocation5 + $0x110] sm:$0xff] }
 0x10b   :  { %7041 = vmatprep.subr.bf16.mxu0 %v7040_v43  ;;  %v464_v43 = vld [vmem:[#allocation5 + $0x138] sm:$0xff]  ;;  %v7054_v51 = vpack.c.bf16 %v459_v39, %v457_v33  ;;  %v7062_v33 = vpack.c.bf16 %v467_v19, %v465_v18  ;;  %v469_v39 = vld [vmem:[#allocation5 + $0x160] sm:$0xff]  ;;  %v7070_v18 = vpack.c.bf16 %v475_v1, %v473_v0  ;;  %v9232_v19 = vld [vmem:[#allocation2 + $0xc0] sm:$0xff] }
 0x10c   :  { %v481_v0 = vld [vmem:[#allocation5 + $0x1c0] sm:$0xff]  ;;  %v483_v1 = vld [vmem:[#allocation5 + $0x1d0] sm:$0xff] }
 0x10d   :  { %649 = vmatmul.mubr.f32.gmra.mrb[10].mxu0 %v9124_v22 }
 0x10e   :  { %7043 = vmatpush1.bf16.msra.mxu0 %v7042_v54  ;;  %654 = vmatprep.mubr.f32.mxu0 %v9134_v32  ;;  %v11479_v54 = vrot.slane %v9194_v46, 1 }
 0x10f   :  { %7045 = vmatprep.subr.bf16.mxu0 %v7044_v59  ;;  %v7056_v59 = vpack.c.bf16 %v464_v43, %v462_v40  ;;  %v471_v40 = vld [vmem:[#allocation5 + $0x170] sm:$0xff]  ;;  %v474_v43 = vld [vmem:[#allocation5 + $0x188] sm:$0xff] }
 0x110   :  { %v9215_v12 = vsel %vm334_vm0, %v369_v29, %v11479_v54  ;;  %v866_v54 = vld [vmem:[#allocation5 + $0x408] sm:$0xff] }
 0x111   :  { %655 = vmatmul.mubr.f32.gmra.mrb[12].mxu0 %v9138_v34  ;;  %11656 = vst [vmem:[#allocation37_spill] sm:$0xff] %v9215_v12  ;;  %v8862_v12 = vmov 0  }
 0x112   :  { %7047 = vmatpush1.bf16.msra.mxu0 %v7046_v9  ;;  %660 = vmatprep.mubr.f32.mxu0 %v9148_v49  ;;  %v9204_v9 = vld [vmem:[#allocation2 + $0xb8] sm:$0xff] }
 0x113   :  { %7049 = vmatprep.subr.bf16.mxu0 %v7048_v15  ;;  %v11478_v5 = vrot.slane %v9204_v9, 1  ;;  %v9209_v15 = vsel %vm334_vm0, %v371_v24, %v375_v45  ;;  %8586 = vset.pattern.permute.xlu0 %v8862_v12 }
 0x114   :  { %11655 = vst [vmem:[#allocation36_spill] sm:$0xff] %v9209_v15  ;;  %v870_v15 = vld [vmem:[#allocation5 + $0x428] sm:$0xff]  ;;  %8587 = vset.pattern.permute.xlu1 %v8862_v12  ;;  %v252_v12 = vrot.slane %v9080_v48, 7  ;;  %v172_v48 = vld [vmem:[%s11468_s3 + $0x20] sm:$0xff] }
 0x115   :  { %661 = vmatmul.mubr.f32.gmra.mrb[14].mxu0 %v9152_v52  ;;  %v9221_v24 = vsel %vm334_vm0, %v375_v45, %v11478_v5  ;;  %v245_v5 = vrot.slane %v9067_v41, 7  ;;  %v168_v41 = vld [vmem:[%s11468_s3] sm:$0xff] }
 0x116   :  { %7051 = vmatpush1.bf16.msra.mxu0 %v7050_v28  ;;  %666 = vmatprep.mubr.f32.mxu0 %v9162_v4  ;;  %v470_v28 = vld [vmem:[#allocation5 + $0x168] sm:$0xff]  ;;  %11657 = vst [vmem:[#allocation38_spill] sm:$0xff] %v9221_v24  ;;  %v868_v24 = vld [vmem:[#allocation5 + $0x418] sm:$0xff] }
 0x117   :  { %7053 = vmatprep.subr.bf16.mxu0 %v7052_v31  ;;  %v472_v31 = vld [vmem:[#allocation5 + $0x178] sm:$0xff]  ;;  %1158 = vperm.xlu0 %8586, %v168_v41   ;;  %v1537_v41 = vld [vmem:[#allocation5 + $0x800] sm:$0xff] }
 0x118   :  { %v7064_v29 = vpack.c.bf16 %v472_v31, %v470_v28  ;;  %v477_v31 = vld [vmem:[#allocation5 + $0x1a0] sm:$0xff]  ;;  %v7150_v53 = vpack.c.bf16 %v1539_v7, %v1537_v41  ;;  %v173_v7 = vld [vmem:[%s11468_s3 + $0x28] sm:$0xff]  ;;  %v260_v41 = vrot.slane %v9106_v8, 7  ;;  %v176_v8 = vld [vmem:[%s11468_s3 + $0x40] sm:$0xff] }
 0x119   :  { %667 = vmatmul.mubr.f32.gmra.mrb[16].mxu0 %v9166_v6 }
 0x11a   :  { %7055 = vmatpush1.bf16.msra.mxu0 %v7054_v51  ;;  %672 = vmatprep.mubr.f32.mxu0 %v9176_v21  ;;  %v476_v51 = vld [vmem:[#allocation5 + $0x198] sm:$0xff] }
 0x11b   :  { %7057 = vmatprep.subr.bf16.mxu0 %v7056_v59  ;;  %v7066_v59 = vpack.c.bf16 %v471_v40, %v469_v39  ;;  %v7068_v45 = vpack.c.bf16 %v476_v51, %v474_v43  ;;  %v482_v39 = vld [vmem:[#allocation5 + $0x1c8] sm:$0xff]  ;;  %v484_v40 = vld [vmem:[#allocation5 + $0x1d8] sm:$0xff]  ;;  %v9238_v51 = vld [vmem:[#allocation2 + $0xd0] sm:$0xff] }
 0x11d   :  { %673 = vmatmul.mubr.f32.gmra.mrb[18].mxu0 %v9180_v25 }
 0x11e   :  { %7059 = vmatpush1.bf16.msra.mxu0 %v7058_v16  ;;  %678 = vmatprep.mubr.f32.mxu0 %v9190_v44  ;;  %v478_v16 = vld [vmem:[#allocation5 + $0x1a8] sm:$0xff] }
 0x11f   :  { %7061 = vmatprep.subr.bf16.mxu0 %v7060_v17  ;;  %v480_v17 = vld [vmem:[#allocation5 + $0x1b8] sm:$0xff] }
 0x120   :  { %v7072_v28 = vpack.c.bf16 %v480_v17, %v478_v16  ;;  %v486_v16 = vld [vmem:[#allocation5 + $0x1e8] sm:$0xff]  ;;  %v488_v17 = vld [vmem:[#allocation5 + $0x1f8] sm:$0xff] }
 0x121   :  { %679 = vmatmul.mubr.f32.gmra.mrb[20].mxu0 %v9194_v46 }
 0x122   :  { %7063 = vmatpush1.bf16.msra.mxu0 %v7062_v33  ;;  %684 = vmatprep.mubr.f32.mxu0 %v9204_v9  ;;  %v479_v33 = vld [vmem:[#allocation5 + $0x1b0] sm:$0xff] }
 0x123   :  { %7065 = vmatprep.subr.bf16.mxu0 %v7064_v29  ;;  %v9234_v29 = vld [vmem:[#allocation2 + $0xd8] sm:$0xff]  ;;  %v7074_v43 = vpack.c.bf16 %v479_v33, %v477_v31  ;;  %v9245_v31 = vld [vmem:[#allocation2 + $0xe0] sm:$0xff]  ;;  %v485_v33 = vld [vmem:[#allocation5 + $0x1e0] sm:$0xff] }
 0x125   :  { %685 = vmatmul.mubr.f32.gmra.mrb[22].mxu0 %v9226_v61 }
 0x126   :  { %7067 = vmatpush1.bf16.msra.mxu0 %v7066_v59  ;;  %690 = vmatprep.mubr.f32.mxu0 %v9228_v3  ;;  %v7076_v59 = vpack.c.bf16 %v484_v40, %v482_v39  ;;  %v487_v39 = vld [vmem:[#allocation5 + $0x1f0] sm:$0xff]  ;;  %v11658_v40 = vmov 0 }
 0x127   :  { %7069 = vmatprep.subr.bf16.mxu0 %v7068_v45  ;;  %v9240_v45 = vld [vmem:[#allocation2 + $0xe8] sm:$0xff]  ;;  %v11659_v40 = vsel %vm9248_vm2, 4294967295, %v11658_v40 }
 0x128   :  { %11660 = vst [vmem:[#allocation39_spill] sm:$0xff] %v11659_v40  ;;  %v1927_v40 = vld [vmem:[#allocation5 + $0xa78] sm:$0xff] }
 0x129   :  { %691 = vmatmul.mubr.f32.gmra.mrb[24].mxu0 %v9232_v19 }
 0x12a   :  { %7071 = vmatpush1.bf16.msra.mxu0 %v7070_v18  ;;  %696 = vmatprep.mubr.f32.mxu0 %v9234_v29  ;;  %v7078_v18 = vpack.c.bf16 %v483_v1, %v481_v0  ;;  %v248_v0 = vrot.slane %v9073_v37, 7  ;;  %v7084_v1 = vpack.c.bf16 %v868_v24, %v866_v54  ;;  %v171_v37 = vld [vmem:[%s11468_s3 + $0x18] sm:$0xff]  ;;  %v246_v54 = vrot.slane %v9075_v38, 7  ;;  %v1544_v38 = vld [vmem:[#allocation5 + $0x838] sm:$0xff] }
 0x12b   :  { %7073 = vmatprep.subr.bf16.mxu0 %v7072_v28  ;;  %v7080_v28 = vpack.c.bf16 %v488_v17, %v486_v16  ;;  %v865_v16 = vld [vmem:[#allocation5 + $0x400] sm:$0xff]  ;;  %v867_v17 = vld [vmem:[#allocation5 + $0x410] sm:$0xff] }
 0x12c   :  { %v7086_v24 = vpack.c.bf16 %v867_v17, %v865_v16  ;;  %v249_v27 = vsel %vm243_vm1, %v245_v5, %v248_v0  ;;  %v7092_v16 = vpack.c.bf16 %v876_v58, %v874_v13  ;;  %v873_v17 = vld [vmem:[#allocation5 + $0x440] sm:$0xff]  ;;  %v1547_v13 = vld [vmem:[#allocation5 + $0x850] sm:$0xff] }
 0x12d   :  { %697 = vmatmul.mubr.f32.gmra.mrb[26].mxu0 %v9238_v51  ;;  %v1545_v58 = vld [vmem:[#allocation5 + $0x840] sm:$0xff] }
 0x12e   :  { %7075 = vmatpush1.bf16.msra.mxu0 %v7074_v43  ;;  %702 = vmatprep.mubr.f32.mxu0 %v9240_v45  ;;  %v7082_v43 = vpack.c.bf16 %v487_v39, %v485_v33  ;;  %v869_v33 = vld [vmem:[#allocation5 + $0x420] sm:$0xff]  ;;  %v169_v39 = vld [vmem:[%s11468_s3 + $0x8] sm:$0xff] }
 0x12f   :  { %7077 = vmatprep.subr.bf16.mxu0 %v7076_v59  ;;  %v170_v59 = vld [vmem:[%s11468_s3 + $0x10] sm:$0xff]  ;;  %1163 = vperm.xlu0 %8586, %v169_v39   ;;  %v875_v39 = vld [vmem:[#allocation5 + $0x450] sm:$0xff] }
 0x130   :  { %1168 = vperm.xlu1 %8587, %v170_v59  }
 0x131   :  { %703 = vmatmul.mubr.f32.gmra.mrb[28].mxu0 %v9245_v31 }
 0x132   :  { %7079 = vmatpush1.bf16.msra.mxu0 %v7078_v18  ;;  %6789 = vmatprep.mubr.msk.f32.mxu0 %vm9248_vm2, %v245_v5  ;;  %v244_v18 = vrot.slane %v9071_v36, 7  ;;  %v7088_v36 = vpack.c.bf16 %v872_v55, %v870_v15  ;;  %v1541_v55 = vld [vmem:[#allocation5 + $0x820] sm:$0xff]  ;;  %v1543_v15 = vld [vmem:[#allocation5 + $0x830] sm:$0xff]  ;;  %v250_v5 = vrot.slane %v9083_v50, 7  ;;  %v7152_v50 = vpack.c.bf16 %v1544_v38, %v1542_v42 }
 0x133   :  { %7081 = vmatprep.subr.bf16.mxu0 %v7080_v28  ;;  %v1538_v28 = vld [vmem:[#allocation5 + $0x808] sm:$0xff]  ;;  %1178 = vperm.xlu0 %8586, %v172_v48   ;;  %v879_v38 = vld [vmem:[#allocation5 + $0x470] sm:$0xff] }
 0x134   :  { %v7148_v59 = vpack.c.bf16 %v1540_v47, %v1538_v28  ;;  %1173 = vperm.xlu1 %8587, %v171_v37   ;;  %v7090_v47 = vpack.c.bf16 %v871_v30, %v869_v33  ;;  %v253_v37 = vsel %vm243_vm1, %v248_v0, %v252_v12  ;;  %v878_v28 = vld [vmem:[#allocation5 + $0x468] sm:$0xff]  ;;  %v254_v33 = vrot.slane %v9096_v62, 7 }
 0x135   :  { %v1546_v30 = vld [vmem:[#allocation5 + $0x848] sm:$0xff]  ;;  %v7094_v0 = vpack.c.bf16 %v875_v39, %v873_v17  ;;  %v251_v42 = vsel %vm243_vm1, %v246_v54, %v250_v5  ;;  %v258_v17 = vrot.slane %v9110_v10, 7 }
 0x136   :  { %7083 = vmatpush1.bf16.msra.mxu0 %v7082_v43  ;;  %v247_v43 = vsel %vm243_vm1, %v244_v18, %v246_v54  ;;  %7149 = vmatprep.subr.bf16.mxu1 %v7148_v59  ;;  %v877_v59 = vld [vmem:[#allocation5 + $0x460] sm:$0xff]  ;;  %v1550_v54 = vld [vmem:[#allocation5 + $0x868] sm:$0xff]  ;;  %v255_v39 = vsel %vm243_vm1, %v250_v5, %v254_v33 }
 0x137   :  { %7085 = vmatprep.subr.bf16.mxu0 %v7084_v1  ;;  %v256_v1 = vrot.slane %v9092_v60, 7  ;;  %7151 = vmatpush1.bf16.msra.mxu1 %v7150_v53  ;;  %v174_v60 = vld [vmem:[%s11468_s3 + $0x30] sm:$0xff]  ;;  %v175_v53 = vld [vmem:[%s11468_s3 + $0x38] sm:$0xff] }
 0x138   :  { %1183 = vperm.xlu1 %8587, %v173_v7   ;;  %7153 = vmatprep.subr.bf16.mxu1 %v7152_v50  ;;  %v1549_v7 = vld [vmem:[#allocation5 + $0x860] sm:$0xff]  ;;  %v1554_v5 = vld [vmem:[#allocation5 + $0x888] sm:$0xff] }
 0x139   :  { %6791 = vmatmul.mubr.msk.f32.vlgmr.msra.gmra.mrb[0].mxu0 %vm9248_vm2, %v244_v18  ;;  %v1548_v18 = vld [vmem:[#allocation5 + $0x858] sm:$0xff]  ;;  %v257_v48 = vsel %vm243_vm1, %v252_v12, %v256_v1  ;;  %1188 = vperm.xlu0 %8586, %v174_v60   ;;  %v7098_v12 = vpack.c.bf16 %v879_v38, %v877_v59  ;;  %v179_v59 = vld [vmem:[%s11468_s3 + $0x58] sm:$0xff]  ;;  %v268_v38 = vrot.slane %v9134_v32, 7  ;;  %v180_v32 = vld [vmem:[%s11468_s3 + $0x60] sm:$0xff] }
 0x13a   :  { %7087 = vmatpush1.bf16.msra.mxu0 %v7086_v24  ;;  %779 = vmatprep.mubr.f32.mxu0 %v249_v27  ;;  %v880_v24 = vld [vmem:[#allocation5 + $0x478] sm:$0xff]  ;;  %v7154_v27 = vpack.c.bf16 %v1543_v15, %v1541_v55  ;;  %v882_v55 = vld [vmem:[#allocation5 + $0x488] sm:$0xff]  ;;  %v7156_v62 = vpack.c.bf16 %v1548_v18, %v1546_v30  ;;  %v261_v30 = vsel %vm243_vm1, %v256_v1, %v260_v41 }
 0x13b   :  { %7089 = vmatprep.subr.bf16.mxu0 %v7088_v36  ;;  %v7096_v36 = vpack.c.bf16 %v880_v24, %v878_v28  ;;  %v884_v15 = vld [vmem:[#allocation5 + $0x498] sm:$0xff]  ;;  %v264_v28 = vrot.slane %v9120_v20, 7  ;;  %v881_v24 = vld [vmem:[#allocation5 + $0x480] sm:$0xff]  ;;  %v886_v18 = vld [vmem:[#allocation5 + $0x4a8] sm:$0xff] }
 0x13c   :  { %7155 = vmatpush1.bf16.msra.mxu1 %v7154_v27  ;;  %1193 = vperm.xlu1 %8587, %v175_v53   ;;  %v7100_v50 = vpack.c.bf16 %v884_v15, %v882_v55  ;;  %v883_v27 = vld [vmem:[#allocation5 + $0x490] sm:$0xff]  ;;  %v888_v60 = vld [vmem:[#allocation5 + $0x4b8] sm:$0xff]  ;;  %v178_v20 = vld [vmem:[%s11468_s3 + $0x50] sm:$0xff]  ;;  %v262_v53 = vrot.slane %v9124_v22, 7 }
 0x13d   :  { %780 = vmatmul.mubr.f32.gmra.mrb[2].mxu0 %v247_v43  ;;  %v1552_v43 = vld [vmem:[#allocation5 + $0x878] sm:$0xff]  ;;  %7157 = vmatprep.subr.bf16.mxu1 %v7156_v62  ;;  %v7102_v1 = vpack.c.bf16 %v883_v27, %v881_v24  ;;  %v885_v55 = vld [vmem:[#allocation5 + $0x4a0] sm:$0xff]  ;;  %v887_v62 = vld [vmem:[#allocation5 + $0x4b0] sm:$0xff]  ;;  %v265_v15 = vsel %vm243_vm1, %v260_v41, %v264_v28  ;;  %v272_v27 = vrot.slane %v9148_v49, 7 }
 0x13e   :  { %7091 = vmatpush1.bf16.msra.mxu0 %v7090_v47  ;;  %785 = vmatprep.mubr.f32.mxu0 %v253_v37  ;;  %v7158_v47 = vpack.c.bf16 %v1547_v13, %v1545_v58  ;;  %v177_v37 = vld [vmem:[%s11468_s3 + $0x48] sm:$0xff]  ;;  %v7160_v10 = vpack.c.bf16 %v1552_v43, %v1550_v54  ;;  %v7106_v41 = vpack.c.bf16 %v887_v62, %v885_v55  ;;  %v893_v62 = vld [vmem:[#allocation5 + $0x4e0] sm:$0xff] }
 0x13f   :  { %7093 = vmatprep.subr.bf16.mxu0 %v7092_v16  ;;  %v1551_v16 = vld [vmem:[#allocation5 + $0x870] sm:$0xff]  ;;  %1198 = vperm.xlu0 %8586, %v176_v8   ;;  %v1556_v13 = vld [vmem:[#allocation5 + $0x898] sm:$0xff] }
 0x140   :  { %7159 = vmatpush1.bf16.msra.mxu1 %v7158_v47  ;;  %v7162_v58 = vpack.c.bf16 %v1551_v16, %v1549_v7  ;;  %1203 = vperm.xlu1 %8587, %v177_v37   ;;  %v890_v47 = vld [vmem:[#allocation5 + $0x4c8] sm:$0xff]  ;;  %v7164_v22 = vpack.c.bf16 %v1556_v13, %v1554_v5  ;;  %v892_v54 = vld [vmem:[#allocation5 + $0x4d8] sm:$0xff]  ;;  %v1557_v7 = vld [vmem:[#allocation5 + $0x8a0] sm:$0xff] }
 0x141   :  { %786 = vmatmul.mubr.f32.gmra.mrb[4].mxu0 %v251_v42  ;;  %v1555_v42 = vld [vmem:[#allocation5 + $0x890] sm:$0xff]  ;;  %7161 = vmatprep.subr.bf16.mxu1 %v7160_v10  ;;  %v1560_v8 = vld [vmem:[#allocation5 + $0x8b8] sm:$0xff]  ;;  %v182_v13 = vld [vmem:[%s11468_s3 + $0x70] sm:$0xff] }
 0x142   :  { %7095 = vmatpush1.bf16.msra.mxu0 %v7094_v0  ;;  %791 = vmatprep.mubr.f32.mxu0 %v257_v48  ;;  %v1553_v0 = vld [vmem:[#allocation5 + $0x880] sm:$0xff]  ;;  %v7104_v48 = vpack.c.bf16 %v888_v60, %v886_v18  ;;  %v1559_v16 = vld [vmem:[#allocation5 + $0x8b0] sm:$0xff]  ;;  %v181_v37 = vld [vmem:[%s11468_s3 + $0x68] sm:$0xff]  ;;  %v269_v60 = vsel %vm243_vm1, %v264_v28, %v268_v38 }
 0x143   :  { %7097 = vmatprep.subr.bf16.mxu0 %v7096_v36  ;;  %v259_v36 = vsel %vm243_vm1, %v254_v33, %v258_v17  ;;  %1208 = vperm.xlu0 %8586, %v178_v20   ;;  %v7166_v43 = vpack.c.bf16 %v1555_v42, %v1553_v0  ;;  %v1558_v33 = vld [vmem:[#allocation5 + $0x8a8] sm:$0xff]  ;;  %v1564_v24 = vld [vmem:[#allocation5 + $0x8d8] sm:$0xff]  ;;  %v889_v18 = vld [vmem:[#allocation5 + $0x4c0] sm:$0xff]  ;;  %v270_v42 = vrot.slane %v9152_v52, 7 }
 0x144   :  { %7163 = vmatpush1.bf16.msra.mxu1 %v7162_v58  ;;  %1213 = vperm.xlu1 %8587, %v179_v59   ;;  %v891_v10 = vld [vmem:[#allocation5 + $0x4d0] sm:$0xff]  ;;  %v894_v58 = vld [vmem:[#allocation5 + $0x4e8] sm:$0xff]  ;;  %v896_v5 = vld [vmem:[#allocation5 + $0x4f8] sm:$0xff] }
 0x145   :  { %792 = vmatmul.mubr.f32.gmra.mrb[6].mxu0 %v255_v39  ;;  %v263_v39 = vsel %vm243_vm1, %v258_v17, %v262_v53  ;;  %7165 = vmatprep.subr.bf16.mxu1 %v7164_v22  ;;  %v7170_v17 = vpack.c.bf16 %v1559_v16, %v1557_v7  ;;  %v1561_v20 = vld [vmem:[#allocation5 + $0x8c0] sm:$0xff]  ;;  %v1563_v0 = vld [vmem:[#allocation5 + $0x8d0] sm:$0xff]  ;;  %v7110_v28 = vpack.c.bf16 %v891_v10, %v889_v18  ;;  %v1568_v59 = vld [vmem:[#allocation5 + $0x8f8] sm:$0xff]  ;;  %v280_v16 = vrot.slane %v9176_v21, 7 }
 0x146   :  { %7099 = vmatpush1.bf16.msra.mxu0 %v7098_v12  ;;  %797 = vmatprep.mubr.f32.mxu0 %v261_v30  ;;  %v266_v12 = vrot.slane %v9138_v34, 7  ;;  %v7108_v30 = vpack.c.bf16 %v892_v54, %v890_v47  ;;  %v7168_v34 = vpack.c.bf16 %v1560_v8, %v1558_v33  ;;  %v7112_v55 = vpack.c.bf16 %v896_v5, %v894_v58  ;;  %v898_v22 = vld [vmem:[#allocation5 + $0x508] sm:$0xff]  ;;  %v900_v54 = vld [vmem:[#allocation5 + $0x518] sm:$0xff]  ;;  %v1567_v33 = vld [vmem:[#allocation5 + $0x8f0] sm:$0xff] }
 0x147   :  { %7101 = vmatprep.subr.bf16.mxu0 %v7100_v50  ;;  %v1562_v50 = vld [vmem:[#allocation5 + $0x8c8] sm:$0xff]  ;;  %1218 = vperm.xlu0 %8586, %v180_v32   ;;  %v273_v47 = vsel %vm243_vm1, %v268_v38, %v272_v27  ;;  %v7174_v52 = vpack.c.bf16 %v1563_v0, %v1561_v20  ;;  %v274_v8 = vrot.slane %v9166_v6, 7  ;;  %v1572_v38 = vld [vmem:[#allocation5 + $0x918] sm:$0xff]  ;;  %v1569_v10 = vld [vmem:[#allocation5 + $0x900] sm:$0xff] }
 0x148   :  { %7167 = vmatpush1.bf16.msra.mxu1 %v7166_v43  ;;  %1223 = vperm.xlu1 %8587, %v181_v37   ;;  %v7172_v49 = vpack.c.bf16 %v1564_v24, %v1562_v50  ;;  %v271_v32 = vsel %vm243_vm1, %v266_v12, %v270_v42  ;;  %v1570_v7 = vld [vmem:[#allocation5 + $0x908] sm:$0xff]  ;;  %v899_v37 = vld [vmem:[#allocation5 + $0x510] sm:$0xff]  ;;  %v1576_v5 = vld [vmem:[#allocation5 + $0x938] sm:$0xff] }
 0x149   :  { %798 = vmatmul.mubr.f32.gmra.mrb[8].mxu0 %v259_v36  ;;  %v1566_v36 = vld [vmem:[#allocation5 + $0x8e8] sm:$0xff]  ;;  %7169 = vmatprep.subr.bf16.mxu1 %v7168_v34  ;;  %v7180_v6 = vpack.c.bf16 %v1572_v38, %v1570_v7  ;;  %v275_v21 = vsel %vm243_vm1, %v270_v42, %v274_v8  ;;  %v282_v42 = vrot.slane %v9194_v46, 7  ;;  %v1579_v7 = vld [vmem:[#allocation5 + $0x950] sm:$0xff] }
 0x14a   :  { %7103 = vmatpush1.bf16.msra.mxu0 %v7102_v1  ;;  %803 = vmatprep.mubr.f32.mxu0 %v265_v15  ;;  %v267_v1 = vsel %vm243_vm1, %v262_v53, %v266_v12  ;;  %v895_v15 = vld [vmem:[#allocation5 + $0x4f0] sm:$0xff]  ;;  %v7176_v43 = vpack.c.bf16 %v1568_v59, %v1566_v36  ;;  %v1565_v53 = vld [vmem:[#allocation5 + $0x8e0] sm:$0xff]  ;;  %v902_v24 = vld [vmem:[#allocation5 + $0x528] sm:$0xff]  ;;  %v278_v12 = vrot.slane %v9180_v25, 7 }
 0x14b   :  { %7105 = vmatprep.subr.bf16.mxu0 %v7104_v48  ;;  %v276_v48 = vrot.slane %v9162_v4, 7  ;;  %1228 = vperm.xlu0 %8586, %v182_v13   ;;  %v7114_v4 = vpack.c.bf16 %v895_v15, %v893_v62  ;;  %v7178_v18 = vpack.c.bf16 %v1567_v33, %v1565_v53  ;;  %v1574_v58 = vld [vmem:[#allocation5 + $0x928] sm:$0xff]  ;;  %v901_v13 = vld [vmem:[#allocation5 + $0x520] sm:$0xff]  ;;  %v1575_v59 = vld [vmem:[#allocation5 + $0x930] sm:$0xff] }
 0x14c   :  { %7171 = vmatpush1.bf16.msra.mxu1 %v7170_v17  ;;  %v906_v0 = vld [vmem:[#allocation5 + $0x548] sm:$0xff]  ;;  %v7184_v25 = vpack.c.bf16 %v1576_v5, %v1574_v58  ;;  %v1573_v36 = vld [vmem:[#allocation5 + $0x920] sm:$0xff]  ;;  %v1580_v15 = vld [vmem:[#allocation5 + $0x958] sm:$0xff] }
 0x14d   :  { %804 = vmatmul.mubr.f32.gmra.mrb[10].mxu0 %v263_v39  ;;  %7173 = vmatprep.subr.bf16.mxu1 %v7172_v49  ;;  %v897_v39 = vld [vmem:[#allocation5 + $0x500] sm:$0xff]  ;;  %v277_v50 = vsel %vm243_vm1, %v272_v27, %v276_v48  ;;  %v284_v27 = vrot.slane %v9190_v44, 7  ;;  %v903_v49 = vld [vmem:[#allocation5 + $0x530] sm:$0xff]  ;;  %v281_v20 = vsel %vm243_vm1, %v276_v48, %v280_v16  ;;  %v279_v44 = vsel %vm243_vm1, %v274_v8, %v278_v12  ;;  %v1578_v62 = vld [vmem:[#allocation5 + $0x948] sm:$0xff] }
 0x14e   :  { %7107 = vmatpush1.bf16.msra.mxu0 %v7106_v41  ;;  %809 = vmatprep.mubr.f32.mxu0 %v269_v60  ;;  %v7116_v41 = vpack.c.bf16 %v900_v54, %v898_v22  ;;  %v1571_v60 = vld [vmem:[#allocation5 + $0x910] sm:$0xff]  ;;  %v7118_v34 = vpack.c.bf16 %v899_v37, %v897_v39  ;;  %v288_v48 = vrot.slane %v9204_v9, 7  ;;  %v905_v22 = vld [vmem:[#allocation5 + $0x540] sm:$0xff]  ;;  %v912_v53 = vld [vmem:[#allocation5 + $0x578] sm:$0xff]  ;;  %v7186_v33 = vpack.c.bf16 %v1575_v59, %v1573_v36 }
 0x14f   :  { %7109 = vmatprep.subr.bf16.mxu0 %v7108_v30  ;;  %v904_v30 = vld [vmem:[#allocation5 + $0x538] sm:$0xff]  ;;  %v907_v54 = vld [vmem:[#allocation5 + $0x550] sm:$0xff]  ;;  %v286_v8 = vrot.slane %v9226_v61, 7  ;;  %v1582_v39 = vld [vmem:[#allocation5 + $0x968] sm:$0xff] }
 0x150   :  { %7175 = vmatpush1.bf16.msra.mxu1 %v7174_v52  ;;  %v7120_v17 = vpack.c.bf16 %v904_v30, %v902_v24  ;;  %v285_v52 = vsel %vm243_vm1, %v280_v16, %v284_v27  ;;  %v7126_v38 = vpack.c.bf16 %v907_v54, %v905_v22  ;;  %v1584_v37 = vld [vmem:[#allocation5 + $0x978] sm:$0xff]  ;;  %v292_v16 = vrot.slane %v9228_v3, 7  ;;  %v909_v24 = vld [vmem:[#allocation5 + $0x560] sm:$0xff]  ;;  %v911_v30 = vld [vmem:[#allocation5 + $0x570] sm:$0xff] }
 0x151   :  { %810 = vmatmul.mubr.f32.gmra.mrb[12].mxu0 %v267_v1  ;;  %7177 = vmatprep.subr.bf16.mxu1 %v7176_v43  ;;  %v7182_v1 = vpack.c.bf16 %v1571_v60, %v1569_v10  ;;  %v910_v43 = vld [vmem:[#allocation5 + $0x568] sm:$0xff]  ;;  %v916_v10 = vld [vmem:[#allocation5 + $0x598] sm:$0xff]  ;;  %v1583_v58 = vld [vmem:[#allocation5 + $0x970] sm:$0xff]  ;;  %v7130_v5 = vpack.c.bf16 %v911_v30, %v909_v24 }
 0x152   :  { %7111 = vmatpush1.bf16.msra.mxu0 %v7110_v28  ;;  %815 = vmatprep.mubr.f32.mxu0 %v273_v47  ;;  %v908_v28 = vld [vmem:[#allocation5 + $0x558] sm:$0xff]  ;;  %v1590_v22 = vld [vmem:[#allocation5 + $0x9a8] sm:$0xff] }
 0x153   :  { %7113 = vmatprep.subr.bf16.mxu0 %v7112_v55  ;;  %v7122_v55 = vpack.c.bf16 %v903_v49, %v901_v13  ;;  %v7124_v47 = vpack.c.bf16 %v908_v28, %v906_v0  ;;  %v1586_v13 = vld [vmem:[#allocation5 + $0x988] sm:$0xff]  ;;  %v1588_v49 = vld [vmem:[#allocation5 + $0x998] sm:$0xff]  ;;  %v913_v0 = vld [vmem:[#allocation5 + $0x580] sm:$0xff] }
 0x154   :  { %7179 = vmatpush1.bf16.msra.mxu1 %v7178_v18  ;;  %v289_v18 = vsel %vm243_vm1, %v284_v27, %v288_v48  ;;  %v296_v27 = vrot.slane %v9234_v29, 7  ;;  %v915_v28 = vld [vmem:[#allocation5 + $0x590] sm:$0xff]  ;;  %v920_v36 = vld [vmem:[#allocation5 + $0x5b8] sm:$0xff]  ;;  %v1594_v24 = vld [vmem:[#allocation5 + $0x9c8] sm:$0xff] }
 0x155   :  { %816 = vmatmul.mubr.f32.gmra.mrb[14].mxu0 %v271_v32  ;;  %7181 = vmatprep.subr.bf16.mxu1 %v7180_v6  ;;  %v1577_v32 = vld [vmem:[#allocation5 + $0x940] sm:$0xff]  ;;  %v914_v6 = vld [vmem:[#allocation5 + $0x588] sm:$0xff]  ;;  %v1592_v54 = vld [vmem:[#allocation5 + $0x9b8] sm:$0xff] }
 0x156   :  { %7115 = vmatpush1.bf16.msra.mxu0 %v7114_v4  ;;  %821 = vmatprep.mubr.f32.mxu0 %v277_v50  ;;  %v7188_v4 = vpack.c.bf16 %v1580_v15, %v1578_v62  ;;  %v7128_v50 = vpack.c.bf16 %v912_v53, %v910_v43  ;;  %v7190_v60 = vpack.c.bf16 %v1579_v7, %v1577_v32  ;;  %v1587_v62 = vld [vmem:[#allocation5 + $0x990] sm:$0xff]  ;;  %v917_v43 = vld [vmem:[#allocation5 + $0x5a0] sm:$0xff]  ;;  %v924_v32 = vld [vmem:[#allocation5 + $0x5d8] sm:$0xff] }
 0x157   :  { %7117 = vmatprep.subr.bf16.mxu0 %v7116_v41  ;;  %v283_v41 = vsel %vm243_vm1, %v278_v12, %v282_v42  ;;  %v290_v12 = vrot.slane %v9232_v19, 7  ;;  %v7134_v15 = vpack.c.bf16 %v915_v28, %v913_v0  ;;  %v919_v53 = vld [vmem:[#allocation5 + $0x5b0] sm:$0xff]  ;;  %v1596_v30 = vld [vmem:[#allocation5 + $0x9d8] sm:$0xff] }
 0x158   :  { %7183 = vmatpush1.bf16.msra.mxu1 %v7182_v1  ;;  %v293_v1 = vsel %vm243_vm1, %v288_v48, %v292_v16  ;;  %v300_v48 = vrot.slane %v9240_v45, 7  ;;  %v927_v0 = vld [vmem:[#allocation5 + $0x5f0] sm:$0xff] }
 0x159   :  { %822 = vmatmul.mubr.f32.gmra.mrb[16].mxu0 %v275_v21  ;;  %7185 = vmatprep.subr.bf16.mxu1 %v7184_v25  ;;  %v1581_v21 = vld [vmem:[#allocation5 + $0x960] sm:$0xff]  ;;  %v918_v25 = vld [vmem:[#allocation5 + $0x5a8] sm:$0xff] }
 0x15a   :  { %7119 = vmatpush1.bf16.msra.mxu0 %v7118_v34  ;;  %827 = vmatprep.mubr.f32.mxu0 %v281_v20  ;;  %v7192_v34 = vpack.c.bf16 %v1584_v37, %v1582_v39  ;;  %v7132_v20 = vpack.c.bf16 %v916_v10, %v914_v6  ;;  %v7194_v59 = vpack.c.bf16 %v1583_v58, %v1581_v21  ;;  %v1591_v39 = vld [vmem:[#allocation5 + $0x9b0] sm:$0xff] }
 0x15b   :  { %7121 = vmatprep.subr.bf16.mxu0 %v7120_v17  ;;  %v287_v17 = vsel %vm243_vm1, %v282_v42, %v286_v8  ;;  %v294_v42 = vrot.slane %v9238_v51, 7  ;;  %v7138_v37 = vpack.c.bf16 %v919_v53, %v917_v43  ;;  %v923_v6 = vld [vmem:[#allocation5 + $0x5d0] sm:$0xff]  ;;  %v301_v10 = vsel %vm243_vm1, %v296_v27, %v300_v48  ;;  %v1597_v43 = vld [vmem:[#allocation5 + $0x9e0] sm:$0xff] }
 0x15c   :  { %7187 = vmatpush1.bf16.msra.mxu1 %v7186_v33  ;;  %v297_v33 = vsel %vm243_vm1, %v292_v16, %v296_v27  ;;  %v7204_v58 = vpack.c.bf16 %v1596_v30, %v1594_v24  ;;  %v1599_v53 = vld [vmem:[#allocation5 + $0x9f0] sm:$0xff] }
 0x15d   :  { %828 = vmatmul.mubr.f32.gmra.mrb[18].mxu0 %v279_v44  ;;  %7189 = vmatprep.subr.bf16.mxu1 %v7188_v4  ;;  %v1585_v44 = vld [vmem:[#allocation5 + $0x980] sm:$0xff]  ;;  %v922_v4 = vld [vmem:[#allocation5 + $0x5c8] sm:$0xff] }
 0x15e   :  { %7123 = vmatpush1.bf16.msra.mxu0 %v7122_v55  ;;  %833 = vmatprep.mubr.f32.mxu0 %v285_v52  ;;  %v7196_v55 = vpack.c.bf16 %v1588_v49, %v1586_v13  ;;  %v7136_v52 = vpack.c.bf16 %v920_v36, %v918_v25  ;;  %v7198_v7 = vpack.c.bf16 %v1587_v62, %v1585_v44  ;;  %v11663_v25 = vld [vmem:[#allocation29_spill] sm:$0xff]  ;;  %v383_v36 = vrot.slane %v9228_v3, 1  ;;  %v11672_v44 = vld [vmem:[#allocation38_spill] sm:$0xff] }
 0x15f   :  { %7125 = vmatprep.subr.bf16.mxu0 %v7124_v47  ;;  %v291_v47 = vsel %vm243_vm1, %v286_v8, %v290_v12  ;;  %v298_v8 = vrot.slane %v9245_v31, 7  ;;  %v7140_v16 = vpack.c.bf16 %v924_v32, %v922_v4  ;;  %v11673_v62 = vrot.slane %v9194_v46, 1  ;;  %v1475_v4 = vld [vmem:[#allocation5 + $0x618] sm:$0xff] }
 0x160   :  { %7191 = vmatpush1.bf16.msra.mxu1 %v7190_v60  ;;  %v926_v60 = vld [vmem:[#allocation5 + $0x5e8] sm:$0xff]  ;;  %v389_v46 = vrot.slane %v9245_v31, 1  ;;  %v7210_v31 = vpack.c.bf16 %v1599_v53, %v1597_v43 }
 0x161   :  { %834 = vmatmul.mubr.f32.gmra.mrb[20].mxu0 %v283_v41  ;;  %7193 = vmatprep.subr.bf16.mxu1 %v7192_v34  ;;  %v1589_v41 = vld [vmem:[#allocation5 + $0x9a0] sm:$0xff]  ;;  %v928_v34 = vld [vmem:[#allocation5 + $0x5f8] sm:$0xff] }
 0x162   :  { %7127 = vmatpush1.bf16.msra.mxu0 %v7126_v38  ;;  %839 = vmatprep.mubr.f32.mxu0 %v289_v18  ;;  %v7200_v38 = vpack.c.bf16 %v1592_v54, %v1590_v22  ;;  %v921_v18 = vld [vmem:[#allocation5 + $0x5c0] sm:$0xff]  ;;  %v7202_v21 = vpack.c.bf16 %v1591_v39, %v1589_v41  ;;  %v7144_v49 = vpack.c.bf16 %v928_v34, %v926_v60  ;;  %v385_v22 = vrot.slane %v9238_v51, 1  ;;  %v1598_v51 = vld [vmem:[#allocation5 + $0x9e8] sm:$0xff] }
 0x163   :  { %7129 = vmatprep.subr.bf16.mxu0 %v7128_v50  ;;  %v295_v50 = vsel %vm243_vm1, %v290_v12, %v294_v42  ;;  %v7142_v13 = vpack.c.bf16 %v923_v6, %v921_v18  ;;  %v299_v12 = vsel %vm243_vm1, %v294_v42, %v298_v8  ;;  %v1114_v39 = vld [vmem:[#allocation7] ss:$8 sm:$0x3] }
 0x164   :  { %7195 = vmatpush1.bf16.msra.mxu1 %v7194_v59  ;;  %v11671_v59 = vld [vmem:[#allocation37_spill] sm:$0xff]  ;;  %v390_v48 = vsel %vm334_vm0, %v385_v22, %v389_v46 }
 0x165   :  { %840 = vmatmul.mubr.f32.gmra.mrb[22].mxu0 %v287_v17  ;;  %7197 = vmatprep.subr.bf16.mxu1 %v7196_v55  ;;  %v1595_v17 = vld [vmem:[#allocation5 + $0x9d0] sm:$0xff]  ;;  %v381_v55 = vrot.slane %v9232_v19, 1  ;;  %v391_v19 = vrot.slane %v9240_v45, 1  ;;  %v1600_v45 = vld [vmem:[#allocation5 + $0x9f8] sm:$0xff]  ;;  %v1472_v6 = vld [vmem:[#allocation5 + $0x600] sm:$0xff] }
 0x166   :  { %7131 = vmatpush1.bf16.msra.mxu0 %v7130_v5  ;;  %845 = vmatprep.mubr.f32.mxu0 %v293_v1  ;;  %v1593_v5 = vld [vmem:[#allocation5 + $0x9c0] sm:$0xff]  ;;  %v1477_v34 = vld [vmem:[#allocation5 + $0x628] sm:$0xff] }
 0x167   :  { %7133 = vmatprep.subr.bf16.mxu0 %v7132_v20  ;;  %v925_v20 = vld [vmem:[#allocation5 + $0x5e0] sm:$0xff]  ;;  %v7206_v27 = vpack.c.bf16 %v1595_v17, %v1593_v5 }
 0x168   :  { %7199 = vmatpush1.bf16.msra.mxu1 %v7198_v7  ;;  %v7146_v28 = vpack.c.bf16 %v927_v0, %v925_v20  ;;  %v11662_v1 = vld [vmem:[#allocation28_spill] sm:$0xff]  ;;  %v11480_v7 = vlaneseq }
 0x169   :  { %846 = vmatmul.mubr.f32.gmra.mrb[24].mxu0 %v291_v47  ;;  %7201 = vmatprep.subr.bf16.mxu1 %v7200_v38  ;;  %v11674_v47 = vrot.slane %v9204_v9, 1  ;;  %v1476_v0 = vld [vmem:[#allocation5 + $0x620] sm:$0xff] }
 0x16a   :  { %7135 = vmatpush1.bf16.msra.mxu0 %v7134_v15  ;;  %851 = vmatprep.mubr.f32.mxu0 %v297_v33  ;;  %v387_v15 = vrot.slane %v9234_v29, 1  ;;  %v386_v29 = vsel %vm334_vm0, %v381_v55, %v385_v22  ;;  %v1473_v33 = vld [vmem:[#allocation5 + $0x608] sm:$0xff]  ;;  %v1117_v38 = vshrl.u32 %v11480_v7, 7 }
 0x16b   :  { %7137 = vmatprep.subr.bf16.mxu0 %v7136_v52  ;;  %v7208_v52 = vpack.c.bf16 %v1600_v45, %v1598_v51  ;;  %v7212_v32 = vpack.c.bf16 %v1475_v4, %v1473_v33  ;;  %v1533_v7 = vld [vmem:[#allocation5 + $0x7e8] sm:$0xff] }
 0x16c   :  { %7203 = vmatpush1.bf16.msra.mxu1 %v7202_v21  ;;  %v388_v54 = vsel %vm334_vm0, %v383_v36, %v387_v15  ;;  %v392_v9 = vsel %vm334_vm0, %v387_v15, %v391_v19  ;;  %v9401_v41 = vsub.s32 0, %v1117_v38  ;;  %v9403_v8 = vsub.s32 1, %v1117_v38  ;;  %v1479_v21 = vld [vmem:[#allocation5 + $0x638] sm:$0xff]  ;;  %v1490_v38 = vld [vmem:[#allocation5 + $0x690] sm:$0xff] }
 0x16d   :  { %852 = vmatmul.mubr.f32.gmra.mrb[26].mxu0 %v295_v50  ;;  %7205 = vmatprep.subr.bf16.mxu1 %v7204_v58  ;;  %v7216_v20 = vpack.c.bf16 %v1479_v21, %v1477_v34 }
 0x16e   :  { %7139 = vmatpush1.bf16.msra.mxu0 %v7138_v37  ;;  %857 = vmatprep.mubr.f32.mxu0 %v301_v10  ;;  %11676 = vst [vmem:[#allocation28_spill] sm:$0xff] %v9403_v8  ;;  %v9406_v37 = vrot.slane %v1114_v39, %v9401_v41  ;;  %v9409_v50 = vrot.slane %v1114_v39, %v9403_v8  ;;  %v1474_v10 = vld [vmem:[#allocation5 + $0x610] sm:$0xff] }
 0x16f   :  { %7141 = vmatprep.subr.bf16.mxu0 %v7140_v16  ;;  %v7214_v17 = vpack.c.bf16 %v1474_v10, %v1472_v6 }
 0x170   :  { %7207 = vmatpush1.bf16.msra.mxu1 %v7206_v27  ;;  %v1478_v27 = vld [vmem:[#allocation5 + $0x630] sm:$0xff] }
 0x171   :  { %858 = vmatmul.mubr.f32.gmra.mrb[28].mxu0 %v299_v12  ;;  %7209 = vmatprep.subr.bf16.mxu1 %v7208_v52 }
 0x172   :  { %7143 = vmatpush1.bf16.msra.mxu0 %v7142_v13  ;;  %993 = vmatprep.mubr.f32.mxu0 %v9087_v56  ;;  %v11661_v56 = vld [vmem:[#allocation27_spill] sm:$0xff] }
 0x173   :  { %7145 = vmatprep.subr.bf16.mxu0 %v7144_v49  ;;  %11675 = vst [vmem:[#allocation27_spill] sm:$0xff] %v9401_v41 }
 0x174   :  { %7211 = vmatpush1.bf16.msra.mxu1 %v7210_v31 }
 0x175   :  { %7213 = vmatprep.subr.bf16.mxu1 %v7212_v32  ;;  %v1488_v32 = vld [vmem:[#allocation5 + $0x680] sm:$0xff] }
 0x176   :  { %7147 = vmatpush1.bf16.msra.mxu0 %v7146_v28 }
 0x179   :  { %994 = vmatmul.mubr.f32.vlgmr.msra.gmra.mrb[0].mxu0 %v9090_v57  ;;  %v11664_v57 = vld [vmem:[#allocation30_spill] sm:$0xff] }
 0x17a   :  { %999 = vmatprep.mubr.f32.mxu0 %v9099_v63  ;;  %v11665_v63 = vld [vmem:[#allocation31_spill] sm:$0xff] }
 0x17d   :  { %1000 = vmatmul.mubr.f32.gmra.mrb[2].mxu0 %v9104_v2  ;;  %v11666_v2 = vld [vmem:[#allocation32_spill] sm:$0xff] }
 0x17e   :  { %1005 = vmatprep.mubr.f32.mxu0 %v9113_v11  ;;  %v11667_v11 = vld [vmem:[#allocation33_spill] sm:$0xff] }
 0x181   :  { %1006 = vmatmul.mubr.f32.gmra.mrb[4].mxu0 %v9118_v14  ;;  %v11668_v14 = vld [vmem:[#allocation34_spill] sm:$0xff] }
 0x182   :  { %1011 = vmatprep.mubr.f32.mxu0 %v9127_v23  ;;  %v11669_v23 = vld [vmem:[#allocation35_spill] sm:$0xff] }
 0x185   :  { %1012 = vmatmul.mubr.f32.gmra.mrb[6].mxu0 %v9132_v26  ;;  %v377_v26 = vrot.slane %v9226_v61, 1  ;;  %v384_v61 = vsel %vm334_vm0, %v11674_v47, %v383_v36  ;;  %v1480_v36 = vld [vmem:[#allocation5 + $0x640] sm:$0xff] }
 0x186   :  { %1017 = vmatprep.mubr.f32.mxu0 %v9141_v35  ;;  %v11670_v35 = vld [vmem:[#allocation36_spill] sm:$0xff] }
 0x187   :  { %v378_v42 = vsel %vm334_vm0, %v11673_v62, %v377_v26  ;;  %v382_v3 = vsel %vm334_vm0, %v377_v26, %v381_v55  ;;  %v1487_v62 = vld [vmem:[#allocation5 + $0x678] sm:$0xff] }
 0x189   :  { %1018 = vmatmul.mubr.f32.gmra.mrb[8].mxu0 %v11661_v56  ;;  %v1481_v56 = vld [vmem:[#allocation5 + $0x648] sm:$0xff] }
 0x18a   :  { %1023 = vmatprep.mubr.f32.mxu0 %v11662_v1  ;;  %v1483_v1 = vld [vmem:[#allocation5 + $0x658] sm:$0xff] }
 0x18d   :  { %1024 = vmatmul.mubr.f32.gmra.mrb[10].mxu0 %v11663_v25 }
 0x18e   :  { %1029 = vmatprep.mubr.f32.mxu0 %v11664_v57 }
 0x191   :  { %1030 = vmatmul.mubr.f32.gmra.mrb[12].mxu0 %v11665_v63 }
 0x192   :  { %1035 = vmatprep.mubr.f32.mxu0 %v11666_v2  ;;  %v7218_v2 = vpack.c.bf16 %v1478_v27, %v1476_v0  ;;  %v1497_v0 = vld [vmem:[#allocation5 + $0x6c8] sm:$0xff]  ;;  %v1499_v27 = vld [vmem:[#allocation5 + $0x6d8] sm:$0xff] }
 0x195   :  { %1036 = vmatmul.mubr.f32.gmra.mrb[14].mxu0 %v11667_v11 }
 0x196   :  { %1041 = vmatprep.mubr.f32.mxu0 %v11668_v14  ;;  %v9411_v30 = vpop.permute.xlu0 %1158 }
 0x197   :  { %11677 = vst [vmem:[#allocation29_spill] sm:$0xff] %v9411_v30 }
 0x199   :  { %1042 = vmatmul.mubr.f32.gmra.mrb[16].mxu0 %v11669_v23 }
 0x19a   :  { %1047 = vmatprep.mubr.f32.mxu0 %v11670_v35  ;;  %v7220_v35 = vpack.c.bf16 %v1483_v1, %v1481_v56 }
 0x19d   :  { %1048 = vmatmul.mubr.f32.gmra.mrb[18].mxu0 %v11671_v59  ;;  %v1482_v59 = vld [vmem:[#allocation5 + $0x650] sm:$0xff] }
 0x19e   :  { %1053 = vmatprep.mubr.f32.mxu0 %v11672_v44  ;;  %v1485_v44 = vld [vmem:[#allocation5 + $0x668] sm:$0xff]  ;;  %v7222_v47 = vpack.c.bf16 %v1482_v59, %v1480_v36  ;;  %v1496_v36 = vld [vmem:[#allocation5 + $0x6c0] sm:$0xff]  ;;  %v1498_v59 = vld [vmem:[#allocation5 + $0x6d0] sm:$0xff] }
 0x1a1   :  { %1054 = vmatmul.mubr.f32.gmra.mrb[20].mxu0 %v378_v42 }
 0x1a2   :  { %1059 = vmatprep.mubr.f32.mxu0 %v384_v61 }
 0x1a5   :  { %1060 = vmatmul.mubr.f32.gmra.mrb[22].mxu0 %v382_v3 }
 0x1a6   :  { %1065 = vmatprep.mubr.f32.mxu0 %v388_v54  ;;  %v1484_v54 = vld [vmem:[#allocation5 + $0x660] sm:$0xff] }
 0x1a9   :  { %1066 = vmatmul.mubr.f32.gmra.mrb[24].mxu0 %v386_v29 }
 0x1aa   :  { %1071 = vmatprep.mubr.f32.mxu0 %v392_v9  ;;  %v1489_v9 = vld [vmem:[#allocation5 + $0x688] sm:$0xff] }
 0x1ad   :  { %1072 = vmatmul.mubr.f32.gmra.mrb[26].mxu0 %v390_v48  ;;  %v1491_v48 = vld [vmem:[#allocation5 + $0x698] sm:$0xff] }
 0x1ae   :  { %6792 = vmatprep.mubr.msk.f32.mxu0 %vm334_vm0, %v391_v19  ;;  %v9424_v25 = vpop.permute.xlu0 %1163  ;;  %v7224_v19 = vpack.c.bf16 %v1487_v62, %v1485_v44  ;;  %v7228_v4 = vpack.c.bf16 %v1491_v48, %v1489_v9  ;;  %v1501_v44 = vld [vmem:[#allocation5 + $0x6e8] sm:$0xff]  ;;  %v1503_v62 = vld [vmem:[#allocation5 + $0x6f8] sm:$0xff]  ;;  %v1500_v9 = vld [vmem:[#allocation5 + $0x6e0] sm:$0xff] }
 0x1af   :  { %11680 = vst [vmem:[#allocation32_spill] sm:$0xff] %v9424_v25  ;;  %v9430_v11 = vpop.permute.xlu1 %1168  ;;  %v1502_v48 = vld [vmem:[#allocation5 + $0x6f0] sm:$0xff] }
 0x1b0   :  { %11682 = vst [vmem:[#allocation34_spill] sm:$0xff] %v9430_v11 }
 0x1b1   :  { %6793 = vmatmul.mubr.msk.f32.gmra.mrb[28].mxu0 %vm334_vm0, %v389_v46  ;;  %v1486_v46 = vld [vmem:[#allocation5 + $0x670] sm:$0xff] }
 0x1b2   :  { %v7226_v43 = vpack.c.bf16 %v1486_v46, %v1484_v54 }
 0x1b3   :  { %v9448_v51 = vpop.permute.xlu1 %1173 }
 0x1b4   :  { %11686 = vst [vmem:[#allocation38_spill] sm:$0xff] %v9448_v51 }
 0x24c   :  { %v995_v24 = vpop.f32.mrb[0].mxu0 }
 0x24d   :  { %v1126_v16 = vadd.f32 %v9406_v37, %v995_v24  ;;  %v997_v18 = vpop.f32.mrb[1].mxu0  ;;  %v1493_v24 = vld [vmem:[#allocation5 + $0x6a8] sm:$0xff] }
 0x24e   :  { %v1127_v60 = vadd.f32 %v9409_v50, %v997_v18  ;;  %v9460_v18 = vpop.permute.xlu0 %1178 }
 0x24f   :  { %v9419_v13 = vmul.f32 %v9411_v30, %v1126_v16  ;;  %v1495_v16 = vld [vmem:[#allocation5 + $0x6b8] sm:$0xff]  ;;  %11689 = vst [vmem:[#allocation42_spill] sm:$0xff] %v9460_v18 }
 0x250   :  { %v9416_v58 = vmul.f32 %v9411_v30, %v1127_v60  ;;  %v1001_v5 = vpop.f32.mrb[2].mxu0  ;;  %v7230_v60 = vpack.c.bf16 %v1490_v38, %v1488_v32  ;;  %v7242_v38 = vpack.c.bf16 %v1502_v48, %v1500_v9 }
 0x251   :  { %11679 = vst [vmem:[#allocation31_spill] sm:$0xff] %v9419_v13  ;;  %v1128_v12 = vadd.f32 %v9406_v37, %v1001_v5  ;;  %v1003_v49 = vpop.f32.mrb[3].mxu0 }
 0x252   :  { %11678 = vst [vmem:[#allocation30_spill] sm:$0xff] %v9416_v58  ;;  %v1129_v28 = vadd.f32 %v9409_v50, %v1003_v49  ;;  %1665 = vmatprep.mubr.f32.mxu1 %v9416_v58  ;;  %v1494_v49 = vld [vmem:[#allocation5 + $0x6b0] sm:$0xff] }
 0x253   :  { %1666 = vmatmul.mubr.f32.vlgmr.msra.gmra.mrb[0].mxu1 %v9419_v13  ;;  %v9433_v14 = vmul.f32 %v9424_v25, %v1128_v12  ;;  %v1492_v12 = vld [vmem:[#allocation5 + $0x6a0] sm:$0xff] }
 0x254   :  { %v9428_v57 = vmul.f32 %v9424_v25, %v1129_v28  ;;  %7215 = vmatpush1.bf16.msra.mxu1 %v7214_v17  ;;  %v1007_v63 = vpop.f32.mrb[4].mxu0  ;;  %v7232_v17 = vpack.c.bf16 %v1495_v16, %v1493_v24  ;;  %v9472_v28 = vpop.permute.xlu1 %1183 }
 0x255   :  { %11683 = vst [vmem:[#allocation35_spill] sm:$0xff] %v9433_v14  ;;  %v1130_v23 = vadd.f32 %v9406_v37, %v1007_v63  ;;  %v1009_v26 = vpop.f32.mrb[5].mxu0  ;;  %7217 = vmatprep.subr.bf16.mxu1 %v7216_v20  ;;  %11692 = vst [vmem:[#allocation45_spill] sm:$0xff] %v9472_v28  ;;  %v7234_v63 = vpack.c.bf16 %v1494_v49, %v1492_v12  ;;  %v1511_v12 = vld [vmem:[#allocation5 + $0x738] sm:$0xff] }
 0x256   :  { %11681 = vst [vmem:[#allocation33_spill] sm:$0xff] %v9428_v57  ;;  %v1131_v55 = vadd.f32 %v9409_v50, %v1009_v26  ;;  %1671 = vmatprep.mubr.f32.mxu1 %v9428_v57 }
 0x257   :  { %1672 = vmatmul.mubr.f32.gmra.mrb[2].mxu1 %v9433_v14  ;;  %v9443_v61 = vmul.f32 %v9430_v11, %v1130_v23 }
 0x258   :  { %v9440_v42 = vmul.f32 %v9430_v11, %v1131_v55  ;;  %7219 = vmatpush1.bf16.msra.mxu1 %v7218_v2  ;;  %v1013_v15 = vpop.f32.mrb[6].mxu0  ;;  %v2557_v11 = vld [vmem:[#allocation5 + $0xe88] sm:$0xff] }
 0x259   :  { %11685 = vst [vmem:[#allocation37_spill] sm:$0xff] %v9443_v61  ;;  %v1132_v22 = vadd.f32 %v9406_v37, %v1013_v15  ;;  %v1015_v3 = vpop.f32.mrb[7].mxu0  ;;  %7221 = vmatprep.subr.bf16.mxu1 %v7220_v35  ;;  %v7236_v35 = vpack.c.bf16 %v1499_v27, %v1497_v0  ;;  %v9484_v15 = vpop.permute.xlu0 %1188 }
 0x25a   :  { %11684 = vst [vmem:[#allocation36_spill] sm:$0xff] %v9440_v42  ;;  %v1133_v29 = vadd.f32 %v9409_v50, %v1015_v3  ;;  %1677 = vmatprep.mubr.f32.mxu1 %v9440_v42  ;;  %11695 = vst [vmem:[#allocation48_spill] sm:$0xff] %v9484_v15  ;;  %v7238_v3 = vpack.c.bf16 %v1498_v59, %v1496_v36  ;;  %v1510_v36 = vld [vmem:[#allocation5 + $0x730] sm:$0xff] }
 0x25b   :  { %1678 = vmatmul.mubr.f32.gmra.mrb[4].mxu1 %v9443_v61  ;;  %v9455_v53 = vmul.f32 %v9448_v51, %v1132_v22 }
 0x25c   :  { %v9452_v45 = vmul.f32 %v9448_v51, %v1133_v29  ;;  %7223 = vmatpush1.bf16.msra.mxu1 %v7222_v47  ;;  %v1019_v52 = vpop.f32.mrb[8].mxu0  ;;  %v7240_v29 = vpack.c.bf16 %v1503_v62, %v1501_v44  ;;  %v1515_v44 = vld [vmem:[#allocation5 + $0x758] sm:$0xff] }
 0x25d   :  { %11688 = vst [vmem:[#allocation41_spill] sm:$0xff] %v9455_v53  ;;  %v1134_v31 = vadd.f32 %v9406_v37, %v1019_v52  ;;  %v1021_v33 = vpop.f32.mrb[9].mxu0  ;;  %7225 = vmatprep.subr.bf16.mxu1 %v7224_v19  ;;  %v9508_v49 = vpop.permute.xlu0 %1198  ;;  %v2555_v51 = vld [vmem:[#allocation5 + $0xe78] sm:$0xff] }
 0x25e   :  { %11687 = vst [vmem:[#allocation40_spill] sm:$0xff] %v9452_v45  ;;  %v1135_v39 = vadd.f32 %v9409_v50, %v1021_v33  ;;  %1683 = vmatprep.mubr.f32.mxu1 %v9452_v45  ;;  %v9496_v33 = vpop.permute.xlu1 %1193  ;;  %11701 = vst [vmem:[#allocation54_spill] sm:$0xff] %v9508_v49 }
 0x25f   :  { %1684 = vmatmul.mubr.f32.gmra.mrb[6].mxu1 %v9455_v53  ;;  %v9467_v34 = vmul.f32 %v9460_v18, %v1134_v31  ;;  %v1507_v31 = vld [vmem:[#allocation5 + $0x718] sm:$0xff]  ;;  %11698 = vst [vmem:[#allocation51_spill] sm:$0xff] %v9496_v33 }
 0x260   :  { %v9464_v6 = vmul.f32 %v9460_v18, %v1135_v39  ;;  %7227 = vmatpush1.bf16.msra.mxu1 %v7226_v43  ;;  %v1025_v10 = vpop.f32.mrb[10].mxu0  ;;  %v1505_v43 = vld [vmem:[#allocation5 + $0x708] sm:$0xff] }
 0x261   :  { %11691 = vst [vmem:[#allocation44_spill] sm:$0xff] %v9467_v34  ;;  %v1136_v21 = vadd.f32 %v9406_v37, %v1025_v10  ;;  %v1027_v5 = vpop.f32.mrb[11].mxu0  ;;  %7229 = vmatprep.subr.bf16.mxu1 %v7228_v4  ;;  %v7244_v10 = vpack.c.bf16 %v1507_v31, %v1505_v43  ;;  %v1514_v43 = vld [vmem:[#allocation5 + $0x750] sm:$0xff] }
 0x262   :  { %11690 = vst [vmem:[#allocation43_spill] sm:$0xff] %v9464_v6  ;;  %v1137_v20 = vadd.f32 %v9409_v50, %v1027_v5  ;;  %1689 = vmatprep.mubr.f32.mxu1 %v9464_v6  ;;  %v9520_v62 = vpop.permute.xlu1 %1203 }
 0x263   :  { %1690 = vmatmul.mubr.f32.gmra.mrb[8].mxu1 %v9467_v34  ;;  %v9479_v2 = vmul.f32 %v9472_v28, %v1136_v21  ;;  %v1506_v21 = vld [vmem:[#allocation5 + $0x710] sm:$0xff]  ;;  %11704 = vst [vmem:[#allocation57_spill] sm:$0xff] %v9520_v62 }
 0x264   :  { %v9476_v56 = vmul.f32 %v9472_v28, %v1137_v20  ;;  %7231 = vmatpush1.bf16.msra.mxu1 %v7230_v60  ;;  %v1031_v1 = vpop.f32.mrb[12].mxu0  ;;  %v1504_v60 = vld [vmem:[#allocation5 + $0x700] sm:$0xff]  ;;  %v2551_v28 = vld [vmem:[#allocation5 + $0xe58] sm:$0xff] }
 0x265   :  { %11694 = vst [vmem:[#allocation47_spill] sm:$0xff] %v9479_v2  ;;  %v1138_v23 = vadd.f32 %v9406_v37, %v1031_v1  ;;  %v1033_v26 = vpop.f32.mrb[13].mxu0  ;;  %7233 = vmatprep.subr.bf16.mxu1 %v7232_v17  ;;  %v1509_v17 = vld [vmem:[#allocation5 + $0x728] sm:$0xff]  ;;  %v7246_v27 = vpack.c.bf16 %v1506_v21, %v1504_v60 }
 0x266   :  { %11693 = vst [vmem:[#allocation46_spill] sm:$0xff] %v9476_v56  ;;  %v1139_v55 = vadd.f32 %v9409_v50, %v1033_v26  ;;  %1695 = vmatprep.mubr.f32.mxu1 %v9476_v56  ;;  %v7248_v26 = vpack.c.bf16 %v1511_v12, %v1509_v17 }
 0x267   :  { %1696 = vmatmul.mubr.f32.gmra.mrb[10].mxu1 %v9479_v2  ;;  %v9491_v19 = vmul.f32 %v9484_v15, %v1138_v23 }
 0x268   :  { %v9488_v47 = vmul.f32 %v9484_v15, %v1139_v55  ;;  %7235 = vmatpush1.bf16.msra.mxu1 %v7234_v63  ;;  %v1037_v22 = vpop.f32.mrb[14].mxu0  ;;  %v1513_v55 = vld [vmem:[#allocation5 + $0x748] sm:$0xff] }
 0x269   :  { %11697 = vst [vmem:[#allocation50_spill] sm:$0xff] %v9491_v19  ;;  %v1140_v54 = vadd.f32 %v9406_v37, %v1037_v22  ;;  %v1039_v46 = vpop.f32.mrb[15].mxu0  ;;  %7237 = vmatprep.subr.bf16.mxu1 %v7236_v35  ;;  %v1508_v35 = vld [vmem:[#allocation5 + $0x720] sm:$0xff]  ;;  %v7252_v48 = vpack.c.bf16 %v1515_v44, %v1513_v55  ;;  %v2549_v15 = vld [vmem:[#allocation5 + $0xe48] sm:$0xff] }
 0x26a   :  { %11696 = vst [vmem:[#allocation49_spill] sm:$0xff] %v9488_v47  ;;  %v1141_v52 = vadd.f32 %v9409_v50, %v1039_v46  ;;  %1701 = vmatprep.mubr.f32.mxu1 %v9488_v47 }
 0x26b   :  { %1702 = vmatmul.mubr.f32.gmra.mrb[12].mxu1 %v9491_v19  ;;  %v9503_v39 = vmul.f32 %v9496_v33, %v1140_v54  ;;  %v7250_v54 = vpack.c.bf16 %v1510_v36, %v1508_v35  ;;  %v9544_v35 = vpop.permute.xlu1 %1213 }
 0x26c   :  { %v9500_v4 = vmul.f32 %v9496_v33, %v1141_v52  ;;  %7239 = vmatpush1.bf16.msra.mxu1 %v7238_v3  ;;  %v1043_v32 = vpop.f32.mrb[16].mxu0  ;;  %v1512_v52 = vld [vmem:[#allocation5 + $0x740] sm:$0xff]  ;;  %11710 = vst [vmem:[#allocation63_spill] sm:$0xff] %v9544_v35  ;;  %v1919_v33 = vld [vmem:[#allocation5 + $0xa38] sm:$0xff] }
 0x26d   :  { %11700 = vst [vmem:[#allocation53_spill] sm:$0xff] %v9503_v39  ;;  %v1142_v24 = vadd.f32 %v9406_v37, %v1043_v32  ;;  %v1045_v16 = vpop.f32.mrb[17].mxu0  ;;  %7241 = vmatprep.subr.bf16.mxu1 %v7240_v29  ;;  %v1517_v32 = vld [vmem:[#allocation5 + $0x768] sm:$0xff]  ;;  %v7254_v60 = vpack.c.bf16 %v1514_v43, %v1512_v52 }
 0x26e   :  { %11699 = vst [vmem:[#allocation52_spill] sm:$0xff] %v9500_v4  ;;  %v1143_v5 = vadd.f32 %v9409_v50, %v1045_v16  ;;  %1707 = vmatprep.mubr.f32.mxu1 %v9500_v4  ;;  %v1525_v43 = vld [vmem:[#allocation5 + $0x7a8] sm:$0xff] }
 0x26f   :  { %1708 = vmatmul.mubr.f32.gmra.mrb[14].mxu1 %v9503_v39  ;;  %v9515_v1 = vmul.f32 %v9508_v49, %v1142_v24  ;;  %v9532_v24 = vpop.permute.xlu0 %1208 }
 0x270   :  { %v9512_v20 = vmul.f32 %v9508_v49, %v1143_v5  ;;  %7243 = vmatpush1.bf16.msra.mxu1 %v7242_v38  ;;  %v1049_v0 = vpop.f32.mrb[18].mxu0  ;;  %v1519_v38 = vld [vmem:[#allocation5 + $0x778] sm:$0xff]  ;;  %11707 = vst [vmem:[#allocation60_spill] sm:$0xff] %v9532_v24  ;;  %v2546_v49 = vld [vmem:[#allocation5 + $0xe30] sm:$0xff] }
 0x271   :  { %11703 = vst [vmem:[#allocation56_spill] sm:$0xff] %v9515_v1  ;;  %v1144_v63 = vadd.f32 %v9406_v37, %v1049_v0  ;;  %v1051_v23 = vpop.f32.mrb[19].mxu0  ;;  %7245 = vmatprep.subr.bf16.mxu1 %v7244_v10  ;;  %v7256_v12 = vpack.c.bf16 %v1519_v38, %v1517_v32  ;;  %v1516_v0 = vld [vmem:[#allocation5 + $0x760] sm:$0xff] }
 0x272   :  { %11702 = vst [vmem:[#allocation55_spill] sm:$0xff] %v9512_v20  ;;  %v1145_v59 = vadd.f32 %v9409_v50, %v1051_v23  ;;  %1713 = vmatprep.mubr.f32.mxu1 %v9512_v20  ;;  %v1521_v23 = vld [vmem:[#allocation5 + $0x788] sm:$0xff] }
 0x273   :  { %1714 = vmatmul.mubr.f32.gmra.mrb[16].mxu1 %v9515_v1  ;;  %v9527_v46 = vmul.f32 %v9520_v62, %v1144_v63  ;;  %v9556_v32 = vpop.permute.xlu0 %1218 }
 0x274   :  { %v9524_v22 = vmul.f32 %v9520_v62, %v1145_v59  ;;  %7247 = vmatpush1.bf16.msra.mxu1 %v7246_v27  ;;  %v1055_v3 = vpop.f32.mrb[20].mxu0  ;;  %v1518_v27 = vld [vmem:[#allocation5 + $0x770] sm:$0xff]  ;;  %11713 = vst [vmem:[#allocation66_spill] sm:$0xff] %v9556_v32  ;;  %v2544_v62 = vld [vmem:[#allocation5 + $0xe20] sm:$0xff] }
 0x275   :  { %11706 = vst [vmem:[#allocation59_spill] sm:$0xff] %v9527_v46  ;;  %v1146_v29 = vadd.f32 %v9406_v37, %v1055_v3  ;;  %v1057_v9 = vpop.f32.mrb[21].mxu0  ;;  %7249 = vmatprep.subr.bf16.mxu1 %v7248_v26  ;;  %v1523_v26 = vld [vmem:[#allocation5 + $0x798] sm:$0xff]  ;;  %v7258_v55 = vpack.c.bf16 %v1518_v27, %v1516_v0  ;;  %v1524_v27 = vld [vmem:[#allocation5 + $0x7a0] sm:$0xff]  ;;  %v7346_v18 = vpack.c.bf16 %v2546_v49, %v2544_v62  ;;  %v1299_v62 = vrot.slane %v9440_v42, 7 }
 0x276   :  { %11705 = vst [vmem:[#allocation58_spill] sm:$0xff] %v9524_v22  ;;  %v1147_v31 = vadd.f32 %v9409_v50, %v1057_v9  ;;  %1719 = vmatprep.mubr.f32.mxu1 %v9524_v22  ;;  %v1520_v9 = vld [vmem:[#allocation5 + $0x780] sm:$0xff] }
 0x277   :  { %1720 = vmatmul.mubr.f32.gmra.mrb[18].mxu1 %v9527_v46  ;;  %v9539_v21 = vmul.f32 %v9532_v24, %v1146_v29  ;;  %v7260_v29 = vpack.c.bf16 %v1523_v26, %v1521_v23  ;;  %v1529_v26 = vld [vmem:[#allocation5 + $0x7c8] sm:$0xff] }
 0x278   :  { %v9536_v16 = vmul.f32 %v9532_v24, %v1147_v31  ;;  %7251 = vmatpush1.bf16.msra.mxu1 %v7250_v54  ;;  %v1061_v10 = vpop.f32.mrb[22].mxu0  ;;  %v1527_v31 = vld [vmem:[#allocation5 + $0x7b8] sm:$0xff] }
 0x279   :  { %11709 = vst [vmem:[#allocation62_spill] sm:$0xff] %v9539_v21  ;;  %v1148_v5 = vadd.f32 %v9406_v37, %v1061_v10  ;;  %v1063_v17 = vpop.f32.mrb[23].mxu0  ;;  %7253 = vmatprep.subr.bf16.mxu1 %v7252_v48  ;;  %v1522_v48 = vld [vmem:[#allocation5 + $0x790] sm:$0xff]  ;;  %v7264_v0 = vpack.c.bf16 %v1527_v31, %v1525_v43  ;;  %v1528_v31 = vld [vmem:[#allocation5 + $0x7c0] sm:$0xff] }
 0x27a   :  { %11708 = vst [vmem:[#allocation61_spill] sm:$0xff] %v9536_v16  ;;  %v1149_v63 = vadd.f32 %v9409_v50, %v1063_v17  ;;  %1725 = vmatprep.mubr.f32.mxu1 %v9536_v16 }
 0x27b   :  { %1726 = vmatmul.mubr.f32.gmra.mrb[20].mxu1 %v9539_v21  ;;  %v9551_v44 = vmul.f32 %v9544_v35, %v1148_v5 }
 0x27c   :  { %v9548_v36 = vmul.f32 %v9544_v35, %v1149_v63  ;;  %7255 = vmatpush1.bf16.msra.mxu1 %v7254_v60  ;;  %v1067_v59 = vpop.f32.mrb[24].mxu0  ;;  %v7262_v60 = vpack.c.bf16 %v1522_v48, %v1520_v9  ;;  %v1526_v63 = vld [vmem:[#allocation5 + $0x7b0] sm:$0xff] }
 0x27d   :  { %11712 = vst [vmem:[#allocation65_spill] sm:$0xff] %v9551_v44  ;;  %v1150_v3 = vadd.f32 %v9406_v37, %v1067_v59  ;;  %v1069_v54 = vpop.f32.mrb[25].mxu0  ;;  %7257 = vmatprep.subr.bf16.mxu1 %v7256_v12  ;;  %v1531_v59 = vld [vmem:[#allocation5 + $0x7d8] sm:$0xff]  ;;  %v7266_v9 = vpack.c.bf16 %v1526_v63, %v1524_v27  ;;  %v1532_v27 = vld [vmem:[#allocation5 + $0x7e0] sm:$0xff]  ;;  %v1292_v63 = vrot.slane %v9416_v58, 7 }
 0x27e   :  { %11711 = vst [vmem:[#allocation64_spill] sm:$0xff] %v9548_v36  ;;  %v1151_v52 = vadd.f32 %v9409_v50, %v1069_v54  ;;  %1731 = vmatprep.mubr.f32.mxu1 %v9548_v36  ;;  %v9568_v54 = vpop.permute.xlu1 %1223  ;;  %v7268_v43 = vpack.c.bf16 %v1531_v59, %v1529_v26  ;;  %v1913_v26 = vld [vmem:[#allocation5 + $0xa08] sm:$0xff]  ;;  %v1915_v59 = vld [vmem:[#allocation5 + $0xa18] sm:$0xff] }
 0x27f   :  { %1732 = vmatmul.mubr.f32.gmra.mrb[22].mxu1 %v9551_v44  ;;  %v9563_v5 = vmul.f32 %v9556_v32, %v1150_v3  ;;  %11716 = vst [vmem:[#allocation69_spill] sm:$0xff] %v9568_v54 }
 0x280   :  { %v9560_v38 = vmul.f32 %v9556_v32, %v1151_v52  ;;  %7259 = vmatpush1.bf16.msra.mxu1 %v7258_v55  ;;  %v1073_v10 = vpop.f32.mrb[26].mxu0  ;;  %v9580_v32 = vpop.permute.xlu0 %1228 }
 0x281   :  { %11715 = vst [vmem:[#allocation68_spill] sm:$0xff] %v9563_v5  ;;  %v1152_v17 = vadd.f32 %v9406_v37, %v1073_v10  ;;  %v1075_v12 = vpop.f32.mrb[27].mxu0  ;;  %7261 = vmatprep.subr.bf16.mxu1 %v7260_v29  ;;  %v1530_v10 = vld [vmem:[#allocation5 + $0x7d0] sm:$0xff]  ;;  %11719 = vst [vmem:[#allocation72_spill] sm:$0xff] %v9580_v32 }
 0x282   :  { %11714 = vst [vmem:[#allocation67_spill] sm:$0xff] %v9560_v38  ;;  %v1153_v23 = vadd.f32 %v9409_v50, %v1075_v12  ;;  %1737 = vmatprep.mubr.f32.mxu1 %v9560_v38 }
 0x283   :  { %1738 = vmatmul.mubr.f32.gmra.mrb[24].mxu1 %v9563_v5  ;;  %v9575_v29 = vmul.f32 %v9568_v54, %v1152_v17 }
 0x284   :  { %v9572_v55 = vmul.f32 %v9568_v54, %v1153_v23  ;;  %7263 = vmatpush1.bf16.msra.mxu1 %v7262_v60  ;;  %v1079_v3 = vpop.f32.mrb[28].mxu0  ;;  %v1535_v23 = vld [vmem:[#allocation5 + $0x7f8] sm:$0xff]  ;;  %v1917_v54 = vld [vmem:[#allocation5 + $0xa28] sm:$0xff] }
 0x285   :  { %11718 = vst [vmem:[#allocation71_spill] sm:$0xff] %v9575_v29  ;;  %v1154_v48 = vadd.f32 %v9406_v37, %v1079_v3  ;;  %v1081_v52 = vpop.f32.mrb[29].mxu0  ;;  %7265 = vmatprep.subr.bf16.mxu1 %v7264_v0  ;;  %v7270_v37 = vpack.c.bf16 %v1530_v10, %v1528_v31  ;;  %v7272_v0 = vpack.c.bf16 %v1535_v23, %v1533_v7  ;;  %v1912_v3 = vld [vmem:[#allocation5 + $0xa00] sm:$0xff]  ;;  %v2545_v10 = vld [vmem:[#allocation5 + $0xe28] sm:$0xff]  ;;  %v2547_v23 = vld [vmem:[#allocation5 + $0xe38] sm:$0xff] }
 0x286   :  { %11717 = vst [vmem:[#allocation70_spill] sm:$0xff] %v9572_v55  ;;  %v1155_v12 = vadd.f32 %v9409_v50, %v1081_v52  ;;  %1743 = vmatprep.mubr.f32.mxu1 %v9572_v55  ;;  %v1534_v50 = vld [vmem:[#allocation5 + $0x7f0] sm:$0xff]  ;;  %v2540_v31 = vld [vmem:[#allocation5 + $0xe00] sm:$0xff]  ;;  %v7344_v24 = vpack.c.bf16 %v2547_v23, %v2545_v10  ;;  %v1923_v10 = vld [vmem:[#allocation5 + $0xa58] sm:$0xff] }
 0x287   :  { %1744 = vmatmul.mubr.f32.gmra.mrb[26].mxu1 %v9575_v29  ;;  %v9587_v17 = vmul.f32 %v9580_v32, %v1154_v48  ;;  %v1914_v52 = vld [vmem:[#allocation5 + $0xa10] sm:$0xff]  ;;  %v7274_v7 = vpack.c.bf16 %v1534_v50, %v1532_v27  ;;  %v2548_v50 = vld [vmem:[#allocation5 + $0xe40] sm:$0xff]  ;;  %v2553_v23 = vld [vmem:[#allocation5 + $0xe68] sm:$0xff] }
 0x288   :  { %v9584_v60 = vmul.f32 %v9580_v32, %v1155_v12  ;;  %7267 = vmatpush1.bf16.msra.mxu1 %v7266_v9  ;;  %v2541_v12 = vld [vmem:[#allocation5 + $0xe08] sm:$0xff]  ;;  %v2543_v9 = vld [vmem:[#allocation5 + $0xe18] sm:$0xff]  ;;  %v7276_v32 = vpack.c.bf16 %v1915_v59, %v1913_v26  ;;  %v7278_v27 = vpack.c.bf16 %v1914_v52, %v1912_v3  ;;  %v7280_v26 = vpack.c.bf16 %v1919_v33, %v1917_v54  ;;  %v1916_v59 = vld [vmem:[#allocation5 + $0xa20] sm:$0xff] }
 0x289   :  { %11721 = vst [vmem:[#allocation74_spill] sm:$0xff] %v9587_v17  ;;  %7269 = vmatprep.subr.bf16.mxu1 %v7268_v43  ;;  %v7340_v48 = vpack.c.bf16 %v2543_v9, %v2541_v12  ;;  %v2542_v43 = vld [vmem:[#allocation5 + $0xe10] sm:$0xff]  ;;  %v1925_v3 = vld [vmem:[#allocation5 + $0xa68] sm:$0xff]  ;;  %v7352_v52 = vpack.c.bf16 %v2555_v51, %v2553_v23 }
 0x28a   :  { %11720 = vst [vmem:[#allocation73_spill] sm:$0xff] %v9584_v60  ;;  %1749 = vmatprep.mubr.f32.mxu1 %v9584_v60  ;;  %v7342_v35 = vpack.c.bf16 %v2542_v43, %v2540_v31  ;;  %v2550_v12 = vld [vmem:[#allocation5 + $0xe50] sm:$0xff]  ;;  %v1921_v31 = vld [vmem:[#allocation5 + $0xa48] sm:$0xff]  ;;  %v7348_v43 = vpack.c.bf16 %v2551_v28, %v2549_v15  ;;  %v1920_v15 = vld [vmem:[#allocation5 + $0xa40] sm:$0xff]  ;;  %v7288_v51 = vpack.c.bf16 %v1927_v40, %v1925_v3 }
 0x28b   :  { %1750 = vmatmul.mubr.f32.gmra.mrb[28].mxu1 %v9587_v17  ;;  %7341 = vmatprep.subr.bf16.mxu0 %v7340_v48  ;;  %v1918_v9 = vld [vmem:[#allocation5 + $0xa30] sm:$0xff]  ;;  %v1293_v48 = vrot.slane %v9433_v14, 7  ;;  %v7284_v28 = vpack.c.bf16 %v1923_v10, %v1921_v31  ;;  %v1933_v3 = vld [vmem:[#allocation5 + $0xaa8] sm:$0xff] }
 0x28c   :  { %7271 = vmatpush1.bf16.msra.mxu1 %v7270_v37  ;;  %6795 = vmatprep.mubr.msk.f32.mxu1 %vm9248_vm2, %v1292_v63  ;;  %v1295_v37 = vrot.slane %v9428_v57, 7  ;;  %v7282_v33 = vpack.c.bf16 %v1918_v9, %v1916_v59  ;;  %v1922_v54 = vld [vmem:[#allocation5 + $0xa50] sm:$0xff]  ;;  %v2556_v59 = vld [vmem:[#allocation5 + $0xe80] sm:$0xff] }
 0x28d   :  { %7273 = vmatprep.subr.bf16.mxu1 %v7272_v0  ;;  %7343 = vmatpush1.bf16.msra.mxu0 %v7342_v35  ;;  %v1291_v0 = vrot.slane %v9419_v13, 7  ;;  %v2552_v35 = vld [vmem:[#allocation5 + $0xe60] sm:$0xff]  ;;  %v2558_v9 = vld [vmem:[#allocation5 + $0xe90] sm:$0xff] }
 0x28e   :  { %7345 = vmatprep.subr.bf16.mxu0 %v7344_v24  ;;  %v1296_v49 = vsel %vm243_vm1, %v1292_v63, %v1295_v37  ;;  %v7350_v24 = vpack.c.bf16 %v2550_v12, %v2548_v50  ;;  %v1297_v63 = vrot.slane %v9443_v61, 7  ;;  %v1303_v50 = vrot.slane %v9452_v45, 7  ;;  %v1926_v31 = vld [vmem:[#allocation5 + $0xa70] sm:$0xff] }
 0x290   :  { %7275 = vmatpush1.bf16.msra.mxu1 %v7274_v7  ;;  %v1294_v7 = vsel %vm243_vm1, %v1291_v0, %v1293_v48  ;;  %v1298_v23 = vsel %vm243_vm1, %v1293_v48, %v1297_v63  ;;  %v1928_v48 = vld [vmem:[#allocation5 + $0xa80] sm:$0xff] }
 0x291   :  { %7277 = vmatprep.subr.bf16.mxu1 %v7276_v32  ;;  %7347 = vmatpush1.bf16.msra.mxu0 %v7346_v18  ;;  %v2554_v32 = vld [vmem:[#allocation5 + $0xe70] sm:$0xff]  ;;  %v2559_v18 = vld [vmem:[#allocation5 + $0xe98] sm:$0xff] }
 0x292   :  { %7349 = vmatprep.subr.bf16.mxu0 %v7348_v43  ;;  %v7354_v12 = vpack.c.bf16 %v2554_v32, %v2552_v35  ;;  %v1929_v43 = vld [vmem:[#allocation5 + $0xa88] sm:$0xff]  ;;  %v7356_v10 = vpack.c.bf16 %v2559_v18, %v2557_v11  ;;  %v1307_v35 = vrot.slane %v9464_v6, 7  ;;  %v7358_v32 = vpack.c.bf16 %v2558_v9, %v2556_v59 }
 0x293   :  { %6797 = vmatmul.mubr.msk.f32.vlgmr.msra.gmra.mrb[0].mxu1 %vm9248_vm2, %v1291_v0  ;;  %v1924_v0 = vld [vmem:[#allocation5 + $0xa60] sm:$0xff]  ;;  %v1311_v59 = vrot.slane %v9476_v56, 7 }
 0x294   :  { %1826 = vmatprep.mubr.f32.mxu1 %v1296_v49  ;;  %7279 = vmatpush1.bf16.msra.mxu1 %v7278_v27  ;;  %v1300_v27 = vsel %vm243_vm1, %v1295_v37, %v1299_v62  ;;  %v1301_v37 = vrot.slane %v9455_v53, 7  ;;  %v1931_v49 = vld [vmem:[#allocation5 + $0xa98] sm:$0xff]  ;;  %v7290_v40 = vpack.c.bf16 %v1926_v31, %v1924_v0  ;;  %v2564_v0 = vld [vmem:[#allocation5 + $0xec0] sm:$0xff]  ;;  %v2566_v31 = vld [vmem:[#allocation5 + $0xed0] sm:$0xff] }
 0x295   :  { %7281 = vmatprep.subr.bf16.mxu1 %v7280_v26  ;;  %7351 = vmatpush1.bf16.msra.mxu0 %v7350_v24  ;;  %v7286_v26 = vpack.c.bf16 %v1922_v54, %v1920_v15  ;;  %v2563_v24 = vld [vmem:[#allocation5 + $0xeb8] sm:$0xff]  ;;  %v2562_v15 = vld [vmem:[#allocation5 + $0xeb0] sm:$0xff]  ;;  %v7292_v11 = vpack.c.bf16 %v1931_v49, %v1929_v43  ;;  %v1937_v49 = vld [vmem:[#allocation5 + $0xac8] sm:$0xff] }
 0x296   :  { %7353 = vmatprep.subr.bf16.mxu0 %v7352_v52  ;;  %v1930_v54 = vld [vmem:[#allocation5 + $0xa90] sm:$0xff]  ;;  %v1302_v18 = vsel %vm243_vm1, %v1297_v63, %v1301_v37  ;;  %v1932_v63 = vld [vmem:[#allocation5 + $0xaa0] sm:$0xff] }
 0x297   :  { %1827 = vmatmul.mubr.f32.gmra.mrb[2].mxu1 %v1294_v7  ;;  %v2561_v7 = vld [vmem:[#allocation5 + $0xea8] sm:$0xff] }
 0x298   :  { %1832 = vmatprep.mubr.f32.mxu1 %v1300_v27  ;;  %7283 = vmatpush1.bf16.msra.mxu1 %v7282_v33  ;;  %v1304_v33 = vsel %vm243_vm1, %v1299_v62, %v1303_v50  ;;  %v7360_v52 = vpack.c.bf16 %v2563_v24, %v2561_v7  ;;  %v1305_v62 = vrot.slane %v9467_v34, 7  ;;  %v1935_v27 = vld [vmem:[#allocation5 + $0xab8] sm:$0xff] }
 0x299   :  { %7285 = vmatprep.subr.bf16.mxu1 %v7284_v28  ;;  %7355 = vmatpush1.bf16.msra.mxu0 %v7354_v12  ;;  %v2560_v28 = vld [vmem:[#allocation5 + $0xea0] sm:$0xff]  ;;  %v2567_v12 = vld [vmem:[#allocation5 + $0xed8] sm:$0xff]  ;;  %v7296_v43 = vpack.c.bf16 %v1935_v27, %v1933_v3  ;;  %v1941_v27 = vld [vmem:[#allocation5 + $0xae8] sm:$0xff] }
 0x29a   :  { %7357 = vmatprep.subr.bf16.mxu0 %v7356_v10  ;;  %v7362_v9 = vpack.c.bf16 %v2562_v15, %v2560_v28  ;;  %v1934_v10 = vld [vmem:[#allocation5 + $0xab0] sm:$0xff]  ;;  %v1306_v24 = vsel %vm243_vm1, %v1301_v37, %v1305_v62  ;;  %v1315_v28 = vrot.slane %v9488_v47, 7  ;;  %v7366_v15 = vpack.c.bf16 %v2566_v31, %v2564_v0  ;;  %v1936_v37 = vld [vmem:[#allocation5 + $0xac0] sm:$0xff] }
 0x29b   :  { %1833 = vmatmul.mubr.f32.gmra.mrb[4].mxu1 %v1298_v23  ;;  %v2565_v23 = vld [vmem:[#allocation5 + $0xec8] sm:$0xff]  ;;  %v1319_v0 = vrot.slane %v9500_v4, 7 }
 0x29c   :  { %1838 = vmatprep.mubr.f32.mxu1 %v1304_v33  ;;  %7287 = vmatpush1.bf16.msra.mxu1 %v7286_v26  ;;  %v1308_v26 = vsel %vm243_vm1, %v1303_v50, %v1307_v35  ;;  %v7364_v7 = vpack.c.bf16 %v2567_v12, %v2565_v23  ;;  %v1309_v50 = vrot.slane %v9479_v2, 7  ;;  %v1939_v33 = vld [vmem:[#allocation5 + $0xad8] sm:$0xff] }
 0x29d   :  { %7289 = vmatprep.subr.bf16.mxu1 %v7288_v51  ;;  %7359 = vmatpush1.bf16.msra.mxu0 %v7358_v32  ;;  %v7294_v51 = vpack.c.bf16 %v1930_v54, %v1928_v48  ;;  %v2571_v32 = vld [vmem:[#allocation5 + $0xef8] sm:$0xff]  ;;  %v2568_v48 = vld [vmem:[#allocation5 + $0xee0] sm:$0xff]  ;;  %v2570_v54 = vld [vmem:[#allocation5 + $0xef0] sm:$0xff]  ;;  %v7300_v3 = vpack.c.bf16 %v1939_v33, %v1937_v49 }
 0x29e   :  { %7361 = vmatprep.subr.bf16.mxu0 %v7360_v52  ;;  %v1938_v52 = vld [vmem:[#allocation5 + $0xad0] sm:$0xff]  ;;  %v1310_v12 = vsel %vm243_vm1, %v1305_v62, %v1309_v50  ;;  %v7370_v31 = vpack.c.bf16 %v2570_v54, %v2568_v48  ;;  %v1940_v62 = vld [vmem:[#allocation5 + $0xae0] sm:$0xff]  ;;  %v1945_v33 = vld [vmem:[#allocation5 + $0xb08] sm:$0xff]  ;;  %v1323_v48 = vrot.slane %v9512_v20, 7 }
 0x29f   :  { %1839 = vmatmul.mubr.f32.gmra.mrb[6].mxu1 %v1302_v18  ;;  %v2569_v18 = vld [vmem:[#allocation5 + $0xee8] sm:$0xff] }
 0x2a0   :  { %1844 = vmatprep.mubr.f32.mxu1 %v1308_v26  ;;  %7291 = vmatpush1.bf16.msra.mxu1 %v7290_v40  ;;  %v1312_v40 = vsel %vm243_vm1, %v1307_v35, %v1311_v59  ;;  %v7368_v23 = vpack.c.bf16 %v2571_v32, %v2569_v18  ;;  %v1313_v35 = vrot.slane %v9491_v19, 7  ;;  %v1943_v26 = vld [vmem:[#allocation5 + $0xaf8] sm:$0xff] }
 0x2a1   :  { %7293 = vmatprep.subr.bf16.mxu1 %v7292_v11  ;;  %7363 = vmatpush1.bf16.msra.mxu0 %v7362_v9  ;;  %v7298_v11 = vpack.c.bf16 %v1934_v10, %v1932_v63  ;;  %v2575_v9 = vld [vmem:[#allocation5 + $0xf18] sm:$0xff]  ;;  %v2572_v63 = vld [vmem:[#allocation5 + $0xf00] sm:$0xff]  ;;  %v2574_v10 = vld [vmem:[#allocation5 + $0xf10] sm:$0xff]  ;;  %v7304_v49 = vpack.c.bf16 %v1943_v26, %v1941_v27 }
 0x2a2   :  { %7365 = vmatprep.subr.bf16.mxu0 %v7364_v7  ;;  %v1942_v7 = vld [vmem:[#allocation5 + $0xaf0] sm:$0xff]  ;;  %v1314_v32 = vsel %vm243_vm1, %v1309_v50, %v1313_v35  ;;  %v7374_v54 = vpack.c.bf16 %v2574_v10, %v2572_v63  ;;  %v1944_v50 = vld [vmem:[#allocation5 + $0xb00] sm:$0xff]  ;;  %v1949_v26 = vld [vmem:[#allocation5 + $0xb28] sm:$0xff]  ;;  %v1327_v63 = vrot.slane %v9524_v22, 7 }
 0x2a3   :  { %1845 = vmatmul.mubr.f32.gmra.mrb[8].mxu1 %v1306_v24  ;;  %v2573_v24 = vld [vmem:[#allocation5 + $0xf08] sm:$0xff] }
 0x2a4   :  { %1850 = vmatprep.mubr.f32.mxu1 %v1312_v40  ;;  %7295 = vmatpush1.bf16.msra.mxu1 %v7294_v51  ;;  %v1316_v51 = vsel %vm243_vm1, %v1311_v59, %v1315_v28  ;;  %v7372_v18 = vpack.c.bf16 %v2575_v9, %v2573_v24  ;;  %v1317_v59 = vrot.slane %v9503_v39, 7  ;;  %v1947_v40 = vld [vmem:[#allocation5 + $0xb18] sm:$0xff] }
 0x2a5   :  { %7297 = vmatprep.subr.bf16.mxu1 %v7296_v43  ;;  %7367 = vmatpush1.bf16.msra.mxu0 %v7366_v15  ;;  %v7302_v43 = vpack.c.bf16 %v1938_v52, %v1936_v37  ;;  %v2579_v15 = vld [vmem:[#allocation5 + $0xf38] sm:$0xff]  ;;  %v2576_v37 = vld [vmem:[#allocation5 + $0xf20] sm:$0xff]  ;;  %v2578_v52 = vld [vmem:[#allocation5 + $0xf30] sm:$0xff]  ;;  %v7308_v27 = vpack.c.bf16 %v1947_v40, %v1945_v33 }
 0x2a6   :  { %7369 = vmatprep.subr.bf16.mxu0 %v7368_v23  ;;  %v1946_v23 = vld [vmem:[#allocation5 + $0xb10] sm:$0xff]  ;;  %v1318_v9 = vsel %vm243_vm1, %v1313_v35, %v1317_v59  ;;  %v7378_v10 = vpack.c.bf16 %v2578_v52, %v2576_v37  ;;  %v1948_v35 = vld [vmem:[#allocation5 + $0xb20] sm:$0xff]  ;;  %v1953_v40 = vld [vmem:[#allocation5 + $0xb48] sm:$0xff]  ;;  %v1331_v37 = vrot.slane %v9536_v16, 7 }
 0x2a7   :  { %1851 = vmatmul.mubr.f32.gmra.mrb[10].mxu1 %v1310_v12  ;;  %v2577_v12 = vld [vmem:[#allocation5 + $0xf28] sm:$0xff] }
 0x2a8   :  { %1856 = vmatprep.mubr.f32.mxu1 %v1316_v51  ;;  %7299 = vmatpush1.bf16.msra.mxu1 %v7298_v11  ;;  %v1320_v11 = vsel %vm243_vm1, %v1315_v28, %v1319_v0  ;;  %v7376_v24 = vpack.c.bf16 %v2579_v15, %v2577_v12  ;;  %v1321_v28 = vrot.slane %v9515_v1, 7  ;;  %v1951_v51 = vld [vmem:[#allocation5 + $0xb38] sm:$0xff] }
 0x2a9   :  { %7301 = vmatprep.subr.bf16.mxu1 %v7300_v3  ;;  %7371 = vmatpush1.bf16.msra.mxu0 %v7370_v31  ;;  %v7306_v3 = vpack.c.bf16 %v1942_v7, %v1940_v62  ;;  %v2583_v31 = vld [vmem:[#allocation5 + $0xf58] sm:$0xff]  ;;  %v2580_v62 = vld [vmem:[#allocation5 + $0xf40] sm:$0xff]  ;;  %v2582_v7 = vld [vmem:[#allocation5 + $0xf50] sm:$0xff]  ;;  %v7312_v33 = vpack.c.bf16 %v1951_v51, %v1949_v26 }
 0x2aa   :  { %7373 = vmatprep.subr.bf16.mxu0 %v7372_v18  ;;  %v1950_v18 = vld [vmem:[#allocation5 + $0xb30] sm:$0xff]  ;;  %v1322_v15 = vsel %vm243_vm1, %v1317_v59, %v1321_v28  ;;  %v7382_v52 = vpack.c.bf16 %v2582_v7, %v2580_v62  ;;  %v1952_v59 = vld [vmem:[#allocation5 + $0xb40] sm:$0xff]  ;;  %v1957_v51 = vld [vmem:[#allocation5 + $0xb68] sm:$0xff]  ;;  %v1335_v62 = vrot.slane %v9548_v36, 7 }
 0x2ab   :  { %1857 = vmatmul.mubr.f32.gmra.mrb[12].mxu1 %v1314_v32  ;;  %v2581_v32 = vld [vmem:[#allocation5 + $0xf48] sm:$0xff] }
 0x2ac   :  { %1862 = vmatprep.mubr.f32.mxu1 %v1320_v11  ;;  %7303 = vmatpush1.bf16.msra.mxu1 %v7302_v43  ;;  %v1324_v43 = vsel %vm243_vm1, %v1319_v0, %v1323_v48  ;;  %v7380_v12 = vpack.c.bf16 %v2583_v31, %v2581_v32  ;;  %v1325_v0 = vrot.slane %v9527_v46, 7  ;;  %v1955_v11 = vld [vmem:[#allocation5 + $0xb58] sm:$0xff] }
 0x2ad   :  { %7305 = vmatprep.subr.bf16.mxu1 %v7304_v49  ;;  %7375 = vmatpush1.bf16.msra.mxu0 %v7374_v54  ;;  %v7310_v49 = vpack.c.bf16 %v1946_v23, %v1944_v50  ;;  %v2587_v54 = vld [vmem:[#allocation5 + $0xf78] sm:$0xff]  ;;  %v2584_v50 = vld [vmem:[#allocation5 + $0xf60] sm:$0xff]  ;;  %v2586_v23 = vld [vmem:[#allocation5 + $0xf70] sm:$0xff]  ;;  %v7316_v26 = vpack.c.bf16 %v1955_v11, %v1953_v40 }
 0x2ae   :  { %7377 = vmatprep.subr.bf16.mxu0 %v7376_v24  ;;  %v1954_v24 = vld [vmem:[#allocation5 + $0xb50] sm:$0xff]  ;;  %v1326_v31 = vsel %vm243_vm1, %v1321_v28, %v1325_v0  ;;  %v7386_v7 = vpack.c.bf16 %v2586_v23, %v2584_v50  ;;  %v1956_v28 = vld [vmem:[#allocation5 + $0xb60] sm:$0xff]  ;;  %v1961_v11 = vld [vmem:[#allocation5 + $0xb88] sm:$0xff]  ;;  %v1339_v50 = vrot.slane %v9560_v38, 7 }
 0x2af   :  { %1863 = vmatmul.mubr.f32.gmra.mrb[14].mxu1 %v1318_v9  ;;  %v2585_v9 = vld [vmem:[#allocation5 + $0xf68] sm:$0xff] }
 0x2b0   :  { %1868 = vmatprep.mubr.f32.mxu1 %v1324_v43  ;;  %7307 = vmatpush1.bf16.msra.mxu1 %v7306_v3  ;;  %v1328_v3 = vsel %vm243_vm1, %v1323_v48, %v1327_v63  ;;  %v7384_v32 = vpack.c.bf16 %v2587_v54, %v2585_v9  ;;  %v1329_v48 = vrot.slane %v9539_v21, 7  ;;  %v1959_v43 = vld [vmem:[#allocation5 + $0xb78] sm:$0xff] }
 0x2b1   :  { %7309 = vmatprep.subr.bf16.mxu1 %v7308_v27  ;;  %7379 = vmatpush1.bf16.msra.mxu0 %v7378_v10  ;;  %v7314_v27 = vpack.c.bf16 %v1950_v18, %v1948_v35  ;;  %v2591_v10 = vld [vmem:[#allocation5 + $0xf98] sm:$0xff]  ;;  %v2588_v35 = vld [vmem:[#allocation5 + $0xf80] sm:$0xff]  ;;  %v2590_v18 = vld [vmem:[#allocation5 + $0xf90] sm:$0xff]  ;;  %v7320_v40 = vpack.c.bf16 %v1959_v43, %v1957_v51 }
 0x2b2   :  { %7381 = vmatprep.subr.bf16.mxu0 %v7380_v12  ;;  %v1958_v12 = vld [vmem:[#allocation5 + $0xb70] sm:$0xff]  ;;  %v1330_v54 = vsel %vm243_vm1, %v1325_v0, %v1329_v48  ;;  %v7390_v23 = vpack.c.bf16 %v2590_v18, %v2588_v35  ;;  %v1960_v0 = vld [vmem:[#allocation5 + $0xb80] sm:$0xff] }
 0x2b3   :  { %1869 = vmatmul.mubr.f32.gmra.mrb[16].mxu1 %v1322_v15  ;;  %v2589_v15 = vld [vmem:[#allocation5 + $0xf88] sm:$0xff] }
 0x2b4   :  { %1874 = vmatprep.mubr.f32.mxu1 %v1328_v3  ;;  %7311 = vmatpush1.bf16.msra.mxu1 %v7310_v49  ;;  %v1332_v49 = vsel %vm243_vm1, %v1327_v63, %v1331_v37  ;;  %v7388_v9 = vpack.c.bf16 %v2591_v10, %v2589_v15  ;;  %v1333_v63 = vrot.slane %v9551_v44, 7  ;;  %v1963_v3 = vld [vmem:[#allocation5 + $0xb98] sm:$0xff]  ;;  %v1337_v10 = vrot.slane %v9563_v5, 7 }
 0x2b5   :  { %7313 = vmatprep.subr.bf16.mxu1 %v7312_v33  ;;  %7383 = vmatpush1.bf16.msra.mxu0 %v7382_v52  ;;  %v7318_v33 = vpack.c.bf16 %v1954_v24, %v1952_v59  ;;  %v2595_v52 = vld [vmem:[#allocation5 + $0xfb8] sm:$0xff]  ;;  %v2592_v59 = vld [vmem:[#allocation5 + $0xfa0] sm:$0xff]  ;;  %v2594_v24 = vld [vmem:[#allocation5 + $0xfb0] sm:$0xff]  ;;  %v7324_v51 = vpack.c.bf16 %v1963_v3, %v1961_v11  ;;  %v1341_v11 = vrot.slane %v9575_v29, 7  ;;  %v1347_v3 = vrot.slane %v9584_v60, 7 }
 0x2b6   :  { %7385 = vmatprep.subr.bf16.mxu0 %v7384_v32  ;;  %v1962_v32 = vld [vmem:[#allocation5 + $0xb90] sm:$0xff]  ;;  %v1334_v15 = vsel %vm243_vm1, %v1329_v48, %v1333_v63  ;;  %v7394_v35 = vpack.c.bf16 %v2594_v24, %v2592_v59  ;;  %v1338_v48 = vsel %vm243_vm1, %v1333_v63, %v1337_v10  ;;  %v1345_v63 = vrot.slane %v9587_v17, 7  ;;  %v1973_v59 = vld [vmem:[#allocation5 + $0xbe8] sm:$0xff]  ;;  %v1975_v24 = vld [vmem:[#allocation5 + $0xbf8] sm:$0xff] }
 0x2b7   :  { %1875 = vmatmul.mubr.f32.gmra.mrb[18].mxu1 %v1326_v31  ;;  %v2593_v31 = vld [vmem:[#allocation5 + $0xfa8] sm:$0xff]  ;;  %v7326_v18 = vpack.c.bf16 %v1962_v32, %v1960_v0  ;;  %v1384_v32 = vrot.slane %v9416_v58, 1 }
 0x2b8   :  { %1880 = vmatprep.mubr.f32.mxu1 %v1332_v49  ;;  %7315 = vmatpush1.bf16.msra.mxu1 %v7314_v27  ;;  %v1336_v27 = vsel %vm243_vm1, %v1331_v37, %v1335_v62  ;;  %v7392_v43 = vpack.c.bf16 %v2595_v52, %v2593_v31  ;;  %v1965_v37 = vld [vmem:[#allocation5 + $0xba8] sm:$0xff]  ;;  %v1967_v49 = vld [vmem:[#allocation5 + $0xbb8] sm:$0xff] }
 0x2b9   :  { %7317 = vmatprep.subr.bf16.mxu1 %v7316_v26  ;;  %7387 = vmatpush1.bf16.msra.mxu0 %v7386_v7  ;;  %v7322_v26 = vpack.c.bf16 %v1958_v12, %v1956_v28  ;;  %v1340_v7 = vsel %vm243_vm1, %v1335_v62, %v1339_v50  ;;  %v1964_v28 = vld [vmem:[#allocation5 + $0xba0] sm:$0xff]  ;;  %v1966_v12 = vld [vmem:[#allocation5 + $0xbb0] sm:$0xff] }
 0x2ba   :  { %7389 = vmatprep.subr.bf16.mxu0 %v7388_v9  ;;  %v1969_v9 = vld [vmem:[#allocation5 + $0xbc8] sm:$0xff]  ;;  %v7330_v31 = vpack.c.bf16 %v1966_v12, %v1964_v28  ;;  %v1387_v28 = vrot.slane %v9443_v61, 1 }
 0x2bb   :  { %1881 = vmatmul.mubr.f32.gmra.mrb[20].mxu1 %v1330_v54  ;;  %v1971_v54 = vld [vmem:[#allocation5 + $0xbd8] sm:$0xff]  ;;  %v2512_v61 = vld [vmem:[#allocation5 + $0xd28] sm:$0xff] }
 0x2bc   :  { %1886 = vmatprep.mubr.f32.mxu1 %v1336_v27  ;;  %7319 = vmatpush1.bf16.msra.mxu1 %v7318_v33  ;;  %v1343_v33 = vrot.slane %v9572_v55, 7  ;;  %v7332_v52 = vpack.c.bf16 %v1971_v54, %v1969_v9  ;;  %v1968_v27 = vld [vmem:[#allocation5 + $0xbc0] sm:$0xff]  ;;  %v1391_v9 = vrot.slane %v9455_v53, 1 }
 0x2bd   :  { %7321 = vmatprep.subr.bf16.mxu1 %v7320_v40  ;;  %7391 = vmatpush1.bf16.msra.mxu0 %v7390_v23  ;;  %v7328_v40 = vpack.c.bf16 %v1967_v49, %v1965_v37  ;;  %v1970_v23 = vld [vmem:[#allocation5 + $0xbd0] sm:$0xff] }
 0x2be   :  { %7393 = vmatprep.subr.bf16.mxu0 %v7392_v43  ;;  %v1344_v62 = vsel %vm243_vm1, %v1339_v50, %v1343_v33  ;;  %v1385_v50 = vrot.slane %v9428_v57, 1  ;;  %v7334_v0 = vpack.c.bf16 %v1970_v23, %v1968_v27  ;;  %v7336_v43 = vpack.c.bf16 %v1975_v24, %v1973_v59  ;;  %v1974_v37 = vld [vmem:[#allocation5 + $0xbf0] sm:$0xff] }
 0x2bf   :  { %1887 = vmatmul.mubr.f32.gmra.mrb[22].mxu1 %v1334_v15  ;;  %v1972_v15 = vld [vmem:[#allocation5 + $0xbe0] sm:$0xff]  ;;  %v1401_v27 = vrot.slane %v9476_v56, 1  ;;  %v1405_v59 = vrot.slane %v9488_v47, 1 }
 0x2c0   :  { %1892 = vmatprep.mubr.f32.mxu1 %v1340_v7  ;;  %7323 = vmatpush1.bf16.msra.mxu1 %v7322_v26  ;;  %v1342_v26 = vsel %vm243_vm1, %v1337_v10, %v1341_v11  ;;  %v1346_v10 = vsel %vm243_vm1, %v1341_v11, %v1345_v63  ;;  %v1386_v49 = vsel %vm334_vm0, %v1384_v32, %v1385_v50  ;;  %v2499_v56 = vld [vmem:[#allocation5 + $0xcc0] sm:$0xff] }
 0x2c1   :  { %7325 = vmatprep.subr.bf16.mxu1 %v7324_v51  ;;  %7395 = vmatpush1.bf16.msra.mxu0 %v7394_v35  ;;  %v1348_v51 = vsel %vm243_vm1, %v1343_v33, %v1347_v3  ;;  %v7338_v7 = vpack.c.bf16 %v1974_v37, %v1972_v15  ;;  %v1382_v33 = vrot.slane %v9433_v14, 1  ;;  %v1389_v35 = vrot.slane %v9440_v42, 1  ;;  %v2507_v42 = vld [vmem:[#allocation5 + $0xd00] sm:$0xff] }
 0x2c2   :  { %v1392_v3 = vsel %vm334_vm0, %v1387_v28, %v1391_v9  ;;  %v1413_v37 = vrot.slane %v9512_v20, 1  ;;  %v2511_v14 = vld [vmem:[#allocation5 + $0xd20] sm:$0xff] }
 0x2c3   :  { %1893 = vmatmul.mubr.f32.gmra.mrb[24].mxu1 %v1338_v48  ;;  %v1390_v12 = vsel %vm334_vm0, %v1385_v50, %v1389_v35  ;;  %v1393_v48 = vrot.slane %v9452_v45, 1  ;;  %v1388_v11 = vsel %vm334_vm0, %v1382_v33, %v1387_v28  ;;  %v1406_v50 = vsel %vm334_vm0, %v1401_v27, %v1405_v59  ;;  %v2508_v45 = vld [vmem:[#allocation5 + $0xd08] sm:$0xff] }
 0x2c4   :  { %1898 = vmatprep.mubr.f32.mxu1 %v1344_v62  ;;  %7327 = vmatpush1.bf16.msra.mxu1 %v7326_v18  ;;  %v1381_v18 = vrot.slane %v9419_v13, 1  ;;  %v1397_v62 = vrot.slane %v9464_v6, 1  ;;  %v1421_v28 = vrot.slane %v9536_v16, 1  ;;  %v2491_v16 = vld [vmem:[#allocation5 + $0xc80] sm:$0xff] }
 0x2c5   :  { %7329 = vmatprep.subr.bf16.mxu1 %v7328_v40  ;;  %v1394_v54 = vsel %vm334_vm0, %v1389_v35, %v1393_v48 }
 0x2c6   :  { %v1383_v40 = vsel %vm334_vm0, %v1381_v18, %v1382_v33  ;;  %v1402_v63 = vsel %vm334_vm0, %v1397_v62, %v1401_v27  ;;  %v1417_v33 = vrot.slane %v9524_v22, 1  ;;  %v1415_v18 = vrot.slane %v9527_v46, 1  ;;  %v2496_v22 = vld [vmem:[#allocation5 + $0xca8] sm:$0xff] }
 0x2c7   :  { %1899 = vmatmul.mubr.f32.gmra.mrb[26].mxu1 %v1342_v26  ;;  %v1399_v26 = vrot.slane %v9479_v2, 1  ;;  %v1427_v27 = vrot.slane %v9563_v5, 1 }
 0x2c8   :  { %1904 = vmatprep.mubr.f32.mxu1 %v1348_v51  ;;  %7331 = vmatpush1.bf16.msra.mxu1 %v7330_v31  ;;  %v1395_v31 = vrot.slane %v9467_v34, 1  ;;  %v1403_v51 = vrot.slane %v9491_v19, 1 }
 0x2c9   :  { %7333 = vmatprep.subr.bf16.mxu1 %v7332_v52  ;;  %v1398_v52 = vsel %vm334_vm0, %v1393_v48, %v1397_v62  ;;  %v1419_v48 = vrot.slane %v9539_v21, 1  ;;  %v1423_v62 = vrot.slane %v9551_v44, 1 }
 0x2ca   :  { %v1396_v23 = vsel %vm334_vm0, %v1391_v9, %v1395_v31  ;;  %v1400_v24 = vsel %vm334_vm0, %v1395_v31, %v1399_v26  ;;  %v1404_v32 = vsel %vm334_vm0, %v1399_v26, %v1403_v51  ;;  %v1425_v9 = vrot.slane %v9548_v36, 1 }
 0x2cb   :  { %1905 = vmatmul.mubr.f32.gmra.mrb[28].mxu1 %v1346_v10  ;;  %v1429_v31 = vrot.slane %v9560_v38, 1  ;;  %v1433_v26 = vrot.slane %v9572_v55, 1  ;;  %v2494_v38 = vld [vmem:[#allocation5 + $0xc98] sm:$0xff] }
 0x2cc   :  { %7335 = vmatpush1.bf16.msra.mxu1 %v7334_v0  ;;  %2040 = vmatprep.mubr.f32.mxu1 %v1386_v49  ;;  %v1409_v0 = vrot.slane %v9500_v4, 1  ;;  %v1411_v49 = vrot.slane %v9515_v1, 1  ;;  %v2495_v1 = vld [vmem:[#allocation5 + $0xca0] sm:$0xff] }
 0x2cd   :  { %7337 = vmatprep.subr.bf16.mxu1 %v7336_v43  ;;  %v1407_v43 = vrot.slane %v9503_v39, 1  ;;  %v2500_v39 = vld [vmem:[#allocation5 + $0xcc8] sm:$0xff] }
 0x2ce   :  { %v1410_v15 = vsel %vm334_vm0, %v1405_v59, %v1409_v0  ;;  %v1431_v59 = vrot.slane %v9575_v29, 1 }
 0x2cf   :  { %v1408_v10 = vsel %vm334_vm0, %v1403_v51, %v1407_v43  ;;  %v1412_v35 = vsel %vm334_vm0, %v1407_v43, %v1411_v49  ;;  %v1437_v51 = vrot.slane %v9584_v60, 1 }
 0x2d0   :  { %7339 = vmatpush1.bf16.msra.mxu1 %v7338_v7  ;;  %v1414_v7 = vsel %vm334_vm0, %v1409_v0, %v1413_v37  ;;  %v1435_v0 = vrot.slane %v9587_v17, 1 }
 0x2d2   :  { %v1436_v43 = vsel %vm334_vm0, %v1431_v59, %v1435_v0 }
 0x2d3   :  { %2041 = vmatmul.mubr.f32.vlgmr.msra.gmra.mrb[0].mxu1 %v1383_v40  ;;  %v1418_v40 = vsel %vm334_vm0, %v1413_v37, %v1417_v33  ;;  %v2599_v37 = vld [vmem:[#allocation5 + $0xfd8] sm:$0xff] }
 0x2d4   :  { %2046 = vmatprep.mubr.f32.mxu1 %v1390_v12  ;;  %v1416_v12 = vsel %vm334_vm0, %v1411_v49, %v1415_v18  ;;  %v2596_v49 = vld [vmem:[#allocation5 + $0xfc0] sm:$0xff] }
 0x2d7   :  { %2047 = vmatmul.mubr.f32.gmra.mrb[2].mxu1 %v1388_v11  ;;  %v1422_v11 = vsel %vm334_vm0, %v1417_v33, %v1421_v28 }
 0x2d8   :  { %2052 = vmatprep.mubr.f32.mxu1 %v1394_v54  ;;  %v1420_v54 = vsel %vm334_vm0, %v1415_v18, %v1419_v48  ;;  %v2603_v18 = vld [vmem:[#allocation5 + $0xff8] sm:$0xff] }
 0x2db   :  { %2053 = vmatmul.mubr.f32.gmra.mrb[4].mxu1 %v1392_v3  ;;  %v1426_v3 = vsel %vm334_vm0, %v1421_v28, %v1425_v9  ;;  %v2600_v28 = vld [vmem:[#allocation5 + $0xfe0] sm:$0xff] }
 0x2dc   :  { %2058 = vmatprep.mubr.f32.mxu1 %v1398_v52  ;;  %v1424_v52 = vsel %vm334_vm0, %v1419_v48, %v1423_v62 }
 0x2df   :  { %2059 = vmatmul.mubr.f32.gmra.mrb[6].mxu1 %v1396_v23  ;;  %v1430_v23 = vsel %vm334_vm0, %v1425_v9, %v1429_v31  ;;  %v2478_v9 = vld [vmem:[#allocation5 + $0xc18] sm:$0xff] }
 0x2e0   :  { %2064 = vmatprep.mubr.f32.mxu1 %v1402_v63  ;;  %v1428_v63 = vsel %vm334_vm0, %v1423_v62, %v1427_v27  ;;  %v2162_v62 = vld [vmem:[#allocation7 + $0x1] ss:$8 sm:$0x3] }
 0x2e3   :  { %2065 = vmatmul.mubr.f32.gmra.mrb[8].mxu1 %v1400_v24  ;;  %v1434_v24 = vsel %vm334_vm0, %v1429_v31, %v1433_v26  ;;  %v9717_v31 = vrot.slane %v2162_v62, %v9403_v8  ;;  %v2520_v8 = vld [vmem:[#allocation5 + $0xd68] sm:$0xff] }
 0x2e4   :  { %2070 = vmatprep.mubr.f32.mxu1 %v1406_v50  ;;  %v1432_v50 = vsel %vm334_vm0, %v1427_v27, %v1431_v59  ;;  %v2475_v59 = vld [vmem:[#allocation5 + $0xc00] sm:$0xff] }
 0x2e7   :  { %2071 = vmatmul.mubr.f32.gmra.mrb[10].mxu1 %v1404_v32  ;;  %v1438_v32 = vsel %vm334_vm0, %v1433_v26, %v1437_v51 }
 0x2e8   :  { %2076 = vmatprep.mubr.f32.mxu1 %v1410_v15  ;;  %v2597_v15 = vld [vmem:[#allocation5 + $0xfc8] sm:$0xff] }
 0x2eb   :  { %2077 = vmatmul.mubr.f32.gmra.mrb[12].mxu1 %v1408_v10  ;;  %v7396_v10 = vpack.c.bf16 %v2599_v37, %v2597_v15  ;;  %v2479_v37 = vld [vmem:[#allocation5 + $0xc20] sm:$0xff] }
 0x2ec   :  { %2082 = vmatprep.mubr.f32.mxu1 %v1414_v7  ;;  %v2598_v7 = vld [vmem:[#allocation5 + $0xfd0] sm:$0xff] }
 0x2ed   :  { %v7398_v33 = vpack.c.bf16 %v2598_v7, %v2596_v49  ;;  %7397 = vmatprep.subr.bf16.mxu0 %v7396_v10  ;;  %v2481_v10 = vld [vmem:[#allocation5 + $0xc30] sm:$0xff]  ;;  %v2484_v49 = vld [vmem:[#allocation5 + $0xc48] sm:$0xff] }
 0x2ef   :  { %2083 = vmatmul.mubr.f32.gmra.mrb[14].mxu1 %v1412_v35  ;;  %7399 = vmatpush1.bf16.msra.mxu0 %v7398_v33  ;;  %v2601_v35 = vld [vmem:[#allocation5 + $0xfe8] sm:$0xff] }
 0x2f0   :  { %2088 = vmatprep.mubr.f32.mxu1 %v1418_v40  ;;  %v7400_v40 = vpack.c.bf16 %v2603_v18, %v2601_v35 }
 0x2f2   :  { %7401 = vmatprep.subr.bf16.mxu0 %v7400_v40  ;;  %v2486_v40 = vld [vmem:[#allocation5 + $0xc58] sm:$0xff] }
 0x2f3   :  { %2089 = vmatmul.mubr.f32.gmra.mrb[16].mxu1 %v1416_v12  ;;  %v2602_v12 = vld [vmem:[#allocation5 + $0xff0] sm:$0xff] }
 0x2f4   :  { %2094 = vmatprep.mubr.f32.mxu1 %v1422_v11  ;;  %v7402_v48 = vpack.c.bf16 %v2602_v12, %v2600_v28  ;;  %v2476_v11 = vld [vmem:[#allocation5 + $0xc08] sm:$0xff]  ;;  %v9729_v28 = vld [vmem:[#allocation5 + $0xc40] sm:$0xff]  ;;  %v9731_v12 = vld [vmem:[#allocation5 + $0xc50] sm:$0xff] }
 0x2f6   :  { %7403 = vmatpush1.bf16.msra.mxu0 %v7402_v48 }
 0x2f7   :  { %2095 = vmatmul.mubr.f32.gmra.mrb[18].mxu1 %v1420_v54  ;;  %v7404_v54 = vpack.c.bf16 %v2478_v9, %v2476_v11 }
 0x2f8   :  { %2100 = vmatprep.mubr.f32.mxu1 %v1426_v3  ;;  %v9714_v3 = vrot.slane %v2162_v62, %v9401_v41  ;;  %v7410_v62 = vpack.c.bf16 %v2481_v10, %v2479_v37 }
 0x2f9   :  { %7405 = vmatprep.subr.bf16.mxu0 %v7404_v54 }
 0x2fb   :  { %2101 = vmatmul.mubr.f32.gmra.mrb[20].mxu1 %v1424_v52 }
 0x2fc   :  { %2106 = vmatprep.mubr.f32.mxu1 %v1430_v23 }
 0x2ff   :  { %2107 = vmatmul.mubr.f32.gmra.mrb[22].mxu1 %v1428_v63 }
 0x300   :  { %2112 = vmatprep.mubr.f32.mxu1 %v1434_v24  ;;  %v2477_v24 = vld [vmem:[#allocation5 + $0xc10] sm:$0xff] }
 0x301   :  { %v7406_v18 = vpack.c.bf16 %v2477_v24, %v2475_v59 }
 0x303   :  { %2113 = vmatmul.mubr.f32.gmra.mrb[24].mxu1 %v1432_v50 }
 0x304   :  { %2118 = vmatprep.mubr.f32.mxu1 %v1438_v32  ;;  %v2482_v32 = vld [vmem:[#allocation5 + $0xc38] sm:$0xff] }
 0x307   :  { %2119 = vmatmul.mubr.f32.gmra.mrb[26].mxu1 %v1436_v43 }
 0x308   :  { %6798 = vmatprep.mubr.msk.f32.mxu1 %vm334_vm0, %v1437_v51 }
 0x30b   :  { %6799 = vmatmul.mubr.msk.f32.gmra.mrb[28].mxu1 %vm334_vm0, %v1435_v0  ;;  %v2480_v0 = vld [vmem:[#allocation5 + $0xc28] sm:$0xff] }
 0x30c   :  { %v7408_v11 = vpack.c.bf16 %v2482_v32, %v2480_v0  ;;  %v11722_v32 = vld [vmem:[#allocation34_spill] sm:$0xff] }
 0x3a6   :  { %v2042_v52 = vpop.f32.mrb[0].mxu1 }
 0x3a7   :  { %v2174_v27 = vadd.f32 %v9714_v3, %v2042_v52  ;;  %v2044_v23 = vpop.f32.mrb[1].mxu1 }
 0x3a8   :  { %v2175_v26 = vadd.f32 %v9717_v31, %v2044_v23 }
 0x3a9   :  { %v2204_v63 = vmul.f32 %v2174_v27, %v9411_v30 }
 0x3aa   :  { %v2205_v51 = vmul.f32 %v2175_v26, %v9411_v30  ;;  %v2048_v50 = vpop.f32.mrb[2].mxu1  ;;  %v7412_v26 = vpack.c.bf16 %v2486_v40, %v2484_v49  ;;  %v2490_v40 = vld [vmem:[#allocation5 + $0xc78] sm:$0xff]  ;;  %v2515_v30 = vld [vmem:[#allocation5 + $0xd40] sm:$0xff] }
 0x3ab   :  { %v2176_v43 = vadd.f32 %v9714_v3, %v2048_v50  ;;  %v2050_v15 = vpop.f32.mrb[3].mxu1  ;;  %v9724_v7 = vmax.f32 %v2204_v63, 0.0  ;;  %v7414_v63 = vpack.c.bf16 %v9731_v12, %v9729_v28 }
 0x3ac   :  { %v9726_v33 = vmax.f32 %v2205_v51, 0.0  ;;  %v2177_v35 = vadd.f32 %v9717_v31, %v2050_v15 }
 0x3ad   :  { %v2206_v48 = vmul.f32 %v2176_v43, %v9424_v25  ;;  %v11511_v59 = vrot.slane %v9724_v7, 7  ;;  %v2384_v24 = vrot.slane %v9724_v7, 1 }
 0x3ae   :  { %v2207_v9 = vmul.f32 %v2177_v35, %v9424_v25  ;;  %v2054_v54 = vpop.f32.mrb[4].mxu1  ;;  %2668 = vmatprep.mubr.f32.mxu0 %v9726_v33  ;;  %v2488_v35 = vld [vmem:[#allocation5 + $0xc68] sm:$0xff]  ;;  %v2387_v12 = vrot.slane %v9726_v33, 1 }
 0x3af   :  { %v2236_v52 = vmax.f32 %v2206_v48, 0.0  ;;  %v2178_v27 = vadd.f32 %v9714_v3, %v2054_v54  ;;  %v2056_v23 = vpop.f32.mrb[5].mxu1  ;;  %2669 = vmatmul.mubr.f32.vlgmr.msra.gmra.mrb[30].mxu0 %v9724_v7  ;;  %v2516_v25 = vld [vmem:[#allocation5 + $0xd48] sm:$0xff] }
 0x3b0   :  { %v2237_v51 = vmax.f32 %v2207_v9, 0.0  ;;  %v2179_v50 = vadd.f32 %v9717_v31, %v2056_v23  ;;  %7407 = vmatpush1.bf16.msra.mxu0 %v7406_v18 }
 0x3b1   :  { %v2385_v0 = vrot.slane %v2236_v52, 1  ;;  %v2208_v43 = vmul.f32 %v2178_v27, %v11722_v32  ;;  %7409 = vmatprep.subr.bf16.mxu0 %v7408_v11  ;;  %v2296_v37 = vrot.slane %v2236_v52, 7  ;;  %v2487_v27 = vld [vmem:[#allocation5 + $0xc60] sm:$0xff]  ;;  %v2489_v11 = vld [vmem:[#allocation5 + $0xc70] sm:$0xff] }
 0x3b2   :  { %v2209_v10 = vmul.f32 %v2179_v50, %v11722_v32  ;;  %v2060_v49 = vpop.f32.mrb[6].mxu1  ;;  %2674 = vmatprep.mubr.f32.mxu0 %v2237_v51  ;;  %v2298_v28 = vrot.slane %v2237_v51, 7  ;;  %v2388_v48 = vrot.slane %v2237_v51, 1  ;;  %v11723_v51 = vrot.slane %v9726_v33, 7 }
 0x3b3   :  { %v2238_v9 = vmax.f32 %v2208_v43, 0.0  ;;  %v2180_v18 = vadd.f32 %v9714_v3, %v2060_v49  ;;  %v2062_v54 = vpop.f32.mrb[7].mxu1  ;;  %2675 = vmatmul.mubr.f32.gmra.mrb[32].mxu0 %v2236_v52  ;;  %v9751_v23 = vsel %vm243_vm1, %v11511_v59, %v2296_v37  ;;  %v9754_v50 = vsel %vm334_vm0, %v2384_v24, %v2385_v0  ;;  %v11724_v49 = vld [vmem:[#allocation38_spill] sm:$0xff] }
 0x3b4   :  { %v2239_v15 = vmax.f32 %v2209_v10, 0.0  ;;  %v2181_v60 = vadd.f32 %v9717_v31, %v2062_v54  ;;  %7411 = vmatpush1.bf16.msra.mxu0 %v7410_v62  ;;  %v9760_v43 = vsel %vm243_vm1, %v11723_v51, %v2298_v28  ;;  %v9763_v52 = vsel %vm334_vm0, %v2387_v12, %v2388_v48  ;;  %v2492_v62 = vld [vmem:[#allocation5 + $0xc88] sm:$0xff] }
 0x3b5   :  { %v2210_v17 = vmul.f32 %v2180_v18, %v11724_v49  ;;  %7413 = vmatprep.subr.bf16.mxu0 %v7412_v26  ;;  %v7416_v59 = vpack.c.bf16 %v2490_v40, %v2488_v35  ;;  %v2300_v55 = vrot.slane %v2238_v9, 7  ;;  %v2390_v29 = vrot.slane %v2238_v9, 1  ;;  %v2493_v18 = vld [vmem:[#allocation5 + $0xc90] sm:$0xff] }
 0x3b6   :  { %v2211_v24 = vmul.f32 %v2181_v60, %v11724_v49  ;;  %v2066_v10 = vpop.f32.mrb[8].mxu1  ;;  %2680 = vmatprep.mubr.f32.mxu0 %v2239_v15  ;;  %v7418_v54 = vpack.c.bf16 %v2489_v11, %v2487_v27  ;;  %v2302_v5 = vrot.slane %v2239_v15, 7  ;;  %v2392_v36 = vrot.slane %v2239_v15, 1  ;;  %v11725_v15 = vld [vmem:[#allocation42_spill] sm:$0xff] }
 0x3b7   :  { %v2240_v51 = vmax.f32 %v2210_v17, 0.0  ;;  %v2182_v44 = vadd.f32 %v9714_v3, %v2066_v10  ;;  %v2068_v12 = vpop.f32.mrb[9].mxu1  ;;  %2681 = vmatmul.mubr.f32.gmra.mrb[34].mxu0 %v2238_v9  ;;  %v9769_v26 = vsel %vm243_vm1, %v2296_v37, %v2300_v55  ;;  %v9772_v35 = vsel %vm334_vm0, %v2385_v0, %v2390_v29 }
 0x3b8   :  { %v2241_v60 = vmax.f32 %v2211_v24, 0.0  ;;  %v2183_v40 = vadd.f32 %v9717_v31, %v2068_v12  ;;  %7415 = vmatpush1.bf16.msra.mxu0 %v7414_v63  ;;  %v9776_v27 = vsel %vm243_vm1, %v2298_v28, %v2302_v5  ;;  %v9779_v17 = vsel %vm334_vm0, %v2388_v48, %v2392_v36  ;;  %v2498_v12 = vld [vmem:[#allocation5 + $0xcb8] sm:$0xff] }
 0x3b9   :  { %v2212_v9 = vmul.f32 %v2182_v44, %v11725_v15  ;;  %7417 = vmatprep.subr.bf16.mxu0 %v7416_v59  ;;  %v7420_v11 = vpack.c.bf16 %v2494_v38, %v2492_v62  ;;  %v2304_v10 = vrot.slane %v2240_v51, 7  ;;  %v2394_v37 = vrot.slane %v2240_v51, 1  ;;  %v2497_v44 = vld [vmem:[#allocation5 + $0xcb0] sm:$0xff] }
 0x3ba   :  { %v2213_v21 = vmul.f32 %v2183_v40, %v11725_v15  ;;  %v2072_v0 = vpop.f32.mrb[10].mxu1  ;;  %2686 = vmatprep.mubr.f32.mxu0 %v2241_v60  ;;  %v7422_v24 = vpack.c.bf16 %v2493_v18, %v2491_v16  ;;  %v2306_v63 = vrot.slane %v2241_v60, 7  ;;  %v2396_v46 = vrot.slane %v2241_v60, 1  ;;  %v11726_v40 = vld [vmem:[#allocation45_spill] sm:$0xff] }
 0x3bb   :  { %v2242_v28 = vmax.f32 %v2212_v9, 0.0  ;;  %v2184_v20 = vadd.f32 %v9714_v3, %v2072_v0  ;;  %v2074_v48 = vpop.f32.mrb[11].mxu1  ;;  %2687 = vmatmul.mubr.f32.gmra.mrb[36].mxu0 %v2240_v51  ;;  %v9785_v38 = vsel %vm243_vm1, %v2300_v55, %v2304_v10  ;;  %v9788_v59 = vsel %vm334_vm0, %v2390_v29, %v2394_v37  ;;  %v2503_v15 = vld [vmem:[#allocation5 + $0xce0] sm:$0xff] }
 0x3bc   :  { %v2243_v62 = vmax.f32 %v2213_v21, 0.0  ;;  %v2185_v16 = vadd.f32 %v9717_v31, %v2074_v48  ;;  %7419 = vmatpush1.bf16.msra.mxu0 %v7418_v54  ;;  %v9792_v18 = vsel %vm243_vm1, %v2302_v5, %v2306_v63  ;;  %v9795_v60 = vsel %vm334_vm0, %v2392_v36, %v2396_v46  ;;  %v2502_v48 = vld [vmem:[#allocation5 + $0xcd8] sm:$0xff] }
 0x3bd   :  { %v2214_v51 = vmul.f32 %v2184_v20, %v11726_v40  ;;  %7421 = vmatprep.subr.bf16.mxu0 %v7420_v11  ;;  %v7424_v9 = vpack.c.bf16 %v2498_v12, %v2496_v22  ;;  %v2308_v0 = vrot.slane %v2242_v28, 7  ;;  %v2398_v55 = vrot.slane %v2242_v28, 1  ;;  %v2501_v20 = vld [vmem:[#allocation5 + $0xcd0] sm:$0xff] }
 0x3be   :  { %v2215_v4 = vmul.f32 %v2185_v16, %v11726_v40  ;;  %v2078_v29 = vpop.f32.mrb[12].mxu1  ;;  %2692 = vmatprep.mubr.f32.mxu0 %v2243_v62  ;;  %v7426_v21 = vpack.c.bf16 %v2497_v44, %v2495_v1  ;;  %v2310_v54 = vrot.slane %v2243_v62, 7  ;;  %v2400_v47 = vrot.slane %v2243_v62, 1  ;;  %v11727_v16 = vld [vmem:[#allocation48_spill] sm:$0xff]  ;;  %v2504_v40 = vld [vmem:[#allocation5 + $0xce8] sm:$0xff] }
 0x3bf   :  { %v2244_v5 = vmax.f32 %v2214_v51, 0.0  ;;  %v2186_v19 = vadd.f32 %v9714_v3, %v2078_v29  ;;  %v2080_v36 = vpop.f32.mrb[13].mxu1  ;;  %2693 = vmatmul.mubr.f32.gmra.mrb[38].mxu0 %v2242_v28  ;;  %v9801_v22 = vsel %vm243_vm1, %v2304_v10, %v2308_v0  ;;  %v9804_v11 = vsel %vm334_vm0, %v2394_v37, %v2398_v55 }
 0x3c0   :  { %v2245_v12 = vmax.f32 %v2215_v4, 0.0  ;;  %v2187_v1 = vadd.f32 %v9717_v31, %v2080_v36  ;;  %7423 = vmatpush1.bf16.msra.mxu0 %v7422_v24  ;;  %v9808_v44 = vsel %vm243_vm1, %v2306_v63, %v2310_v54  ;;  %v9811_v62 = vsel %vm334_vm0, %v2396_v46, %v2400_v47  ;;  %v2506_v36 = vld [vmem:[#allocation5 + $0xcf8] sm:$0xff] }
 0x3c1   :  { %v2216_v28 = vmul.f32 %v2186_v19, %v11727_v16  ;;  %7425 = vmatprep.subr.bf16.mxu0 %v7424_v9  ;;  %v7428_v51 = vpack.c.bf16 %v2502_v48, %v2500_v39  ;;  %v2312_v29 = vrot.slane %v2244_v5, 7  ;;  %v2402_v10 = vrot.slane %v2244_v5, 1  ;;  %v2505_v19 = vld [vmem:[#allocation5 + $0xcf0] sm:$0xff] }
 0x3c2   :  { %v2217_v2 = vmul.f32 %v2187_v1, %v11727_v16  ;;  %v2084_v37 = vpop.f32.mrb[14].mxu1  ;;  %2698 = vmatprep.mubr.f32.mxu0 %v2245_v12  ;;  %v7430_v4 = vpack.c.bf16 %v2501_v20, %v2499_v56  ;;  %v2314_v24 = vrot.slane %v2245_v12, 7  ;;  %v2404_v6 = vrot.slane %v2245_v12, 1  ;;  %v11730_v1 = vld [vmem:[#allocation51_spill] sm:$0xff] }
 0x3c3   :  { %v2246_v63 = vmax.f32 %v2216_v28, 0.0  ;;  %v2188_v34 = vadd.f32 %v9714_v3, %v2084_v37  ;;  %v2086_v46 = vpop.f32.mrb[15].mxu1  ;;  %2699 = vmatmul.mubr.f32.gmra.mrb[40].mxu0 %v2244_v5  ;;  %v9817_v39 = vsel %vm243_vm1, %v2308_v0, %v2312_v29  ;;  %v9820_v9 = vsel %vm334_vm0, %v2398_v55, %v2402_v10 }
 0x3c4   :  { %11728 = vst [vmem:[#allocation75_spill] sm:$0xff] %v9820_v9  ;;  %v2247_v48 = vmax.f32 %v2217_v2, 0.0  ;;  %v2189_v56 = vadd.f32 %v9717_v31, %v2086_v46  ;;  %7427 = vmatpush1.bf16.msra.mxu0 %v7426_v21  ;;  %v9824_v20 = vsel %vm243_vm1, %v2310_v54, %v2314_v24  ;;  %v9827_v12 = vsel %vm334_vm0, %v2400_v47, %v2404_v6  ;;  %v2510_v46 = vld [vmem:[#allocation5 + $0xd18] sm:$0xff] }
 0x3c5   :  { %11729 = vst [vmem:[#allocation76_spill] sm:$0xff] %v9827_v12  ;;  %v2218_v5 = vmul.f32 %v2188_v34, %v11730_v1  ;;  %7429 = vmatprep.subr.bf16.mxu0 %v7428_v51  ;;  %v7432_v28 = vpack.c.bf16 %v2506_v36, %v2504_v40  ;;  %v2316_v37 = vrot.slane %v2246_v63, 7  ;;  %v2406_v0 = vrot.slane %v2246_v63, 1  ;;  %v2509_v34 = vld [vmem:[#allocation5 + $0xd10] sm:$0xff] }
 0x3c6   :  { %v2219_v16 = vmul.f32 %v2189_v56, %v11730_v1  ;;  %v2090_v55 = vpop.f32.mrb[16].mxu1  ;;  %2704 = vmatprep.mubr.f32.mxu0 %v2247_v48  ;;  %v7434_v2 = vpack.c.bf16 %v2505_v19, %v2503_v15  ;;  %v2318_v21 = vrot.slane %v2247_v48, 7  ;;  %v2408_v53 = vrot.slane %v2247_v48, 1  ;;  %v11733_v56 = vld [vmem:[#allocation54_spill] sm:$0xff] }
 0x3c7   :  { %v2248_v54 = vmax.f32 %v2218_v5, 0.0  ;;  %v2190_v49 = vadd.f32 %v9714_v3, %v2090_v55  ;;  %v2092_v47 = vpop.f32.mrb[17].mxu1  ;;  %2705 = vmatmul.mubr.f32.gmra.mrb[42].mxu0 %v2246_v63  ;;  %v9833_v40 = vsel %vm243_vm1, %v2312_v29, %v2316_v37  ;;  %v9836_v51 = vsel %vm334_vm0, %v2402_v10, %v2406_v0 }
 0x3c8   :  { %11731 = vst [vmem:[#allocation77_spill] sm:$0xff] %v9836_v51  ;;  %v2249_v36 = vmax.f32 %v2219_v16, 0.0  ;;  %v2191_v15 = vadd.f32 %v9717_v31, %v2092_v47  ;;  %7431 = vmatpush1.bf16.msra.mxu0 %v7430_v4  ;;  %v9840_v19 = vsel %vm243_vm1, %v2314_v24, %v2318_v21  ;;  %v9843_v48 = vsel %vm334_vm0, %v2404_v6, %v2408_v53  ;;  %v2514_v47 = vld [vmem:[#allocation5 + $0xd38] sm:$0xff] }
 0x3c9   :  { %11732 = vst [vmem:[#allocation78_spill] sm:$0xff] %v9843_v48  ;;  %v2220_v63 = vmul.f32 %v2190_v49, %v11733_v56  ;;  %7433 = vmatprep.subr.bf16.mxu0 %v7432_v28  ;;  %v7436_v5 = vpack.c.bf16 %v2510_v46, %v2508_v45  ;;  %v2320_v55 = vrot.slane %v2248_v54, 7  ;;  %v2410_v29 = vrot.slane %v2248_v54, 1  ;;  %v2513_v49 = vld [vmem:[#allocation5 + $0xd30] sm:$0xff] }
 0x3ca   :  { %v2221_v1 = vmul.f32 %v2191_v15, %v11733_v56  ;;  %v2096_v10 = vpop.f32.mrb[18].mxu1  ;;  %2710 = vmatprep.mubr.f32.mxu0 %v2249_v36  ;;  %v7438_v16 = vpack.c.bf16 %v2509_v34, %v2507_v42  ;;  %v2322_v4 = vrot.slane %v2249_v36, 7  ;;  %v2412_v32 = vrot.slane %v2249_v36, 1  ;;  %v11736_v15 = vld [vmem:[#allocation57_spill] sm:$0xff] }
 0x3cb   :  { %v2250_v24 = vmax.f32 %v2220_v63, 0.0  ;;  %v2192_v57 = vadd.f32 %v9714_v3, %v2096_v10  ;;  %v2098_v6 = vpop.f32.mrb[19].mxu1  ;;  %2711 = vmatmul.mubr.f32.gmra.mrb[44].mxu0 %v2248_v54  ;;  %v9849_v45 = vsel %vm243_vm1, %v2316_v37, %v2320_v55  ;;  %v9852_v28 = vsel %vm334_vm0, %v2406_v0, %v2410_v29 }
 0x3cc   :  { %11734 = vst [vmem:[#allocation79_spill] sm:$0xff] %v9852_v28  ;;  %v2251_v46 = vmax.f32 %v2221_v1, 0.0  ;;  %v2193_v42 = vadd.f32 %v9717_v31, %v2098_v6  ;;  %7435 = vmatpush1.bf16.msra.mxu0 %v7434_v2  ;;  %v9856_v34 = vsel %vm243_vm1, %v2318_v21, %v2322_v4  ;;  %v9859_v36 = vsel %vm334_vm0, %v2408_v53, %v2412_v32  ;;  %v2518_v6 = vld [vmem:[#allocation5 + $0xd58] sm:$0xff] }
 0x3cd   :  { %11735 = vst [vmem:[#allocation80_spill] sm:$0xff] %v9859_v36  ;;  %v2222_v54 = vmul.f32 %v2192_v57, %v11736_v15  ;;  %7437 = vmatprep.subr.bf16.mxu0 %v7436_v5  ;;  %v7440_v63 = vpack.c.bf16 %v2514_v47, %v2512_v61  ;;  %v2324_v10 = vrot.slane %v2250_v24, 7  ;;  %v2414_v37 = vrot.slane %v2250_v24, 1  ;;  %v2517_v57 = vld [vmem:[#allocation5 + $0xd50] sm:$0xff] }
 0x3ce   :  { %v2223_v56 = vmul.f32 %v2193_v42, %v11736_v15  ;;  %v2102_v0 = vpop.f32.mrb[20].mxu1  ;;  %2716 = vmatprep.mubr.f32.mxu0 %v2251_v46  ;;  %v7442_v1 = vpack.c.bf16 %v2513_v49, %v2511_v14  ;;  %v2326_v2 = vrot.slane %v2251_v46, 7  ;;  %v2416_v58 = vrot.slane %v2251_v46, 1  ;;  %v11739_v42 = vld [vmem:[#allocation60_spill] sm:$0xff] }
 0x3cf   :  { %v2252_v21 = vmax.f32 %v2222_v54, 0.0  ;;  %v2194_v13 = vadd.f32 %v9714_v3, %v2102_v0  ;;  %v2104_v53 = vpop.f32.mrb[21].mxu1  ;;  %2717 = vmatmul.mubr.f32.gmra.mrb[46].mxu0 %v2250_v24  ;;  %v9865_v61 = vsel %vm243_vm1, %v2320_v55, %v2324_v10  ;;  %v9868_v5 = vsel %vm334_vm0, %v2410_v29, %v2414_v37 }
 0x3d0   :  { %11737 = vst [vmem:[#allocation81_spill] sm:$0xff] %v9868_v5  ;;  %v2253_v47 = vmax.f32 %v2223_v56, 0.0  ;;  %v2195_v14 = vadd.f32 %v9717_v31, %v2104_v53  ;;  %7439 = vmatpush1.bf16.msra.mxu0 %v7438_v16  ;;  %v9872_v49 = vsel %vm243_vm1, %v2322_v4, %v2326_v2  ;;  %v9875_v46 = vsel %vm334_vm0, %v2412_v32, %v2416_v58  ;;  %v2522_v53 = vld [vmem:[#allocation5 + $0xd78] sm:$0xff] }
 0x3d1   :  { %11738 = vst [vmem:[#allocation82_spill] sm:$0xff] %v9875_v46  ;;  %v2224_v24 = vmul.f32 %v2194_v13, %v11739_v42  ;;  %7441 = vmatprep.subr.bf16.mxu0 %v7440_v63  ;;  %v7444_v54 = vpack.c.bf16 %v2518_v6, %v2516_v25  ;;  %v2328_v0 = vrot.slane %v2252_v21, 7  ;;  %v2418_v55 = vrot.slane %v2252_v21, 1  ;;  %v2519_v46 = vld [vmem:[#allocation5 + $0xd60] sm:$0xff]  ;;  %v2521_v13 = vld [vmem:[#allocation5 + $0xd70] sm:$0xff] }
 0x3d2   :  { %v2225_v15 = vmul.f32 %v2195_v14, %v11739_v42  ;;  %v2108_v29 = vpop.f32.mrb[22].mxu1  ;;  %2722 = vmatprep.mubr.f32.mxu0 %v2253_v47  ;;  %v7446_v56 = vpack.c.bf16 %v2517_v57, %v2515_v30  ;;  %v2330_v16 = vrot.slane %v2253_v47, 7  ;;  %v2420_v41 = vrot.slane %v2253_v47, 1  ;;  %v11742_v14 = vld [vmem:[#allocation63_spill] sm:$0xff] }
 0x3d3   :  { %v2254_v4 = vmax.f32 %v2224_v24, 0.0  ;;  %v2196_v5 = vadd.f32 %v9714_v3, %v2108_v29  ;;  %v2110_v32 = vpop.f32.mrb[23].mxu1  ;;  %2723 = vmatmul.mubr.f32.gmra.mrb[48].mxu0 %v2252_v21  ;;  %v9881_v25 = vsel %vm243_vm1, %v2324_v10, %v2328_v0  ;;  %v9884_v63 = vsel %vm334_vm0, %v2414_v37, %v2418_v55 }
 0x3d4   :  { %11740 = vst [vmem:[#allocation83_spill] sm:$0xff] %v9884_v63  ;;  %v2255_v6 = vmax.f32 %v2225_v15, 0.0  ;;  %v2197_v30 = vadd.f32 %v9717_v31, %v2110_v32  ;;  %7443 = vmatpush1.bf16.msra.mxu0 %v7442_v1  ;;  %v9888_v57 = vsel %vm243_vm1, %v2326_v2, %v2330_v16  ;;  %v9891_v47 = vsel %vm334_vm0, %v2416_v58, %v2420_v41  ;;  %v2524_v63 = vld [vmem:[#allocation5 + $0xd88] sm:$0xff]  ;;  %v2526_v32 = vld [vmem:[#allocation5 + $0xd98] sm:$0xff] }
 0x3d5   :  { %11741 = vst [vmem:[#allocation84_spill] sm:$0xff] %v9891_v47  ;;  %v2226_v21 = vmul.f32 %v2196_v5, %v11742_v14  ;;  %7445 = vmatprep.subr.bf16.mxu0 %v7444_v54  ;;  %v7448_v24 = vpack.c.bf16 %v2522_v53, %v2520_v8  ;;  %v2332_v29 = vrot.slane %v2254_v4, 7  ;;  %v2422_v10 = vrot.slane %v2254_v4, 1  ;;  %v2523_v47 = vld [vmem:[#allocation5 + $0xd80] sm:$0xff]  ;;  %v2525_v5 = vld [vmem:[#allocation5 + $0xd90] sm:$0xff] }
 0x3d6   :  { %v2227_v42 = vmul.f32 %v2197_v30, %v11742_v14  ;;  %v2114_v37 = vpop.f32.mrb[24].mxu1  ;;  %2728 = vmatprep.mubr.f32.mxu0 %v2255_v6  ;;  %v7450_v15 = vpack.c.bf16 %v2521_v13, %v2519_v46  ;;  %v2334_v1 = vrot.slane %v2255_v6, 7  ;;  %v2424_v28 = vrot.slane %v2255_v6, 1  ;;  %v11745_v30 = vld [vmem:[#allocation66_spill] sm:$0xff] }
 0x3d7   :  { %v2256_v2 = vmax.f32 %v2226_v21, 0.0  ;;  %v2198_v36 = vadd.f32 %v9714_v3, %v2114_v37  ;;  %v2116_v58 = vpop.f32.mrb[25].mxu1  ;;  %2729 = vmatmul.mubr.f32.gmra.mrb[50].mxu0 %v2254_v4  ;;  %v9897_v8 = vsel %vm243_vm1, %v2328_v0, %v2332_v29  ;;  %v9900_v54 = vsel %vm334_vm0, %v2418_v55, %v2422_v10 }
 0x3d8   :  { %11743 = vst [vmem:[#allocation85_spill] sm:$0xff] %v9900_v54  ;;  %v2257_v53 = vmax.f32 %v2227_v42, 0.0  ;;  %v2199_v46 = vadd.f32 %v9717_v31, %v2116_v58  ;;  %7447 = vmatpush1.bf16.msra.mxu0 %v7446_v56  ;;  %v9904_v13 = vsel %vm243_vm1, %v2330_v16, %v2334_v1  ;;  %v9907_v6 = vsel %vm334_vm0, %v2420_v41, %v2424_v28  ;;  %v2528_v54 = vld [vmem:[#allocation5 + $0xda8] sm:$0xff]  ;;  %v2530_v58 = vld [vmem:[#allocation5 + $0xdb8] sm:$0xff] }
 0x3d9   :  { %11744 = vst [vmem:[#allocation86_spill] sm:$0xff] %v9907_v6  ;;  %v2228_v4 = vmul.f32 %v2198_v36, %v11745_v30  ;;  %7449 = vmatprep.subr.bf16.mxu0 %v7448_v24  ;;  %v7452_v21 = vpack.c.bf16 %v2526_v32, %v2524_v63  ;;  %v2336_v37 = vrot.slane %v2256_v2, 7  ;;  %v2426_v0 = vrot.slane %v2256_v2, 1  ;;  %v2527_v6 = vld [vmem:[#allocation5 + $0xda0] sm:$0xff]  ;;  %v2529_v36 = vld [vmem:[#allocation5 + $0xdb0] sm:$0xff] }
 0x3da   :  { %v2229_v14 = vmul.f32 %v2199_v46, %v11745_v30  ;;  %v2120_v55 = vpop.f32.mrb[26].mxu1  ;;  %2734 = vmatprep.mubr.f32.mxu0 %v2257_v53  ;;  %v7454_v42 = vpack.c.bf16 %v2525_v5, %v2523_v47  ;;  %v2338_v56 = vrot.slane %v2257_v53, 7  ;;  %v2428_v51 = vrot.slane %v2257_v53, 1  ;;  %v11748_v46 = vld [vmem:[#allocation69_spill] sm:$0xff] }
 0x3db   :  { %v2258_v16 = vmax.f32 %v2228_v4, 0.0  ;;  %v2200_v48 = vadd.f32 %v9714_v3, %v2120_v55  ;;  %v2122_v41 = vpop.f32.mrb[27].mxu1  ;;  %2735 = vmatmul.mubr.f32.gmra.mrb[52].mxu0 %v2256_v2  ;;  %v9913_v63 = vsel %vm243_vm1, %v2332_v29, %v2336_v37  ;;  %v9916_v24 = vsel %vm334_vm0, %v2422_v10, %v2426_v0 }
 0x3dc   :  { %11746 = vst [vmem:[#allocation87_spill] sm:$0xff] %v9916_v24  ;;  %v2259_v32 = vmax.f32 %v2229_v14, 0.0  ;;  %v2201_v47 = vadd.f32 %v9717_v31, %v2122_v41  ;;  %7451 = vmatpush1.bf16.msra.mxu0 %v7450_v15  ;;  %v9920_v5 = vsel %vm243_vm1, %v2334_v1, %v2338_v56  ;;  %v9923_v53 = vsel %vm334_vm0, %v2424_v28, %v2428_v51  ;;  %v2532_v24 = vld [vmem:[#allocation5 + $0xdc8] sm:$0xff]  ;;  %v2534_v41 = vld [vmem:[#allocation5 + $0xdd8] sm:$0xff] }
 0x3dd   :  { %11747 = vst [vmem:[#allocation88_spill] sm:$0xff] %v9923_v53  ;;  %v2230_v2 = vmul.f32 %v2200_v48, %v11748_v46  ;;  %7453 = vmatprep.subr.bf16.mxu0 %v7452_v21  ;;  %v7456_v4 = vpack.c.bf16 %v2530_v58, %v2528_v54  ;;  %v2340_v55 = vrot.slane %v2258_v16, 7  ;;  %v2430_v29 = vrot.slane %v2258_v16, 1  ;;  %v3579_v53 = vld [vmem:[#allocation5 + $0x1430] sm:$0xff] }
 0x3de   :  { %v2231_v30 = vmul.f32 %v2201_v47, %v11748_v46  ;;  %v2126_v10 = vpop.f32.mrb[28].mxu1  ;;  %2740 = vmatprep.mubr.f32.mxu0 %v2259_v32  ;;  %v7458_v14 = vpack.c.bf16 %v2529_v36, %v2527_v6  ;;  %v2342_v15 = vrot.slane %v2259_v32, 7  ;;  %v2432_v9 = vrot.slane %v2259_v32, 1  ;;  %v11751_v32 = vld [vmem:[#allocation72_spill] sm:$0xff] }
 0x3df   :  { %v2260_v1 = vmax.f32 %v2230_v2, 0.0  ;;  %v2202_v12 = vadd.f32 %v9714_v3, %v2126_v10  ;;  %v2128_v28 = vpop.f32.mrb[29].mxu1  ;;  %2741 = vmatmul.mubr.f32.gmra.mrb[54].mxu0 %v2258_v16  ;;  %v9929_v48 = vsel %vm243_vm1, %v2336_v37, %v2340_v55  ;;  %v9932_v54 = vsel %vm334_vm0, %v2426_v0, %v2430_v29  ;;  %v2531_v47 = vld [vmem:[#allocation5 + $0xdc0] sm:$0xff]  ;;  %v2533_v37 = vld [vmem:[#allocation5 + $0xdd0] sm:$0xff]  ;;  %v3576_v46 = vld [vmem:[#allocation5 + $0x1418] sm:$0xff] }
 0x3e0   :  { %11749 = vst [vmem:[#allocation89_spill] sm:$0xff] %v9932_v54  ;;  %v2261_v21 = vmax.f32 %v2231_v30, 0.0  ;;  %v2203_v58 = vadd.f32 %v9717_v31, %v2128_v28  ;;  %7455 = vmatpush1.bf16.msra.mxu0 %v7454_v42  ;;  %v9936_v6 = vsel %vm243_vm1, %v2338_v56, %v2342_v15  ;;  %v9939_v36 = vsel %vm334_vm0, %v2428_v51, %v2432_v9  ;;  %v2536_v30 = vld [vmem:[#allocation5 + $0xde8] sm:$0xff]  ;;  %v2538_v31 = vld [vmem:[#allocation5 + $0xdf8] sm:$0xff] }
 0x3e1   :  { %11750 = vst [vmem:[#allocation90_spill] sm:$0xff] %v9939_v36  ;;  %v2232_v3 = vmul.f32 %v2202_v12, %v11751_v32  ;;  %7457 = vmatprep.subr.bf16.mxu0 %v7456_v4  ;;  %v7460_v16 = vpack.c.bf16 %v2534_v41, %v2532_v24  ;;  %v2344_v2 = vrot.slane %v2260_v1, 7  ;;  %v2434_v10 = vrot.slane %v2260_v1, 1  ;;  %v2535_v41 = vld [vmem:[#allocation5 + $0xde0] sm:$0xff] }
 0x3e2   :  { %v2233_v0 = vmul.f32 %v2203_v58, %v11751_v32  ;;  %2746 = vmatprep.mubr.f32.mxu0 %v2261_v21  ;;  %v2346_v42 = vrot.slane %v2261_v21, 7  ;;  %v2436_v28 = vrot.slane %v2261_v21, 1  ;;  %v7462_v4 = vpack.c.bf16 %v2533_v37, %v2531_v47  ;;  %v2537_v58 = vld [vmem:[#allocation5 + $0xdf0] sm:$0xff]  ;;  %v2915_v37 = vld [vmem:[#allocation5 + $0x1000] sm:$0xff]  ;;  %v3963_v47 = vld [vmem:[#allocation5 + $0x1678] sm:$0xff] }
 0x3e3   :  { %v9943_v56 = vmax.f32 %v2232_v3, 0.0  ;;  %2747 = vmatmul.mubr.f32.gmra.mrb[56].mxu0 %v2260_v1  ;;  %v9946_v51 = vsel %vm243_vm1, %v2340_v55, %v2344_v2  ;;  %v9949_v12 = vsel %vm334_vm0, %v2430_v29, %v2434_v10  ;;  %v7464_v1 = vpack.c.bf16 %v2538_v31, %v2536_v30  ;;  %v2916_v29 = vld [vmem:[#allocation5 + $0x1008] sm:$0xff]  ;;  %v3577_v36 = vld [vmem:[#allocation5 + $0x1420] sm:$0xff] }
 0x3e4   :  { %11753 = vst [vmem:[#allocation92_spill] sm:$0xff] %v9949_v12  ;;  %v9951_v24 = vmax.f32 %v2233_v0, 0.0  ;;  %7459 = vmatpush1.bf16.msra.mxu0 %v7458_v14  ;;  %v9954_v32 = vsel %vm243_vm1, %v2342_v15, %v2346_v42  ;;  %v9957_v21 = vsel %vm334_vm0, %v2432_v9, %v2436_v28  ;;  %v2918_v0 = vld [vmem:[#allocation5 + $0x1018] sm:$0xff]  ;;  %v7466_v15 = vpack.c.bf16 %v2537_v58, %v2535_v41  ;;  %v2917_v9 = vld [vmem:[#allocation5 + $0x1010] sm:$0xff]  ;;  %v3574_v31 = vld [vmem:[#allocation5 + $0x1408] sm:$0xff] }
 0x3e5   :  { %11752 = vst [vmem:[#allocation91_spill] sm:$0xff] %v9943_v56  ;;  %11755 = vst [vmem:[#allocation94_spill] sm:$0xff] %v9957_v21  ;;  %7461 = vmatprep.subr.bf16.mxu0 %v7460_v16  ;;  %v2348_v55 = vrot.slane %v9943_v56, 7  ;;  %v11561_v3 = vrot.slane %v9943_v56, 1  ;;  %v3573_v12 = vld [vmem:[#allocation5 + $0x1400] sm:$0xff]  ;;  %v11757_v21 = vrot.slane %v9726_v33, 7 }
 0x3e6   :  { %11754 = vst [vmem:[#allocation93_spill] sm:$0xff] %v9951_v24  ;;  %2752 = vmatprep.mubr.f32.mxu0 %v9951_v24  ;;  %v2350_v14 = vrot.slane %v9951_v24, 7 }
 0x3e7   :  { %2753 = vmatmul.mubr.f32.gmra.mrb[58].mxu0 %v9943_v56  ;;  %v9966_v16 = vsel %vm243_vm1, %v2344_v2, %v2348_v55  ;;  %v9971_v30 = vsel %vm334_vm0, %v2434_v10, %v11561_v3  ;;  %v11759_v2 = vrot.slane %v9951_v24, 1  ;;  %v7532_v55 = vpack.c.bf16 %v3576_v46, %v3574_v31  ;;  %v3575_v10 = vld [vmem:[#allocation5 + $0x1410] sm:$0xff]  ;;  %v3578_v3 = vld [vmem:[#allocation5 + $0x1428] sm:$0xff]  ;;  %v3580_v56 = vld [vmem:[#allocation5 + $0x1438] sm:$0xff] }
 0x3e8   :  { %11756 = vst [vmem:[#allocation95_spill] sm:$0xff] %v9971_v30  ;;  %7463 = vmatpush1.bf16.msra.mxu0 %v7462_v4  ;;  %6801 = vmatprep.mubr.msk.f32.mxu0 %vm9248_vm2, %v11757_v21  ;;  %v9978_v41 = vsel %vm243_vm1, %v2346_v42, %v2350_v14  ;;  %v7468_v30 = vpack.c.bf16 %v2918_v0, %v2916_v29  ;;  %v2920_v4 = vld [vmem:[#allocation5 + $0x1028] sm:$0xff]  ;;  %v2922_v21 = vld [vmem:[#allocation5 + $0x1038] sm:$0xff]  ;;  %v3581_v46 = vld [vmem:[#allocation5 + $0x1440] sm:$0xff] }
 0x3e9   :  { %v9983_v58 = vsel %vm334_vm0, %v2436_v28, %v11759_v2  ;;  %7465 = vmatprep.subr.bf16.mxu0 %v7464_v1  ;;  %v7534_v54 = vpack.c.bf16 %v3575_v10, %v3573_v12  ;;  %v7536_v33 = vpack.c.bf16 %v3580_v56, %v3578_v3  ;;  %7533 = vmatprep.subr.bf16.mxu1 %v7532_v55  ;;  %v3582_v42 = vld [vmem:[#allocation5 + $0x1448] sm:$0xff]  ;;  %v3584_v14 = vld [vmem:[#allocation5 + $0x1458] sm:$0xff]  ;;  %v3583_v31 = vld [vmem:[#allocation5 + $0x1450] sm:$0xff]  ;;  %v11760_v55 = vrot.slane %v9724_v7, 7 }
 0x3ea   :  { %v7538_v24 = vpack.c.bf16 %v3579_v53, %v3577_v36  ;;  %v7470_v28 = vpack.c.bf16 %v2917_v9, %v2915_v37  ;;  %v7472_v2 = vpack.c.bf16 %v2922_v21, %v2920_v4  ;;  %v2919_v1 = vld [vmem:[#allocation5 + $0x1020] sm:$0xff]  ;;  %v2921_v29 = vld [vmem:[#allocation5 + $0x1030] sm:$0xff]  ;;  %v2924_v0 = vld [vmem:[#allocation5 + $0x1048] sm:$0xff]  ;;  %v7540_v12 = vpack.c.bf16 %v3584_v14, %v3582_v42 }
 0x3eb   :  { %7535 = vmatpush1.bf16.msra.mxu1 %v7534_v54  ;;  %v2926_v56 = vld [vmem:[#allocation5 + $0x1058] sm:$0xff]  ;;  %v3586_v3 = vld [vmem:[#allocation5 + $0x1468] sm:$0xff]  ;;  %v7542_v53 = vpack.c.bf16 %v3583_v31, %v3581_v46  ;;  %v7474_v54 = vpack.c.bf16 %v2921_v29, %v2919_v1  ;;  %v3585_v36 = vld [vmem:[#allocation5 + $0x1460] sm:$0xff] }
 0x3ec   :  { %7467 = vmatpush1.bf16.msra.mxu0 %v7466_v15  ;;  %7537 = vmatprep.subr.bf16.mxu1 %v7536_v33  ;;  %v3588_v10 = vld [vmem:[#allocation5 + $0x1478] sm:$0xff]  ;;  %v3587_v15 = vld [vmem:[#allocation5 + $0x1470] sm:$0xff]  ;;  %v7476_v37 = vpack.c.bf16 %v2926_v56, %v2924_v0  ;;  %v2923_v9 = vld [vmem:[#allocation5 + $0x1040] sm:$0xff] }
 0x3ed   :  { %7469 = vmatprep.subr.bf16.mxu0 %v7468_v30  ;;  %v2925_v30 = vld [vmem:[#allocation5 + $0x1050] sm:$0xff]  ;;  %v2928_v4 = vld [vmem:[#allocation5 + $0x1068] sm:$0xff]  ;;  %v7544_v33 = vpack.c.bf16 %v3588_v10, %v3586_v3  ;;  %v2930_v21 = vld [vmem:[#allocation5 + $0x1078] sm:$0xff] }
 0x3ee   :  { %v3590_v7 = vld [vmem:[#allocation5 + $0x1488] sm:$0xff]  ;;  %v3592_v42 = vld [vmem:[#allocation5 + $0x1498] sm:$0xff]  ;;  %v3589_v14 = vld [vmem:[#allocation5 + $0x1480] sm:$0xff]  ;;  %v7480_v46 = vpack.c.bf16 %v2930_v21, %v2928_v4 }
 0x3ef   :  { %6803 = vmatmul.mubr.msk.f32.vlgmr.msra.gmra.mrb[30].mxu0 %vm9248_vm2, %v11760_v55  ;;  %7539 = vmatpush1.bf16.msra.mxu1 %v7538_v24  ;;  %v7546_v24 = vpack.c.bf16 %v3587_v15, %v3585_v36  ;;  %v2927_v31 = vld [vmem:[#allocation5 + $0x1060] sm:$0xff]  ;;  %v2932_v1 = vld [vmem:[#allocation5 + $0x1088] sm:$0xff]  ;;  %v7548_v29 = vpack.c.bf16 %v3592_v42, %v3590_v7  ;;  %v2934_v0 = vld [vmem:[#allocation5 + $0x1098] sm:$0xff] }
 0x3f0   :  { %2829 = vmatprep.mubr.f32.mxu0 %v9760_v43  ;;  %7471 = vmatpush1.bf16.msra.mxu0 %v7470_v28  ;;  %v7478_v43 = vpack.c.bf16 %v2925_v30, %v2923_v9  ;;  %v3591_v28 = vld [vmem:[#allocation5 + $0x1490] sm:$0xff]  ;;  %v3596_v56 = vld [vmem:[#allocation5 + $0x14b8] sm:$0xff]  ;;  %v3593_v3 = vld [vmem:[#allocation5 + $0x14a0] sm:$0xff]  ;;  %v7484_v55 = vpack.c.bf16 %v2934_v0, %v2932_v1 }
 0x3f1   :  { %7473 = vmatprep.subr.bf16.mxu0 %v7472_v2  ;;  %7541 = vmatprep.subr.bf16.mxu1 %v7540_v12  ;;  %v2929_v2 = vld [vmem:[#allocation5 + $0x1070] sm:$0xff]  ;;  %v3594_v12 = vld [vmem:[#allocation5 + $0x14a8] sm:$0xff]  ;;  %v3600_v30 = vld [vmem:[#allocation5 + $0x14d8] sm:$0xff] }
 0x3f2   :  { %v3595_v10 = vld [vmem:[#allocation5 + $0x14b0] sm:$0xff]  ;;  %v2936_v36 = vld [vmem:[#allocation5 + $0x10a8] sm:$0xff]  ;;  %v7552_v15 = vpack.c.bf16 %v3596_v56, %v3594_v12  ;;  %v3597_v4 = vld [vmem:[#allocation5 + $0x14c0] sm:$0xff] }
 0x3f3   :  { %2830 = vmatmul.mubr.f32.gmra.mrb[32].mxu0 %v9751_v23  ;;  %7543 = vmatpush1.bf16.msra.mxu1 %v7542_v53  ;;  %v7550_v23 = vpack.c.bf16 %v3591_v28, %v3589_v14  ;;  %v2931_v53 = vld [vmem:[#allocation5 + $0x1080] sm:$0xff]  ;;  %v3598_v9 = vld [vmem:[#allocation5 + $0x14c8] sm:$0xff]  ;;  %v2937_v42 = vld [vmem:[#allocation5 + $0x10b0] sm:$0xff] }
 0x3f4   :  { %2835 = vmatprep.mubr.f32.mxu0 %v9776_v27  ;;  %7475 = vmatpush1.bf16.msra.mxu0 %v7474_v54  ;;  %v7482_v27 = vpack.c.bf16 %v2929_v2, %v2927_v31  ;;  %v2933_v54 = vld [vmem:[#allocation5 + $0x1090] sm:$0xff]  ;;  %v2935_v7 = vld [vmem:[#allocation5 + $0x10a0] sm:$0xff]  ;;  %v2942_v14 = vld [vmem:[#allocation5 + $0x10d8] sm:$0xff] }
 0x3f5   :  { %7477 = vmatprep.subr.bf16.mxu0 %v7476_v37  ;;  %7545 = vmatprep.subr.bf16.mxu1 %v7544_v33  ;;  %v2938_v37 = vld [vmem:[#allocation5 + $0x10b8] sm:$0xff]  ;;  %v3599_v33 = vld [vmem:[#allocation5 + $0x14d0] sm:$0xff]  ;;  %v3602_v28 = vld [vmem:[#allocation5 + $0x14e8] sm:$0xff] }
 0x3f6   :  { %v7488_v21 = vpack.c.bf16 %v2938_v37, %v2936_v36  ;;  %v3601_v31 = vld [vmem:[#allocation5 + $0x14e0] sm:$0xff]  ;;  %v3603_v2 = vld [vmem:[#allocation5 + $0x14f0] sm:$0xff]  ;;  %v2944_v12 = vld [vmem:[#allocation5 + $0x10e8] sm:$0xff] }
 0x3f7   :  { %2836 = vmatmul.mubr.f32.gmra.mrb[34].mxu0 %v9769_v26  ;;  %7547 = vmatpush1.bf16.msra.mxu1 %v7546_v24  ;;  %v7554_v26 = vpack.c.bf16 %v3595_v10, %v3593_v3  ;;  %v2940_v24 = vld [vmem:[#allocation5 + $0x10c8] sm:$0xff]  ;;  %v2941_v0 = vld [vmem:[#allocation5 + $0x10d0] sm:$0xff]  ;;  %v3608_v3 = vld [vmem:[#allocation5 + $0x1518] sm:$0xff] }
 0x3f8   :  { %2841 = vmatprep.mubr.f32.mxu0 %v9792_v18  ;;  %7479 = vmatpush1.bf16.msra.mxu0 %v7478_v43  ;;  %v7486_v18 = vpack.c.bf16 %v2933_v54, %v2931_v53  ;;  %v7556_v43 = vpack.c.bf16 %v3600_v30, %v3598_v9  ;;  %v7492_v1 = vpack.c.bf16 %v2942_v14, %v2940_v24  ;;  %v3605_v10 = vld [vmem:[#allocation5 + $0x1500] sm:$0xff]  ;;  %v2945_v36 = vld [vmem:[#allocation5 + $0x10f0] sm:$0xff]  ;;  %v2950_v9 = vld [vmem:[#allocation5 + $0x1118] sm:$0xff] }
 0x3f9   :  { %7481 = vmatprep.subr.bf16.mxu0 %v7480_v46  ;;  %7549 = vmatprep.subr.bf16.mxu1 %v7548_v29  ;;  %v3604_v46 = vld [vmem:[#allocation5 + $0x14f8] sm:$0xff]  ;;  %v2939_v29 = vld [vmem:[#allocation5 + $0x10c0] sm:$0xff]  ;;  %v3610_v30 = vld [vmem:[#allocation5 + $0x1528] sm:$0xff] }
 0x3fa   :  { %v7560_v56 = vpack.c.bf16 %v3604_v46, %v3602_v28  ;;  %v2943_v54 = vld [vmem:[#allocation5 + $0x10e0] sm:$0xff]  ;;  %v3614_v14 = vld [vmem:[#allocation5 + $0x1548] sm:$0xff]  ;;  %v3616_v28 = vld [vmem:[#allocation5 + $0x1558] sm:$0xff] }
 0x3fb   :  { %2842 = vmatmul.mubr.f32.gmra.mrb[36].mxu0 %v9785_v38  ;;  %7551 = vmatpush1.bf16.msra.mxu1 %v7550_v23  ;;  %v7558_v38 = vpack.c.bf16 %v3599_v33, %v3597_v4  ;;  %v2946_v23 = vld [vmem:[#allocation5 + $0x10f8] sm:$0xff]  ;;  %v3611_v4 = vld [vmem:[#allocation5 + $0x1530] sm:$0xff]  ;;  %v3613_v46 = vld [vmem:[#allocation5 + $0x1540] sm:$0xff] }
 0x3fc   :  { %2847 = vmatprep.mubr.f32.mxu0 %v9808_v44  ;;  %7483 = vmatpush1.bf16.msra.mxu0 %v7482_v27  ;;  %v7490_v44 = vpack.c.bf16 %v2937_v42, %v2935_v7  ;;  %v3606_v27 = vld [vmem:[#allocation5 + $0x1508] sm:$0xff]  ;;  %v7496_v53 = vpack.c.bf16 %v2946_v23, %v2944_v12  ;;  %v2949_v7 = vld [vmem:[#allocation5 + $0x1110] sm:$0xff]  ;;  %v3617_v23 = vld [vmem:[#allocation5 + $0x1560] sm:$0xff] }
 0x3fd   :  { %7485 = vmatprep.subr.bf16.mxu0 %v7484_v55  ;;  %7553 = vmatprep.subr.bf16.mxu1 %v7552_v15  ;;  %v3607_v55 = vld [vmem:[#allocation5 + $0x1510] sm:$0xff]  ;;  %v2948_v15 = vld [vmem:[#allocation5 + $0x1108] sm:$0xff]  ;;  %v7564_v37 = vpack.c.bf16 %v3608_v3, %v3606_v27 }
 0x3fe   :  { %v7500_v33 = vpack.c.bf16 %v2950_v9, %v2948_v15  ;;  %v2952_v42 = vld [vmem:[#allocation5 + $0x1128] sm:$0xff]  ;;  %v3619_v27 = vld [vmem:[#allocation5 + $0x1570] sm:$0xff]  ;;  %v3621_v15 = vld [vmem:[#allocation5 + $0x1580] sm:$0xff] }
 0x3ff   :  { %2848 = vmatmul.mubr.f32.gmra.mrb[38].mxu0 %v9801_v22  ;;  %7555 = vmatpush1.bf16.msra.mxu1 %v7554_v26  ;;  %v7562_v22 = vpack.c.bf16 %v3603_v2, %v3601_v31  ;;  %v3612_v26 = vld [vmem:[#allocation5 + $0x1538] sm:$0xff]  ;;  %v2951_v31 = vld [vmem:[#allocation5 + $0x1120] sm:$0xff]  ;;  %v2953_v2 = vld [vmem:[#allocation5 + $0x1130] sm:$0xff] }
 0x400   :  { %2853 = vmatprep.mubr.f32.mxu0 %v9824_v20  ;;  %7487 = vmatpush1.bf16.msra.mxu0 %v7486_v18  ;;  %v7494_v20 = vpack.c.bf16 %v2941_v0, %v2939_v29  ;;  %v3609_v18 = vld [vmem:[#allocation5 + $0x1520] sm:$0xff]  ;;  %v7568_v24 = vpack.c.bf16 %v3612_v26, %v3610_v30  ;;  %v7572_v29 = vpack.c.bf16 %v3616_v28, %v3614_v14  ;;  %v2958_v0 = vld [vmem:[#allocation5 + $0x1158] sm:$0xff]  ;;  %v3618_v12 = vld [vmem:[#allocation5 + $0x1568] sm:$0xff] }
 0x401   :  { %7489 = vmatprep.subr.bf16.mxu0 %v7488_v21  ;;  %7557 = vmatprep.subr.bf16.mxu1 %v7556_v43  ;;  %v2947_v21 = vld [vmem:[#allocation5 + $0x1100] sm:$0xff]  ;;  %v2954_v43 = vld [vmem:[#allocation5 + $0x1138] sm:$0xff]  ;;  %v2961_v26 = vld [vmem:[#allocation5 + $0x1170] sm:$0xff] }
 0x402   :  { %v2959_v30 = vld [vmem:[#allocation5 + $0x1160] sm:$0xff]  ;;  %v2968_v28 = vld [vmem:[#allocation5 + $0x11a8] sm:$0xff] }
 0x403   :  { %2854 = vmatmul.mubr.f32.gmra.mrb[40].mxu0 %v9817_v39  ;;  %7559 = vmatpush1.bf16.msra.mxu1 %v7558_v38  ;;  %v7566_v39 = vpack.c.bf16 %v3607_v55, %v3605_v10  ;;  %v3615_v38 = vld [vmem:[#allocation5 + $0x1550] sm:$0xff]  ;;  %v2960_v10 = vld [vmem:[#allocation5 + $0x1168] sm:$0xff] }
 0x404   :  { %2859 = vmatprep.mubr.f32.mxu0 %v9840_v19  ;;  %7491 = vmatpush1.bf16.msra.mxu0 %v7490_v44  ;;  %v7498_v19 = vpack.c.bf16 %v2945_v36, %v2943_v54  ;;  %v7504_v44 = vpack.c.bf16 %v2954_v43, %v2952_v42  ;;  %v3622_v54 = vld [vmem:[#allocation5 + $0x1588] sm:$0xff]  ;;  %v3624_v36 = vld [vmem:[#allocation5 + $0x1598] sm:$0xff]  ;;  %v2965_v43 = vld [vmem:[#allocation5 + $0x1190] sm:$0xff] }
 0x405   :  { %7493 = vmatprep.subr.bf16.mxu0 %v7492_v1  ;;  %7561 = vmatprep.subr.bf16.mxu1 %v7560_v56  ;;  %v2956_v1 = vld [vmem:[#allocation5 + $0x1148] sm:$0xff]  ;;  %v3620_v56 = vld [vmem:[#allocation5 + $0x1578] sm:$0xff] }
 0x406   :  { %v7508_v3 = vpack.c.bf16 %v2958_v0, %v2956_v1  ;;  %v7576_v55 = vpack.c.bf16 %v3620_v56, %v3618_v12  ;;  %v2971_v1 = vld [vmem:[#allocation5 + $0x11c0] sm:$0xff]  ;;  %v2978_v0 = vld [vmem:[#allocation5 + $0x11f8] sm:$0xff] }
 0x407   :  { %2860 = vmatmul.mubr.f32.gmra.mrb[42].mxu0 %v9833_v40  ;;  %7563 = vmatpush1.bf16.msra.mxu1 %v7562_v22  ;;  %v7570_v40 = vpack.c.bf16 %v3611_v4, %v3609_v18  ;;  %v2955_v22 = vld [vmem:[#allocation5 + $0x1140] sm:$0xff]  ;;  %v2966_v18 = vld [vmem:[#allocation5 + $0x1198] sm:$0xff]  ;;  %v3626_v4 = vld [vmem:[#allocation5 + $0x15a8] sm:$0xff] }
 0x408   :  { %2865 = vmatprep.mubr.f32.mxu0 %v9856_v34  ;;  %7495 = vmatpush1.bf16.msra.mxu0 %v7494_v20  ;;  %v7502_v34 = vpack.c.bf16 %v2949_v7, %v2947_v21  ;;  %v2957_v20 = vld [vmem:[#allocation5 + $0x1150] sm:$0xff]  ;;  %v3625_v21 = vld [vmem:[#allocation5 + $0x15a0] sm:$0xff] }
 0x409   :  { %7497 = vmatprep.subr.bf16.mxu0 %v7496_v53  ;;  %7565 = vmatprep.subr.bf16.mxu1 %v7564_v37  ;;  %v2962_v53 = vld [vmem:[#allocation5 + $0x1178] sm:$0xff]  ;;  %v3623_v37 = vld [vmem:[#allocation5 + $0x1590] sm:$0xff] }
 0x40a   :  { %v7512_v9 = vpack.c.bf16 %v2962_v53, %v2960_v10  ;;  %v3627_v7 = vld [vmem:[#allocation5 + $0x15b0] sm:$0xff]  ;;  %v11778_v10 = vld [vmem:[#allocation92_spill] sm:$0xff]  ;;  %v11780_v53 = vld [vmem:[#allocation93_spill] sm:$0xff] }
 0x40b   :  { %2866 = vmatmul.mubr.f32.gmra.mrb[44].mxu0 %v9849_v45  ;;  %7567 = vmatpush1.bf16.msra.mxu1 %v7566_v39  ;;  %v7574_v45 = vpack.c.bf16 %v3615_v38, %v3613_v46  ;;  %v2964_v39 = vld [vmem:[#allocation5 + $0x1188] sm:$0xff]  ;;  %v2967_v46 = vld [vmem:[#allocation5 + $0x11a0] sm:$0xff]  ;;  %v2969_v38 = vld [vmem:[#allocation5 + $0x11b0] sm:$0xff] }
 0x40c   :  { %2871 = vmatprep.mubr.f32.mxu0 %v9872_v49  ;;  %7499 = vmatpush1.bf16.msra.mxu0 %v7498_v19  ;;  %v7506_v49 = vpack.c.bf16 %v2953_v2, %v2951_v31  ;;  %v7580_v19 = vpack.c.bf16 %v3624_v36, %v3622_v54  ;;  %v7516_v42 = vpack.c.bf16 %v2966_v18, %v2964_v39  ;;  %v2974_v31 = vld [vmem:[#allocation5 + $0x11d8] sm:$0xff]  ;;  %v11781_v54 = vrot.slane %v11780_v53, 1  ;;  %v3634_v39 = vld [vmem:[#allocation5 + $0x15e8] sm:$0xff]  ;;  %v3633_v18 = vld [vmem:[#allocation5 + $0x15e0] sm:$0xff] }
 0x40d   :  { %7501 = vmatprep.subr.bf16.mxu0 %v7500_v33  ;;  %7569 = vmatprep.subr.bf16.mxu1 %v7568_v24  ;;  %v3628_v33 = vld [vmem:[#allocation5 + $0x15b8] sm:$0xff]  ;;  %v2963_v24 = vld [vmem:[#allocation5 + $0x1180] sm:$0xff] }
 0x40e   :  { %v7584_v14 = vpack.c.bf16 %v3628_v33, %v3626_v4  ;;  %v11782_v36 = vld [vmem:[#allocation91_spill] sm:$0xff] }
 0x40f   :  { %2872 = vmatmul.mubr.f32.gmra.mrb[46].mxu0 %v9865_v61  ;;  %7571 = vmatpush1.bf16.msra.mxu1 %v7570_v40  ;;  %v7578_v61 = vpack.c.bf16 %v3619_v27, %v3617_v23  ;;  %v2970_v40 = vld [vmem:[#allocation5 + $0x11b8] sm:$0xff]  ;;  %v3635_v4 = vld [vmem:[#allocation5 + $0x15f0] sm:$0xff] }
 0x410   :  { %2877 = vmatprep.mubr.f32.mxu0 %v9888_v57  ;;  %7503 = vmatpush1.bf16.msra.mxu0 %v7502_v34  ;;  %v7510_v57 = vpack.c.bf16 %v2957_v20, %v2955_v22  ;;  %v7520_v34 = vpack.c.bf16 %v2970_v40, %v2968_v28  ;;  %v11773_v23 = vld [vmem:[#allocation88_spill] sm:$0xff]  ;;  %v11774_v27 = vld [vmem:[#allocation87_spill] sm:$0xff]  ;;  %v11776_v22 = vld [vmem:[#allocation89_spill] sm:$0xff]  ;;  %v7594_v33 = vpack.c.bf16 %v3635_v4, %v3633_v18 }
 0x411   :  { %7505 = vmatprep.subr.bf16.mxu0 %v7504_v44  ;;  %7573 = vmatprep.subr.bf16.mxu1 %v7572_v29  ;;  %v2972_v44 = vld [vmem:[#allocation5 + $0x11c8] sm:$0xff]  ;;  %v11798_v18 = vld [vmem:[#allocation36_spill] sm:$0xff] }
 0x412   :  { %v7524_v2 = vpack.c.bf16 %v2974_v31, %v2972_v44  ;;  %v2976_v29 = vld [vmem:[#allocation5 + $0x11e8] sm:$0xff]  ;;  %v11787_v31 = vld [vmem:[#allocation31_spill] sm:$0xff] }
 0x413   :  { %2878 = vmatmul.mubr.f32.gmra.mrb[48].mxu0 %v9881_v25  ;;  %7575 = vmatpush1.bf16.msra.mxu1 %v7574_v45  ;;  %v7582_v25 = vpack.c.bf16 %v3623_v37, %v3621_v15  ;;  %v7528_v56 = vpack.c.bf16 %v2978_v0, %v2976_v29  ;;  %v2977_v45 = vld [vmem:[#allocation5 + $0x11f0] sm:$0xff]  ;;  %v3632_v15 = vld [vmem:[#allocation5 + $0x15d8] sm:$0xff] }
 0x414   :  { %2883 = vmatprep.mubr.f32.mxu0 %v9904_v13  ;;  %7507 = vmatpush1.bf16.msra.mxu0 %v7506_v49  ;;  %v7514_v13 = vpack.c.bf16 %v2961_v26, %v2959_v30  ;;  %v11772_v49 = vld [vmem:[#allocation85_spill] sm:$0xff]  ;;  %v11777_v20 = vld [vmem:[#allocation94_spill] sm:$0xff] }
 0x415   :  { %7509 = vmatprep.subr.bf16.mxu0 %v7508_v3  ;;  %7577 = vmatprep.subr.bf16.mxu1 %v7576_v55  ;;  %v11775_v3 = vld [vmem:[#allocation90_spill] sm:$0xff]  ;;  %v11779_v55 = vld [vmem:[#allocation95_spill] sm:$0xff] }
 0x416   :  { %v3631_v30 = vld [vmem:[#allocation5 + $0x15d0] sm:$0xff] }
 0x417   :  { %2884 = vmatmul.mubr.f32.gmra.mrb[50].mxu0 %v9897_v8  ;;  %7579 = vmatpush1.bf16.msra.mxu1 %v7578_v61  ;;  %v7586_v8 = vpack.c.bf16 %v3627_v7, %v3625_v21  ;;  %v11783_v61 = vrot.slane %v11782_v36, 1  ;;  %v3165_v7 = vld [vmem:[#allocation7 + $0x2] ss:$8 sm:$0x3]  ;;  %v3510_v29 = vld [vmem:[#allocation5 + $0x1210] sm:$0xff] }
 0x418   :  { %2889 = vmatprep.mubr.f32.mxu0 %v9920_v5  ;;  %7511 = vmatpush1.bf16.msra.mxu0 %v7510_v57  ;;  %v7518_v5 = vpack.c.bf16 %v2965_v43, %v2963_v24  ;;  %v3630_v57 = vld [vmem:[#allocation5 + $0x15c8] sm:$0xff]  ;;  %v11785_v43 = vld [vmem:[#allocation28_spill] sm:$0xff] }
 0x419   :  { %7513 = vmatprep.subr.bf16.mxu0 %v7512_v9  ;;  %7581 = vmatprep.subr.bf16.mxu1 %v7580_v19  ;;  %v7588_v37 = vpack.c.bf16 %v3632_v15, %v3630_v57  ;;  %v3629_v9 = vld [vmem:[#allocation5 + $0x15c0] sm:$0xff]  ;;  %v11788_v0 = vld [vmem:[#allocation30_spill] sm:$0xff] }
 0x41a   :  { %v7590_v26 = vpack.c.bf16 %v3631_v30, %v3629_v9 }
 0x41b   :  { %2890 = vmatmul.mubr.f32.gmra.mrb[52].mxu0 %v9913_v63  ;;  %7583 = vmatpush1.bf16.msra.mxu1 %v7582_v25  ;;  %v7522_v63 = vpack.c.bf16 %v2969_v38, %v2967_v46  ;;  %v3509_v25 = vld [vmem:[#allocation5 + $0x1208] sm:$0xff] }
 0x41c   :  { %2895 = vmatprep.mubr.f32.mxu0 %v9936_v6  ;;  %7515 = vmatpush1.bf16.msra.mxu0 %v7514_v13  ;;  %v2973_v6 = vld [vmem:[#allocation5 + $0x11d0] sm:$0xff]  ;;  %v3511_v13 = vld [vmem:[#allocation5 + $0x1218] sm:$0xff] }
 0x41d   :  { %7517 = vmatprep.subr.bf16.mxu0 %v7516_v42  ;;  %7585 = vmatprep.subr.bf16.mxu1 %v7584_v14  ;;  %v7526_v12 = vpack.c.bf16 %v2973_v6, %v2971_v1  ;;  %v7596_v21 = vpack.c.bf16 %v3511_v13, %v3509_v25  ;;  %v11784_v42 = vld [vmem:[#allocation27_spill] sm:$0xff]  ;;  %v10055_v14 = vrot.slane %v3165_v7, %v11785_v43  ;;  %v3508_v6 = vld [vmem:[#allocation5 + $0x1200] sm:$0xff]  ;;  %v3521_v25 = vld [vmem:[#allocation5 + $0x1268] sm:$0xff] }
 0x41e   :  { %v10052_v24 = vrot.slane %v3165_v7, %v11784_v42  ;;  %v3523_v13 = vld [vmem:[#allocation5 + $0x1278] sm:$0xff] }
 0x41f   :  { %2896 = vmatmul.mubr.f32.gmra.mrb[54].mxu0 %v9929_v48  ;;  %7587 = vmatpush1.bf16.msra.mxu1 %v7586_v8  ;;  %v2975_v48 = vld [vmem:[#allocation5 + $0x11e0] sm:$0xff] }
 0x420   :  { %2901 = vmatprep.mubr.f32.mxu0 %v9954_v32  ;;  %7519 = vmatpush1.bf16.msra.mxu0 %v7518_v5  ;;  %v7530_v32 = vpack.c.bf16 %v2977_v45, %v2975_v48  ;;  %v3513_v48 = vld [vmem:[#allocation5 + $0x1228] sm:$0xff]  ;;  %v3515_v45 = vld [vmem:[#allocation5 + $0x1238] sm:$0xff] }
 0x421   :  { %7521 = vmatprep.subr.bf16.mxu0 %v7520_v34  ;;  %7589 = vmatprep.subr.bf16.mxu1 %v7588_v37  ;;  %v11786_v34 = vld [vmem:[#allocation29_spill] sm:$0xff] }
 0x422   :  { %v11797_v37 = vld [vmem:[#allocation37_spill] sm:$0xff] }
 0x423   :  { %2902 = vmatmul.mubr.f32.gmra.mrb[56].mxu0 %v9946_v51  ;;  %v11761_v51 = vld [vmem:[#allocation76_spill] sm:$0xff]  ;;  %7591 = vmatpush1.bf16.msra.mxu1 %v7590_v26 }
 0x424   :  { %2907 = vmatprep.mubr.f32.mxu0 %v9978_v41  ;;  %7523 = vmatpush1.bf16.msra.mxu0 %v7522_v63  ;;  %v11764_v41 = vld [vmem:[#allocation77_spill] sm:$0xff] }
 0x425   :  { %7525 = vmatprep.subr.bf16.mxu0 %v7524_v2 }
 0x427   :  { %2908 = vmatmul.mubr.f32.gmra.mrb[58].mxu0 %v9966_v16  ;;  %v11763_v16 = vld [vmem:[#allocation78_spill] sm:$0xff] }
 0x428   :  { %7527 = vmatpush1.bf16.msra.mxu0 %v7526_v12  ;;  %3043 = vmatprep.mubr.f32.mxu0 %v9763_v52  ;;  %v11762_v52 = vld [vmem:[#allocation75_spill] sm:$0xff] }
 0x429   :  { %7529 = vmatprep.subr.bf16.mxu0 %v7528_v56 }
 0x42c   :  { %7531 = vmatpush1.bf16.msra.mxu0 %v7530_v32  ;;  %v11789_v32 = vld [vmem:[#allocation32_spill] sm:$0xff] }
 0x42f   :  { %3044 = vmatmul.mubr.f32.vlgmr.msra.gmra.mrb[30].mxu0 %v9754_v50  ;;  %v11765_v50 = vld [vmem:[#allocation80_spill] sm:$0xff] }
 0x430   :  { %3049 = vmatprep.mubr.f32.mxu0 %v9779_v17  ;;  %v11766_v17 = vld [vmem:[#allocation79_spill] sm:$0xff] }
 0x433   :  { %3050 = vmatmul.mubr.f32.gmra.mrb[32].mxu0 %v9772_v35  ;;  %v11767_v35 = vld [vmem:[#allocation82_spill] sm:$0xff] }
 0x434   :  { %3055 = vmatprep.mubr.f32.mxu0 %v9795_v60  ;;  %v11768_v60 = vld [vmem:[#allocation81_spill] sm:$0xff] }
 0x437   :  { %3056 = vmatmul.mubr.f32.gmra.mrb[34].mxu0 %v9788_v59  ;;  %v11769_v59 = vld [vmem:[#allocation84_spill] sm:$0xff] }
 0x438   :  { %3061 = vmatprep.mubr.f32.mxu0 %v9811_v62  ;;  %v11770_v62 = vld [vmem:[#allocation83_spill] sm:$0xff] }
 0x43b   :  { %3062 = vmatmul.mubr.f32.gmra.mrb[36].mxu0 %v9804_v11  ;;  %v11771_v11 = vld [vmem:[#allocation86_spill] sm:$0xff] }
 0x43c   :  { %3067 = vmatprep.mubr.f32.mxu0 %v11761_v51 }
 0x43f   :  { %3068 = vmatmul.mubr.f32.gmra.mrb[38].mxu0 %v11762_v52 }
 0x440   :  { %3073 = vmatprep.mubr.f32.mxu0 %v11763_v16 }
 0x443   :  { %3074 = vmatmul.mubr.f32.gmra.mrb[40].mxu0 %v11764_v41 }
 0x444   :  { %3079 = vmatprep.mubr.f32.mxu0 %v11765_v50  ;;  %v7598_v50 = vpack.c.bf16 %v3510_v29, %v3508_v6  ;;  %v3522_v6 = vld [vmem:[#allocation5 + $0x1270] sm:$0xff]  ;;  %v11803_v29 = vld [vmem:[#allocation40_spill] sm:$0xff] }
 0x447   :  { %3080 = vmatmul.mubr.f32.gmra.mrb[42].mxu0 %v11766_v17 }
 0x448   :  { %3085 = vmatprep.mubr.f32.mxu0 %v11767_v35  ;;  %v11792_v35 = vld [vmem:[#allocation35_spill] sm:$0xff] }
 0x44b   :  { %3086 = vmatmul.mubr.f32.gmra.mrb[44].mxu0 %v11768_v60 }
 0x44c   :  { %3091 = vmatprep.mubr.f32.mxu0 %v11769_v59 }
 0x44f   :  { %3092 = vmatmul.mubr.f32.gmra.mrb[46].mxu0 %v11770_v62 }
 0x450   :  { %3097 = vmatprep.mubr.f32.mxu0 %v11771_v11  ;;  %v7600_v11 = vpack.c.bf16 %v3515_v45, %v3513_v48  ;;  %v3527_v48 = vld [vmem:[#allocation5 + $0x1298] sm:$0xff]  ;;  %v11804_v45 = vld [vmem:[#allocation42_spill] sm:$0xff] }
 0x453   :  { %3098 = vmatmul.mubr.f32.gmra.mrb[48].mxu0 %v11772_v49  ;;  %v3512_v49 = vld [vmem:[#allocation5 + $0x1220] sm:$0xff] }
 0x454   :  { %3103 = vmatprep.mubr.f32.mxu0 %v11773_v23  ;;  %v3514_v23 = vld [vmem:[#allocation5 + $0x1230] sm:$0xff] }
 0x455   :  { %v7602_v57 = vpack.c.bf16 %v3514_v23, %v3512_v49 }
 0x457   :  { %3104 = vmatmul.mubr.f32.gmra.mrb[50].mxu0 %v11774_v27  ;;  %v11793_v27 = vld [vmem:[#allocation33_spill] sm:$0xff] }
 0x458   :  { %3109 = vmatprep.mubr.f32.mxu0 %v11775_v3 }
 0x45b   :  { %3110 = vmatmul.mubr.f32.gmra.mrb[52].mxu0 %v11776_v22 }
 0x45c   :  { %3115 = vmatprep.mubr.f32.mxu0 %v11777_v20  ;;  %v3517_v20 = vld [vmem:[#allocation5 + $0x1248] sm:$0xff] }
 0x45f   :  { %3116 = vmatmul.mubr.f32.gmra.mrb[54].mxu0 %v11778_v10  ;;  %v3519_v10 = vld [vmem:[#allocation5 + $0x1258] sm:$0xff] }
 0x460   :  { %3121 = vmatprep.mubr.f32.mxu0 %v9983_v58  ;;  %v3636_v58 = vld [vmem:[#allocation5 + $0x15f8] sm:$0xff] }
 0x461   :  { %v7592_v19 = vpack.c.bf16 %v3636_v58, %v3634_v39  ;;  %v7604_v39 = vpack.c.bf16 %v3519_v10, %v3517_v20  ;;  %v3516_v58 = vld [vmem:[#allocation5 + $0x1240] sm:$0xff] }
 0x463   :  { %3122 = vmatmul.mubr.f32.gmra.mrb[56].mxu0 %v11779_v55  ;;  %7593 = vmatprep.subr.bf16.mxu1 %v7592_v19  ;;  %v11794_v55 = vld [vmem:[#allocation34_spill] sm:$0xff] }
 0x464   :  { %6804 = vmatprep.mubr.msk.f32.mxu0 %vm334_vm0, %v11781_v54  ;;  %7595 = vmatpush1.bf16.msra.mxu1 %v7594_v33  ;;  %v3518_v19 = vld [vmem:[#allocation5 + $0x1250] sm:$0xff] }
 0x465   :  { %7597 = vmatprep.subr.bf16.mxu1 %v7596_v21  ;;  %v11799_v21 = vld [vmem:[#allocation38_spill] sm:$0xff] }
 0x467   :  { %6805 = vmatmul.mubr.msk.f32.gmra.mrb[58].mxu0 %vm334_vm0, %v11783_v61 }
 0x502   :  { %v3045_v28 = vpop.f32.mrb[30].mxu0 }
 0x503   :  { %v3177_v40 = vadd.f32 %v10052_v24, %v3045_v28  ;;  %v3047_v8 = vpop.f32.mrb[31].mxu0 }
 0x504   :  { %v3178_v5 = vadd.f32 %v10055_v14, %v3047_v8 }
 0x505   :  { %v3207_v46 = vmul.f32 %v3177_v40, %v11786_v34 }
 0x506   :  { %v3208_v38 = vmul.f32 %v3178_v5, %v11786_v34  ;;  %v3051_v44 = vpop.f32.mrb[32].mxu0  ;;  %v7606_v5 = vpack.c.bf16 %v3518_v19, %v3516_v58  ;;  %v11812_v58 = vld [vmem:[#allocation47_spill] sm:$0xff] }
 0x507   :  { %v3237_v63 = vadd.f32 %v3207_v46, %v11787_v31  ;;  %v3179_v2 = vadd.f32 %v10052_v24, %v3051_v44  ;;  %v3053_v1 = vpop.f32.mrb[33].mxu0 }
 0x508   :  { %v3238_v12 = vadd.f32 %v3208_v38, %v11788_v0  ;;  %v3180_v56 = vadd.f32 %v10055_v14, %v3053_v1  ;;  %v11802_v38 = vld [vmem:[#allocation41_spill] sm:$0xff] }
 0x509   :  { %v3209_v51 = vmul.f32 %v3179_v2, %v11789_v32  ;;  %v10069_v17 = vmax.f32 %v3237_v63, 0.0  ;;  %v7608_v2 = vpack.c.bf16 %v3523_v13, %v3521_v25  ;;  %v3520_v1 = vld [vmem:[#allocation5 + $0x1260] sm:$0xff]  ;;  %v3530_v13 = vld [vmem:[#allocation5 + $0x12b0] sm:$0xff] }
 0x50a   :  { %v10066_v52 = vmax.f32 %v3238_v12, 0.0  ;;  %v3210_v16 = vmul.f32 %v3180_v56, %v11789_v32  ;;  %v3057_v41 = vpop.f32.mrb[34].mxu0  ;;  %v3525_v56 = vld [vmem:[#allocation5 + $0x1288] sm:$0xff]  ;;  %v3528_v25 = vld [vmem:[#allocation5 + $0x12a0] sm:$0xff] }
 0x50b   :  { %11791 = vst [vmem:[#allocation75_spill] sm:$0xff] %v10069_v17  ;;  %v3239_v60 = vadd.f32 %v3209_v51, %v11792_v35  ;;  %v3181_v59 = vadd.f32 %v10052_v24, %v3057_v41  ;;  %v3059_v62 = vpop.f32.mrb[35].mxu0  ;;  %v7610_v35 = vpack.c.bf16 %v3522_v6, %v3520_v1  ;;  %v7612_v23 = vpack.c.bf16 %v3527_v48, %v3525_v56 }
 0x50c   :  { %11790 = vst [vmem:[#allocation76_spill] sm:$0xff] %v10066_v52  ;;  %v3240_v3 = vadd.f32 %v3210_v16, %v11793_v27  ;;  %v3182_v22 = vadd.f32 %v10055_v14, %v3059_v62  ;;  %3701 = vmatprep.mubr.f32.mxu1 %v10066_v52  ;;  %v3524_v27 = vld [vmem:[#allocation5 + $0x1280] sm:$0xff]  ;;  %v7618_v6 = vpack.c.bf16 %v3530_v13, %v3528_v25  ;;  %v3541_v25 = vld [vmem:[#allocation5 + $0x1308] sm:$0xff]  ;;  %v3543_v13 = vld [vmem:[#allocation5 + $0x1318] sm:$0xff] }
 0x50d   :  { %v3211_v53 = vmul.f32 %v3181_v59, %v11794_v55  ;;  %3702 = vmatmul.mubr.f32.vlgmr.msra.gmra.mrb[30].mxu1 %v10069_v17  ;;  %v10081_v15 = vmax.f32 %v3239_v60, 0.0  ;;  %v11807_v59 = vld [vmem:[#allocation44_spill] sm:$0xff] }
 0x50e   :  { %v10078_v54 = vmax.f32 %v3240_v3, 0.0  ;;  %v3212_v36 = vmul.f32 %v3182_v22, %v11794_v55  ;;  %7599 = vmatpush1.bf16.msra.mxu1 %v7598_v50  ;;  %v3063_v61 = vpop.f32.mrb[36].mxu0  ;;  %v3526_v3 = vld [vmem:[#allocation5 + $0x1290] sm:$0xff]  ;;  %v4593_v55 = vld [vmem:[#allocation5 + $0x1a88] sm:$0xff] }
 0x50f   :  { %11796 = vst [vmem:[#allocation77_spill] sm:$0xff] %v10081_v15  ;;  %v3241_v9 = vadd.f32 %v3211_v53, %v11797_v37  ;;  %v3183_v30 = vadd.f32 %v10052_v24, %v3063_v61  ;;  %v3065_v26 = vpop.f32.mrb[37].mxu0  ;;  %7601 = vmatprep.subr.bf16.mxu1 %v7600_v11  ;;  %v11808_v22 = vld [vmem:[#allocation43_spill] sm:$0xff]  ;;  %v3529_v53 = vld [vmem:[#allocation5 + $0x12a8] sm:$0xff] }
 0x510   :  { %11795 = vst [vmem:[#allocation78_spill] sm:$0xff] %v10078_v54  ;;  %v3242_v4 = vadd.f32 %v3212_v36, %v11798_v18  ;;  %v3184_v33 = vadd.f32 %v10055_v14, %v3065_v26  ;;  %3707 = vmatprep.mubr.f32.mxu1 %v10078_v54  ;;  %v3531_v36 = vld [vmem:[#allocation5 + $0x12b8] sm:$0xff]  ;;  %v11809_v61 = vld [vmem:[#allocation45_spill] sm:$0xff]  ;;  %v7614_v26 = vpack.c.bf16 %v3526_v3, %v3524_v27 }
 0x511   :  { %v3213_v7 = vmul.f32 %v3183_v30, %v11799_v21  ;;  %3708 = vmatmul.mubr.f32.gmra.mrb[32].mxu1 %v10081_v15  ;;  %v10093_v46 = vmax.f32 %v3241_v9, 0.0 }
 0x512   :  { %v10090_v28 = vmax.f32 %v3242_v4, 0.0  ;;  %v3214_v40 = vmul.f32 %v3184_v33, %v11799_v21  ;;  %7603 = vmatpush1.bf16.msra.mxu1 %v7602_v57  ;;  %v3069_v8 = vpop.f32.mrb[38].mxu0  ;;  %v7616_v33 = vpack.c.bf16 %v3531_v36, %v3529_v53  ;;  %v11822_v36 = vld [vmem:[#allocation53_spill] sm:$0xff]  ;;  %v4591_v21 = vld [vmem:[#allocation5 + $0x1a78] sm:$0xff] }
 0x513   :  { %11801 = vst [vmem:[#allocation79_spill] sm:$0xff] %v10093_v46  ;;  %v3243_v44 = vadd.f32 %v3213_v7, %v11802_v38  ;;  %v3185_v31 = vadd.f32 %v10052_v24, %v3069_v8  ;;  %v3071_v63 = vpop.f32.mrb[39].mxu0  ;;  %7605 = vmatprep.subr.bf16.mxu1 %v7604_v39  ;;  %v11813_v7 = vld [vmem:[#allocation46_spill] sm:$0xff]  ;;  %v3535_v38 = vld [vmem:[#allocation5 + $0x12d8] sm:$0xff] }
 0x514   :  { %11800 = vst [vmem:[#allocation80_spill] sm:$0xff] %v10090_v28  ;;  %v3244_v0 = vadd.f32 %v3214_v40, %v11803_v29  ;;  %v3186_v12 = vadd.f32 %v10055_v14, %v3071_v63  ;;  %3713 = vmatprep.mubr.f32.mxu1 %v10090_v28 }
 0x515   :  { %v3215_v51 = vmul.f32 %v3185_v31, %v11804_v45  ;;  %3714 = vmatmul.mubr.f32.gmra.mrb[34].mxu1 %v10093_v46  ;;  %v10105_v60 = vmax.f32 %v3243_v44, 0.0  ;;  %v11814_v44 = vld [vmem:[#allocation48_spill] sm:$0xff] }
 0x516   :  { %v10102_v16 = vmax.f32 %v3244_v0, 0.0  ;;  %v3216_v41 = vmul.f32 %v3186_v12, %v11804_v45  ;;  %7607 = vmatpush1.bf16.msra.mxu1 %v7606_v5  ;;  %v3075_v50 = vpop.f32.mrb[40].mxu0  ;;  %v3533_v5 = vld [vmem:[#allocation5 + $0x12c8] sm:$0xff] }
 0x517   :  { %11806 = vst [vmem:[#allocation81_spill] sm:$0xff] %v10105_v60  ;;  %v3245_v62 = vadd.f32 %v3215_v51, %v11807_v59  ;;  %v3187_v11 = vadd.f32 %v10052_v24, %v3075_v50  ;;  %v3077_v49 = vpop.f32.mrb[41].mxu0  ;;  %7609 = vmatprep.subr.bf16.mxu1 %v7608_v2  ;;  %v11817_v0 = vld [vmem:[#allocation50_spill] sm:$0xff]  ;;  %v7620_v51 = vpack.c.bf16 %v3535_v38, %v3533_v5 }
 0x518   :  { %11805 = vst [vmem:[#allocation82_spill] sm:$0xff] %v10102_v16  ;;  %v3246_v20 = vadd.f32 %v3216_v41, %v11808_v22  ;;  %v3188_v10 = vadd.f32 %v10055_v14, %v3077_v49  ;;  %3719 = vmatprep.mubr.f32.mxu1 %v10102_v16  ;;  %v3532_v41 = vld [vmem:[#allocation5 + $0x12c0] sm:$0xff]  ;;  %v3534_v50 = vld [vmem:[#allocation5 + $0x12d0] sm:$0xff]  ;;  %v3539_v49 = vld [vmem:[#allocation5 + $0x12f8] sm:$0xff] }
 0x519   :  { %v3217_v57 = vmul.f32 %v3187_v11, %v11809_v61  ;;  %3720 = vmatmul.mubr.f32.gmra.mrb[36].mxu1 %v10105_v60  ;;  %v10117_v39 = vmax.f32 %v3245_v62, 0.0  ;;  %v3537_v11 = vld [vmem:[#allocation5 + $0x12e8] sm:$0xff] }
 0x51a   :  { %v10114_v37 = vmax.f32 %v3246_v20, 0.0  ;;  %v3218_v9 = vmul.f32 %v3188_v10, %v11809_v61  ;;  %7611 = vmatpush1.bf16.msra.mxu1 %v7610_v35  ;;  %v3081_v30 = vpop.f32.mrb[42].mxu0  ;;  %v11818_v35 = vld [vmem:[#allocation49_spill] sm:$0xff]  ;;  %v7622_v10 = vpack.c.bf16 %v3534_v50, %v3532_v41  ;;  %v11828_v41 = vld [vmem:[#allocation55_spill] sm:$0xff] }
 0x51b   :  { %11811 = vst [vmem:[#allocation83_spill] sm:$0xff] %v10117_v39  ;;  %v3247_v19 = vadd.f32 %v3217_v57, %v11812_v58  ;;  %v3189_v18 = vadd.f32 %v10052_v24, %v3081_v30  ;;  %v3083_v4 = vpop.f32.mrb[43].mxu0  ;;  %7613 = vmatprep.subr.bf16.mxu1 %v7612_v23  ;;  %v11819_v23 = vld [vmem:[#allocation51_spill] sm:$0xff]  ;;  %v3536_v58 = vld [vmem:[#allocation5 + $0x12e0] sm:$0xff] }
 0x51c   :  { %11810 = vst [vmem:[#allocation84_spill] sm:$0xff] %v10114_v37  ;;  %v3248_v40 = vadd.f32 %v3218_v9, %v11813_v7  ;;  %v3190_v8 = vadd.f32 %v10055_v14, %v3083_v4  ;;  %3725 = vmatprep.mubr.f32.mxu1 %v10114_v37  ;;  %v11824_v7 = vld [vmem:[#allocation54_spill] sm:$0xff]  ;;  %v4587_v61 = vld [vmem:[#allocation5 + $0x1a58] sm:$0xff] }
 0x51d   :  { %v3219_v31 = vmul.f32 %v3189_v18, %v11814_v44  ;;  %3726 = vmatmul.mubr.f32.gmra.mrb[38].mxu1 %v10117_v39  ;;  %v10129_v29 = vmax.f32 %v3247_v19, 0.0  ;;  %v3538_v19 = vld [vmem:[#allocation5 + $0x12f0] sm:$0xff]  ;;  %v11823_v18 = vld [vmem:[#allocation52_spill] sm:$0xff] }
 0x51e   :  { %v10126_v63 = vmax.f32 %v3248_v40, 0.0  ;;  %v3220_v2 = vmul.f32 %v3190_v8, %v11814_v44  ;;  %7615 = vmatpush1.bf16.msra.mxu1 %v7614_v26  ;;  %v3087_v1 = vpop.f32.mrb[44].mxu0  ;;  %v7624_v26 = vpack.c.bf16 %v3539_v49, %v3537_v11  ;;  %v11829_v11 = vld [vmem:[#allocation57_spill] sm:$0xff] }
 0x51f   :  { %11816 = vst [vmem:[#allocation85_spill] sm:$0xff] %v10129_v29  ;;  %v3249_v12 = vadd.f32 %v3219_v31, %v11817_v0  ;;  %v3191_v56 = vadd.f32 %v10052_v24, %v3087_v1  ;;  %v3089_v48 = vpop.f32.mrb[45].mxu0  ;;  %7617 = vmatprep.subr.bf16.mxu1 %v7616_v33  ;;  %v7626_v31 = vpack.c.bf16 %v3538_v19, %v3536_v58  ;;  %v11827_v1 = vld [vmem:[#allocation56_spill] sm:$0xff]  ;;  %v4585_v44 = vld [vmem:[#allocation5 + $0x1a48] sm:$0xff] }
 0x520   :  { %11815 = vst [vmem:[#allocation86_spill] sm:$0xff] %v10126_v63  ;;  %v3250_v59 = vadd.f32 %v3220_v2, %v11818_v35  ;;  %v3192_v62 = vadd.f32 %v10055_v14, %v3089_v48  ;;  %3731 = vmatprep.mubr.f32.mxu1 %v10126_v63  ;;  %v3540_v48 = vld [vmem:[#allocation5 + $0x1300] sm:$0xff] }
 0x521   :  { %v3221_v27 = vmul.f32 %v3191_v56, %v11819_v23  ;;  %3732 = vmatmul.mubr.f32.gmra.mrb[40].mxu1 %v10129_v29  ;;  %v10141_v53 = vmax.f32 %v3249_v12, 0.0  ;;  %v7628_v56 = vpack.c.bf16 %v3543_v13, %v3541_v25  ;;  %v3544_v19 = vld [vmem:[#allocation5 + $0x1320] sm:$0xff]  ;;  %v3549_v13 = vld [vmem:[#allocation5 + $0x1348] sm:$0xff] }
 0x522   :  { %v10138_v3 = vmax.f32 %v3250_v59, 0.0  ;;  %v3222_v22 = vmul.f32 %v3192_v62, %v11819_v23  ;;  %7619 = vmatpush1.bf16.msra.mxu1 %v7618_v6  ;;  %v3093_v20 = vpop.f32.mrb[46].mxu0  ;;  %v3545_v59 = vld [vmem:[#allocation5 + $0x1328] sm:$0xff]  ;;  %v3547_v62 = vld [vmem:[#allocation5 + $0x1338] sm:$0xff] }
 0x523   :  { %11821 = vst [vmem:[#allocation87_spill] sm:$0xff] %v10141_v53  ;;  %v3251_v57 = vadd.f32 %v3221_v27, %v11822_v36  ;;  %v3193_v9 = vadd.f32 %v10052_v24, %v3093_v20  ;;  %v3095_v30 = vpop.f32.mrb[47].mxu0  ;;  %7621 = vmatprep.subr.bf16.mxu1 %v7620_v51  ;;  %v3542_v51 = vld [vmem:[#allocation5 + $0x1310] sm:$0xff]  ;;  %v7632_v58 = vpack.c.bf16 %v3547_v62, %v3545_v59  ;;  %v11838_v62 = vld [vmem:[#allocation61_spill] sm:$0xff]  ;;  %v3955_v23 = vld [vmem:[#allocation5 + $0x1638] sm:$0xff] }
 0x524   :  { %11820 = vst [vmem:[#allocation88_spill] sm:$0xff] %v10138_v3  ;;  %v3252_v4 = vadd.f32 %v3222_v22, %v11823_v18  ;;  %v3194_v33 = vadd.f32 %v10055_v14, %v3095_v30  ;;  %3737 = vmatprep.mubr.f32.mxu1 %v10138_v3  ;;  %v3546_v18 = vld [vmem:[#allocation5 + $0x1330] sm:$0xff] }
 0x525   :  { %v3223_v40 = vmul.f32 %v3193_v9, %v11824_v7  ;;  %3738 = vmatmul.mubr.f32.gmra.mrb[42].mxu1 %v10141_v53  ;;  %v10153_v2 = vmax.f32 %v3251_v57, 0.0  ;;  %v11832_v57 = vld [vmem:[#allocation59_spill] sm:$0xff] }
 0x526   :  { %v10150_v8 = vmax.f32 %v3252_v4, 0.0  ;;  %v3224_v5 = vmul.f32 %v3194_v33, %v11824_v7  ;;  %7623 = vmatpush1.bf16.msra.mxu1 %v7622_v10  ;;  %v3099_v38 = vpop.f32.mrb[48].mxu0  ;;  %v7630_v10 = vpack.c.bf16 %v3542_v51, %v3540_v48  ;;  %v11833_v4 = vld [vmem:[#allocation58_spill] sm:$0xff] }
 0x527   :  { %11826 = vst [vmem:[#allocation89_spill] sm:$0xff] %v10153_v2  ;;  %v3253_v6 = vadd.f32 %v3223_v40, %v11827_v1  ;;  %v3195_v0 = vadd.f32 %v10052_v24, %v3099_v38  ;;  %v3101_v12 = vpop.f32.mrb[49].mxu0  ;;  %7625 = vmatprep.subr.bf16.mxu1 %v7624_v26  ;;  %v3551_v40 = vld [vmem:[#allocation5 + $0x1358] sm:$0xff]  ;;  %v3550_v59 = vld [vmem:[#allocation5 + $0x1350] sm:$0xff] }
 0x528   :  { %11825 = vst [vmem:[#allocation90_spill] sm:$0xff] %v10150_v8  ;;  %v3254_v50 = vadd.f32 %v3224_v5, %v11828_v41  ;;  %v3196_v35 = vadd.f32 %v10055_v14, %v3101_v12  ;;  %3743 = vmatprep.mubr.f32.mxu1 %v10150_v8  ;;  %v11834_v5 = vld [vmem:[#allocation60_spill] sm:$0xff]  ;;  %v4582_v7 = vld [vmem:[#allocation5 + $0x1a30] sm:$0xff] }
 0x529   :  { %v3225_v49 = vmul.f32 %v3195_v0, %v11829_v11  ;;  %3744 = vmatmul.mubr.f32.gmra.mrb[44].mxu1 %v10153_v2  ;;  %v10165_v36 = vmax.f32 %v3253_v6, 0.0  ;;  %v7634_v0 = vpack.c.bf16 %v3546_v18, %v3544_v19 }
 0x52a   :  { %v10162_v27 = vmax.f32 %v3254_v50, 0.0  ;;  %v3226_v22 = vmul.f32 %v3196_v35, %v11829_v11  ;;  %7627 = vmatpush1.bf16.msra.mxu1 %v7626_v31  ;;  %v3105_v20 = vpop.f32.mrb[50].mxu0  ;;  %v7636_v50 = vpack.c.bf16 %v3551_v40, %v3549_v13  ;;  %v3548_v35 = vld [vmem:[#allocation5 + $0x1340] sm:$0xff] }
 0x52b   :  { %11831 = vst [vmem:[#allocation92_spill] sm:$0xff] %v10165_v36  ;;  %v3255_v9 = vadd.f32 %v3225_v49, %v11832_v57  ;;  %v3197_v30 = vadd.f32 %v10052_v24, %v3105_v20  ;;  %v3107_v26 = vpop.f32.mrb[51].mxu0  ;;  %7629 = vmatprep.subr.bf16.mxu1 %v7628_v56  ;;  %v11837_v56 = vld [vmem:[#allocation62_spill] sm:$0xff]  ;;  %v11839_v57 = vld [vmem:[#allocation63_spill] sm:$0xff]  ;;  %v7638_v19 = vpack.c.bf16 %v3550_v59, %v3548_v35  ;;  %v4580_v11 = vld [vmem:[#allocation5 + $0x1a20] sm:$0xff] }
 0x52c   :  { %11830 = vst [vmem:[#allocation94_spill] sm:$0xff] %v10162_v27  ;;  %v3256_v33 = vadd.f32 %v3226_v22, %v11833_v4  ;;  %v3198_v25 = vadd.f32 %v10055_v14, %v3107_v26  ;;  %3749 = vmatprep.mubr.f32.mxu1 %v10162_v27  ;;  %v3553_v20 = vld [vmem:[#allocation5 + $0x1368] sm:$0xff]  ;;  %v7730_v45 = vpack.c.bf16 %v4582_v7, %v4580_v11  ;;  %v3335_v11 = vrot.slane %v10090_v28, 7 }
 0x52d   :  { %v3227_v38 = vmul.f32 %v3197_v30, %v11834_v5  ;;  %3750 = vmatmul.mubr.f32.gmra.mrb[46].mxu1 %v10165_v36  ;;  %v10177_v12 = vmax.f32 %v3255_v9, 0.0  ;;  %v11842_v4 = vld [vmem:[#allocation65_spill] sm:$0xff]  ;;  %v11844_v35 = vld [vmem:[#allocation66_spill] sm:$0xff] }
 0x52e   :  { %v10174_v31 = vmax.f32 %v3256_v33, 0.0  ;;  %v3228_v1 = vmul.f32 %v3198_v25, %v11834_v5  ;;  %7631 = vmatpush1.bf16.msra.mxu1 %v7630_v10  ;;  %v3111_v6 = vpop.f32.mrb[52].mxu0  ;;  %v3555_v10 = vld [vmem:[#allocation5 + $0x1378] sm:$0xff] }
 0x52f   :  { %11836 = vst [vmem:[#allocation93_spill] sm:$0xff] %v10177_v12  ;;  %v3257_v48 = vadd.f32 %v3227_v38, %v11837_v56  ;;  %v3199_v51 = vadd.f32 %v10052_v24, %v3111_v6  ;;  %v3113_v41 = vpop.f32.mrb[53].mxu0  ;;  %7633 = vmatprep.subr.bf16.mxu1 %v7632_v58  ;;  %v7640_v40 = vpack.c.bf16 %v3555_v10, %v3553_v20  ;;  %v3552_v38 = vld [vmem:[#allocation5 + $0x1360] sm:$0xff] }
 0x530   :  { %11835 = vst [vmem:[#allocation95_spill] sm:$0xff] %v10174_v31  ;;  %v3258_v49 = vadd.f32 %v3228_v1, %v11838_v62  ;;  %v3200_v22 = vadd.f32 %v10055_v14, %v3113_v41  ;;  %3755 = vmatprep.mubr.f32.mxu1 %v10174_v31  ;;  %v3554_v1 = vld [vmem:[#allocation5 + $0x1370] sm:$0xff]  ;;  %v11843_v6 = vld [vmem:[#allocation64_spill] sm:$0xff] }
 0x531   :  { %v3229_v9 = vmul.f32 %v3199_v51, %v11839_v57  ;;  %3756 = vmatmul.mubr.f32.gmra.mrb[48].mxu1 %v10177_v12  ;;  %v10189_v18 = vmax.f32 %v3257_v48, 0.0  ;;  %v3559_v41 = vld [vmem:[#allocation5 + $0x1398] sm:$0xff] }
 0x532   :  { %v10186_v30 = vmax.f32 %v3258_v49, 0.0  ;;  %v3230_v26 = vmul.f32 %v3200_v22, %v11839_v57  ;;  %7635 = vmatpush1.bf16.msra.mxu1 %v7634_v0  ;;  %v3117_v58 = vpop.f32.mrb[54].mxu0  ;;  %v3557_v0 = vld [vmem:[#allocation5 + $0x1388] sm:$0xff]  ;;  %v7642_v49 = vpack.c.bf16 %v3554_v1, %v3552_v38  ;;  %v11847_v20 = vld [vmem:[#allocation68_spill] sm:$0xff] }
 0x533   :  { %11841 = vst [vmem:[#allocation31_spill] sm:$0xff] %v10189_v18  ;;  %v3259_v33 = vadd.f32 %v3229_v9, %v11842_v4  ;;  %v3201_v25 = vadd.f32 %v10052_v24, %v3117_v58  ;;  %v3119_v13 = vpop.f32.mrb[55].mxu0  ;;  %7637 = vmatprep.subr.bf16.mxu1 %v7636_v50  ;;  %v7644_v58 = vpack.c.bf16 %v3559_v41, %v3557_v0  ;;  %v3556_v4 = vld [vmem:[#allocation5 + $0x1380] sm:$0xff]  ;;  %v11853_v57 = vld [vmem:[#allocation70_spill] sm:$0xff] }
 0x534   :  { %11840 = vst [vmem:[#allocation91_spill] sm:$0xff] %v10186_v30  ;;  %v3260_v56 = vadd.f32 %v3230_v26, %v11843_v6  ;;  %v3202_v51 = vadd.f32 %v10055_v14, %v3119_v13  ;;  %3761 = vmatprep.mubr.f32.mxu1 %v10186_v30  ;;  %v11848_v13 = vld [vmem:[#allocation67_spill] sm:$0xff]  ;;  %v11849_v38 = vld [vmem:[#allocation69_spill] sm:$0xff] }
 0x535   :  { %v3231_v48 = vmul.f32 %v3201_v25, %v11844_v35  ;;  %3762 = vmatmul.mubr.f32.gmra.mrb[50].mxu1 %v10189_v18  ;;  %v10201_v22 = vmax.f32 %v3259_v33, 0.0  ;;  %v3558_v25 = vld [vmem:[#allocation5 + $0x1390] sm:$0xff] }
 0x536   :  { %v10198_v59 = vmax.f32 %v3260_v56, 0.0  ;;  %v3232_v62 = vmul.f32 %v3202_v51, %v11844_v35  ;;  %7639 = vmatpush1.bf16.msra.mxu1 %v7638_v19  ;;  %v3123_v50 = vpop.f32.mrb[56].mxu0  ;;  %v3561_v19 = vld [vmem:[#allocation5 + $0x13a8] sm:$0xff]  ;;  %v3563_v51 = vld [vmem:[#allocation5 + $0x13b8] sm:$0xff]  ;;  %v7646_v0 = vpack.c.bf16 %v3558_v25, %v3556_v4  ;;  %v3560_v35 = vld [vmem:[#allocation5 + $0x13a0] sm:$0xff] }
 0x537   :  { %11846 = vst [vmem:[#allocation35_spill] sm:$0xff] %v10201_v22  ;;  %v3261_v10 = vadd.f32 %v3231_v48, %v11847_v20  ;;  %v3203_v9 = vadd.f32 %v10052_v24, %v3123_v50  ;;  %v3125_v26 = vpop.f32.mrb[57].mxu0  ;;  %7641 = vmatprep.subr.bf16.mxu1 %v7640_v40  ;;  %v11854_v4 = vld [vmem:[#allocation72_spill] sm:$0xff] }
 0x538   :  { %11845 = vst [vmem:[#allocation30_spill] sm:$0xff] %v10198_v59  ;;  %v3262_v6 = vadd.f32 %v3232_v62, %v11848_v13  ;;  %v3204_v56 = vadd.f32 %v10055_v14, %v3125_v26  ;;  %3767 = vmatprep.mubr.f32.mxu1 %v10198_v59  ;;  %v11852_v62 = vld [vmem:[#allocation71_spill] sm:$0xff]  ;;  %v7648_v13 = vpack.c.bf16 %v3563_v51, %v3561_v19  ;;  %v11857_v51 = vld [vmem:[#allocation74_spill] sm:$0xff] }
 0x539   :  { %v3233_v33 = vmul.f32 %v3203_v9, %v11849_v38  ;;  %3768 = vmatmul.mubr.f32.gmra.mrb[52].mxu1 %v10201_v22  ;;  %v10213_v41 = vmax.f32 %v3261_v10, 0.0  ;;  %v3562_v9 = vld [vmem:[#allocation5 + $0x13b0] sm:$0xff] }
 0x53a   :  { %v10210_v1 = vmax.f32 %v3262_v6, 0.0  ;;  %v3234_v48 = vmul.f32 %v3204_v56, %v11849_v38  ;;  %7643 = vmatpush1.bf16.msra.mxu1 %v7642_v49  ;;  %v3129_v40 = vpop.f32.mrb[58].mxu0  ;;  %v3565_v49 = vld [vmem:[#allocation5 + $0x13c8] sm:$0xff]  ;;  %v3567_v56 = vld [vmem:[#allocation5 + $0x13d8] sm:$0xff] }
 0x53b   :  { %11851 = vst [vmem:[#allocation37_spill] sm:$0xff] %v10213_v41  ;;  %v3263_v50 = vadd.f32 %v3233_v33, %v11852_v62  ;;  %v3205_v20 = vadd.f32 %v10052_v24, %v3129_v40  ;;  %v3131_v26 = vpop.f32.mrb[59].mxu0  ;;  %7645 = vmatprep.subr.bf16.mxu1 %v7644_v58  ;;  %v7650_v58 = vpack.c.bf16 %v3562_v9, %v3560_v35  ;;  %v3564_v33 = vld [vmem:[#allocation5 + $0x13c0] sm:$0xff]  ;;  %v3570_v9 = vld [vmem:[#allocation5 + $0x13f0] sm:$0xff] }
 0x53c   :  { %11850 = vst [vmem:[#allocation33_spill] sm:$0xff] %v10210_v1  ;;  %v3264_v5 = vadd.f32 %v3234_v48, %v11853_v57  ;;  %v3206_v6 = vadd.f32 %v10055_v14, %v3131_v26  ;;  %3773 = vmatprep.mubr.f32.mxu1 %v10210_v1  ;;  %v7652_v14 = vpack.c.bf16 %v3567_v56, %v3565_v49  ;;  %v3566_v48 = vld [vmem:[#allocation5 + $0x13d0] sm:$0xff]  ;;  %v11858_v40 = vld [vmem:[#allocation73_spill] sm:$0xff]  ;;  %v3571_v26 = vld [vmem:[#allocation5 + $0x13f8] sm:$0xff] }
 0x53d   :  { %v3235_v10 = vmul.f32 %v3205_v20, %v11854_v4  ;;  %3774 = vmatmul.mubr.f32.gmra.mrb[54].mxu1 %v10213_v41  ;;  %v10225_v19 = vmax.f32 %v3263_v50, 0.0  ;;  %v3569_v20 = vld [vmem:[#allocation5 + $0x13e8] sm:$0xff]  ;;  %v7654_v35 = vpack.c.bf16 %v3566_v48, %v3564_v33  ;;  %v3951_v56 = vld [vmem:[#allocation5 + $0x1618] sm:$0xff]  ;;  %v4578_v33 = vld [vmem:[#allocation5 + $0x1a10] sm:$0xff] }
 0x53e   :  { %v10222_v25 = vmax.f32 %v3264_v5, 0.0  ;;  %v3236_v24 = vmul.f32 %v3206_v6, %v11854_v4  ;;  %7647 = vmatpush1.bf16.msra.mxu1 %v7646_v0  ;;  %v7656_v50 = vpack.c.bf16 %v3571_v26, %v3569_v20  ;;  %v3328_v6 = vrot.slane %v10066_v52, 7  ;;  %v3949_v49 = vld [vmem:[#allocation5 + $0x1608] sm:$0xff] }
 0x53f   :  { %11856 = vst [vmem:[#allocation41_spill] sm:$0xff] %v10225_v19  ;;  %v3265_v57 = vadd.f32 %v3235_v10, %v11857_v51  ;;  %7649 = vmatprep.subr.bf16.mxu1 %v7648_v13  ;;  %v3568_v13 = vld [vmem:[#allocation5 + $0x13e0] sm:$0xff]  ;;  %v4577_v51 = vld [vmem:[#allocation5 + $0x1a08] sm:$0xff]  ;;  %v7660_v20 = vpack.c.bf16 %v3951_v56, %v3949_v49 }
 0x540   :  { %11855 = vst [vmem:[#allocation36_spill] sm:$0xff] %v10222_v25  ;;  %v3266_v62 = vadd.f32 %v3236_v24, %v11858_v40  ;;  %3779 = vmatprep.mubr.f32.mxu1 %v10222_v25  ;;  %v3948_v10 = vld [vmem:[#allocation5 + $0x1600] sm:$0xff]  ;;  %v3950_v24 = vld [vmem:[#allocation5 + $0x1610] sm:$0xff]  ;;  %v4579_v40 = vld [vmem:[#allocation5 + $0x1a18] sm:$0xff] }
 0x541   :  { %3780 = vmatmul.mubr.f32.gmra.mrb[56].mxu1 %v10225_v19  ;;  %v10233_v0 = vmax.f32 %v3265_v57, 0.0  ;;  %v7658_v57 = vpack.c.bf16 %v3570_v9, %v3568_v13  ;;  %v4581_v48 = vld [vmem:[#allocation5 + $0x1a28] sm:$0xff]  ;;  %v7662_v13 = vpack.c.bf16 %v3950_v24, %v3948_v10  ;;  %v4584_v9 = vld [vmem:[#allocation5 + $0x1a40] sm:$0xff]  ;;  %v4590_v10 = vld [vmem:[#allocation5 + $0x1a70] sm:$0xff] }
 0x542   :  { %v10231_v5 = vmax.f32 %v3266_v62, 0.0  ;;  %7651 = vmatpush1.bf16.msra.mxu1 %v7650_v58  ;;  %v4576_v58 = vld [vmem:[#allocation5 + $0x1a00] sm:$0xff]  ;;  %v4583_v62 = vld [vmem:[#allocation5 + $0x1a38] sm:$0xff]  ;;  %v3953_v26 = vld [vmem:[#allocation5 + $0x1628] sm:$0xff] }
 0x543   :  { %11860 = vst [vmem:[#allocation44_spill] sm:$0xff] %v10233_v0  ;;  %7653 = vmatprep.subr.bf16.mxu1 %v7652_v14  ;;  %v7724_v14 = vpack.c.bf16 %v4579_v40, %v4577_v51  ;;  %v7726_v4 = vpack.c.bf16 %v4578_v33, %v4576_v58  ;;  %v7728_v38 = vpack.c.bf16 %v4583_v62, %v4581_v48  ;;  %v4586_v51 = vld [vmem:[#allocation5 + $0x1a50] sm:$0xff]  ;;  %v3952_v56 = vld [vmem:[#allocation5 + $0x1620] sm:$0xff]  ;;  %v3957_v58 = vld [vmem:[#allocation5 + $0x1648] sm:$0xff] }
 0x544   :  { %11859 = vst [vmem:[#allocation40_spill] sm:$0xff] %v10231_v5  ;;  %3785 = vmatprep.mubr.f32.mxu1 %v10231_v5  ;;  %v7664_v49 = vpack.c.bf16 %v3955_v23, %v3953_v26  ;;  %v3954_v40 = vld [vmem:[#allocation5 + $0x1630] sm:$0xff]  ;;  %v7732_v33 = vpack.c.bf16 %v4587_v61, %v4585_v44  ;;  %v3959_v48 = vld [vmem:[#allocation5 + $0x1658] sm:$0xff]  ;;  %v4589_v62 = vld [vmem:[#allocation5 + $0x1a68] sm:$0xff] }
 0x545   :  { %3786 = vmatmul.mubr.f32.gmra.mrb[58].mxu1 %v10233_v0  ;;  %7725 = vmatprep.subr.bf16.mxu0 %v7724_v14  ;;  %v3329_v14 = vrot.slane %v10081_v15, 7  ;;  %v7666_v23 = vpack.c.bf16 %v3954_v40, %v3952_v56  ;;  %v7668_v61 = vpack.c.bf16 %v3959_v48, %v3957_v58  ;;  %v3956_v44 = vld [vmem:[#allocation5 + $0x1640] sm:$0xff]  ;;  %v3958_v24 = vld [vmem:[#allocation5 + $0x1650] sm:$0xff] }
 0x546   :  { %7655 = vmatpush1.bf16.msra.mxu1 %v7654_v35  ;;  %6807 = vmatprep.mubr.msk.f32.mxu1 %vm9248_vm2, %v3328_v6  ;;  %v3331_v35 = vrot.slane %v10078_v54, 7  ;;  %v4592_v56 = vld [vmem:[#allocation5 + $0x1a80] sm:$0xff]  ;;  %v4594_v40 = vld [vmem:[#allocation5 + $0x1a90] sm:$0xff] }
 0x547   :  { %7657 = vmatprep.subr.bf16.mxu1 %v7656_v50  ;;  %7727 = vmatpush1.bf16.msra.mxu0 %v7726_v4  ;;  %v3327_v50 = vrot.slane %v10069_v17, 7  ;;  %v4588_v4 = vld [vmem:[#allocation5 + $0x1a60] sm:$0xff]  ;;  %v3962_v58 = vld [vmem:[#allocation5 + $0x1670] sm:$0xff] }
 0x548   :  { %7729 = vmatprep.subr.bf16.mxu0 %v7728_v38  ;;  %v3332_v7 = vsel %vm243_vm1, %v3328_v6, %v3331_v35  ;;  %v7734_v38 = vpack.c.bf16 %v4586_v51, %v4584_v9  ;;  %v3333_v6 = vrot.slane %v10093_v46, 7  ;;  %v3339_v9 = vrot.slane %v10102_v16, 7 }
 0x549   :  { %v3330_v26 = vsel %vm243_vm1, %v3327_v50, %v3329_v14  ;;  %v7738_v51 = vpack.c.bf16 %v4590_v10, %v4588_v4  ;;  %v3343_v4 = vrot.slane %v10114_v37, 7  ;;  %v7742_v10 = vpack.c.bf16 %v4594_v40, %v4592_v56 }
 0x54a   :  { %7659 = vmatpush1.bf16.msra.mxu1 %v7658_v57  ;;  %v3961_v57 = vld [vmem:[#allocation5 + $0x1668] sm:$0xff]  ;;  %v3347_v56 = vrot.slane %v10126_v63, 7 }
 0x54b   :  { %7661 = vmatprep.subr.bf16.mxu1 %v7660_v20  ;;  %7731 = vmatpush1.bf16.msra.mxu0 %v7730_v45  ;;  %v7736_v20 = vpack.c.bf16 %v4591_v21, %v4589_v62  ;;  %v4595_v45 = vld [vmem:[#allocation5 + $0x1a98] sm:$0xff]  ;;  %v7672_v21 = vpack.c.bf16 %v3963_v47, %v3961_v57  ;;  %v3334_v62 = vsel %vm243_vm1, %v3329_v14, %v3333_v6  ;;  %v3964_v14 = vld [vmem:[#allocation5 + $0x1680] sm:$0xff]  ;;  %v3969_v57 = vld [vmem:[#allocation5 + $0x16a8] sm:$0xff] }
 0x54c   :  { %7733 = vmatprep.subr.bf16.mxu0 %v7732_v33  ;;  %v3965_v33 = vld [vmem:[#allocation5 + $0x1688] sm:$0xff]  ;;  %v7740_v48 = vpack.c.bf16 %v4595_v45, %v4593_v55 }
 0x54d   :  { %6809 = vmatmul.mubr.msk.f32.vlgmr.msra.gmra.mrb[30].mxu1 %vm9248_vm2, %v3327_v50  ;;  %v3960_v50 = vld [vmem:[#allocation5 + $0x1660] sm:$0xff] }
 0x54e   :  { %3862 = vmatprep.mubr.f32.mxu1 %v3332_v7  ;;  %7663 = vmatpush1.bf16.msra.mxu1 %v7662_v13  ;;  %v3336_v13 = vsel %vm243_vm1, %v3331_v35, %v3335_v11  ;;  %v3337_v35 = vrot.slane %v10105_v60, 7  ;;  %v3967_v7 = vld [vmem:[#allocation5 + $0x1698] sm:$0xff]  ;;  %v7674_v47 = vpack.c.bf16 %v3962_v58, %v3960_v50  ;;  %v4600_v50 = vld [vmem:[#allocation5 + $0x1ac0] sm:$0xff]  ;;  %v4602_v58 = vld [vmem:[#allocation5 + $0x1ad0] sm:$0xff] }
 0x54f   :  { %7665 = vmatprep.subr.bf16.mxu1 %v7664_v49  ;;  %7735 = vmatpush1.bf16.msra.mxu0 %v7734_v38  ;;  %v7670_v49 = vpack.c.bf16 %v3958_v24, %v3956_v44  ;;  %v4599_v38 = vld [vmem:[#allocation5 + $0x1ab8] sm:$0xff]  ;;  %v4598_v44 = vld [vmem:[#allocation5 + $0x1ab0] sm:$0xff]  ;;  %v7676_v55 = vpack.c.bf16 %v3967_v7, %v3965_v33  ;;  %v3973_v7 = vld [vmem:[#allocation5 + $0x16c8] sm:$0xff] }
 0x550   :  { %7737 = vmatprep.subr.bf16.mxu0 %v7736_v20  ;;  %v3966_v24 = vld [vmem:[#allocation5 + $0x1690] sm:$0xff]  ;;  %v3338_v45 = vsel %vm243_vm1, %v3333_v6, %v3337_v35  ;;  %v3968_v6 = vld [vmem:[#allocation5 + $0x16a0] sm:$0xff] }
 0x551   :  { %3863 = vmatmul.mubr.f32.gmra.mrb[32].mxu1 %v3330_v26  ;;  %v4597_v26 = vld [vmem:[#allocation5 + $0x1aa8] sm:$0xff] }
 0x552   :  { %3868 = vmatprep.mubr.f32.mxu1 %v3336_v13  ;;  %7667 = vmatpush1.bf16.msra.mxu1 %v7666_v23  ;;  %v3340_v23 = vsel %vm243_vm1, %v3335_v11, %v3339_v9  ;;  %v7744_v20 = vpack.c.bf16 %v4599_v38, %v4597_v26  ;;  %v3341_v11 = vrot.slane %v10117_v39, 7  ;;  %v3971_v13 = vld [vmem:[#allocation5 + $0x16b8] sm:$0xff] }
 0x553   :  { %7669 = vmatprep.subr.bf16.mxu1 %v7668_v61  ;;  %7739 = vmatpush1.bf16.msra.mxu0 %v7738_v51  ;;  %v4596_v61 = vld [vmem:[#allocation5 + $0x1aa0] sm:$0xff]  ;;  %v4603_v51 = vld [vmem:[#allocation5 + $0x1ad8] sm:$0xff]  ;;  %v7680_v33 = vpack.c.bf16 %v3971_v13, %v3969_v57  ;;  %v3977_v13 = vld [vmem:[#allocation5 + $0x16e8] sm:$0xff] }
 0x554   :  { %7741 = vmatprep.subr.bf16.mxu0 %v7740_v48  ;;  %v7746_v40 = vpack.c.bf16 %v4598_v44, %v4596_v61  ;;  %v3970_v48 = vld [vmem:[#allocation5 + $0x16b0] sm:$0xff]  ;;  %v3342_v38 = vsel %vm243_vm1, %v3337_v35, %v3341_v11  ;;  %v3351_v61 = vrot.slane %v10138_v3, 7  ;;  %v7750_v44 = vpack.c.bf16 %v4602_v58, %v4600_v50  ;;  %v3972_v35 = vld [vmem:[#allocation5 + $0x16c0] sm:$0xff] }
 0x555   :  { %3869 = vmatmul.mubr.f32.gmra.mrb[34].mxu1 %v3334_v62  ;;  %v4601_v62 = vld [vmem:[#allocation5 + $0x1ac8] sm:$0xff]  ;;  %v3355_v50 = vrot.slane %v10150_v8, 7 }
 0x556   :  { %3874 = vmatprep.mubr.f32.mxu1 %v3340_v23  ;;  %7671 = vmatpush1.bf16.msra.mxu1 %v7670_v49  ;;  %v3344_v49 = vsel %vm243_vm1, %v3339_v9, %v3343_v4  ;;  %v7748_v26 = vpack.c.bf16 %v4603_v51, %v4601_v62  ;;  %v3345_v9 = vrot.slane %v10129_v29, 7  ;;  %v3975_v23 = vld [vmem:[#allocation5 + $0x16d8] sm:$0xff] }
 0x557   :  { %7673 = vmatprep.subr.bf16.mxu1 %v7672_v21  ;;  %7743 = vmatpush1.bf16.msra.mxu0 %v7742_v10  ;;  %v7678_v21 = vpack.c.bf16 %v3966_v24, %v3964_v14  ;;  %v4607_v10 = vld [vmem:[#allocation5 + $0x1af8] sm:$0xff]  ;;  %v4604_v14 = vld [vmem:[#allocation5 + $0x1ae0] sm:$0xff]  ;;  %v4606_v24 = vld [vmem:[#allocation5 + $0x1af0] sm:$0xff]  ;;  %v7684_v57 = vpack.c.bf16 %v3975_v23, %v3973_v7 }
 0x558   :  { %7745 = vmatprep.subr.bf16.mxu0 %v7744_v20  ;;  %v3974_v20 = vld [vmem:[#allocation5 + $0x16d0] sm:$0xff]  ;;  %v3346_v51 = vsel %vm243_vm1, %v3341_v11, %v3345_v9  ;;  %v7754_v58 = vpack.c.bf16 %v4606_v24, %v4604_v14  ;;  %v3976_v11 = vld [vmem:[#allocation5 + $0x16e0] sm:$0xff]  ;;  %v3981_v23 = vld [vmem:[#allocation5 + $0x1708] sm:$0xff]  ;;  %v3359_v14 = vrot.slane %v10162_v27, 7 }
 0x559   :  { %3875 = vmatmul.mubr.f32.gmra.mrb[36].mxu1 %v3338_v45  ;;  %v4605_v45 = vld [vmem:[#allocation5 + $0x1ae8] sm:$0xff] }
 0x55a   :  { %3880 = vmatprep.mubr.f32.mxu1 %v3344_v49  ;;  %7675 = vmatpush1.bf16.msra.mxu1 %v7674_v47  ;;  %v3348_v47 = vsel %vm243_vm1, %v3343_v4, %v3347_v56  ;;  %v7752_v62 = vpack.c.bf16 %v4607_v10, %v4605_v45  ;;  %v3349_v4 = vrot.slane %v10141_v53, 7  ;;  %v3979_v49 = vld [vmem:[#allocation5 + $0x16f8] sm:$0xff] }
 0x55b   :  { %7677 = vmatprep.subr.bf16.mxu1 %v7676_v55  ;;  %7747 = vmatpush1.bf16.msra.mxu0 %v7746_v40  ;;  %v7682_v55 = vpack.c.bf16 %v3970_v48, %v3968_v6  ;;  %v4611_v40 = vld [vmem:[#allocation5 + $0x1b18] sm:$0xff]  ;;  %v4608_v6 = vld [vmem:[#allocation5 + $0x1b00] sm:$0xff]  ;;  %v4610_v48 = vld [vmem:[#allocation5 + $0x1b10] sm:$0xff]  ;;  %v7688_v7 = vpack.c.bf16 %v3979_v49, %v3977_v13 }
 0x55c   :  { %7749 = vmatprep.subr.bf16.mxu0 %v7748_v26  ;;  %v3978_v26 = vld [vmem:[#allocation5 + $0x16f0] sm:$0xff]  ;;  %v3350_v10 = vsel %vm243_vm1, %v3345_v9, %v3349_v4  ;;  %v7758_v24 = vpack.c.bf16 %v4610_v48, %v4608_v6  ;;  %v3980_v9 = vld [vmem:[#allocation5 + $0x1700] sm:$0xff]  ;;  %v3985_v49 = vld [vmem:[#allocation5 + $0x1728] sm:$0xff]  ;;  %v3363_v6 = vrot.slane %v10174_v31, 7 }
 0x55d   :  { %3881 = vmatmul.mubr.f32.gmra.mrb[38].mxu1 %v3342_v38  ;;  %v4609_v38 = vld [vmem:[#allocation5 + $0x1b08] sm:$0xff] }
 0x55e   :  { %3886 = vmatprep.mubr.f32.mxu1 %v3348_v47  ;;  %7679 = vmatpush1.bf16.msra.mxu1 %v7678_v21  ;;  %v3352_v21 = vsel %vm243_vm1, %v3347_v56, %v3351_v61  ;;  %v7756_v45 = vpack.c.bf16 %v4611_v40, %v4609_v38  ;;  %v3353_v56 = vrot.slane %v10153_v2, 7  ;;  %v3983_v47 = vld [vmem:[#allocation5 + $0x1718] sm:$0xff] }
 0x55f   :  { %7681 = vmatprep.subr.bf16.mxu1 %v7680_v33  ;;  %7751 = vmatpush1.bf16.msra.mxu0 %v7750_v44  ;;  %v7686_v33 = vpack.c.bf16 %v3974_v20, %v3972_v35  ;;  %v4615_v44 = vld [vmem:[#allocation5 + $0x1b38] sm:$0xff]  ;;  %v4612_v35 = vld [vmem:[#allocation5 + $0x1b20] sm:$0xff]  ;;  %v4614_v20 = vld [vmem:[#allocation5 + $0x1b30] sm:$0xff]  ;;  %v7692_v13 = vpack.c.bf16 %v3983_v47, %v3981_v23 }
 0x560   :  { %7753 = vmatprep.subr.bf16.mxu0 %v7752_v62  ;;  %v3982_v62 = vld [vmem:[#allocation5 + $0x1710] sm:$0xff]  ;;  %v3354_v40 = vsel %vm243_vm1, %v3349_v4, %v3353_v56  ;;  %v7762_v48 = vpack.c.bf16 %v4614_v20, %v4612_v35  ;;  %v3984_v4 = vld [vmem:[#allocation5 + $0x1720] sm:$0xff]  ;;  %v3989_v47 = vld [vmem:[#allocation5 + $0x1748] sm:$0xff]  ;;  %v3367_v35 = vrot.slane %v10186_v30, 7 }
 0x561   :  { %3887 = vmatmul.mubr.f32.gmra.mrb[40].mxu1 %v3346_v51  ;;  %v4613_v51 = vld [vmem:[#allocation5 + $0x1b28] sm:$0xff] }
 0x562   :  { %3892 = vmatprep.mubr.f32.mxu1 %v3352_v21  ;;  %7683 = vmatpush1.bf16.msra.mxu1 %v7682_v55  ;;  %v3356_v55 = vsel %vm243_vm1, %v3351_v61, %v3355_v50  ;;  %v7760_v38 = vpack.c.bf16 %v4615_v44, %v4613_v51  ;;  %v3357_v61 = vrot.slane %v10165_v36, 7  ;;  %v3987_v21 = vld [vmem:[#allocation5 + $0x1738] sm:$0xff] }
 0x563   :  { %7685 = vmatprep.subr.bf16.mxu1 %v7684_v57  ;;  %7755 = vmatpush1.bf16.msra.mxu0 %v7754_v58  ;;  %v7690_v57 = vpack.c.bf16 %v3978_v26, %v3976_v11  ;;  %v4619_v58 = vld [vmem:[#allocation5 + $0x1b58] sm:$0xff]  ;;  %v4616_v11 = vld [vmem:[#allocation5 + $0x1b40] sm:$0xff]  ;;  %v4618_v26 = vld [vmem:[#allocation5 + $0x1b50] sm:$0xff]  ;;  %v7696_v23 = vpack.c.bf16 %v3987_v21, %v3985_v49 }
 0x564   :  { %7757 = vmatprep.subr.bf16.mxu0 %v7756_v45  ;;  %v3986_v45 = vld [vmem:[#allocation5 + $0x1730] sm:$0xff]  ;;  %v3358_v44 = vsel %vm243_vm1, %v3353_v56, %v3357_v61  ;;  %v7766_v20 = vpack.c.bf16 %v4618_v26, %v4616_v11  ;;  %v3988_v56 = vld [vmem:[#allocation5 + $0x1740] sm:$0xff]  ;;  %v3993_v21 = vld [vmem:[#allocation5 + $0x1768] sm:$0xff]  ;;  %v3371_v11 = vrot.slane %v10198_v59, 7 }
 0x565   :  { %3893 = vmatmul.mubr.f32.gmra.mrb[42].mxu1 %v3350_v10  ;;  %v4617_v10 = vld [vmem:[#allocation5 + $0x1b48] sm:$0xff] }
 0x566   :  { %3898 = vmatprep.mubr.f32.mxu1 %v3356_v55  ;;  %7687 = vmatpush1.bf16.msra.mxu1 %v7686_v33  ;;  %v3360_v33 = vsel %vm243_vm1, %v3355_v50, %v3359_v14  ;;  %v7764_v51 = vpack.c.bf16 %v4619_v58, %v4617_v10  ;;  %v3361_v50 = vrot.slane %v10177_v12, 7  ;;  %v3991_v55 = vld [vmem:[#allocation5 + $0x1758] sm:$0xff] }
 0x567   :  { %7689 = vmatprep.subr.bf16.mxu1 %v7688_v7  ;;  %7759 = vmatpush1.bf16.msra.mxu0 %v7758_v24  ;;  %v7694_v7 = vpack.c.bf16 %v3982_v62, %v3980_v9  ;;  %v4623_v24 = vld [vmem:[#allocation5 + $0x1b78] sm:$0xff]  ;;  %v4620_v9 = vld [vmem:[#allocation5 + $0x1b60] sm:$0xff]  ;;  %v4622_v62 = vld [vmem:[#allocation5 + $0x1b70] sm:$0xff]  ;;  %v7700_v49 = vpack.c.bf16 %v3991_v55, %v3989_v47 }
 0x568   :  { %7761 = vmatprep.subr.bf16.mxu0 %v7760_v38  ;;  %v3990_v38 = vld [vmem:[#allocation5 + $0x1750] sm:$0xff]  ;;  %v3362_v58 = vsel %vm243_vm1, %v3357_v61, %v3361_v50  ;;  %v7770_v26 = vpack.c.bf16 %v4622_v62, %v4620_v9  ;;  %v3992_v61 = vld [vmem:[#allocation5 + $0x1760] sm:$0xff]  ;;  %v3997_v55 = vld [vmem:[#allocation5 + $0x1788] sm:$0xff]  ;;  %v3375_v9 = vrot.slane %v10210_v1, 7 }
 0x569   :  { %3899 = vmatmul.mubr.f32.gmra.mrb[44].mxu1 %v3354_v40  ;;  %v4621_v40 = vld [vmem:[#allocation5 + $0x1b68] sm:$0xff] }
 0x56a   :  { %3904 = vmatprep.mubr.f32.mxu1 %v3360_v33  ;;  %7691 = vmatpush1.bf16.msra.mxu1 %v7690_v57  ;;  %v3364_v57 = vsel %vm243_vm1, %v3359_v14, %v3363_v6  ;;  %v7768_v10 = vpack.c.bf16 %v4623_v24, %v4621_v40  ;;  %v3365_v14 = vrot.slane %v10189_v18, 7  ;;  %v3995_v33 = vld [vmem:[#allocation5 + $0x1778] sm:$0xff] }
 0x56b   :  { %7693 = vmatprep.subr.bf16.mxu1 %v7692_v13  ;;  %7763 = vmatpush1.bf16.msra.mxu0 %v7762_v48  ;;  %v7698_v13 = vpack.c.bf16 %v3986_v45, %v3984_v4  ;;  %v4627_v48 = vld [vmem:[#allocation5 + $0x1b98] sm:$0xff]  ;;  %v4624_v4 = vld [vmem:[#allocation5 + $0x1b80] sm:$0xff]  ;;  %v4626_v45 = vld [vmem:[#allocation5 + $0x1b90] sm:$0xff]  ;;  %v7704_v47 = vpack.c.bf16 %v3995_v33, %v3993_v21 }
 0x56c   :  { %7765 = vmatprep.subr.bf16.mxu0 %v7764_v51  ;;  %v3994_v51 = vld [vmem:[#allocation5 + $0x1770] sm:$0xff]  ;;  %v3366_v24 = vsel %vm243_vm1, %v3361_v50, %v3365_v14  ;;  %v7774_v62 = vpack.c.bf16 %v4626_v45, %v4624_v4  ;;  %v3996_v50 = vld [vmem:[#allocation5 + $0x1780] sm:$0xff] }
 0x56d   :  { %3905 = vmatmul.mubr.f32.gmra.mrb[46].mxu1 %v3358_v44  ;;  %v4625_v44 = vld [vmem:[#allocation5 + $0x1b88] sm:$0xff] }
 0x56e   :  { %3910 = vmatprep.mubr.f32.mxu1 %v3364_v57  ;;  %7695 = vmatpush1.bf16.msra.mxu1 %v7694_v7  ;;  %v3368_v7 = vsel %vm243_vm1, %v3363_v6, %v3367_v35  ;;  %v7772_v40 = vpack.c.bf16 %v4627_v48, %v4625_v44  ;;  %v3369_v6 = vrot.slane %v10201_v22, 7  ;;  %v3999_v57 = vld [vmem:[#allocation5 + $0x1798] sm:$0xff]  ;;  %v3373_v48 = vrot.slane %v10213_v41, 7 }
 0x56f   :  { %7697 = vmatprep.subr.bf16.mxu1 %v7696_v23  ;;  %7767 = vmatpush1.bf16.msra.mxu0 %v7766_v20  ;;  %v7702_v23 = vpack.c.bf16 %v3990_v38, %v3988_v56  ;;  %v4631_v20 = vld [vmem:[#allocation5 + $0x1bb8] sm:$0xff]  ;;  %v4628_v56 = vld [vmem:[#allocation5 + $0x1ba0] sm:$0xff]  ;;  %v4630_v38 = vld [vmem:[#allocation5 + $0x1bb0] sm:$0xff]  ;;  %v7708_v21 = vpack.c.bf16 %v3999_v57, %v3997_v55  ;;  %v3377_v55 = vrot.slane %v10225_v19, 7  ;;  %v3383_v57 = vrot.slane %v10231_v5, 7 }
 0x570   :  { %7769 = vmatprep.subr.bf16.mxu0 %v7768_v10  ;;  %v3998_v10 = vld [vmem:[#allocation5 + $0x1790] sm:$0xff]  ;;  %v3370_v44 = vsel %vm243_vm1, %v3365_v14, %v3369_v6  ;;  %v7778_v4 = vpack.c.bf16 %v4630_v38, %v4628_v56  ;;  %v3374_v14 = vsel %vm243_vm1, %v3369_v6, %v3373_v48  ;;  %v3381_v6 = vrot.slane %v10233_v0, 7  ;;  %v4009_v56 = vld [vmem:[#allocation5 + $0x17e8] sm:$0xff]  ;;  %v4011_v38 = vld [vmem:[#allocation5 + $0x17f8] sm:$0xff] }
 0x571   :  { %3911 = vmatmul.mubr.f32.gmra.mrb[48].mxu1 %v3362_v58  ;;  %v4629_v58 = vld [vmem:[#allocation5 + $0x1ba8] sm:$0xff]  ;;  %v7710_v45 = vpack.c.bf16 %v3998_v10, %v3996_v50  ;;  %v3420_v10 = vrot.slane %v10066_v52, 1 }
 0x572   :  { %3916 = vmatprep.mubr.f32.mxu1 %v3368_v7  ;;  %7699 = vmatpush1.bf16.msra.mxu1 %v7698_v13  ;;  %v3372_v13 = vsel %vm243_vm1, %v3367_v35, %v3371_v11  ;;  %v7776_v33 = vpack.c.bf16 %v4631_v20, %v4629_v58  ;;  %v4001_v35 = vld [vmem:[#allocation5 + $0x17a8] sm:$0xff]  ;;  %v4003_v7 = vld [vmem:[#allocation5 + $0x17b8] sm:$0xff] }
 0x573   :  { %7701 = vmatprep.subr.bf16.mxu1 %v7700_v49  ;;  %7771 = vmatpush1.bf16.msra.mxu0 %v7770_v26  ;;  %v7706_v49 = vpack.c.bf16 %v3994_v51, %v3992_v61  ;;  %v3376_v26 = vsel %vm243_vm1, %v3371_v11, %v3375_v9  ;;  %v4000_v61 = vld [vmem:[#allocation5 + $0x17a0] sm:$0xff]  ;;  %v4002_v51 = vld [vmem:[#allocation5 + $0x17b0] sm:$0xff] }
 0x574   :  { %7773 = vmatprep.subr.bf16.mxu0 %v7772_v40  ;;  %v4005_v40 = vld [vmem:[#allocation5 + $0x17c8] sm:$0xff]  ;;  %v7714_v58 = vpack.c.bf16 %v4002_v51, %v4000_v61  ;;  %v3423_v61 = vrot.slane %v10093_v46, 1 }
 0x575   :  { %3917 = vmatmul.mubr.f32.gmra.mrb[50].mxu1 %v3366_v24  ;;  %v4007_v24 = vld [vmem:[#allocation5 + $0x17d8] sm:$0xff]  ;;  %v4548_v46 = vld [vmem:[#allocation5 + $0x1928] sm:$0xff] }
 0x576   :  { %3922 = vmatprep.mubr.f32.mxu1 %v3372_v13  ;;  %7703 = vmatpush1.bf16.msra.mxu1 %v7702_v23  ;;  %v3379_v23 = vrot.slane %v10222_v25, 7  ;;  %v7716_v20 = vpack.c.bf16 %v4007_v24, %v4005_v40  ;;  %v4004_v13 = vld [vmem:[#allocation5 + $0x17c0] sm:$0xff]  ;;  %v3427_v40 = vrot.slane %v10105_v60, 1 }
 0x577   :  { %7705 = vmatprep.subr.bf16.mxu1 %v7704_v47  ;;  %7775 = vmatpush1.bf16.msra.mxu0 %v7774_v62  ;;  %v7712_v47 = vpack.c.bf16 %v4003_v7, %v4001_v35  ;;  %v4006_v62 = vld [vmem:[#allocation5 + $0x17d0] sm:$0xff] }
 0x578   :  { %7777 = vmatprep.subr.bf16.mxu0 %v7776_v33  ;;  %v3380_v11 = vsel %vm243_vm1, %v3375_v9, %v3379_v23  ;;  %v3421_v9 = vrot.slane %v10078_v54, 1  ;;  %v7718_v50 = vpack.c.bf16 %v4006_v62, %v4004_v13  ;;  %v7720_v33 = vpack.c.bf16 %v4011_v38, %v4009_v56  ;;  %v4010_v35 = vld [vmem:[#allocation5 + $0x17f0] sm:$0xff] }
 0x579   :  { %3923 = vmatmul.mubr.f32.gmra.mrb[52].mxu1 %v3370_v44  ;;  %v4008_v44 = vld [vmem:[#allocation5 + $0x17e0] sm:$0xff]  ;;  %v3437_v13 = vrot.slane %v10126_v63, 1  ;;  %v3441_v56 = vrot.slane %v10138_v3, 1 }
 0x57a   :  { %3928 = vmatprep.mubr.f32.mxu1 %v3376_v26  ;;  %7707 = vmatpush1.bf16.msra.mxu1 %v7706_v49  ;;  %v3378_v49 = vsel %vm243_vm1, %v3373_v48, %v3377_v55  ;;  %v3382_v48 = vsel %vm243_vm1, %v3377_v55, %v3381_v6  ;;  %v3422_v7 = vsel %vm334_vm0, %v3420_v10, %v3421_v9  ;;  %v4535_v63 = vld [vmem:[#allocation5 + $0x18c0] sm:$0xff] }
 0x57b   :  { %7709 = vmatprep.subr.bf16.mxu1 %v7708_v21  ;;  %7779 = vmatpush1.bf16.msra.mxu0 %v7778_v4  ;;  %v3384_v21 = vsel %vm243_vm1, %v3379_v23, %v3383_v57  ;;  %v7722_v26 = vpack.c.bf16 %v4010_v35, %v4008_v44  ;;  %v3418_v23 = vrot.slane %v10081_v15, 1  ;;  %v3425_v4 = vrot.slane %v10090_v28, 1  ;;  %v4543_v28 = vld [vmem:[#allocation5 + $0x1900] sm:$0xff] }
 0x57c   :  { %v3428_v57 = vsel %vm334_vm0, %v3423_v61, %v3427_v40  ;;  %v3449_v35 = vrot.slane %v10162_v27, 1  ;;  %v4547_v15 = vld [vmem:[#allocation5 + $0x1920] sm:$0xff] }
 0x57d   :  { %3929 = vmatmul.mubr.f32.gmra.mrb[54].mxu1 %v3374_v14  ;;  %v3426_v51 = vsel %vm334_vm0, %v3421_v9, %v3425_v4  ;;  %v3429_v14 = vrot.slane %v10102_v16, 1  ;;  %v3424_v55 = vsel %vm334_vm0, %v3418_v23, %v3423_v61  ;;  %v3442_v9 = vsel %vm334_vm0, %v3437_v13, %v3441_v56  ;;  %v4544_v16 = vld [vmem:[#allocation5 + $0x1908] sm:$0xff] }
 0x57e   :  { %3934 = vmatprep.mubr.f32.mxu1 %v3380_v11  ;;  %7711 = vmatpush1.bf16.msra.mxu1 %v7710_v45  ;;  %v3417_v45 = vrot.slane %v10069_v17, 1  ;;  %v3433_v11 = vrot.slane %v10114_v37, 1  ;;  %v3457_v61 = vrot.slane %v10186_v30, 1  ;;  %v4527_v30 = vld [vmem:[#allocation5 + $0x1880] sm:$0xff] }
 0x57f   :  { %7713 = vmatprep.subr.bf16.mxu1 %v7712_v47  ;;  %v3430_v24 = vsel %vm334_vm0, %v3425_v4, %v3429_v14 }
 0x580   :  { %v3419_v47 = vsel %vm334_vm0, %v3417_v45, %v3418_v23  ;;  %v3438_v6 = vsel %vm334_vm0, %v3433_v11, %v3437_v13  ;;  %v3453_v23 = vrot.slane %v10174_v31, 1  ;;  %v3451_v45 = vrot.slane %v10177_v12, 1  ;;  %v4532_v31 = vld [vmem:[#allocation5 + $0x18a8] sm:$0xff] }
 0x581   :  { %3935 = vmatmul.mubr.f32.gmra.mrb[56].mxu1 %v3378_v49  ;;  %v3435_v49 = vrot.slane %v10129_v29, 1  ;;  %v3463_v13 = vrot.slane %v10213_v41, 1 }
 0x582   :  { %3940 = vmatprep.mubr.f32.mxu1 %v3384_v21  ;;  %7715 = vmatpush1.bf16.msra.mxu1 %v7714_v58  ;;  %v3431_v58 = vrot.slane %v10117_v39, 1  ;;  %v3439_v21 = vrot.slane %v10141_v53, 1 }
 0x583   :  { %7717 = vmatprep.subr.bf16.mxu1 %v7716_v20  ;;  %v3434_v20 = vsel %vm334_vm0, %v3429_v14, %v3433_v11  ;;  %v3455_v14 = vrot.slane %v10189_v18, 1  ;;  %v3459_v11 = vrot.slane %v10201_v22, 1 }
 0x584   :  { %v3432_v62 = vsel %vm334_vm0, %v3427_v40, %v3431_v58  ;;  %v3436_v38 = vsel %vm334_vm0, %v3431_v58, %v3435_v49  ;;  %v3440_v10 = vsel %vm334_vm0, %v3435_v49, %v3439_v21  ;;  %v3461_v40 = vrot.slane %v10198_v59, 1 }
 0x585   :  { %3941 = vmatmul.mubr.f32.gmra.mrb[58].mxu1 %v3382_v48  ;;  %v3465_v58 = vrot.slane %v10210_v1, 1  ;;  %v3469_v49 = vrot.slane %v10222_v25, 1  ;;  %v4530_v1 = vld [vmem:[#allocation5 + $0x1898] sm:$0xff] }
 0x586   :  { %7719 = vmatpush1.bf16.msra.mxu1 %v7718_v50  ;;  %4076 = vmatprep.mubr.f32.mxu1 %v3422_v7  ;;  %v3445_v50 = vrot.slane %v10150_v8, 1  ;;  %v3447_v7 = vrot.slane %v10165_v36, 1  ;;  %v4531_v36 = vld [vmem:[#allocation5 + $0x18a0] sm:$0xff] }
 0x587   :  { %7721 = vmatprep.subr.bf16.mxu1 %v7720_v33  ;;  %v3443_v33 = vrot.slane %v10153_v2, 1  ;;  %v4536_v2 = vld [vmem:[#allocation5 + $0x18c8] sm:$0xff] }
 0x588   :  { %v3446_v44 = vsel %vm334_vm0, %v3441_v56, %v3445_v50  ;;  %v3467_v56 = vrot.slane %v10225_v19, 1 }
 0x589   :  { %v3444_v48 = vsel %vm334_vm0, %v3439_v21, %v3443_v33  ;;  %v3448_v4 = vsel %vm334_vm0, %v3443_v33, %v3447_v7  ;;  %v3473_v21 = vrot.slane %v10231_v5, 1 }
 0x58a   :  { %7723 = vmatpush1.bf16.msra.mxu1 %v7722_v26  ;;  %v3450_v26 = vsel %vm334_vm0, %v3445_v50, %v3449_v35  ;;  %v3471_v50 = vrot.slane %v10233_v0, 1 }
 0x58c   :  { %v3472_v33 = vsel %vm334_vm0, %v3467_v56, %v3471_v50 }
 0x58d   :  { %4077 = vmatmul.mubr.f32.vlgmr.msra.gmra.mrb[30].mxu1 %v3419_v47  ;;  %v3454_v47 = vsel %vm334_vm0, %v3449_v35, %v3453_v23  ;;  %v4635_v35 = vld [vmem:[#allocation5 + $0x1bd8] sm:$0xff] }
 0x58e   :  { %4082 = vmatprep.mubr.f32.mxu1 %v3426_v51  ;;  %v3452_v51 = vsel %vm334_vm0, %v3447_v7, %v3451_v45  ;;  %v4632_v7 = vld [vmem:[#allocation5 + $0x1bc0] sm:$0xff] }
 0x591   :  { %4083 = vmatmul.mubr.f32.gmra.mrb[32].mxu1 %v3424_v55  ;;  %v3458_v55 = vsel %vm334_vm0, %v3453_v23, %v3457_v61 }
 0x592   :  { %4088 = vmatprep.mubr.f32.mxu1 %v3430_v24  ;;  %v3456_v24 = vsel %vm334_vm0, %v3451_v45, %v3455_v14  ;;  %v4639_v45 = vld [vmem:[#allocation5 + $0x1bf8] sm:$0xff] }
 0x595   :  { %4089 = vmatmul.mubr.f32.gmra.mrb[34].mxu1 %v3428_v57  ;;  %v3462_v57 = vsel %vm334_vm0, %v3457_v61, %v3461_v40  ;;  %v4636_v61 = vld [vmem:[#allocation5 + $0x1be0] sm:$0xff] }
 0x596   :  { %4094 = vmatprep.mubr.f32.mxu1 %v3434_v20  ;;  %v3460_v20 = vsel %vm334_vm0, %v3455_v14, %v3459_v11 }
 0x599   :  { %4095 = vmatmul.mubr.f32.gmra.mrb[36].mxu1 %v3432_v62  ;;  %v3466_v62 = vsel %vm334_vm0, %v3461_v40, %v3465_v58  ;;  %v4514_v40 = vld [vmem:[#allocation5 + $0x1818] sm:$0xff] }
 0x59a   :  { %4100 = vmatprep.mubr.f32.mxu1 %v3438_v6  ;;  %v3464_v6 = vsel %vm334_vm0, %v3459_v11, %v3463_v13  ;;  %v4198_v11 = vld [vmem:[#allocation7 + $0x3] ss:$8 sm:$0x3] }
 0x59d   :  { %4101 = vmatmul.mubr.f32.gmra.mrb[38].mxu1 %v3436_v38  ;;  %v3470_v38 = vsel %vm334_vm0, %v3465_v58, %v3469_v49  ;;  %v10363_v58 = vrot.slane %v4198_v11, %v11785_v43  ;;  %v4556_v43 = vld [vmem:[#allocation5 + $0x1968] sm:$0xff] }
 0x59e   :  { %4106 = vmatprep.mubr.f32.mxu1 %v3442_v9  ;;  %v3468_v9 = vsel %vm334_vm0, %v3463_v13, %v3467_v56  ;;  %v4511_v56 = vld [vmem:[#allocation5 + $0x1800] sm:$0xff] }
 0x5a1   :  { %4107 = vmatmul.mubr.f32.gmra.mrb[40].mxu1 %v3440_v10  ;;  %v3474_v10 = vsel %vm334_vm0, %v3469_v49, %v3473_v21 }
 0x5a2   :  { %4112 = vmatprep.mubr.f32.mxu1 %v3446_v44  ;;  %v4633_v44 = vld [vmem:[#allocation5 + $0x1bc8] sm:$0xff] }
 0x5a5   :  { %4113 = vmatmul.mubr.f32.gmra.mrb[42].mxu1 %v3444_v48  ;;  %v7780_v48 = vpack.c.bf16 %v4635_v35, %v4633_v44  ;;  %v4515_v35 = vld [vmem:[#allocation5 + $0x1820] sm:$0xff] }
 0x5a6   :  { %4118 = vmatprep.mubr.f32.mxu1 %v3450_v26  ;;  %v4634_v26 = vld [vmem:[#allocation5 + $0x1bd0] sm:$0xff] }
 0x5a7   :  { %v7782_v23 = vpack.c.bf16 %v4634_v26, %v4632_v7  ;;  %7781 = vmatprep.subr.bf16.mxu0 %v7780_v48  ;;  %v4517_v48 = vld [vmem:[#allocation5 + $0x1830] sm:$0xff]  ;;  %v4520_v7 = vld [vmem:[#allocation5 + $0x1848] sm:$0xff] }
 0x5a9   :  { %4119 = vmatmul.mubr.f32.gmra.mrb[44].mxu1 %v3448_v4  ;;  %7783 = vmatpush1.bf16.msra.mxu0 %v7782_v23  ;;  %v4637_v4 = vld [vmem:[#allocation5 + $0x1be8] sm:$0xff] }
 0x5aa   :  { %4124 = vmatprep.mubr.f32.mxu1 %v3454_v47  ;;  %v7784_v47 = vpack.c.bf16 %v4639_v45, %v4637_v4 }
 0x5ac   :  { %7785 = vmatprep.subr.bf16.mxu0 %v7784_v47  ;;  %v4522_v47 = vld [vmem:[#allocation5 + $0x1858] sm:$0xff] }
 0x5ad   :  { %4125 = vmatmul.mubr.f32.gmra.mrb[46].mxu1 %v3452_v51  ;;  %v4638_v51 = vld [vmem:[#allocation5 + $0x1bf0] sm:$0xff] }
 0x5ae   :  { %4130 = vmatprep.mubr.f32.mxu1 %v3458_v55  ;;  %v7786_v14 = vpack.c.bf16 %v4638_v51, %v4636_v61  ;;  %v4512_v55 = vld [vmem:[#allocation5 + $0x1808] sm:$0xff]  ;;  %v10375_v61 = vld [vmem:[#allocation5 + $0x1840] sm:$0xff]  ;;  %v10377_v51 = vld [vmem:[#allocation5 + $0x1850] sm:$0xff] }
 0x5b0   :  { %7787 = vmatpush1.bf16.msra.mxu0 %v7786_v14 }
 0x5b1   :  { %4131 = vmatmul.mubr.f32.gmra.mrb[48].mxu1 %v3456_v24  ;;  %v7788_v24 = vpack.c.bf16 %v4514_v40, %v4512_v55 }
 0x5b2   :  { %4136 = vmatprep.mubr.f32.mxu1 %v3462_v57  ;;  %v10360_v57 = vrot.slane %v4198_v11, %v11784_v42  ;;  %v7794_v11 = vpack.c.bf16 %v4517_v48, %v4515_v35 }
 0x5b3   :  { %7789 = vmatprep.subr.bf16.mxu0 %v7788_v24 }
 0x5b5   :  { %4137 = vmatmul.mubr.f32.gmra.mrb[50].mxu1 %v3460_v20 }
 0x5b6   :  { %4142 = vmatprep.mubr.f32.mxu1 %v3466_v62 }
 0x5b9   :  { %4143 = vmatmul.mubr.f32.gmra.mrb[52].mxu1 %v3464_v6 }
 0x5ba   :  { %4148 = vmatprep.mubr.f32.mxu1 %v3470_v38  ;;  %v4513_v38 = vld [vmem:[#allocation5 + $0x1810] sm:$0xff] }
 0x5bb   :  { %v7790_v45 = vpack.c.bf16 %v4513_v38, %v4511_v56 }
 0x5bd   :  { %4149 = vmatmul.mubr.f32.gmra.mrb[54].mxu1 %v3468_v9 }
 0x5be   :  { %4154 = vmatprep.mubr.f32.mxu1 %v3474_v10  ;;  %v4518_v10 = vld [vmem:[#allocation5 + $0x1838] sm:$0xff] }
 0x5c1   :  { %4155 = vmatmul.mubr.f32.gmra.mrb[56].mxu1 %v3472_v33 }
 0x5c2   :  { %6810 = vmatprep.mubr.msk.f32.mxu1 %vm334_vm0, %v3473_v21 }
 0x5c5   :  { %6811 = vmatmul.mubr.msk.f32.gmra.mrb[58].mxu1 %vm334_vm0, %v3471_v50  ;;  %v4516_v50 = vld [vmem:[#allocation5 + $0x1828] sm:$0xff] }
 0x5c6   :  { %v7792_v55 = vpack.c.bf16 %v4518_v10, %v4516_v50  ;;  %v11861_v10 = vld [vmem:[#allocation34_spill] sm:$0xff] }
 0x660   :  { %v4078_v20 = vpop.f32.mrb[30].mxu1 }
 0x661   :  { %v4210_v13 = vadd.f32 %v10360_v57, %v4078_v20  ;;  %v4080_v62 = vpop.f32.mrb[31].mxu1 }
 0x662   :  { %v4211_v49 = vadd.f32 %v10363_v58, %v4080_v62 }
 0x663   :  { %v4240_v6 = vmul.f32 %v4210_v13, %v11786_v34 }
 0x664   :  { %v4241_v21 = vmul.f32 %v4211_v49, %v11786_v34  ;;  %v4084_v9 = vpop.f32.mrb[32].mxu1  ;;  %v7796_v49 = vpack.c.bf16 %v4522_v47, %v4520_v7  ;;  %v4526_v47 = vld [vmem:[#allocation5 + $0x1878] sm:$0xff]  ;;  %v4551_v34 = vld [vmem:[#allocation5 + $0x1940] sm:$0xff] }
 0x665   :  { %v4212_v33 = vadd.f32 %v10360_v57, %v4084_v9  ;;  %v4086_v44 = vpop.f32.mrb[33].mxu1  ;;  %v10370_v26 = vmax.f32 %v4240_v6, 0.0  ;;  %v7798_v6 = vpack.c.bf16 %v10377_v51, %v10375_v61 }
 0x666   :  { %v10372_v23 = vmax.f32 %v4241_v21, 0.0  ;;  %v4213_v4 = vadd.f32 %v10363_v58, %v4086_v44 }
 0x667   :  { %v4242_v14 = vmul.f32 %v4212_v33, %v11789_v32  ;;  %v11580_v56 = vrot.slane %v10370_v26, 7  ;;  %v4420_v38 = vrot.slane %v10370_v26, 1 }
 0x668   :  { %v4243_v40 = vmul.f32 %v4213_v4, %v11789_v32  ;;  %v4090_v24 = vpop.f32.mrb[34].mxu1  ;;  %4704 = vmatprep.mubr.f32.mxu0 %v10372_v23  ;;  %v4524_v4 = vld [vmem:[#allocation5 + $0x1868] sm:$0xff]  ;;  %v4423_v51 = vrot.slane %v10372_v23, 1 }
 0x669   :  { %v4272_v20 = vmax.f32 %v4242_v14, 0.0  ;;  %v4214_v13 = vadd.f32 %v10360_v57, %v4090_v24  ;;  %v4092_v62 = vpop.f32.mrb[35].mxu1  ;;  %4705 = vmatmul.mubr.f32.vlgmr.msra.gmra.mrb[60].mxu0 %v10370_v26  ;;  %v4552_v32 = vld [vmem:[#allocation5 + $0x1948] sm:$0xff] }
 0x66a   :  { %v4273_v21 = vmax.f32 %v4243_v40, 0.0  ;;  %v4215_v9 = vadd.f32 %v10363_v58, %v4092_v62  ;;  %7791 = vmatpush1.bf16.msra.mxu0 %v7790_v45 }
 0x66b   :  { %v4421_v50 = vrot.slane %v4272_v20, 1  ;;  %v4244_v33 = vmul.f32 %v4214_v13, %v11861_v10  ;;  %7793 = vmatprep.subr.bf16.mxu0 %v7792_v55  ;;  %v4332_v35 = vrot.slane %v4272_v20, 7  ;;  %v4523_v13 = vld [vmem:[#allocation5 + $0x1860] sm:$0xff]  ;;  %v4525_v55 = vld [vmem:[#allocation5 + $0x1870] sm:$0xff] }
 0x66c   :  { %v4245_v48 = vmul.f32 %v4215_v9, %v11861_v10  ;;  %v4096_v7 = vpop.f32.mrb[36].mxu1  ;;  %4710 = vmatprep.mubr.f32.mxu0 %v4273_v21  ;;  %v4334_v61 = vrot.slane %v4273_v21, 7  ;;  %v4424_v14 = vrot.slane %v4273_v21, 1  ;;  %v11862_v21 = vrot.slane %v10372_v23, 7 }
 0x66d   :  { %v4274_v40 = vmax.f32 %v4244_v33, 0.0  ;;  %v4216_v45 = vadd.f32 %v10360_v57, %v4096_v7  ;;  %v4098_v24 = vpop.f32.mrb[37].mxu1  ;;  %4711 = vmatmul.mubr.f32.gmra.mrb[62].mxu0 %v4272_v20  ;;  %v10397_v62 = vsel %vm243_vm1, %v11580_v56, %v4332_v35  ;;  %v10400_v9 = vsel %vm334_vm0, %v4420_v38, %v4421_v50  ;;  %v11863_v7 = vld [vmem:[#allocation38_spill] sm:$0xff] }
 0x66e   :  { %v4275_v44 = vmax.f32 %v4245_v48, 0.0  ;;  %v4217_v5 = vadd.f32 %v10363_v58, %v4098_v24  ;;  %7795 = vmatpush1.bf16.msra.mxu0 %v7794_v11  ;;  %v10406_v33 = vsel %vm243_vm1, %v11862_v21, %v4334_v61  ;;  %v10409_v20 = vsel %vm334_vm0, %v4423_v51, %v4424_v14  ;;  %v4528_v11 = vld [vmem:[#allocation5 + $0x1888] sm:$0xff] }
 0x66f   :  { %v4246_v0 = vmul.f32 %v4216_v45, %v11863_v7  ;;  %7797 = vmatprep.subr.bf16.mxu0 %v7796_v49  ;;  %v7800_v56 = vpack.c.bf16 %v4526_v47, %v4524_v4  ;;  %v4336_v25 = vrot.slane %v4274_v40, 7  ;;  %v4426_v19 = vrot.slane %v4274_v40, 1  ;;  %v4529_v45 = vld [vmem:[#allocation5 + $0x1890] sm:$0xff] }
 0x670   :  { %v4247_v38 = vmul.f32 %v4217_v5, %v11863_v7  ;;  %v4102_v48 = vpop.f32.mrb[38].mxu1  ;;  %4716 = vmatprep.mubr.f32.mxu0 %v4275_v44  ;;  %v7802_v24 = vpack.c.bf16 %v4525_v55, %v4523_v13  ;;  %v4338_v41 = vrot.slane %v4275_v44, 7  ;;  %v4428_v59 = vrot.slane %v4275_v44, 1  ;;  %v11864_v44 = vld [vmem:[#allocation42_spill] sm:$0xff] }
 0x671   :  { %v4276_v21 = vmax.f32 %v4246_v0, 0.0  ;;  %v4218_v22 = vadd.f32 %v10360_v57, %v4102_v48  ;;  %v4104_v51 = vpop.f32.mrb[39].mxu1  ;;  %4717 = vmatmul.mubr.f32.gmra.mrb[64].mxu0 %v4274_v40  ;;  %v10415_v49 = vsel %vm243_vm1, %v4332_v35, %v4336_v25  ;;  %v10418_v4 = vsel %vm334_vm0, %v4421_v50, %v4426_v19 }
 0x672   :  { %v4277_v5 = vmax.f32 %v4247_v38, 0.0  ;;  %v4219_v47 = vadd.f32 %v10363_v58, %v4104_v51  ;;  %7799 = vmatpush1.bf16.msra.mxu0 %v7798_v6  ;;  %v10422_v13 = vsel %vm243_vm1, %v4334_v61, %v4338_v41  ;;  %v10425_v0 = vsel %vm334_vm0, %v4424_v14, %v4428_v59  ;;  %v4534_v51 = vld [vmem:[#allocation5 + $0x18b8] sm:$0xff] }
 0x673   :  { %v4248_v40 = vmul.f32 %v4218_v22, %v11864_v44  ;;  %7801 = vmatprep.subr.bf16.mxu0 %v7800_v56  ;;  %v7804_v55 = vpack.c.bf16 %v4530_v1, %v4528_v11  ;;  %v4340_v48 = vrot.slane %v4276_v21, 7  ;;  %v4430_v35 = vrot.slane %v4276_v21, 1  ;;  %v4533_v22 = vld [vmem:[#allocation5 + $0x18b0] sm:$0xff] }
 0x674   :  { %v4249_v18 = vmul.f32 %v4219_v47, %v11864_v44  ;;  %v4108_v50 = vpop.f32.mrb[40].mxu1  ;;  %4722 = vmatprep.mubr.f32.mxu0 %v4277_v5  ;;  %v7806_v38 = vpack.c.bf16 %v4529_v45, %v4527_v30  ;;  %v4342_v6 = vrot.slane %v4277_v5, 7  ;;  %v4432_v12 = vrot.slane %v4277_v5, 1  ;;  %v11865_v47 = vld [vmem:[#allocation45_spill] sm:$0xff] }
 0x675   :  { %v4278_v61 = vmax.f32 %v4248_v40, 0.0  ;;  %v4220_v27 = vadd.f32 %v10360_v57, %v4108_v50  ;;  %v4110_v14 = vpop.f32.mrb[41].mxu1  ;;  %4723 = vmatmul.mubr.f32.gmra.mrb[66].mxu0 %v4276_v21  ;;  %v10431_v1 = vsel %vm243_vm1, %v4336_v25, %v4340_v48  ;;  %v10434_v56 = vsel %vm334_vm0, %v4426_v19, %v4430_v35  ;;  %v4539_v44 = vld [vmem:[#allocation5 + $0x18e0] sm:$0xff] }
 0x676   :  { %v4279_v11 = vmax.f32 %v4249_v18, 0.0  ;;  %v4221_v30 = vadd.f32 %v10363_v58, %v4110_v14  ;;  %7803 = vmatpush1.bf16.msra.mxu0 %v7802_v24  ;;  %v10438_v45 = vsel %vm243_vm1, %v4338_v41, %v4342_v6  ;;  %v10441_v5 = vsel %vm334_vm0, %v4428_v59, %v4432_v12  ;;  %v4538_v14 = vld [vmem:[#allocation5 + $0x18d8] sm:$0xff] }
 0x677   :  { %v4250_v21 = vmul.f32 %v4220_v27, %v11865_v47  ;;  %7805 = vmatprep.subr.bf16.mxu0 %v7804_v55  ;;  %v7808_v40 = vpack.c.bf16 %v4534_v51, %v4532_v31  ;;  %v4344_v50 = vrot.slane %v4278_v61, 7  ;;  %v4434_v25 = vrot.slane %v4278_v61, 1  ;;  %v4537_v27 = vld [vmem:[#allocation5 + $0x18d0] sm:$0xff] }
 0x678   :  { %v4251_v8 = vmul.f32 %v4221_v30, %v11865_v47  ;;  %v4114_v19 = vpop.f32.mrb[42].mxu1  ;;  %4728 = vmatprep.mubr.f32.mxu0 %v4279_v11  ;;  %v7810_v18 = vpack.c.bf16 %v4533_v22, %v4531_v36  ;;  %v4346_v24 = vrot.slane %v4279_v11, 7  ;;  %v4436_v3 = vrot.slane %v4279_v11, 1  ;;  %v11866_v30 = vld [vmem:[#allocation48_spill] sm:$0xff]  ;;  %v4540_v47 = vld [vmem:[#allocation5 + $0x18e8] sm:$0xff] }
 0x679   :  { %v4280_v41 = vmax.f32 %v4250_v21, 0.0  ;;  %v4222_v53 = vadd.f32 %v10360_v57, %v4114_v19  ;;  %v4116_v59 = vpop.f32.mrb[43].mxu1  ;;  %4729 = vmatmul.mubr.f32.gmra.mrb[68].mxu0 %v4278_v61  ;;  %v10447_v31 = vsel %vm243_vm1, %v4340_v48, %v4344_v50  ;;  %v10450_v55 = vsel %vm334_vm0, %v4430_v35, %v4434_v25 }
 0x67a   :  { %v4281_v51 = vmax.f32 %v4251_v8, 0.0  ;;  %v4223_v36 = vadd.f32 %v10363_v58, %v4116_v59  ;;  %7807 = vmatpush1.bf16.msra.mxu0 %v7806_v38  ;;  %v10454_v22 = vsel %vm243_vm1, %v4342_v6, %v4346_v24  ;;  %v10457_v11 = vsel %vm334_vm0, %v4432_v12, %v4436_v3  ;;  %v4542_v59 = vld [vmem:[#allocation5 + $0x18f8] sm:$0xff] }
 0x67b   :  { %v4252_v61 = vmul.f32 %v4222_v53, %v11866_v30  ;;  %7809 = vmatprep.subr.bf16.mxu0 %v7808_v40  ;;  %v7812_v21 = vpack.c.bf16 %v4538_v14, %v4536_v2  ;;  %v4348_v19 = vrot.slane %v4280_v41, 7  ;;  %v4438_v48 = vrot.slane %v4280_v41, 1  ;;  %v4541_v53 = vld [vmem:[#allocation5 + $0x18f0] sm:$0xff] }
 0x67c   :  { %v4253_v29 = vmul.f32 %v4223_v36, %v11866_v30  ;;  %v4120_v35 = vpop.f32.mrb[44].mxu1  ;;  %4734 = vmatprep.mubr.f32.mxu0 %v4281_v51  ;;  %v7814_v8 = vpack.c.bf16 %v4537_v27, %v4535_v63  ;;  %v4350_v38 = vrot.slane %v4281_v51, 7  ;;  %v4440_v37 = vrot.slane %v4281_v51, 1  ;;  %v11869_v36 = vld [vmem:[#allocation51_spill] sm:$0xff] }
 0x67d   :  { %v4282_v6 = vmax.f32 %v4252_v61, 0.0  ;;  %v4224_v39 = vadd.f32 %v10360_v57, %v4120_v35  ;;  %v4122_v12 = vpop.f32.mrb[45].mxu1  ;;  %4735 = vmatmul.mubr.f32.gmra.mrb[70].mxu0 %v4280_v41  ;;  %v10463_v2 = vsel %vm243_vm1, %v4344_v50, %v4348_v19  ;;  %v10466_v40 = vsel %vm334_vm0, %v4434_v25, %v4438_v48 }
 0x67e   :  { %11867 = vst [vmem:[#allocation43_spill] sm:$0xff] %v10466_v40  ;;  %v4283_v14 = vmax.f32 %v4253_v29, 0.0  ;;  %v4225_v63 = vadd.f32 %v10363_v58, %v4122_v12  ;;  %7811 = vmatpush1.bf16.msra.mxu0 %v7810_v18  ;;  %v10470_v27 = vsel %vm243_vm1, %v4346_v24, %v4350_v38  ;;  %v10473_v51 = vsel %vm334_vm0, %v4436_v3, %v4440_v37  ;;  %v4546_v12 = vld [vmem:[#allocation5 + $0x1918] sm:$0xff] }
 0x67f   :  { %11868 = vst [vmem:[#allocation47_spill] sm:$0xff] %v10473_v51  ;;  %v4254_v41 = vmul.f32 %v4224_v39, %v11869_v36  ;;  %7813 = vmatprep.subr.bf16.mxu0 %v7812_v21  ;;  %v7816_v61 = vpack.c.bf16 %v4542_v59, %v4540_v47  ;;  %v4352_v35 = vrot.slane %v4282_v6, 7  ;;  %v4442_v50 = vrot.slane %v4282_v6, 1  ;;  %v4545_v39 = vld [vmem:[#allocation5 + $0x1910] sm:$0xff] }
 0x680   :  { %v4255_v30 = vmul.f32 %v4225_v63, %v11869_v36  ;;  %v4126_v25 = vpop.f32.mrb[46].mxu1  ;;  %4740 = vmatprep.mubr.f32.mxu0 %v4283_v14  ;;  %v7818_v29 = vpack.c.bf16 %v4541_v53, %v4539_v44  ;;  %v4354_v18 = vrot.slane %v4283_v14, 7  ;;  %v4444_v60 = vrot.slane %v4283_v14, 1  ;;  %v11872_v63 = vld [vmem:[#allocation54_spill] sm:$0xff] }
 0x681   :  { %v4284_v24 = vmax.f32 %v4254_v41, 0.0  ;;  %v4226_v7 = vadd.f32 %v10360_v57, %v4126_v25  ;;  %v4128_v3 = vpop.f32.mrb[47].mxu1  ;;  %4741 = vmatmul.mubr.f32.gmra.mrb[72].mxu0 %v4282_v6  ;;  %v10479_v47 = vsel %vm243_vm1, %v4348_v19, %v4352_v35  ;;  %v10482_v21 = vsel %vm334_vm0, %v4438_v48, %v4442_v50 }
 0x682   :  { %11870 = vst [vmem:[#allocation46_spill] sm:$0xff] %v10482_v21  ;;  %v4285_v59 = vmax.f32 %v4255_v30, 0.0  ;;  %v4227_v44 = vadd.f32 %v10363_v58, %v4128_v3  ;;  %7815 = vmatpush1.bf16.msra.mxu0 %v7814_v8  ;;  %v10486_v53 = vsel %vm243_vm1, %v4350_v38, %v4354_v18  ;;  %v10489_v14 = vsel %vm334_vm0, %v4440_v37, %v4444_v60  ;;  %v4550_v3 = vld [vmem:[#allocation5 + $0x1938] sm:$0xff] }
 0x683   :  { %11871 = vst [vmem:[#allocation50_spill] sm:$0xff] %v10489_v14  ;;  %v4256_v6 = vmul.f32 %v4226_v7, %v11872_v63  ;;  %7817 = vmatprep.subr.bf16.mxu0 %v7816_v61  ;;  %v7820_v41 = vpack.c.bf16 %v4546_v12, %v4544_v16  ;;  %v4356_v25 = vrot.slane %v4284_v24, 7  ;;  %v4446_v19 = vrot.slane %v4284_v24, 1  ;;  %v4549_v7 = vld [vmem:[#allocation5 + $0x1930] sm:$0xff] }
 0x684   :  { %v4257_v36 = vmul.f32 %v4227_v44, %v11872_v63  ;;  %v4132_v48 = vpop.f32.mrb[48].mxu1  ;;  %4746 = vmatprep.mubr.f32.mxu0 %v4285_v59  ;;  %v7822_v30 = vpack.c.bf16 %v4545_v39, %v4543_v28  ;;  %v4358_v8 = vrot.slane %v4285_v59, 7  ;;  %v4448_v10 = vrot.slane %v4285_v59, 1  ;;  %v11875_v44 = vld [vmem:[#allocation57_spill] sm:$0xff] }
 0x685   :  { %v4286_v38 = vmax.f32 %v4256_v6, 0.0  ;;  %v4228_v54 = vadd.f32 %v10360_v57, %v4132_v48  ;;  %v4134_v37 = vpop.f32.mrb[49].mxu1  ;;  %4747 = vmatmul.mubr.f32.gmra.mrb[74].mxu0 %v4284_v24  ;;  %v10495_v16 = vsel %vm243_vm1, %v4352_v35, %v4356_v25  ;;  %v10498_v61 = vsel %vm334_vm0, %v4442_v50, %v4446_v19 }
 0x686   :  { %11873 = vst [vmem:[#allocation49_spill] sm:$0xff] %v10498_v61  ;;  %v4287_v12 = vmax.f32 %v4257_v36, 0.0  ;;  %v4229_v28 = vadd.f32 %v10363_v58, %v4134_v37  ;;  %7819 = vmatpush1.bf16.msra.mxu0 %v7818_v29  ;;  %v10502_v39 = vsel %vm243_vm1, %v4354_v18, %v4358_v8  ;;  %v10505_v59 = vsel %vm334_vm0, %v4444_v60, %v4448_v10  ;;  %v4554_v37 = vld [vmem:[#allocation5 + $0x1958] sm:$0xff] }
 0x687   :  { %11874 = vst [vmem:[#allocation53_spill] sm:$0xff] %v10505_v59  ;;  %v4258_v24 = vmul.f32 %v4228_v54, %v11875_v44  ;;  %7821 = vmatprep.subr.bf16.mxu0 %v7820_v41  ;;  %v7824_v6 = vpack.c.bf16 %v4550_v3, %v4548_v46  ;;  %v4360_v48 = vrot.slane %v4286_v38, 7  ;;  %v4450_v35 = vrot.slane %v4286_v38, 1  ;;  %v4553_v54 = vld [vmem:[#allocation5 + $0x1950] sm:$0xff] }
 0x688   :  { %v4259_v63 = vmul.f32 %v4229_v28, %v11875_v44  ;;  %v4138_v50 = vpop.f32.mrb[50].mxu1  ;;  %4752 = vmatprep.mubr.f32.mxu0 %v4287_v12  ;;  %v7826_v36 = vpack.c.bf16 %v4549_v7, %v4547_v15  ;;  %v4362_v29 = vrot.slane %v4287_v12, 7  ;;  %v4452_v52 = vrot.slane %v4287_v12, 1  ;;  %v11878_v28 = vld [vmem:[#allocation60_spill] sm:$0xff] }
 0x689   :  { %v4288_v18 = vmax.f32 %v4258_v24, 0.0  ;;  %v4230_v17 = vadd.f32 %v10360_v57, %v4138_v50  ;;  %v4140_v60 = vpop.f32.mrb[51].mxu1  ;;  %4753 = vmatmul.mubr.f32.gmra.mrb[76].mxu0 %v4286_v38  ;;  %v10511_v46 = vsel %vm243_vm1, %v4356_v25, %v4360_v48  ;;  %v10514_v41 = vsel %vm334_vm0, %v4446_v19, %v4450_v35 }
 0x68a   :  { %11876 = vst [vmem:[#allocation52_spill] sm:$0xff] %v10514_v41  ;;  %v4289_v3 = vmax.f32 %v4259_v63, 0.0  ;;  %v4231_v15 = vadd.f32 %v10363_v58, %v4140_v60  ;;  %7823 = vmatpush1.bf16.msra.mxu0 %v7822_v30  ;;  %v10518_v7 = vsel %vm243_vm1, %v4358_v8, %v4362_v29  ;;  %v10521_v12 = vsel %vm334_vm0, %v4448_v10, %v4452_v52  ;;  %v4558_v60 = vld [vmem:[#allocation5 + $0x1978] sm:$0xff] }
 0x68b   :  { %11877 = vst [vmem:[#allocation56_spill] sm:$0xff] %v10521_v12  ;;  %v4260_v38 = vmul.f32 %v4230_v17, %v11878_v28  ;;  %7825 = vmatprep.subr.bf16.mxu0 %v7824_v6  ;;  %v7828_v24 = vpack.c.bf16 %v4554_v37, %v4552_v32  ;;  %v4364_v50 = vrot.slane %v4288_v18, 7  ;;  %v4454_v25 = vrot.slane %v4288_v18, 1  ;;  %v4555_v12 = vld [vmem:[#allocation5 + $0x1960] sm:$0xff]  ;;  %v4557_v17 = vld [vmem:[#allocation5 + $0x1970] sm:$0xff] }
 0x68c   :  { %v4261_v44 = vmul.f32 %v4231_v15, %v11878_v28  ;;  %v4144_v19 = vpop.f32.mrb[52].mxu1  ;;  %4758 = vmatprep.mubr.f32.mxu0 %v4289_v3  ;;  %v7830_v63 = vpack.c.bf16 %v4553_v54, %v4551_v34  ;;  %v4366_v30 = vrot.slane %v4289_v3, 7  ;;  %v4456_v42 = vrot.slane %v4289_v3, 1  ;;  %v11881_v15 = vld [vmem:[#allocation63_spill] sm:$0xff] }
 0x68d   :  { %v4290_v8 = vmax.f32 %v4260_v38, 0.0  ;;  %v4232_v41 = vadd.f32 %v10360_v57, %v4144_v19  ;;  %v4146_v10 = vpop.f32.mrb[53].mxu1  ;;  %4759 = vmatmul.mubr.f32.gmra.mrb[78].mxu0 %v4288_v18  ;;  %v10527_v32 = vsel %vm243_vm1, %v4360_v48, %v4364_v50  ;;  %v10530_v6 = vsel %vm334_vm0, %v4450_v35, %v4454_v25 }
 0x68e   :  { %11879 = vst [vmem:[#allocation55_spill] sm:$0xff] %v10530_v6  ;;  %v4291_v37 = vmax.f32 %v4261_v44, 0.0  ;;  %v4233_v34 = vadd.f32 %v10363_v58, %v4146_v10  ;;  %7827 = vmatpush1.bf16.msra.mxu0 %v7826_v36  ;;  %v10534_v54 = vsel %vm243_vm1, %v4362_v29, %v4366_v30  ;;  %v10537_v3 = vsel %vm334_vm0, %v4452_v52, %v4456_v42  ;;  %v4560_v6 = vld [vmem:[#allocation5 + $0x1988] sm:$0xff]  ;;  %v4562_v10 = vld [vmem:[#allocation5 + $0x1998] sm:$0xff] }
 0x68f   :  { %11880 = vst [vmem:[#allocation59_spill] sm:$0xff] %v10537_v3  ;;  %v4262_v18 = vmul.f32 %v4232_v41, %v11881_v15  ;;  %7829 = vmatprep.subr.bf16.mxu0 %v7828_v24  ;;  %v7832_v38 = vpack.c.bf16 %v4558_v60, %v4556_v43  ;;  %v4368_v19 = vrot.slane %v4290_v8, 7  ;;  %v4458_v48 = vrot.slane %v4290_v8, 1  ;;  %v4559_v3 = vld [vmem:[#allocation5 + $0x1980] sm:$0xff]  ;;  %v4561_v41 = vld [vmem:[#allocation5 + $0x1990] sm:$0xff] }
 0x690   :  { %v4263_v28 = vmul.f32 %v4233_v34, %v11881_v15  ;;  %v4150_v35 = vpop.f32.mrb[54].mxu1  ;;  %4764 = vmatprep.mubr.f32.mxu0 %v4291_v37  ;;  %v7834_v44 = vpack.c.bf16 %v4557_v17, %v4555_v12  ;;  %v4370_v36 = vrot.slane %v4291_v37, 7  ;;  %v4460_v61 = vrot.slane %v4291_v37, 1  ;;  %v11884_v34 = vld [vmem:[#allocation66_spill] sm:$0xff] }
 0x691   :  { %v4292_v29 = vmax.f32 %v4262_v18, 0.0  ;;  %v4234_v59 = vadd.f32 %v10360_v57, %v4150_v35  ;;  %v4152_v52 = vpop.f32.mrb[55].mxu1  ;;  %4765 = vmatmul.mubr.f32.gmra.mrb[80].mxu0 %v4290_v8  ;;  %v10543_v43 = vsel %vm243_vm1, %v4364_v50, %v4368_v19  ;;  %v10546_v24 = vsel %vm334_vm0, %v4454_v25, %v4458_v48 }
 0x692   :  { %11882 = vst [vmem:[#allocation58_spill] sm:$0xff] %v10546_v24  ;;  %v4293_v60 = vmax.f32 %v4263_v28, 0.0  ;;  %v4235_v12 = vadd.f32 %v10363_v58, %v4152_v52  ;;  %7831 = vmatpush1.bf16.msra.mxu0 %v7830_v63  ;;  %v10550_v17 = vsel %vm243_vm1, %v4366_v30, %v4370_v36  ;;  %v10553_v37 = vsel %vm334_vm0, %v4456_v42, %v4460_v61  ;;  %v4564_v24 = vld [vmem:[#allocation5 + $0x19a8] sm:$0xff]  ;;  %v4566_v52 = vld [vmem:[#allocation5 + $0x19b8] sm:$0xff] }
 0x693   :  { %11883 = vst [vmem:[#allocation62_spill] sm:$0xff] %v10553_v37  ;;  %v4264_v8 = vmul.f32 %v4234_v59, %v11884_v34  ;;  %7833 = vmatprep.subr.bf16.mxu0 %v7832_v38  ;;  %v7836_v18 = vpack.c.bf16 %v4562_v10, %v4560_v6  ;;  %v4372_v35 = vrot.slane %v4292_v29, 7  ;;  %v4462_v50 = vrot.slane %v4292_v29, 1  ;;  %v4563_v37 = vld [vmem:[#allocation5 + $0x19a0] sm:$0xff]  ;;  %v4565_v59 = vld [vmem:[#allocation5 + $0x19b0] sm:$0xff] }
 0x694   :  { %v4265_v15 = vmul.f32 %v4235_v12, %v11884_v34  ;;  %v4156_v25 = vpop.f32.mrb[56].mxu1  ;;  %4770 = vmatprep.mubr.f32.mxu0 %v4293_v60  ;;  %v7838_v28 = vpack.c.bf16 %v4561_v41, %v4559_v3  ;;  %v4374_v63 = vrot.slane %v4293_v60, 7  ;;  %v4464_v21 = vrot.slane %v4293_v60, 1  ;;  %v11887_v12 = vld [vmem:[#allocation69_spill] sm:$0xff] }
 0x695   :  { %v4294_v30 = vmax.f32 %v4264_v8, 0.0  ;;  %v4236_v14 = vadd.f32 %v10360_v57, %v4156_v25  ;;  %v4158_v42 = vpop.f32.mrb[57].mxu1  ;;  %4771 = vmatmul.mubr.f32.gmra.mrb[82].mxu0 %v4292_v29  ;;  %v10559_v6 = vsel %vm243_vm1, %v4368_v19, %v4372_v35  ;;  %v10562_v38 = vsel %vm334_vm0, %v4458_v48, %v4462_v50 }
 0x696   :  { %11885 = vst [vmem:[#allocation61_spill] sm:$0xff] %v10562_v38  ;;  %v4295_v10 = vmax.f32 %v4265_v15, 0.0  ;;  %v4237_v3 = vadd.f32 %v10363_v58, %v4158_v42  ;;  %7835 = vmatpush1.bf16.msra.mxu0 %v7834_v44  ;;  %v10566_v41 = vsel %vm243_vm1, %v4370_v36, %v4374_v63  ;;  %v10569_v60 = vsel %vm334_vm0, %v4460_v61, %v4464_v21  ;;  %v4568_v38 = vld [vmem:[#allocation5 + $0x19c8] sm:$0xff]  ;;  %v4570_v42 = vld [vmem:[#allocation5 + $0x19d8] sm:$0xff] }
 0x697   :  { %11886 = vst [vmem:[#allocation65_spill] sm:$0xff] %v10569_v60  ;;  %v4266_v29 = vmul.f32 %v4236_v14, %v11887_v12  ;;  %7837 = vmatprep.subr.bf16.mxu0 %v7836_v18  ;;  %v7840_v8 = vpack.c.bf16 %v4566_v52, %v4564_v24  ;;  %v4376_v25 = vrot.slane %v4294_v30, 7  ;;  %v4466_v19 = vrot.slane %v4294_v30, 1  ;;  %v5615_v60 = vld [vmem:[#allocation5 + $0x2030] sm:$0xff] }
 0x698   :  { %v4267_v34 = vmul.f32 %v4237_v3, %v11887_v12  ;;  %v4162_v48 = vpop.f32.mrb[58].mxu1  ;;  %4776 = vmatprep.mubr.f32.mxu0 %v4295_v10  ;;  %v7842_v15 = vpack.c.bf16 %v4565_v59, %v4563_v37  ;;  %v4378_v44 = vrot.slane %v4295_v10, 7  ;;  %v4468_v40 = vrot.slane %v4295_v10, 1  ;;  %v11890_v10 = vld [vmem:[#allocation72_spill] sm:$0xff] }
 0x699   :  { %v4296_v36 = vmax.f32 %v4266_v29, 0.0  ;;  %v4238_v51 = vadd.f32 %v10360_v57, %v4162_v48  ;;  %v4164_v61 = vpop.f32.mrb[59].mxu1  ;;  %4777 = vmatmul.mubr.f32.gmra.mrb[84].mxu0 %v4294_v30  ;;  %v10575_v14 = vsel %vm243_vm1, %v4372_v35, %v4376_v25  ;;  %v10578_v24 = vsel %vm334_vm0, %v4462_v50, %v4466_v19  ;;  %v4567_v3 = vld [vmem:[#allocation5 + $0x19c0] sm:$0xff]  ;;  %v4569_v35 = vld [vmem:[#allocation5 + $0x19d0] sm:$0xff]  ;;  %v5612_v12 = vld [vmem:[#allocation5 + $0x2018] sm:$0xff] }
 0x69a   :  { %11888 = vst [vmem:[#allocation64_spill] sm:$0xff] %v10578_v24  ;;  %v4297_v18 = vmax.f32 %v4267_v34, 0.0  ;;  %v4239_v52 = vadd.f32 %v10363_v58, %v4164_v61  ;;  %7839 = vmatpush1.bf16.msra.mxu0 %v7838_v28  ;;  %v10582_v37 = vsel %vm243_vm1, %v4374_v63, %v4378_v44  ;;  %v10585_v59 = vsel %vm334_vm0, %v4464_v21, %v4468_v40  ;;  %v4572_v34 = vld [vmem:[#allocation5 + $0x19e8] sm:$0xff]  ;;  %v4574_v58 = vld [vmem:[#allocation5 + $0x19f8] sm:$0xff] }
 0x69b   :  { %11889 = vst [vmem:[#allocation68_spill] sm:$0xff] %v10585_v59  ;;  %v4268_v57 = vmul.f32 %v4238_v51, %v11890_v10  ;;  %7841 = vmatprep.subr.bf16.mxu0 %v7840_v8  ;;  %v7844_v30 = vpack.c.bf16 %v4570_v42, %v4568_v38  ;;  %v4380_v29 = vrot.slane %v4296_v36, 7  ;;  %v4470_v48 = vrot.slane %v4296_v36, 1  ;;  %v4571_v42 = vld [vmem:[#allocation5 + $0x19e0] sm:$0xff] }
 0x69c   :  { %v4269_v50 = vmul.f32 %v4239_v52, %v11890_v10  ;;  %4782 = vmatprep.mubr.f32.mxu0 %v4297_v18  ;;  %v4382_v28 = vrot.slane %v4297_v18, 7  ;;  %v4472_v61 = vrot.slane %v4297_v18, 1  ;;  %v7846_v8 = vpack.c.bf16 %v4569_v35, %v4567_v3  ;;  %v4573_v52 = vld [vmem:[#allocation5 + $0x19f0] sm:$0xff]  ;;  %v4951_v35 = vld [vmem:[#allocation5 + $0x1c00] sm:$0xff] }
 0x69d   :  { %v10589_v63 = vmax.f32 %v4268_v57, 0.0  ;;  %4783 = vmatmul.mubr.f32.gmra.mrb[86].mxu0 %v4296_v36  ;;  %v10592_v21 = vsel %vm243_vm1, %v4376_v25, %v4380_v29  ;;  %v10595_v51 = vsel %vm334_vm0, %v4466_v19, %v4470_v48  ;;  %v7848_v36 = vpack.c.bf16 %v4574_v58, %v4572_v34  ;;  %v4952_v19 = vld [vmem:[#allocation5 + $0x1c08] sm:$0xff]  ;;  %v5613_v59 = vld [vmem:[#allocation5 + $0x2020] sm:$0xff] }
 0x69e   :  { %11892 = vst [vmem:[#allocation71_spill] sm:$0xff] %v10595_v51  ;;  %v10597_v38 = vmax.f32 %v4269_v50, 0.0  ;;  %7843 = vmatpush1.bf16.msra.mxu0 %v7842_v15  ;;  %v10600_v10 = vsel %vm243_vm1, %v4378_v44, %v4382_v28  ;;  %v10603_v18 = vsel %vm334_vm0, %v4468_v40, %v4472_v61  ;;  %v4954_v50 = vld [vmem:[#allocation5 + $0x1c18] sm:$0xff]  ;;  %v7850_v44 = vpack.c.bf16 %v4573_v52, %v4571_v42  ;;  %v4953_v40 = vld [vmem:[#allocation5 + $0x1c10] sm:$0xff]  ;;  %v5610_v58 = vld [vmem:[#allocation5 + $0x2008] sm:$0xff] }
 0x69f   :  { %11891 = vst [vmem:[#allocation67_spill] sm:$0xff] %v10589_v63  ;;  %11894 = vst [vmem:[#allocation74_spill] sm:$0xff] %v10603_v18  ;;  %7845 = vmatprep.subr.bf16.mxu0 %v7844_v30  ;;  %v4384_v25 = vrot.slane %v10589_v63, 7  ;;  %v11626_v57 = vrot.slane %v10589_v63, 1  ;;  %v5609_v51 = vld [vmem:[#allocation5 + $0x2000] sm:$0xff]  ;;  %v11896_v18 = vrot.slane %v10372_v23, 7 }
 0x6a0   :  { %11893 = vst [vmem:[#allocation70_spill] sm:$0xff] %v10597_v38  ;;  %4788 = vmatprep.mubr.f32.mxu0 %v10597_v38  ;;  %v4386_v15 = vrot.slane %v10597_v38, 7  ;;  %v11939_v3 = vld [vmem:[#allocation32_spill] sm:$0xff] }
 0x6a1   :  { %4789 = vmatmul.mubr.f32.gmra.mrb[88].mxu0 %v10589_v63  ;;  %v10612_v30 = vsel %vm243_vm1, %v4380_v29, %v4384_v25  ;;  %v10617_v34 = vsel %vm334_vm0, %v4470_v48, %v11626_v57  ;;  %v11898_v29 = vrot.slane %v10597_v38, 1  ;;  %v7916_v25 = vpack.c.bf16 %v5612_v12, %v5610_v58  ;;  %v5611_v48 = vld [vmem:[#allocation5 + $0x2010] sm:$0xff]  ;;  %v5614_v57 = vld [vmem:[#allocation5 + $0x2028] sm:$0xff]  ;;  %v5616_v63 = vld [vmem:[#allocation5 + $0x2038] sm:$0xff] }
 0x6a2   :  { %11895 = vst [vmem:[#allocation73_spill] sm:$0xff] %v10617_v34  ;;  %7847 = vmatpush1.bf16.msra.mxu0 %v7846_v8  ;;  %6813 = vmatprep.mubr.msk.f32.mxu0 %vm9248_vm2, %v11896_v18  ;;  %v10624_v42 = vsel %vm243_vm1, %v4382_v28, %v4386_v15  ;;  %v7852_v34 = vpack.c.bf16 %v4954_v50, %v4952_v19  ;;  %v4956_v8 = vld [vmem:[#allocation5 + $0x1c28] sm:$0xff]  ;;  %v4958_v18 = vld [vmem:[#allocation5 + $0x1c38] sm:$0xff]  ;;  %v5617_v12 = vld [vmem:[#allocation5 + $0x2040] sm:$0xff] }
 0x6a3   :  { %v10629_v52 = vsel %vm334_vm0, %v4472_v61, %v11898_v29  ;;  %7849 = vmatprep.subr.bf16.mxu0 %v7848_v36  ;;  %v7918_v24 = vpack.c.bf16 %v5611_v48, %v5609_v51  ;;  %v7920_v23 = vpack.c.bf16 %v5616_v63, %v5614_v57  ;;  %7917 = vmatprep.subr.bf16.mxu1 %v7916_v25  ;;  %v5618_v28 = vld [vmem:[#allocation5 + $0x2048] sm:$0xff]  ;;  %v5620_v15 = vld [vmem:[#allocation5 + $0x2058] sm:$0xff]  ;;  %v5619_v58 = vld [vmem:[#allocation5 + $0x2050] sm:$0xff]  ;;  %v11899_v25 = vrot.slane %v10370_v26, 7 }
 0x6a4   :  { %v7922_v38 = vpack.c.bf16 %v5615_v60, %v5613_v59  ;;  %v7854_v61 = vpack.c.bf16 %v4953_v40, %v4951_v35  ;;  %v7856_v29 = vpack.c.bf16 %v4958_v18, %v4956_v8  ;;  %v4955_v36 = vld [vmem:[#allocation5 + $0x1c20] sm:$0xff]  ;;  %v4957_v19 = vld [vmem:[#allocation5 + $0x1c30] sm:$0xff]  ;;  %v4960_v50 = vld [vmem:[#allocation5 + $0x1c48] sm:$0xff]  ;;  %v7924_v51 = vpack.c.bf16 %v5620_v15, %v5618_v28 }
 0x6a5   :  { %7919 = vmatpush1.bf16.msra.mxu1 %v7918_v24  ;;  %v4962_v63 = vld [vmem:[#allocation5 + $0x1c58] sm:$0xff]  ;;  %v5622_v57 = vld [vmem:[#allocation5 + $0x2068] sm:$0xff]  ;;  %v7926_v60 = vpack.c.bf16 %v5619_v58, %v5617_v12  ;;  %v7858_v24 = vpack.c.bf16 %v4957_v19, %v4955_v36  ;;  %v5621_v59 = vld [vmem:[#allocation5 + $0x2060] sm:$0xff] }
 0x6a6   :  { %7851 = vmatpush1.bf16.msra.mxu0 %v7850_v44  ;;  %7921 = vmatprep.subr.bf16.mxu1 %v7920_v23  ;;  %v5624_v48 = vld [vmem:[#allocation5 + $0x2078] sm:$0xff]  ;;  %v5623_v44 = vld [vmem:[#allocation5 + $0x2070] sm:$0xff]  ;;  %v7860_v35 = vpack.c.bf16 %v4962_v63, %v4960_v50  ;;  %v4959_v40 = vld [vmem:[#allocation5 + $0x1c40] sm:$0xff] }
 0x6a7   :  { %7853 = vmatprep.subr.bf16.mxu0 %v7852_v34  ;;  %v4961_v34 = vld [vmem:[#allocation5 + $0x1c50] sm:$0xff]  ;;  %v4964_v8 = vld [vmem:[#allocation5 + $0x1c68] sm:$0xff]  ;;  %v7928_v23 = vpack.c.bf16 %v5624_v48, %v5622_v57  ;;  %v4966_v18 = vld [vmem:[#allocation5 + $0x1c78] sm:$0xff] }
 0x6a8   :  { %v5626_v26 = vld [vmem:[#allocation5 + $0x2088] sm:$0xff]  ;;  %v5628_v28 = vld [vmem:[#allocation5 + $0x2098] sm:$0xff]  ;;  %v5625_v15 = vld [vmem:[#allocation5 + $0x2080] sm:$0xff]  ;;  %v7864_v12 = vpack.c.bf16 %v4966_v18, %v4964_v8 }
 0x6a9   :  { %6815 = vmatmul.mubr.msk.f32.vlgmr.msra.gmra.mrb[60].mxu0 %vm9248_vm2, %v11899_v25  ;;  %7923 = vmatpush1.bf16.msra.mxu1 %v7922_v38  ;;  %v7930_v38 = vpack.c.bf16 %v5623_v44, %v5621_v59  ;;  %v4963_v58 = vld [vmem:[#allocation5 + $0x1c60] sm:$0xff]  ;;  %v4968_v36 = vld [vmem:[#allocation5 + $0x1c88] sm:$0xff]  ;;  %v7932_v19 = vpack.c.bf16 %v5628_v28, %v5626_v26  ;;  %v4970_v50 = vld [vmem:[#allocation5 + $0x1c98] sm:$0xff] }
 0x6aa   :  { %4865 = vmatprep.mubr.f32.mxu0 %v10406_v33  ;;  %7855 = vmatpush1.bf16.msra.mxu0 %v7854_v61  ;;  %v7862_v33 = vpack.c.bf16 %v4961_v34, %v4959_v40  ;;  %v5627_v61 = vld [vmem:[#allocation5 + $0x2090] sm:$0xff]  ;;  %v5632_v63 = vld [vmem:[#allocation5 + $0x20b8] sm:$0xff]  ;;  %v5629_v57 = vld [vmem:[#allocation5 + $0x20a0] sm:$0xff]  ;;  %v7868_v25 = vpack.c.bf16 %v4970_v50, %v4968_v36 }
 0x6ab   :  { %7857 = vmatprep.subr.bf16.mxu0 %v7856_v29  ;;  %7925 = vmatprep.subr.bf16.mxu1 %v7924_v51  ;;  %v4965_v29 = vld [vmem:[#allocation5 + $0x1c70] sm:$0xff]  ;;  %v5630_v51 = vld [vmem:[#allocation5 + $0x20a8] sm:$0xff]  ;;  %v5636_v34 = vld [vmem:[#allocation5 + $0x20d8] sm:$0xff] }
 0x6ac   :  { %v5631_v48 = vld [vmem:[#allocation5 + $0x20b0] sm:$0xff]  ;;  %v4972_v59 = vld [vmem:[#allocation5 + $0x1ca8] sm:$0xff]  ;;  %v7936_v44 = vpack.c.bf16 %v5632_v63, %v5630_v51  ;;  %v5633_v8 = vld [vmem:[#allocation5 + $0x20c0] sm:$0xff] }
 0x6ad   :  { %4866 = vmatmul.mubr.f32.gmra.mrb[62].mxu0 %v10397_v62  ;;  %7927 = vmatpush1.bf16.msra.mxu1 %v7926_v60  ;;  %v7934_v62 = vpack.c.bf16 %v5627_v61, %v5625_v15  ;;  %v4967_v60 = vld [vmem:[#allocation5 + $0x1c80] sm:$0xff]  ;;  %v5634_v40 = vld [vmem:[#allocation5 + $0x20c8] sm:$0xff]  ;;  %v4973_v28 = vld [vmem:[#allocation5 + $0x1cb0] sm:$0xff] }
 0x6ae   :  { %4871 = vmatprep.mubr.f32.mxu0 %v10422_v13  ;;  %7859 = vmatpush1.bf16.msra.mxu0 %v7858_v24  ;;  %v7866_v13 = vpack.c.bf16 %v4965_v29, %v4963_v58  ;;  %v4969_v24 = vld [vmem:[#allocation5 + $0x1c90] sm:$0xff]  ;;  %v4971_v26 = vld [vmem:[#allocation5 + $0x1ca0] sm:$0xff]  ;;  %v4978_v15 = vld [vmem:[#allocation5 + $0x1cd8] sm:$0xff] }
 0x6af   :  { %7861 = vmatprep.subr.bf16.mxu0 %v7860_v35  ;;  %7929 = vmatprep.subr.bf16.mxu1 %v7928_v23  ;;  %v4974_v35 = vld [vmem:[#allocation5 + $0x1cb8] sm:$0xff]  ;;  %v5635_v23 = vld [vmem:[#allocation5 + $0x20d0] sm:$0xff]  ;;  %v5638_v61 = vld [vmem:[#allocation5 + $0x20e8] sm:$0xff] }
 0x6b0   :  { %v7872_v18 = vpack.c.bf16 %v4974_v35, %v4972_v59  ;;  %v5637_v58 = vld [vmem:[#allocation5 + $0x20e0] sm:$0xff]  ;;  %v5639_v29 = vld [vmem:[#allocation5 + $0x20f0] sm:$0xff]  ;;  %v4980_v51 = vld [vmem:[#allocation5 + $0x1ce8] sm:$0xff] }
 0x6b1   :  { %4872 = vmatmul.mubr.f32.gmra.mrb[64].mxu0 %v10415_v49  ;;  %7931 = vmatpush1.bf16.msra.mxu1 %v7930_v38  ;;  %v7938_v49 = vpack.c.bf16 %v5631_v48, %v5629_v57  ;;  %v4976_v38 = vld [vmem:[#allocation5 + $0x1cc8] sm:$0xff]  ;;  %v4977_v50 = vld [vmem:[#allocation5 + $0x1cd0] sm:$0xff]  ;;  %v5644_v57 = vld [vmem:[#allocation5 + $0x2118] sm:$0xff] }
 0x6b2   :  { %4877 = vmatprep.mubr.f32.mxu0 %v10438_v45  ;;  %7863 = vmatpush1.bf16.msra.mxu0 %v7862_v33  ;;  %v7870_v45 = vpack.c.bf16 %v4969_v24, %v4967_v60  ;;  %v7940_v33 = vpack.c.bf16 %v5636_v34, %v5634_v40  ;;  %v7876_v36 = vpack.c.bf16 %v4978_v15, %v4976_v38  ;;  %v5641_v48 = vld [vmem:[#allocation5 + $0x2100] sm:$0xff]  ;;  %v4981_v59 = vld [vmem:[#allocation5 + $0x1cf0] sm:$0xff]  ;;  %v4986_v40 = vld [vmem:[#allocation5 + $0x1d18] sm:$0xff] }
 0x6b3   :  { %7865 = vmatprep.subr.bf16.mxu0 %v7864_v12  ;;  %7933 = vmatprep.subr.bf16.mxu1 %v7932_v19  ;;  %v5640_v12 = vld [vmem:[#allocation5 + $0x20f8] sm:$0xff]  ;;  %v4975_v19 = vld [vmem:[#allocation5 + $0x1cc0] sm:$0xff]  ;;  %v5646_v34 = vld [vmem:[#allocation5 + $0x2128] sm:$0xff] }
 0x6b4   :  { %v7944_v63 = vpack.c.bf16 %v5640_v12, %v5638_v61  ;;  %v4979_v24 = vld [vmem:[#allocation5 + $0x1ce0] sm:$0xff]  ;;  %v5650_v15 = vld [vmem:[#allocation5 + $0x2148] sm:$0xff]  ;;  %v5652_v61 = vld [vmem:[#allocation5 + $0x2158] sm:$0xff] }
 0x6b5   :  { %4878 = vmatmul.mubr.f32.gmra.mrb[66].mxu0 %v10431_v1  ;;  %7935 = vmatpush1.bf16.msra.mxu1 %v7934_v62  ;;  %v7942_v1 = vpack.c.bf16 %v5635_v23, %v5633_v8  ;;  %v4982_v62 = vld [vmem:[#allocation5 + $0x1cf8] sm:$0xff]  ;;  %v5647_v8 = vld [vmem:[#allocation5 + $0x2130] sm:$0xff]  ;;  %v5649_v12 = vld [vmem:[#allocation5 + $0x2140] sm:$0xff] }
 0x6b6   :  { %4883 = vmatprep.mubr.f32.mxu0 %v10454_v22  ;;  %7867 = vmatpush1.bf16.msra.mxu0 %v7866_v13  ;;  %v7874_v22 = vpack.c.bf16 %v4973_v28, %v4971_v26  ;;  %v5642_v13 = vld [vmem:[#allocation5 + $0x2108] sm:$0xff]  ;;  %v7880_v60 = vpack.c.bf16 %v4982_v62, %v4980_v51  ;;  %v4985_v26 = vld [vmem:[#allocation5 + $0x1d10] sm:$0xff]  ;;  %v5653_v62 = vld [vmem:[#allocation5 + $0x2160] sm:$0xff] }
 0x6b7   :  { %7869 = vmatprep.subr.bf16.mxu0 %v7868_v25  ;;  %7937 = vmatprep.subr.bf16.mxu1 %v7936_v44  ;;  %v5643_v25 = vld [vmem:[#allocation5 + $0x2110] sm:$0xff]  ;;  %v4984_v44 = vld [vmem:[#allocation5 + $0x1d08] sm:$0xff]  ;;  %v7948_v35 = vpack.c.bf16 %v5644_v57, %v5642_v13 }
 0x6b8   :  { %v7884_v23 = vpack.c.bf16 %v4986_v40, %v4984_v44  ;;  %v4988_v28 = vld [vmem:[#allocation5 + $0x1d28] sm:$0xff]  ;;  %v5655_v13 = vld [vmem:[#allocation5 + $0x2170] sm:$0xff]  ;;  %v5657_v44 = vld [vmem:[#allocation5 + $0x2180] sm:$0xff] }
 0x6b9   :  { %4884 = vmatmul.mubr.f32.gmra.mrb[68].mxu0 %v10447_v31  ;;  %7939 = vmatpush1.bf16.msra.mxu1 %v7938_v49  ;;  %v7946_v31 = vpack.c.bf16 %v5639_v29, %v5637_v58  ;;  %v5648_v49 = vld [vmem:[#allocation5 + $0x2138] sm:$0xff]  ;;  %v4987_v58 = vld [vmem:[#allocation5 + $0x1d20] sm:$0xff]  ;;  %v4989_v29 = vld [vmem:[#allocation5 + $0x1d30] sm:$0xff] }
 0x6ba   :  { %4889 = vmatprep.mubr.f32.mxu0 %v10470_v27  ;;  %7871 = vmatpush1.bf16.msra.mxu0 %v7870_v45  ;;  %v7878_v27 = vpack.c.bf16 %v4977_v50, %v4975_v19  ;;  %v5645_v45 = vld [vmem:[#allocation5 + $0x2120] sm:$0xff]  ;;  %v7952_v38 = vpack.c.bf16 %v5648_v49, %v5646_v34  ;;  %v7956_v19 = vpack.c.bf16 %v5652_v61, %v5650_v15  ;;  %v4994_v50 = vld [vmem:[#allocation5 + $0x1d58] sm:$0xff]  ;;  %v5654_v51 = vld [vmem:[#allocation5 + $0x2168] sm:$0xff] }
 0x6bb   :  { %7873 = vmatprep.subr.bf16.mxu0 %v7872_v18  ;;  %7941 = vmatprep.subr.bf16.mxu1 %v7940_v33  ;;  %v4983_v18 = vld [vmem:[#allocation5 + $0x1d00] sm:$0xff]  ;;  %v4990_v33 = vld [vmem:[#allocation5 + $0x1d38] sm:$0xff]  ;;  %v4997_v49 = vld [vmem:[#allocation5 + $0x1d70] sm:$0xff] }
 0x6bc   :  { %v4995_v34 = vld [vmem:[#allocation5 + $0x1d60] sm:$0xff]  ;;  %v5004_v61 = vld [vmem:[#allocation5 + $0x1da8] sm:$0xff] }
 0x6bd   :  { %4890 = vmatmul.mubr.f32.gmra.mrb[70].mxu0 %v10463_v2  ;;  %7943 = vmatpush1.bf16.msra.mxu1 %v7942_v1  ;;  %v7950_v2 = vpack.c.bf16 %v5643_v25, %v5641_v48  ;;  %v5651_v1 = vld [vmem:[#allocation5 + $0x2150] sm:$0xff]  ;;  %v4996_v48 = vld [vmem:[#allocation5 + $0x1d68] sm:$0xff] }
 0x6be   :  { %4895 = vmatprep.mubr.f32.mxu0 %v10486_v53  ;;  %7875 = vmatpush1.bf16.msra.mxu0 %v7874_v22  ;;  %v7882_v53 = vpack.c.bf16 %v4981_v59, %v4979_v24  ;;  %v7888_v22 = vpack.c.bf16 %v4990_v33, %v4988_v28  ;;  %v5658_v24 = vld [vmem:[#allocation5 + $0x2188] sm:$0xff]  ;;  %v5660_v59 = vld [vmem:[#allocation5 + $0x2198] sm:$0xff]  ;;  %v5001_v33 = vld [vmem:[#allocation5 + $0x1d90] sm:$0xff] }
 0x6bf   :  { %7877 = vmatprep.subr.bf16.mxu0 %v7876_v36  ;;  %7945 = vmatprep.subr.bf16.mxu1 %v7944_v63  ;;  %v4992_v36 = vld [vmem:[#allocation5 + $0x1d48] sm:$0xff]  ;;  %v5656_v63 = vld [vmem:[#allocation5 + $0x2178] sm:$0xff] }
 0x6c0   :  { %v7892_v57 = vpack.c.bf16 %v4994_v50, %v4992_v36  ;;  %v7960_v25 = vpack.c.bf16 %v5656_v63, %v5654_v51  ;;  %v5007_v36 = vld [vmem:[#allocation5 + $0x1dc0] sm:$0xff]  ;;  %v5014_v50 = vld [vmem:[#allocation5 + $0x1df8] sm:$0xff] }
 0x6c1   :  { %4896 = vmatmul.mubr.f32.gmra.mrb[72].mxu0 %v10479_v47  ;;  %7947 = vmatpush1.bf16.msra.mxu1 %v7946_v31  ;;  %v7954_v47 = vpack.c.bf16 %v5647_v8, %v5645_v45  ;;  %v4991_v31 = vld [vmem:[#allocation5 + $0x1d40] sm:$0xff]  ;;  %v5002_v45 = vld [vmem:[#allocation5 + $0x1d98] sm:$0xff]  ;;  %v5662_v8 = vld [vmem:[#allocation5 + $0x21a8] sm:$0xff] }
 0x6c2   :  { %4901 = vmatprep.mubr.f32.mxu0 %v10502_v39  ;;  %7879 = vmatpush1.bf16.msra.mxu0 %v7878_v27  ;;  %v7886_v39 = vpack.c.bf16 %v4985_v26, %v4983_v18  ;;  %v4993_v27 = vld [vmem:[#allocation5 + $0x1d50] sm:$0xff]  ;;  %v5661_v18 = vld [vmem:[#allocation5 + $0x21a0] sm:$0xff] }
 0x6c3   :  { %7881 = vmatprep.subr.bf16.mxu0 %v7880_v60  ;;  %7949 = vmatprep.subr.bf16.mxu1 %v7948_v35  ;;  %v4998_v60 = vld [vmem:[#allocation5 + $0x1d78] sm:$0xff]  ;;  %v5659_v35 = vld [vmem:[#allocation5 + $0x2190] sm:$0xff] }
 0x6c4   :  { %v7896_v40 = vpack.c.bf16 %v4998_v60, %v4996_v48  ;;  %v5663_v26 = vld [vmem:[#allocation5 + $0x21b0] sm:$0xff] }
 0x6c5   :  { %4902 = vmatmul.mubr.f32.gmra.mrb[74].mxu0 %v10495_v16  ;;  %7951 = vmatpush1.bf16.msra.mxu1 %v7950_v2  ;;  %v7958_v16 = vpack.c.bf16 %v5651_v1, %v5649_v12  ;;  %v5000_v2 = vld [vmem:[#allocation5 + $0x1d88] sm:$0xff]  ;;  %v5003_v12 = vld [vmem:[#allocation5 + $0x1da0] sm:$0xff]  ;;  %v5005_v1 = vld [vmem:[#allocation5 + $0x1db0] sm:$0xff] }
 0x6c6   :  { %4907 = vmatprep.mubr.f32.mxu0 %v10518_v7  ;;  %7883 = vmatpush1.bf16.msra.mxu0 %v7882_v53  ;;  %v7890_v7 = vpack.c.bf16 %v4989_v29, %v4987_v58  ;;  %v7964_v53 = vpack.c.bf16 %v5660_v59, %v5658_v24  ;;  %v7900_v28 = vpack.c.bf16 %v5002_v45, %v5000_v2  ;;  %v5010_v58 = vld [vmem:[#allocation5 + $0x1dd8] sm:$0xff]  ;;  %v11919_v60 = vld [vmem:[#allocation70_spill] sm:$0xff]  ;;  %v5669_v45 = vld [vmem:[#allocation5 + $0x21e0] sm:$0xff] }
 0x6c7   :  { %7885 = vmatprep.subr.bf16.mxu0 %v7884_v23  ;;  %7953 = vmatprep.subr.bf16.mxu1 %v7952_v38  ;;  %v5664_v23 = vld [vmem:[#allocation5 + $0x21b8] sm:$0xff]  ;;  %v4999_v38 = vld [vmem:[#allocation5 + $0x1d80] sm:$0xff]  ;;  %v11920_v24 = vrot.slane %v11919_v60, 1  ;;  %v5670_v2 = vld [vmem:[#allocation5 + $0x21e8] sm:$0xff] }
 0x6c8   :  { %v7968_v15 = vpack.c.bf16 %v5664_v23, %v5662_v8  ;;  %v11917_v48 = vld [vmem:[#allocation71_spill] sm:$0xff] }
 0x6c9   :  { %4908 = vmatmul.mubr.f32.gmra.mrb[76].mxu0 %v10511_v46  ;;  %7955 = vmatpush1.bf16.msra.mxu1 %v7954_v47  ;;  %v7962_v46 = vpack.c.bf16 %v5655_v13, %v5653_v62  ;;  %v5006_v47 = vld [vmem:[#allocation5 + $0x1db8] sm:$0xff]  ;;  %v11912_v62 = vld [vmem:[#allocation65_spill] sm:$0xff]  ;;  %v5671_v8 = vld [vmem:[#allocation5 + $0x21f0] sm:$0xff] }
 0x6ca   :  { %4913 = vmatprep.mubr.f32.mxu0 %v10534_v54  ;;  %7887 = vmatpush1.bf16.msra.mxu0 %v7886_v39  ;;  %v7894_v54 = vpack.c.bf16 %v4993_v27, %v4991_v31  ;;  %v7904_v39 = vpack.c.bf16 %v5006_v47, %v5004_v61  ;;  %v11913_v13 = vld [vmem:[#allocation61_spill] sm:$0xff]  ;;  %v11915_v31 = vld [vmem:[#allocation64_spill] sm:$0xff]  ;;  %v11916_v27 = vld [vmem:[#allocation74_spill] sm:$0xff]  ;;  %v7978_v23 = vpack.c.bf16 %v5671_v8, %v5669_v45 }
 0x6cb   :  { %7889 = vmatprep.subr.bf16.mxu0 %v7888_v22  ;;  %7957 = vmatprep.subr.bf16.mxu1 %v7956_v19  ;;  %v5008_v22 = vld [vmem:[#allocation5 + $0x1dc8] sm:$0xff]  ;;  %v11921_v59 = vld [vmem:[#allocation67_spill] sm:$0xff]  ;;  %v10705_v61 = vld [vmem:[#allocation5 + $0x1e20] sm:$0xff] }
 0x6cc   :  { %v7908_v29 = vpack.c.bf16 %v5010_v58, %v5008_v22  ;;  %v5012_v19 = vld [vmem:[#allocation5 + $0x1de8] sm:$0xff]  ;;  %v10707_v47 = vld [vmem:[#allocation5 + $0x1e30] sm:$0xff]  ;;  %v10719_v22 = vld [vmem:[#allocation5 + $0x1e78] sm:$0xff] }
 0x6cd   :  { %4914 = vmatmul.mubr.f32.gmra.mrb[78].mxu0 %v10527_v32  ;;  %7959 = vmatpush1.bf16.msra.mxu1 %v7958_v16  ;;  %v7966_v32 = vpack.c.bf16 %v5659_v35, %v5657_v44  ;;  %v7912_v63 = vpack.c.bf16 %v5014_v50, %v5012_v19  ;;  %v5013_v16 = vld [vmem:[#allocation5 + $0x1df0] sm:$0xff]  ;;  %v5668_v44 = vld [vmem:[#allocation5 + $0x21d8] sm:$0xff]  ;;  %v10732_v50 = vld [vmem:[#allocation5 + $0x1e80] sm:$0xff] }
 0x6ce   :  { %4919 = vmatprep.mubr.f32.mxu0 %v10550_v17  ;;  %7891 = vmatpush1.bf16.msra.mxu0 %v7890_v7  ;;  %v7898_v17 = vpack.c.bf16 %v4997_v49, %v4995_v34  ;;  %v11911_v7 = vld [vmem:[#allocation58_spill] sm:$0xff]  ;;  %v11923_v58 = vld [vmem:[#allocation27_spill] sm:$0xff]  ;;  %v11930_v45 = vld [vmem:[#allocation29_spill] sm:$0xff] }
 0x6cf   :  { %7893 = vmatprep.subr.bf16.mxu0 %v7892_v57  ;;  %7961 = vmatprep.subr.bf16.mxu1 %v7960_v25  ;;  %v11914_v57 = vld [vmem:[#allocation68_spill] sm:$0xff]  ;;  %v11918_v25 = vld [vmem:[#allocation73_spill] sm:$0xff]  ;;  %v5667_v34 = vld [vmem:[#allocation5 + $0x21d0] sm:$0xff] }
 0x6d0   :  { %v10730_v19 = vld [vmem:[#allocation5 + $0x1e98] sm:$0xff]  ;;  %v10833_v60 = vld [vmem:[#allocation5 + $0x1f70] sm:$0xff] }
 0x6d1   :  { %4920 = vmatmul.mubr.f32.gmra.mrb[80].mxu0 %v10543_v43  ;;  %7963 = vmatpush1.bf16.msra.mxu1 %v7962_v46  ;;  %v7970_v43 = vpack.c.bf16 %v5663_v26, %v5661_v18  ;;  %v11922_v46 = vrot.slane %v11921_v59, 1  ;;  %v5201_v26 = vld [vmem:[#allocation7 + $0x4] ss:$8 sm:$0x3]  ;;  %v11933_v59 = vld [vmem:[#allocation75_spill] sm:$0xff] }
 0x6d2   :  { %4925 = vmatprep.mubr.f32.mxu0 %v10566_v41  ;;  %7895 = vmatpush1.bf16.msra.mxu0 %v7894_v54  ;;  %v7902_v41 = vpack.c.bf16 %v5001_v33, %v4999_v38  ;;  %v5666_v54 = vld [vmem:[#allocation5 + $0x21c8] sm:$0xff]  ;;  %v10699_v38 = vld [vmem:[#allocation5 + $0x1e10] sm:$0xff] }
 0x6d3   :  { %7897 = vmatprep.subr.bf16.mxu0 %v7896_v40  ;;  %7965 = vmatprep.subr.bf16.mxu1 %v7964_v53  ;;  %v7972_v35 = vpack.c.bf16 %v5668_v44, %v5666_v54  ;;  %v5665_v40 = vld [vmem:[#allocation5 + $0x21c0] sm:$0xff]  ;;  %v10701_v33 = vld [vmem:[#allocation5 + $0x1e28] sm:$0xff]  ;;  %v10786_v44 = vld [vmem:[#allocation5 + $0x1f38] sm:$0xff] }
 0x6d4   :  { %v7974_v49 = vpack.c.bf16 %v5667_v34, %v5665_v40  ;;  %v10784_v54 = vld [vmem:[#allocation5 + $0x1f28] sm:$0xff]  ;;  %v10825_v40 = vld [vmem:[#allocation5 + $0x1f60] sm:$0xff] }
 0x6d5   :  { %4926 = vmatmul.mubr.f32.gmra.mrb[82].mxu0 %v10559_v6  ;;  %7967 = vmatpush1.bf16.msra.mxu1 %v7966_v32  ;;  %v7906_v6 = vpack.c.bf16 %v5005_v1, %v5003_v12  ;;  %v5545_v32 = vld [vmem:[#allocation5 + $0x1e08] sm:$0xff]  ;;  %v10715_v12 = vld [vmem:[#allocation5 + $0x1e50] sm:$0xff] }
 0x6d6   :  { %4931 = vmatprep.mubr.f32.mxu0 %v10582_v37  ;;  %7899 = vmatpush1.bf16.msra.mxu0 %v7898_v17  ;;  %v5009_v37 = vld [vmem:[#allocation5 + $0x1dd0] sm:$0xff]  ;;  %v5547_v17 = vld [vmem:[#allocation5 + $0x1e18] sm:$0xff]  ;;  %v10717_v1 = vld [vmem:[#allocation5 + $0x1e68] sm:$0xff] }
 0x6d7   :  { %7901 = vmatprep.subr.bf16.mxu0 %v7900_v28  ;;  %7969 = vmatprep.subr.bf16.mxu1 %v7968_v15  ;;  %v7910_v51 = vpack.c.bf16 %v5009_v37, %v5007_v36  ;;  %v7980_v18 = vpack.c.bf16 %v5547_v17, %v5545_v32  ;;  %v10697_v28 = vld [vmem:[#allocation5 + $0x1e00] sm:$0xff]  ;;  %v10703_v15 = vld [vmem:[#allocation5 + $0x1e38] sm:$0xff]  ;;  %v10726_v36 = vld [vmem:[#allocation5 + $0x1e70] sm:$0xff] }
 0x6d8   :  { %v10728_v37 = vld [vmem:[#allocation5 + $0x1e88] sm:$0xff]  ;;  %v10823_v17 = vld [vmem:[#allocation5 + $0x1f78] sm:$0xff] }
 0x6d9   :  { %4932 = vmatmul.mubr.f32.gmra.mrb[84].mxu0 %v10575_v14  ;;  %7971 = vmatpush1.bf16.msra.mxu1 %v7970_v43  ;;  %v5011_v14 = vld [vmem:[#allocation5 + $0x1de0] sm:$0xff]  ;;  %v10709_v43 = vld [vmem:[#allocation5 + $0x1e48] sm:$0xff] }
 0x6da   :  { %4937 = vmatprep.mubr.f32.mxu0 %v10600_v10  ;;  %7903 = vmatpush1.bf16.msra.mxu0 %v7902_v41  ;;  %v7914_v10 = vpack.c.bf16 %v5013_v16, %v5011_v14  ;;  %v10711_v41 = vld [vmem:[#allocation5 + $0x1e58] sm:$0xff]  ;;  %v10739_v16 = vld [vmem:[#allocation5 + $0x1ea8] sm:$0xff] }
 0x6db   :  { %7905 = vmatprep.subr.bf16.mxu0 %v7904_v39  ;;  %7973 = vmatprep.subr.bf16.mxu1 %v7972_v35  ;;  %v10713_v39 = vld [vmem:[#allocation5 + $0x1e40] sm:$0xff]  ;;  %v10821_v34 = vld [vmem:[#allocation5 + $0x1f68] sm:$0xff] }
 0x6dc   :  { %v10835_v32 = vld [vmem:[#allocation5 + $0x1f88] sm:$0xff] }
 0x6dd   :  { %4938 = vmatmul.mubr.f32.gmra.mrb[86].mxu0 %v10592_v21  ;;  %v11900_v21 = vld [vmem:[#allocation47_spill] sm:$0xff]  ;;  %7975 = vmatpush1.bf16.msra.mxu1 %v7974_v49 }
 0x6de   :  { %4943 = vmatprep.mubr.f32.mxu0 %v10624_v42  ;;  %7907 = vmatpush1.bf16.msra.mxu0 %v7906_v6  ;;  %v11903_v42 = vld [vmem:[#allocation46_spill] sm:$0xff]  ;;  %v10722_v6 = vrot.slane %v5201_v26, %v11923_v58 }
 0x6df   :  { %7909 = vmatprep.subr.bf16.mxu0 %v7908_v29  ;;  %v10724_v29 = vld [vmem:[#allocation5 + $0x1e60] sm:$0xff] }
 0x6e1   :  { %4944 = vmatmul.mubr.f32.gmra.mrb[88].mxu0 %v10612_v30  ;;  %v11902_v30 = vld [vmem:[#allocation50_spill] sm:$0xff] }
 0x6e2   :  { %7911 = vmatpush1.bf16.msra.mxu0 %v7910_v51  ;;  %5079 = vmatprep.mubr.f32.mxu0 %v10409_v20  ;;  %v11901_v20 = vld [vmem:[#allocation43_spill] sm:$0xff] }
 0x6e3   :  { %7913 = vmatprep.subr.bf16.mxu0 %v7912_v63  ;;  %v10734_v51 = vld [vmem:[#allocation5 + $0x1e90] sm:$0xff]  ;;  %v11924_v63 = vld [vmem:[#allocation28_spill] sm:$0xff]  ;;  %11926 = vst [vmem:[#allocation43_spill] sm:$0xff] %v10784_v54 }
 0x6e4   :  { %v10737_v14 = vrot.slane %v5201_v26, %v11924_v63  ;;  %v10810_v26 = vld [vmem:[#allocation5 + $0x1f40] sm:$0xff] }
 0x6e6   :  { %7915 = vmatpush1.bf16.msra.mxu0 %v7914_v10  ;;  %v10741_v10 = vld [vmem:[#allocation5 + $0x1eb8] sm:$0xff] }
 0x6e9   :  { %5080 = vmatmul.mubr.f32.vlgmr.msra.gmra.mrb[60].mxu0 %v10400_v9  ;;  %v11904_v9 = vld [vmem:[#allocation53_spill] sm:$0xff] }
 0x6ea   :  { %5085 = vmatprep.mubr.f32.mxu0 %v10425_v0  ;;  %v11905_v0 = vld [vmem:[#allocation49_spill] sm:$0xff] }
 0x6eb   :  { %11931 = vst [vmem:[#allocation49_spill] sm:$0xff] %v10810_v26  ;;  %v11943_v26 = vld [vmem:[#allocation77_spill] sm:$0xff] }
 0x6ed   :  { %5086 = vmatmul.mubr.f32.gmra.mrb[62].mxu0 %v10418_v4  ;;  %v11906_v4 = vld [vmem:[#allocation56_spill] sm:$0xff] }
 0x6ee   :  { %5091 = vmatprep.mubr.f32.mxu0 %v10441_v5  ;;  %v11907_v5 = vld [vmem:[#allocation52_spill] sm:$0xff] }
 0x6ef   :  { %11934 = vst [vmem:[#allocation52_spill] sm:$0xff] %v10835_v32 }
 0x6f1   :  { %5092 = vmatmul.mubr.f32.gmra.mrb[64].mxu0 %v10434_v56  ;;  %v11908_v56 = vld [vmem:[#allocation59_spill] sm:$0xff] }
 0x6f2   :  { %5097 = vmatprep.mubr.f32.mxu0 %v10457_v11  ;;  %v11909_v11 = vld [vmem:[#allocation55_spill] sm:$0xff] }
 0x6f5   :  { %5098 = vmatmul.mubr.f32.gmra.mrb[66].mxu0 %v10450_v55  ;;  %v11910_v55 = vld [vmem:[#allocation62_spill] sm:$0xff] }
 0x6f6   :  { %5103 = vmatprep.mubr.f32.mxu0 %v11900_v21  ;;  %v10743_v21 = vld [vmem:[#allocation5 + $0x1ea0] sm:$0xff] }
 0x6f9   :  { %5104 = vmatmul.mubr.f32.gmra.mrb[68].mxu0 %v11901_v20  ;;  %v10745_v20 = vld [vmem:[#allocation5 + $0x1eb0] sm:$0xff] }
 0x6fa   :  { %5109 = vmatprep.mubr.f32.mxu0 %v11902_v30  ;;  %v10747_v30 = vld [vmem:[#allocation5 + $0x1ec8] sm:$0xff] }
 0x6fd   :  { %5110 = vmatmul.mubr.f32.gmra.mrb[70].mxu0 %v11903_v42  ;;  %v10749_v42 = vld [vmem:[#allocation5 + $0x1ed8] sm:$0xff] }
 0x6fe   :  { %5115 = vmatprep.mubr.f32.mxu0 %v11904_v9  ;;  %v10751_v9 = vld [vmem:[#allocation5 + $0x1ec0] sm:$0xff] }
 0x701   :  { %5116 = vmatmul.mubr.f32.gmra.mrb[72].mxu0 %v11905_v0  ;;  %v10753_v0 = vld [vmem:[#allocation5 + $0x1ed0] sm:$0xff] }
 0x702   :  { %5121 = vmatprep.mubr.f32.mxu0 %v11906_v4  ;;  %v10755_v4 = vld [vmem:[#allocation5 + $0x1ee8] sm:$0xff] }
 0x705   :  { %5122 = vmatmul.mubr.f32.gmra.mrb[74].mxu0 %v11907_v5  ;;  %v10757_v5 = vld [vmem:[#allocation5 + $0x1ef8] sm:$0xff] }
 0x706   :  { %5127 = vmatprep.mubr.f32.mxu0 %v11908_v56  ;;  %v10759_v56 = vld [vmem:[#allocation5 + $0x1ee0] sm:$0xff] }
 0x709   :  { %5128 = vmatmul.mubr.f32.gmra.mrb[76].mxu0 %v11909_v11  ;;  %v10761_v11 = vld [vmem:[#allocation5 + $0x1ef0] sm:$0xff] }
 0x70a   :  { %5133 = vmatprep.mubr.f32.mxu0 %v11910_v55 }
 0x70d   :  { %5134 = vmatmul.mubr.f32.gmra.mrb[78].mxu0 %v11911_v7  ;;  %v11935_v7 = vld [vmem:[#allocation76_spill] sm:$0xff] }
 0x70e   :  { %5139 = vmatprep.mubr.f32.mxu0 %v11912_v62 }
 0x711   :  { %5140 = vmatmul.mubr.f32.gmra.mrb[80].mxu0 %v11913_v13  ;;  %v10837_v13 = vld [vmem:[#allocation5 + $0x1f98] sm:$0xff] }
 0x712   :  { %5145 = vmatprep.mubr.f32.mxu0 %v11914_v57  ;;  %v10769_v57 = vld [vmem:[#allocation5 + $0x1f08] sm:$0xff] }
 0x715   :  { %5146 = vmatmul.mubr.f32.gmra.mrb[82].mxu0 %v11915_v31  ;;  %v10771_v31 = vld [vmem:[#allocation5 + $0x1f18] sm:$0xff] }
 0x716   :  { %5151 = vmatprep.mubr.f32.mxu0 %v11916_v27  ;;  %v10773_v27 = vld [vmem:[#allocation5 + $0x1f00] sm:$0xff] }
 0x717   :  { %11925 = vst [vmem:[#allocation47_spill] sm:$0xff] %v10773_v27 }
 0x719   :  { %5152 = vmatmul.mubr.f32.gmra.mrb[84].mxu0 %v11917_v48 }
 0x71a   :  { %5157 = vmatprep.mubr.f32.mxu0 %v10629_v52  ;;  %v5672_v52 = vld [vmem:[#allocation5 + $0x21f8] sm:$0xff] }
 0x71b   :  { %v7976_v53 = vpack.c.bf16 %v5672_v52, %v5670_v2  ;;  %v10795_v2 = vld [vmem:[#allocation5 + $0x1f20] sm:$0xff]  ;;  %v10797_v52 = vld [vmem:[#allocation5 + $0x1f30] sm:$0xff] }
 0x71c   :  { %11927 = vst [vmem:[#allocation50_spill] sm:$0xff] %v10795_v2  ;;  %11928 = vst [vmem:[#allocation46_spill] sm:$0xff] %v10797_v52 }
 0x71d   :  { %5158 = vmatmul.mubr.f32.gmra.mrb[86].mxu0 %v11918_v25  ;;  %7977 = vmatprep.subr.bf16.mxu1 %v7976_v53  ;;  %v10799_v53 = vld [vmem:[#allocation5 + $0x1f48] sm:$0xff] }
 0x71e   :  { %6816 = vmatprep.mubr.msk.f32.mxu0 %vm334_vm0, %v11920_v24  ;;  %7979 = vmatpush1.bf16.msra.mxu1 %v7978_v23  ;;  %11929 = vst [vmem:[#allocation53_spill] sm:$0xff] %v10799_v53  ;;  %v10849_v23 = vld [vmem:[#allocation5 + $0x1fa8] sm:$0xff] }
 0x71f   :  { %7981 = vmatprep.subr.bf16.mxu1 %v7980_v18  ;;  %v10808_v18 = vld [vmem:[#allocation5 + $0x1f58] sm:$0xff]  ;;  %11938 = vst [vmem:[#allocation62_spill] sm:$0xff] %v10849_v23  ;;  %v11945_v53 = vld [vmem:[#allocation34_spill] sm:$0xff] }
 0x721   :  { %6817 = vmatmul.mubr.msk.f32.gmra.mrb[88].mxu0 %vm334_vm0, %v11922_v46  ;;  %v10782_v46 = vld [vmem:[#allocation5 + $0x1f10] sm:$0xff] }
 0x7bc   :  { %v5081_v55 = vpop.f32.mrb[60].mxu0 }
 0x7bd   :  { %v5213_v48 = vadd.f32 %v10722_v6, %v5081_v55  ;;  %v5083_v25 = vpop.f32.mrb[61].mxu0  ;;  %v10812_v55 = vld [vmem:[#allocation5 + $0x1f50] sm:$0xff] }
 0x7be   :  { %v5214_v35 = vadd.f32 %v10737_v14, %v5083_v25  ;;  %11932 = vst [vmem:[#allocation56_spill] sm:$0xff] %v10812_v55 }
 0x7bf   :  { %v5243_v8 = vmul.f32 %v5213_v48, %v11930_v45  ;;  %v10847_v48 = vld [vmem:[#allocation5 + $0x1f90] sm:$0xff] }
 0x7c0   :  { %v5244_v25 = vmul.f32 %v5214_v35, %v11930_v45  ;;  %v5087_v49 = vpop.f32.mrb[62].mxu0  ;;  %11937 = vst [vmem:[#allocation55_spill] sm:$0xff] %v10847_v48 }
 0x7c1   :  { %v5273_v24 = vadd.f32 %v5243_v8, %v11933_v59  ;;  %v5215_v35 = vadd.f32 %v10722_v6, %v5087_v49  ;;  %v5089_v45 = vpop.f32.mrb[63].mxu0  ;;  %v10845_v8 = vld [vmem:[#allocation5 + $0x1f80] sm:$0xff]  ;;  %v10862_v49 = vld [vmem:[#allocation5 + $0x1fb0] sm:$0xff] }
 0x7c2   :  { %v5216_v62 = vadd.f32 %v10737_v14, %v5089_v45  ;;  %v5274_v63 = vadd.f32 %v5244_v25, %v11935_v7  ;;  %11936 = vst [vmem:[#allocation59_spill] sm:$0xff] %v10845_v8  ;;  %v10858_v25 = vld [vmem:[#allocation5 + $0x1fb8] sm:$0xff]  ;;  %v10860_v59 = vld [vmem:[#allocation5 + $0x1fa0] sm:$0xff]  ;;  %11942 = vst [vmem:[#allocation61_spill] sm:$0xff] %v10862_v49 }
 0x7c3   :  { %v10851_v58 = vmax.f32 %v5273_v24, 0.0  ;;  %v5245_v27 = vmul.f32 %v5215_v35, %v11939_v3  ;;  %11940 = vst [vmem:[#allocation58_spill] sm:$0xff] %v10858_v25  ;;  %11941 = vst [vmem:[#allocation65_spill] sm:$0xff] %v10860_v59  ;;  %v11948_v49 = vld [vmem:[#allocation79_spill] sm:$0xff]  ;;  %v11950_v25 = vld [vmem:[#allocation38_spill] sm:$0xff] }
 0x7c4   :  { %v5246_v2 = vmul.f32 %v5216_v62, %v11939_v3  ;;  %v5093_v52 = vpop.f32.mrb[64].mxu0  ;;  %v10865_v54 = vmax.f32 %v5274_v63, 0.0  ;;  %v11944_v62 = vld [vmem:[#allocation78_spill] sm:$0xff] }
 0x7c5   :  { %v5217_v45 = vadd.f32 %v10722_v6, %v5093_v52  ;;  %v5095_v7 = vpop.f32.mrb[65].mxu0  ;;  %v5275_v55 = vadd.f32 %v5245_v27, %v11943_v26  ;;  %v5453_v26 = vrot.slane %v10851_v58, 1  ;;  %v11951_v48 = vrot.slane %v10851_v58, 7 }
 0x7c6   :  { %v5218_v63 = vadd.f32 %v10737_v14, %v5095_v7  ;;  %5737 = vmatprep.mubr.f32.mxu1 %v10865_v54  ;;  %v5276_v24 = vadd.f32 %v5246_v2, %v11944_v62  ;;  %v11946_v2 = vpack.c.bf16 %v10699_v38, %v10697_v28  ;;  %v5456_v52 = vrot.slane %v10865_v54, 1  ;;  %v11949_v38 = vld [vmem:[#allocation80_spill] sm:$0xff] }
 0x7c7   :  { %v5247_v32 = vmul.f32 %v5217_v45, %v11945_v53  ;;  %5738 = vmatmul.mubr.f32.vlgmr.msra.gmra.mrb[60].mxu1 %v10851_v58  ;;  %v5305_v3 = vmax.f32 %v5275_v55, 0.0  ;;  %v11947_v45 = vpack.c.bf16 %v10703_v15, %v10701_v33 }
 0x7c8   :  { %v5248_v7 = vmul.f32 %v5218_v63, %v11945_v53  ;;  %7983 = vmatpush1.bf16.msra.mxu1 %v11946_v2  ;;  %v5099_v62 = vpop.f32.mrb[66].mxu0  ;;  %v5306_v35 = vmax.f32 %v5276_v24, 0.0 }
 0x7c9   :  { %v5219_v27 = vadd.f32 %v10722_v6, %v5099_v62  ;;  %v5101_v59 = vpop.f32.mrb[67].mxu0  ;;  %7985 = vmatprep.subr.bf16.mxu1 %v11947_v45  ;;  %v5454_v55 = vrot.slane %v5305_v3, 1  ;;  %v5277_v53 = vadd.f32 %v5247_v32, %v11948_v49  ;;  %v5365_v63 = vrot.slane %v5305_v3, 7  ;;  %v11957_v45 = vld [vmem:[#allocation81_spill] sm:$0xff] }
 0x7ca   :  { %v5220_v28 = vadd.f32 %v10737_v14, %v5101_v59  ;;  %5743 = vmatprep.mubr.f32.mxu1 %v5306_v35  ;;  %v5278_v24 = vadd.f32 %v5248_v7, %v11949_v38  ;;  %v5367_v2 = vrot.slane %v5306_v35, 7  ;;  %v5457_v23 = vrot.slane %v5306_v35, 1  ;;  %v11958_v38 = vld [vmem:[#allocation82_spill] sm:$0xff] }
 0x7cb   :  { %v5249_v8 = vmul.f32 %v5219_v27, %v11950_v25  ;;  %5744 = vmatmul.mubr.f32.gmra.mrb[62].mxu1 %v5305_v3  ;;  %v5307_v62 = vmax.f32 %v5277_v53, 0.0  ;;  %v10905_v33 = vsel %vm243_vm1, %v11951_v48, %v5365_v63  ;;  %v10908_v15 = vsel %vm334_vm0, %v5453_v26, %v5454_v55 }
 0x7cc   :  { %11952 = vst [vmem:[#allocation68_spill] sm:$0xff] %v10908_v15  ;;  %v5250_v32 = vmul.f32 %v5220_v28, %v11950_v25  ;;  %v11953_v59 = vpack.c.bf16 %v10707_v47, %v10705_v61  ;;  %v5105_v49 = vpop.f32.mrb[68].mxu0  ;;  %v5308_v35 = vmax.f32 %v5278_v24, 0.0  ;;  %v11954_v27 = vrot.slane %v10865_v54, 7 }
 0x7cd   :  { %v10920_v7 = vsel %vm334_vm0, %v5456_v52, %v5457_v23  ;;  %v5221_v48 = vadd.f32 %v10722_v6, %v5105_v49  ;;  %v5107_v26 = vpop.f32.mrb[69].mxu0  ;;  %v11956_v25 = vpack.c.bf16 %v10711_v41, %v10709_v43  ;;  %v5279_v61 = vadd.f32 %v5249_v8, %v11957_v45  ;;  %v11959_v52 = vld [vmem:[#allocation42_spill] sm:$0xff] }
 0x7ce   :  { %7987 = vmatpush1.bf16.msra.mxu1 %v11953_v59  ;;  %v10917_v3 = vsel %vm243_vm1, %v11954_v27, %v5367_v2  ;;  %11955 = vst [vmem:[#allocation64_spill] sm:$0xff] %v10920_v7  ;;  %v5369_v47 = vrot.slane %v5307_v62, 7  ;;  %v5459_v53 = vrot.slane %v5307_v62, 1  ;;  %v5222_v28 = vadd.f32 %v10737_v14, %v5107_v26  ;;  %5749 = vmatprep.mubr.f32.mxu1 %v5308_v35 }
 0x7cf   :  { %7989 = vmatprep.subr.bf16.mxu1 %v11956_v25  ;;  %v5280_v24 = vadd.f32 %v5250_v32, %v11958_v38  ;;  %v5371_v59 = vrot.slane %v5308_v35, 7  ;;  %v5461_v27 = vrot.slane %v5308_v35, 1  ;;  %v5251_v15 = vmul.f32 %v5221_v48, %v11959_v52  ;;  %5750 = vmatmul.mubr.f32.gmra.mrb[64].mxu1 %v5307_v62  ;;  %v11962_v25 = vld [vmem:[#allocation83_spill] sm:$0xff] }
 0x7d0   :  { %v5309_v49 = vmax.f32 %v5279_v61, 0.0  ;;  %v10931_v7 = vsel %vm243_vm1, %v5365_v63, %v5369_v47  ;;  %v10934_v43 = vsel %vm334_vm0, %v5454_v55, %v5459_v53  ;;  %v5252_v41 = vmul.f32 %v5222_v28, %v11959_v52  ;;  %v5111_v26 = vpop.f32.mrb[70].mxu0  ;;  %v11963_v28 = vld [vmem:[#allocation84_spill] sm:$0xff] }
 0x7d1   :  { %v11960_v8 = vpack.c.bf16 %v10715_v12, %v10713_v39  ;;  %v5310_v32 = vmax.f32 %v5280_v24, 0.0  ;;  %v10941_v35 = vsel %vm243_vm1, %v5367_v2, %v5371_v59  ;;  %v10944_v62 = vsel %vm334_vm0, %v5457_v23, %v5461_v27  ;;  %v5113_v48 = vpop.f32.mrb[71].mxu0  ;;  %v11964_v23 = vld [vmem:[#allocation45_spill] sm:$0xff] }
 0x7d2   :  { %v5223_v63 = vadd.f32 %v10722_v6, %v5111_v26  ;;  %v11961_v55 = vpack.c.bf16 %v10719_v22, %v10717_v1  ;;  %v5281_v45 = vadd.f32 %v5251_v15, %v11962_v25  ;;  %v5373_v61 = vrot.slane %v5309_v49, 7 }
 0x7d3   :  { %7991 = vmatpush1.bf16.msra.mxu1 %v11960_v8  ;;  %v5463_v39 = vrot.slane %v5309_v49, 1  ;;  %v5224_v12 = vadd.f32 %v10737_v14, %v5113_v48  ;;  %5755 = vmatprep.mubr.f32.mxu1 %v5310_v32  ;;  %v5282_v2 = vadd.f32 %v5252_v41, %v11963_v28  ;;  %v5375_v38 = vrot.slane %v5310_v32, 7 }
 0x7d4   :  { %7993 = vmatprep.subr.bf16.mxu1 %v11961_v55  ;;  %v5465_v24 = vrot.slane %v5310_v32, 1  ;;  %v5253_v52 = vmul.f32 %v5223_v63, %v11964_v23  ;;  %5756 = vmatmul.mubr.f32.gmra.mrb[66].mxu1 %v5309_v49  ;;  %v5311_v8 = vmax.f32 %v5281_v45, 0.0  ;;  %v10955_v26 = vsel %vm243_vm1, %v5369_v47, %v5373_v61  ;;  %v5117_v48 = vpop.f32.mrb[72].mxu0  ;;  %v11967_v55 = vld [vmem:[#allocation85_spill] sm:$0xff] }
 0x7d5   :  { %v10958_v1 = vsel %vm334_vm0, %v5459_v53, %v5463_v39  ;;  %v5254_v22 = vmul.f32 %v5224_v12, %v11964_v23  ;;  %v11965_v15 = vpack.c.bf16 %v10726_v36, %v10724_v29  ;;  %v5312_v41 = vmax.f32 %v5282_v2, 0.0  ;;  %v5119_v63 = vpop.f32.mrb[73].mxu0  ;;  %v11968_v12 = vld [vmem:[#allocation86_spill] sm:$0xff] }
 0x7d6   :  { %v10965_v32 = vsel %vm243_vm1, %v5371_v59, %v5375_v38  ;;  %v10968_v49 = vsel %vm334_vm0, %v5461_v27, %v5465_v24  ;;  %v5225_v47 = vadd.f32 %v10722_v6, %v5117_v48  ;;  %v11966_v53 = vpack.c.bf16 %v10730_v19, %v10728_v37  ;;  %v11969_v27 = vld [vmem:[#allocation48_spill] sm:$0xff] }
 0x7d7   :  { %7995 = vmatpush1.bf16.msra.mxu1 %v11965_v15  ;;  %v5283_v25 = vadd.f32 %v5253_v52, %v11967_v55  ;;  %v5377_v45 = vrot.slane %v5311_v8, 7  ;;  %v5467_v29 = vrot.slane %v5311_v8, 1  ;;  %v5226_v36 = vadd.f32 %v10737_v14, %v5119_v63  ;;  %5761 = vmatprep.mubr.f32.mxu1 %v5312_v41 }
 0x7d8   :  { %7997 = vmatprep.subr.bf16.mxu1 %v11966_v53  ;;  %v5284_v59 = vadd.f32 %v5254_v22, %v11968_v12  ;;  %v5379_v28 = vrot.slane %v5312_v41, 7  ;;  %v5469_v2 = vrot.slane %v5312_v41, 1  ;;  %v5255_v23 = vmul.f32 %v5225_v47, %v11969_v27  ;;  %5762 = vmatmul.mubr.f32.gmra.mrb[68].mxu1 %v5311_v8  ;;  %v5123_v63 = vpop.f32.mrb[74].mxu0  ;;  %v11972_v53 = vld [vmem:[#allocation87_spill] sm:$0xff] }
 0x7d9   :  { %v5313_v15 = vmax.f32 %v5283_v25, 0.0  ;;  %v10979_v48 = vsel %vm243_vm1, %v5373_v61, %v5377_v45  ;;  %v10982_v37 = vsel %vm334_vm0, %v5463_v39, %v5467_v29  ;;  %v5256_v19 = vmul.f32 %v5226_v36, %v11969_v27  ;;  %v5125_v47 = vpop.f32.mrb[75].mxu0  ;;  %v11973_v36 = vld [vmem:[#allocation88_spill] sm:$0xff] }
 0x7da   :  { %v11970_v52 = vpack.c.bf16 %v10734_v51, %v10732_v50  ;;  %v5314_v22 = vmax.f32 %v5284_v59, 0.0  ;;  %v10989_v41 = vsel %vm243_vm1, %v5375_v38, %v5379_v28  ;;  %v10992_v8 = vsel %vm334_vm0, %v5465_v24, %v5469_v2  ;;  %v11974_v24 = vld [vmem:[#allocation51_spill] sm:$0xff] }
 0x7db   :  { %v5227_v61 = vadd.f32 %v10722_v6, %v5123_v63  ;;  %v11971_v39 = vpack.c.bf16 %v10741_v10, %v10739_v16  ;;  %v5285_v55 = vadd.f32 %v5255_v23, %v11972_v53  ;;  %v5381_v25 = vrot.slane %v5313_v15, 7 }
 0x7dc   :  { %7999 = vmatpush1.bf16.msra.mxu1 %v11970_v52  ;;  %v5471_v50 = vrot.slane %v5313_v15, 1  ;;  %v5228_v51 = vadd.f32 %v10737_v14, %v5125_v47  ;;  %5767 = vmatprep.mubr.f32.mxu1 %v5314_v22  ;;  %v5286_v38 = vadd.f32 %v5256_v19, %v11973_v36  ;;  %v5383_v12 = vrot.slane %v5314_v22, 7  ;;  %v5129_v47 = vpop.f32.mrb[76].mxu0 }
 0x7dd   :  { %8001 = vmatprep.subr.bf16.mxu1 %v11971_v39  ;;  %v5473_v59 = vrot.slane %v5314_v22, 1  ;;  %v5257_v27 = vmul.f32 %v5227_v61, %v11974_v24  ;;  %5768 = vmatmul.mubr.f32.gmra.mrb[70].mxu1 %v5313_v15  ;;  %v5315_v52 = vmax.f32 %v5285_v55, 0.0  ;;  %v11003_v63 = vsel %vm243_vm1, %v5377_v45, %v5381_v25  ;;  %v5131_v61 = vpop.f32.mrb[77].mxu0  ;;  %v11977_v39 = vld [vmem:[#allocation89_spill] sm:$0xff] }
 0x7de   :  { %v11006_v16 = vsel %vm334_vm0, %v5467_v29, %v5471_v50  ;;  %v5258_v10 = vmul.f32 %v5228_v51, %v11974_v24  ;;  %v11975_v23 = vpack.c.bf16 %v10745_v20, %v10743_v21  ;;  %v5316_v19 = vmax.f32 %v5286_v38, 0.0  ;;  %v11978_v51 = vld [vmem:[#allocation90_spill] sm:$0xff] }
 0x7df   :  { %v11013_v22 = vsel %vm243_vm1, %v5379_v28, %v5383_v12  ;;  %v11016_v15 = vsel %vm334_vm0, %v5469_v2, %v5473_v59  ;;  %v5229_v45 = vadd.f32 %v10722_v6, %v5129_v47  ;;  %v11976_v29 = vpack.c.bf16 %v10749_v42, %v10747_v30  ;;  %v11979_v2 = vld [vmem:[#allocation54_spill] sm:$0xff] }
 0x7e0   :  { %8003 = vmatpush1.bf16.msra.mxu1 %v11975_v23  ;;  %v5287_v53 = vadd.f32 %v5257_v27, %v11977_v39  ;;  %v5385_v55 = vrot.slane %v5315_v52, 7  ;;  %v5475_v21 = vrot.slane %v5315_v52, 1  ;;  %v5230_v20 = vadd.f32 %v10737_v14, %v5131_v61  ;;  %5773 = vmatprep.mubr.f32.mxu1 %v5316_v19  ;;  %v5135_v61 = vpop.f32.mrb[78].mxu0 }
 0x7e1   :  { %8005 = vmatprep.subr.bf16.mxu1 %v11976_v29  ;;  %v5288_v28 = vadd.f32 %v5258_v10, %v11978_v51  ;;  %v5387_v36 = vrot.slane %v5316_v19, 7  ;;  %v5477_v38 = vrot.slane %v5316_v19, 1  ;;  %v5259_v24 = vmul.f32 %v5229_v45, %v11979_v2  ;;  %5774 = vmatmul.mubr.f32.gmra.mrb[72].mxu1 %v5315_v52  ;;  %v5137_v45 = vpop.f32.mrb[79].mxu0  ;;  %v11982_v29 = vld [vmem:[#allocation92_spill] sm:$0xff] }
 0x7e2   :  { %v5317_v23 = vmax.f32 %v5287_v53, 0.0  ;;  %v11027_v47 = vsel %vm243_vm1, %v5381_v25, %v5385_v55  ;;  %v11030_v30 = vsel %vm334_vm0, %v5471_v50, %v5475_v21  ;;  %v5260_v42 = vmul.f32 %v5230_v20, %v11979_v2  ;;  %v11983_v20 = vld [vmem:[#allocation94_spill] sm:$0xff] }
 0x7e3   :  { %v11980_v27 = vpack.c.bf16 %v10753_v0, %v10751_v9  ;;  %v5318_v10 = vmax.f32 %v5288_v28, 0.0  ;;  %v11037_v19 = vsel %vm243_vm1, %v5383_v12, %v5387_v36  ;;  %v11040_v52 = vsel %vm334_vm0, %v5473_v59, %v5477_v38  ;;  %v11984_v59 = vld [vmem:[#allocation57_spill] sm:$0xff] }
 0x7e4   :  { %v5231_v25 = vadd.f32 %v10722_v6, %v5135_v61  ;;  %v11981_v50 = vpack.c.bf16 %v10757_v5, %v10755_v4  ;;  %v5289_v39 = vadd.f32 %v5259_v24, %v11982_v29  ;;  %v5389_v53 = vrot.slane %v5317_v23, 7 }
 0x7e5   :  { %8007 = vmatpush1.bf16.msra.mxu1 %v11980_v27  ;;  %v5479_v9 = vrot.slane %v5317_v23, 1  ;;  %v5232_v0 = vadd.f32 %v10737_v14, %v5137_v45  ;;  %5779 = vmatprep.mubr.f32.mxu1 %v5318_v10  ;;  %v5290_v12 = vadd.f32 %v5260_v42, %v11983_v20  ;;  %v5391_v51 = vrot.slane %v5318_v10, 7  ;;  %v5141_v45 = vpop.f32.mrb[80].mxu0 }
 0x7e6   :  { %8009 = vmatprep.subr.bf16.mxu1 %v11981_v50  ;;  %v5481_v28 = vrot.slane %v5318_v10, 1  ;;  %v5261_v2 = vmul.f32 %v5231_v25, %v11984_v59  ;;  %5780 = vmatmul.mubr.f32.gmra.mrb[74].mxu1 %v5317_v23  ;;  %v5319_v27 = vmax.f32 %v5289_v39, 0.0  ;;  %v11051_v61 = vsel %vm243_vm1, %v5385_v55, %v5389_v53  ;;  %v5143_v25 = vpop.f32.mrb[81].mxu0  ;;  %v11989_v50 = vld [vmem:[#allocation93_spill] sm:$0xff] }
 0x7e7   :  { %v11054_v4 = vsel %vm334_vm0, %v5475_v21, %v5479_v9  ;;  %v5262_v5 = vmul.f32 %v5232_v0, %v11984_v59  ;;  %v11986_v24 = vpack.c.bf16 %v10761_v11, %v10759_v56  ;;  %v5320_v42 = vmax.f32 %v5290_v12, 0.0  ;;  %v11990_v0 = vld [vmem:[#allocation95_spill] sm:$0xff] }
 0x7e8   :  { %11985 = vst [vmem:[#allocation74_spill] sm:$0xff] %v11054_v4  ;;  %v11061_v10 = vsel %vm243_vm1, %v5387_v36, %v5391_v51  ;;  %v11064_v23 = vsel %vm334_vm0, %v5477_v38, %v5481_v28  ;;  %v5233_v55 = vadd.f32 %v10722_v6, %v5141_v45  ;;  %v11988_v21 = vpack.c.bf16 %v10771_v31, %v10769_v57  ;;  %v11991_v38 = vld [vmem:[#allocation60_spill] sm:$0xff] }
 0x7e9   :  { %8011 = vmatpush1.bf16.msra.mxu1 %v11986_v24  ;;  %11987 = vst [vmem:[#allocation71_spill] sm:$0xff] %v11064_v23  ;;  %v5291_v29 = vadd.f32 %v5261_v2, %v11989_v50  ;;  %v5393_v39 = vrot.slane %v5319_v27, 7  ;;  %v5483_v56 = vrot.slane %v5319_v27, 1  ;;  %v5234_v11 = vadd.f32 %v10737_v14, %v5143_v25  ;;  %5785 = vmatprep.mubr.f32.mxu1 %v5320_v42  ;;  %v11993_v2 = vld [vmem:[#allocation47_spill] sm:$0xff] }
 0x7ea   :  { %8013 = vmatprep.subr.bf16.mxu1 %v11988_v21  ;;  %v5292_v36 = vadd.f32 %v5262_v5, %v11990_v0  ;;  %v5395_v20 = vrot.slane %v5320_v42, 7  ;;  %v5485_v12 = vrot.slane %v5320_v42, 1  ;;  %v5263_v59 = vmul.f32 %v5233_v55, %v11991_v38  ;;  %5786 = vmatmul.mubr.f32.gmra.mrb[76].mxu1 %v5319_v27  ;;  %v5147_v21 = vpop.f32.mrb[82].mxu0 }
 0x7eb   :  { %v5321_v24 = vmax.f32 %v5291_v29, 0.0  ;;  %v11075_v45 = vsel %vm243_vm1, %v5389_v53, %v5393_v39  ;;  %v11078_v57 = vsel %vm334_vm0, %v5479_v9, %v5483_v56  ;;  %v5264_v31 = vmul.f32 %v5234_v11, %v11991_v38  ;;  %v5149_v55 = vpop.f32.mrb[83].mxu0  ;;  %v11996_v9 = vld [vmem:[#allocation43_spill] sm:$0xff] }
 0x7ec   :  { %11992 = vst [vmem:[#allocation73_spill] sm:$0xff] %v11078_v57  ;;  %v11994_v25 = vpack.c.bf16 %v10782_v46, %v11993_v2  ;;  %v5322_v5 = vmax.f32 %v5292_v36, 0.0  ;;  %v11085_v42 = vsel %vm243_vm1, %v5391_v51, %v5395_v20  ;;  %v11088_v27 = vsel %vm334_vm0, %v5481_v28, %v5485_v12  ;;  %v11998_v29 = vld [vmem:[#allocation31_spill] sm:$0xff] }
 0x7ed   :  { %11995 = vst [vmem:[#allocation70_spill] sm:$0xff] %v11088_v27  ;;  %v5235_v53 = vadd.f32 %v10722_v6, %v5147_v21  ;;  %v11997_v50 = vpack.c.bf16 %v10786_v44, %v11996_v9  ;;  %v5293_v11 = vadd.f32 %v5263_v59, %v11998_v29  ;;  %v5397_v0 = vrot.slane %v5321_v24, 7  ;;  %v11999_v36 = vld [vmem:[#allocation91_spill] sm:$0xff]  ;;  %v12002_v9 = vld [vmem:[#allocation46_spill] sm:$0xff]  ;;  %v5153_v29 = vpop.f32.mrb[84].mxu0 }
 0x7ee   :  { %8015 = vmatpush1.bf16.msra.mxu1 %v11994_v25  ;;  %v5487_v46 = vrot.slane %v5321_v24, 1  ;;  %v5236_v38 = vadd.f32 %v10737_v14, %v5149_v55  ;;  %5791 = vmatprep.mubr.f32.mxu1 %v5322_v5  ;;  %v5294_v51 = vadd.f32 %v5264_v31, %v11999_v36  ;;  %v5399_v2 = vrot.slane %v5322_v5, 7  ;;  %v12000_v28 = vld [vmem:[#allocation63_spill] sm:$0xff] }
 0x7ef   :  { %8017 = vmatprep.subr.bf16.mxu1 %v11997_v50  ;;  %v5489_v25 = vrot.slane %v5322_v5, 1  ;;  %v5265_v57 = vmul.f32 %v5235_v53, %v12000_v28  ;;  %5792 = vmatmul.mubr.f32.gmra.mrb[78].mxu1 %v5321_v24  ;;  %v5323_v21 = vmax.f32 %v5293_v11, 0.0  ;;  %v11099_v27 = vsel %vm243_vm1, %v5393_v39, %v5397_v0  ;;  %v12003_v50 = vld [vmem:[#allocation50_spill] sm:$0xff]  ;;  %v5155_v53 = vpop.f32.mrb[85].mxu0 }
 0x7f0   :  { %v11102_v44 = vsel %vm334_vm0, %v5483_v56, %v5487_v46  ;;  %v5266_v59 = vmul.f32 %v5236_v38, %v12000_v28  ;;  %v12004_v55 = vpack.c.bf16 %v12002_v9, %v12003_v50  ;;  %v5324_v31 = vmax.f32 %v5294_v51, 0.0  ;;  %v12006_v56 = vld [vmem:[#allocation53_spill] sm:$0xff]  ;;  %v12008_v38 = vld [vmem:[#allocation35_spill] sm:$0xff]  ;;  %v12009_v51 = vld [vmem:[#allocation30_spill] sm:$0xff] }
 0x7f1   :  { %12001 = vst [vmem:[#allocation67_spill] sm:$0xff] %v11102_v44  ;;  %v11109_v5 = vsel %vm243_vm1, %v5395_v20, %v5399_v2  ;;  %v11112_v24 = vsel %vm334_vm0, %v5485_v12, %v5489_v25  ;;  %v5237_v39 = vadd.f32 %v10722_v6, %v5153_v29  ;;  %v12007_v11 = vpack.c.bf16 %v10808_v18, %v12006_v56  ;;  %v12010_v12 = vld [vmem:[#allocation66_spill] sm:$0xff]  ;;  %v12012_v56 = vld [vmem:[#allocation56_spill] sm:$0xff] }
 0x7f2   :  { %8019 = vmatpush1.bf16.msra.mxu1 %v12004_v55  ;;  %12005 = vst [vmem:[#allocation29_spill] sm:$0xff] %v11112_v24  ;;  %v5295_v36 = vadd.f32 %v5265_v57, %v12008_v38  ;;  %v5401_v28 = vrot.slane %v5323_v21, 7  ;;  %v5491_v9 = vrot.slane %v5323_v21, 1  ;;  %v5238_v50 = vadd.f32 %v10737_v14, %v5155_v53  ;;  %5797 = vmatprep.mubr.f32.mxu1 %v5324_v31  ;;  %v5159_v38 = vpop.f32.mrb[86].mxu0 }
 0x7f3   :  { %8021 = vmatprep.subr.bf16.mxu1 %v12007_v11  ;;  %v5296_v20 = vadd.f32 %v5266_v59, %v12009_v51  ;;  %v5403_v55 = vrot.slane %v5324_v31, 7  ;;  %v5493_v44 = vrot.slane %v5324_v31, 1  ;;  %v5267_v24 = vmul.f32 %v5237_v39, %v12010_v12  ;;  %5798 = vmatmul.mubr.f32.gmra.mrb[80].mxu1 %v5323_v21  ;;  %v12013_v11 = vld [vmem:[#allocation49_spill] sm:$0xff]  ;;  %v5161_v39 = vpop.f32.mrb[87].mxu0 }
 0x7f4   :  { %v5325_v29 = vmax.f32 %v5295_v36, 0.0  ;;  %v11123_v4 = vsel %vm243_vm1, %v5397_v0, %v5401_v28  ;;  %v11126_v18 = vsel %vm334_vm0, %v5487_v46, %v5491_v9  ;;  %v5268_v57 = vmul.f32 %v5238_v50, %v12010_v12  ;;  %v12017_v36 = vld [vmem:[#allocation37_spill] sm:$0xff] }
 0x7f5   :  { %12011 = vst [vmem:[#allocation75_spill] sm:$0xff] %v11126_v18  ;;  %v12014_v53 = vpack.c.bf16 %v12012_v56, %v12013_v11  ;;  %v5326_v59 = vmax.f32 %v5296_v20, 0.0  ;;  %v11133_v31 = vsel %vm243_vm1, %v5399_v2, %v5403_v55  ;;  %v11136_v21 = vsel %vm334_vm0, %v5489_v25, %v5493_v44  ;;  %v12018_v20 = vld [vmem:[#allocation33_spill] sm:$0xff] }
 0x7f6   :  { %12015 = vst [vmem:[#allocation76_spill] sm:$0xff] %v11136_v21  ;;  %v5239_v0 = vadd.f32 %v10722_v6, %v5159_v38  ;;  %v12016_v46 = vpack.c.bf16 %v10823_v17, %v10821_v34  ;;  %v5297_v50 = vadd.f32 %v5267_v24, %v12017_v36  ;;  %v5405_v51 = vrot.slane %v5325_v29, 7  ;;  %v12019_v25 = vld [vmem:[#allocation69_spill] sm:$0xff] }
 0x7f7   :  { %8023 = vmatpush1.bf16.msra.mxu1 %v12014_v53  ;;  %v5495_v12 = vrot.slane %v5325_v29, 1  ;;  %v5240_v56 = vadd.f32 %v10737_v14, %v5161_v39  ;;  %5803 = vmatprep.mubr.f32.mxu1 %v5326_v59  ;;  %v5298_v2 = vadd.f32 %v5268_v57, %v12018_v20  ;;  %v5407_v11 = vrot.slane %v5326_v59, 7  ;;  %v5165_v39 = vpop.f32.mrb[88].mxu0  ;;  %v12025_v36 = vld [vmem:[#allocation41_spill] sm:$0xff]  ;;  %v12026_v20 = vld [vmem:[#allocation36_spill] sm:$0xff] }
 0x7f8   :  { %8025 = vmatprep.subr.bf16.mxu1 %v12016_v46  ;;  %v5497_v53 = vrot.slane %v5326_v59, 1  ;;  %v5269_v18 = vmul.f32 %v5239_v0, %v12019_v25  ;;  %5804 = vmatmul.mubr.f32.gmra.mrb[82].mxu1 %v5325_v29  ;;  %v5327_v38 = vmax.f32 %v5297_v50, 0.0  ;;  %v11147_v21 = vsel %vm243_vm1, %v5401_v28, %v5405_v51  ;;  %v5167_v0 = vpop.f32.mrb[89].mxu0 }
 0x7f9   :  { %v11150_v34 = vsel %vm334_vm0, %v5491_v9, %v5495_v12  ;;  %v5270_v17 = vmul.f32 %v5240_v56, %v12019_v25  ;;  %v12021_v24 = vpack.c.bf16 %v10833_v60, %v10825_v40  ;;  %v5328_v57 = vmax.f32 %v5298_v2, 0.0  ;;  %v12023_v9 = vld [vmem:[#allocation52_spill] sm:$0xff]  ;;  %v5601_v2 = vld [vmem:[#allocation5 + $0x1fc8] sm:$0xff] }
 0x7fa   :  { %12020 = vst [vmem:[#allocation32_spill] sm:$0xff] %v11150_v34  ;;  %v11157_v59 = vsel %vm243_vm1, %v5403_v55, %v5407_v11  ;;  %v11160_v29 = vsel %vm334_vm0, %v5493_v44, %v5497_v53  ;;  %v5241_v28 = vadd.f32 %v10722_v6, %v5165_v39  ;;  %v12024_v46 = vpack.c.bf16 %v10837_v13, %v12023_v9  ;;  %v5603_v25 = vld [vmem:[#allocation5 + $0x1fd8] sm:$0xff] }
 0x7fb   :  { %8027 = vmatpush1.bf16.msra.mxu1 %v12021_v24  ;;  %12022 = vst [vmem:[#allocation77_spill] sm:$0xff] %v11160_v29  ;;  %v5299_v50 = vadd.f32 %v5269_v18, %v12025_v36  ;;  %v5409_v56 = vrot.slane %v5327_v38, 7  ;;  %v5499_v60 = vrot.slane %v5327_v38, 1  ;;  %v5242_v40 = vadd.f32 %v10737_v14, %v5167_v0  ;;  %5809 = vmatprep.mubr.f32.mxu1 %v5328_v57  ;;  %v12027_v34 = vld [vmem:[#allocation72_spill] sm:$0xff]  ;;  %v12029_v14 = vld [vmem:[#allocation55_spill] sm:$0xff] }
 0x7fc   :  { %8029 = vmatprep.subr.bf16.mxu1 %v12024_v46  ;;  %v5300_v55 = vadd.f32 %v5270_v17, %v12026_v20  ;;  %v5411_v44 = vrot.slane %v5328_v57, 7  ;;  %v5501_v24 = vrot.slane %v5328_v57, 1  ;;  %v5271_v6 = vmul.f32 %v5241_v28, %v12027_v34  ;;  %5810 = vmatmul.mubr.f32.gmra.mrb[84].mxu1 %v5327_v38  ;;  %v12030_v0 = vld [vmem:[#allocation59_spill] sm:$0xff]  ;;  %v12032_v38 = vld [vmem:[#allocation58_spill] sm:$0xff] }
 0x7fd   :  { %v5329_v39 = vmax.f32 %v5299_v50, 0.0  ;;  %v11171_v13 = vsel %vm243_vm1, %v5405_v51, %v5409_v56  ;;  %v11174_v18 = vsel %vm334_vm0, %v5495_v12, %v5499_v60  ;;  %v5272_v9 = vmul.f32 %v5242_v40, %v12027_v34  ;;  %v12033_v28 = vld [vmem:[#allocation62_spill] sm:$0xff]  ;;  %v12035_v12 = vld [vmem:[#allocation44_spill] sm:$0xff] }
 0x7fe   :  { %12028 = vst [vmem:[#allocation78_spill] sm:$0xff] %v11174_v18  ;;  %v12031_v46 = vpack.c.bf16 %v12029_v14, %v12030_v0  ;;  %v5330_v17 = vmax.f32 %v5300_v55, 0.0  ;;  %v11181_v36 = vsel %vm243_vm1, %v5407_v11, %v5411_v44  ;;  %v11184_v57 = vsel %vm334_vm0, %v5497_v53, %v5501_v24  ;;  %v5600_v18 = vld [vmem:[#allocation5 + $0x1fc0] sm:$0xff]  ;;  %v5602_v34 = vld [vmem:[#allocation5 + $0x1fd0] sm:$0xff]  ;;  %v5605_v0 = vld [vmem:[#allocation5 + $0x1fe8] sm:$0xff] }
 0x7ff   :  { %v12034_v51 = vpack.c.bf16 %v12032_v38, %v12033_v28  ;;  %v8036_v50 = vpack.c.bf16 %v5603_v25, %v5601_v2  ;;  %v5301_v20 = vadd.f32 %v5271_v6, %v12035_v12  ;;  %v5413_v40 = vrot.slane %v5329_v39, 7  ;;  %v12036_v14 = vld [vmem:[#allocation40_spill] sm:$0xff]  ;;  %v12038_v25 = vld [vmem:[#allocation61_spill] sm:$0xff] }
 0x800   :  { %8031 = vmatpush1.bf16.msra.mxu1 %v12031_v46  ;;  %v5503_v29 = vrot.slane %v5329_v39, 1  ;;  %5815 = vmatprep.mubr.f32.mxu1 %v5330_v17  ;;  %v5302_v55 = vadd.f32 %v5272_v9, %v12036_v14  ;;  %v5607_v11 = vld [vmem:[#allocation5 + $0x1ff8] sm:$0xff]  ;;  %v5415_v46 = vrot.slane %v5330_v17, 7  ;;  %v5505_v23 = vrot.slane %v5330_v17, 1  ;;  %v12039_v6 = vld [vmem:[#allocation65_spill] sm:$0xff] }
 0x801   :  { %8033 = vmatprep.subr.bf16.mxu1 %v12034_v51  ;;  %5816 = vmatmul.mubr.f32.gmra.mrb[86].mxu1 %v5329_v39  ;;  %v11191_v53 = vmax.f32 %v5301_v20, 0.0  ;;  %v11194_v38 = vsel %vm243_vm1, %v5409_v56, %v5413_v40  ;;  %v12040_v28 = vpack.c.bf16 %v12038_v25, %v12039_v6  ;;  %v8038_v9 = vpack.c.bf16 %v5602_v34, %v5600_v18  ;;  %v5604_v56 = vld [vmem:[#allocation5 + $0x1fe0] sm:$0xff]  ;;  %v5606_v20 = vld [vmem:[#allocation5 + $0x1ff0] sm:$0xff]  ;;  %v5985_v25 = vld [vmem:[#allocation5 + $0x2208] sm:$0xff] }
 0x802   :  { %v11197_v2 = vsel %vm334_vm0, %v5499_v60, %v5503_v29  ;;  %v11202_v51 = vmax.f32 %v5302_v55, 0.0  ;;  %v11205_v12 = vsel %vm243_vm1, %v5411_v44, %v5415_v46  ;;  %v11208_v39 = vsel %vm334_vm0, %v5501_v24, %v5505_v23  ;;  %v5987_v55 = vld [vmem:[#allocation5 + $0x2218] sm:$0xff] }
 0x803   :  { %12037 = vst [vmem:[#allocation34_spill] sm:$0xff] %v11191_v53  ;;  %v8040_v17 = vpack.c.bf16 %v5607_v11, %v5605_v0  ;;  %v5417_v60 = vrot.slane %v11191_v53, 7  ;;  %v11644_v14 = vrot.slane %v11191_v53, 1  ;;  %v12041_v34 = vrot.slane %v10865_v54, 7  ;;  %v5996_v0 = vld [vmem:[#allocation5 + $0x2260] sm:$0xff] }
 0x804   :  { %8035 = vmatpush1.bf16.msra.mxu1 %v12040_v28  ;;  %5821 = vmatprep.mubr.f32.mxu1 %v11202_v51  ;;  %v5419_v18 = vrot.slane %v11202_v51, 7  ;;  %v5509_v44 = vrot.slane %v11202_v51, 1  ;;  %v8042_v11 = vpack.c.bf16 %v5606_v20, %v5604_v56  ;;  %v8044_v28 = vpack.c.bf16 %v5987_v55, %v5985_v25  ;;  %v5990_v56 = vld [vmem:[#allocation5 + $0x2230] sm:$0xff]  ;;  %v5993_v20 = vld [vmem:[#allocation5 + $0x2248] sm:$0xff]  ;;  %v5992_v25 = vld [vmem:[#allocation5 + $0x2240] sm:$0xff] }
 0x805   :  { %8037 = vmatprep.subr.bf16.mxu1 %v8036_v50  ;;  %5822 = vmatmul.mubr.f32.gmra.mrb[88].mxu1 %v11191_v53  ;;  %v11217_v24 = vsel %vm243_vm1, %v5413_v40, %v5417_v60  ;;  %v11222_v50 = vsel %vm334_vm0, %v5503_v29, %v11644_v14  ;;  %v5984_v60 = vld [vmem:[#allocation5 + $0x2200] sm:$0xff]  ;;  %v5986_v29 = vld [vmem:[#allocation5 + $0x2210] sm:$0xff]  ;;  %v5989_v14 = vld [vmem:[#allocation5 + $0x2228] sm:$0xff] }
 0x806   :  { %6819 = vmatprep.mubr.msk.f32.mxu1 %vm9248_vm2, %v12041_v34  ;;  %v11229_v6 = vsel %vm243_vm1, %v5415_v46, %v5419_v18  ;;  %v11234_v40 = vsel %vm334_vm0, %v5505_v23, %v5509_v44  ;;  %v8046_v54 = vpack.c.bf16 %v5986_v29, %v5984_v60  ;;  %v5988_v34 = vld [vmem:[#allocation5 + $0x2220] sm:$0xff]  ;;  %v5995_v46 = vld [vmem:[#allocation5 + $0x2258] sm:$0xff]  ;;  %v12043_v18 = vrot.slane %v10851_v58, 7  ;;  %v5994_v55 = vld [vmem:[#allocation5 + $0x2250] sm:$0xff] }
 0x807   :  { %v8050_v23 = vpack.c.bf16 %v5990_v56, %v5988_v34  ;;  %v5998_v60 = vld [vmem:[#allocation5 + $0x2270] sm:$0xff]  ;;  %v6001_v29 = vld [vmem:[#allocation5 + $0x2288] sm:$0xff] }
 0x808   :  { %8039 = vmatpush1.bf16.msra.mxu1 %v8038_v9  ;;  %v5991_v9 = vld [vmem:[#allocation5 + $0x2238] sm:$0xff]  ;;  %v6005_v34 = vld [vmem:[#allocation5 + $0x22a8] sm:$0xff]  ;;  %v6382_v51 = vld [vmem:[%s11470_s5] sm:$0xff] }
 0x809   :  { %8041 = vmatprep.subr.bf16.mxu1 %v8040_v17  ;;  %v8048_v53 = vpack.c.bf16 %v5991_v9, %v5989_v14  ;;  %v8052_v17 = vpack.c.bf16 %v5995_v46, %v5993_v20  ;;  %v8054_v14 = vpack.c.bf16 %v5994_v55, %v5992_v25  ;;  %v6004_v46 = vld [vmem:[#allocation5 + $0x22a0] sm:$0xff]  ;;  %v6013_v55 = vld [vmem:[#allocation5 + $0x22e8] sm:$0xff] }
 0x80a   :  { %v6008_v25 = vld [vmem:[#allocation5 + $0x22c0] sm:$0xff] }
 0x80c   :  { %8043 = vmatpush1.bf16.msra.mxu1 %v8042_v11  ;;  %v5997_v11 = vld [vmem:[#allocation5 + $0x2268] sm:$0xff] }
 0x80d   :  { %8045 = vmatprep.subr.bf16.mxu1 %v8044_v28  ;;  %v5999_v28 = vld [vmem:[#allocation5 + $0x2278] sm:$0xff] }
 0x80e   :  { %v8056_v58 = vpack.c.bf16 %v5999_v28, %v5997_v11 }
 0x80f   :  { %6821 = vmatmul.mubr.msk.f32.vlgmr.msra.gmra.mrb[60].mxu1 %vm9248_vm2, %v12043_v18  ;;  %v6009_v18 = vld [vmem:[#allocation5 + $0x22c8] sm:$0xff] }
 0x810   :  { %5898 = vmatprep.mubr.f32.mxu1 %v10917_v3  ;;  %8047 = vmatpush1.bf16.msra.mxu1 %v8046_v54  ;;  %v6003_v3 = vld [vmem:[#allocation5 + $0x2298] sm:$0xff]  ;;  %v6000_v54 = vld [vmem:[#allocation5 + $0x2280] sm:$0xff] }
 0x811   :  { %8049 = vmatprep.subr.bf16.mxu1 %v8048_v53  ;;  %v8058_v53 = vpack.c.bf16 %v5998_v60, %v5996_v0  ;;  %v8060_v9 = vpack.c.bf16 %v6003_v3, %v6001_v29  ;;  %v6016_v29 = vld [vmem:[#allocation5 + $0x2300] sm:$0xff]  ;;  %v6021_v3 = vld [vmem:[#allocation5 + $0x2328] sm:$0xff] }
 0x813   :  { %5899 = vmatmul.mubr.f32.gmra.mrb[62].mxu1 %v10905_v33  ;;  %v6002_v33 = vld [vmem:[#allocation5 + $0x2290] sm:$0xff] }
 0x814   :  { %5904 = vmatprep.mubr.f32.mxu1 %v10941_v35  ;;  %8051 = vmatpush1.bf16.msra.mxu1 %v8050_v23  ;;  %v6007_v35 = vld [vmem:[#allocation5 + $0x22b8] sm:$0xff]  ;;  %v8062_v56 = vpack.c.bf16 %v6002_v33, %v6000_v54  ;;  %v6020_v54 = vld [vmem:[#allocation5 + $0x2320] sm:$0xff]  ;;  %v6025_v33 = vld [vmem:[#allocation5 + $0x2348] sm:$0xff] }
 0x815   :  { %8053 = vmatprep.subr.bf16.mxu1 %v8052_v17  ;;  %v8064_v20 = vpack.c.bf16 %v6007_v35, %v6005_v34 }
 0x817   :  { %5905 = vmatmul.mubr.f32.gmra.mrb[64].mxu1 %v10931_v7  ;;  %v6006_v7 = vld [vmem:[#allocation5 + $0x22b0] sm:$0xff] }
 0x818   :  { %5910 = vmatprep.mubr.f32.mxu1 %v10965_v32  ;;  %8055 = vmatpush1.bf16.msra.mxu1 %v8054_v14  ;;  %v6011_v32 = vld [vmem:[#allocation5 + $0x22d8] sm:$0xff]  ;;  %v8066_v23 = vpack.c.bf16 %v6006_v7, %v6004_v46  ;;  %v6012_v14 = vld [vmem:[#allocation5 + $0x22e0] sm:$0xff] }
 0x819   :  { %8057 = vmatprep.subr.bf16.mxu1 %v8056_v58  ;;  %v8068_v17 = vpack.c.bf16 %v6011_v32, %v6009_v18  ;;  %v6017_v58 = vld [vmem:[#allocation5 + $0x2308] sm:$0xff]  ;;  %v6028_v18 = vld [vmem:[#allocation5 + $0x2360] sm:$0xff] }
 0x81a   :  { %v6033_v32 = vld [vmem:[#allocation5 + $0x2388] sm:$0xff] }
 0x81b   :  { %5911 = vmatmul.mubr.f32.gmra.mrb[66].mxu1 %v10955_v26  ;;  %v6010_v26 = vld [vmem:[#allocation5 + $0x22d0] sm:$0xff] }
 0x81c   :  { %5916 = vmatprep.mubr.f32.mxu1 %v10989_v41  ;;  %8059 = vmatpush1.bf16.msra.mxu1 %v8058_v53  ;;  %v6015_v41 = vld [vmem:[#allocation5 + $0x22f8] sm:$0xff]  ;;  %v8070_v11 = vpack.c.bf16 %v6010_v26, %v6008_v25  ;;  %v6032_v25 = vld [vmem:[#allocation5 + $0x2380] sm:$0xff]  ;;  %v6037_v26 = vld [vmem:[#allocation5 + $0x23a8] sm:$0xff] }
 0x81d   :  { %8061 = vmatprep.subr.bf16.mxu1 %v8060_v9  ;;  %v8072_v28 = vpack.c.bf16 %v6015_v41, %v6013_v55 }
 0x81f   :  { %5917 = vmatmul.mubr.f32.gmra.mrb[68].mxu1 %v10979_v48  ;;  %v6014_v48 = vld [vmem:[#allocation5 + $0x22f0] sm:$0xff] }
 0x820   :  { %5922 = vmatprep.mubr.f32.mxu1 %v11013_v22  ;;  %8063 = vmatpush1.bf16.msra.mxu1 %v8062_v56  ;;  %v6019_v22 = vld [vmem:[#allocation5 + $0x2318] sm:$0xff]  ;;  %v8074_v0 = vpack.c.bf16 %v6014_v48, %v6012_v14  ;;  %v6024_v56 = vld [vmem:[#allocation5 + $0x2340] sm:$0xff] }
 0x821   :  { %8065 = vmatprep.subr.bf16.mxu1 %v8064_v20  ;;  %v8076_v60 = vpack.c.bf16 %v6019_v22, %v6017_v58  ;;  %v6029_v20 = vld [vmem:[#allocation5 + $0x2368] sm:$0xff]  ;;  %v6040_v58 = vld [vmem:[#allocation5 + $0x23c0] sm:$0xff] }
 0x822   :  { %v6045_v22 = vld [vmem:[#allocation5 + $0x23e8] sm:$0xff] }
 0x823   :  { %5923 = vmatmul.mubr.f32.gmra.mrb[70].mxu1 %v11003_v63  ;;  %v6018_v63 = vld [vmem:[#allocation5 + $0x2310] sm:$0xff] }
 0x824   :  { %5928 = vmatprep.mubr.f32.mxu1 %v11037_v19  ;;  %8067 = vmatpush1.bf16.msra.mxu1 %v8066_v23  ;;  %v6023_v19 = vld [vmem:[#allocation5 + $0x2338] sm:$0xff]  ;;  %v8078_v53 = vpack.c.bf16 %v6018_v63, %v6016_v29  ;;  %v6044_v29 = vld [vmem:[#allocation5 + $0x23e0] sm:$0xff] }
 0x825   :  { %8069 = vmatprep.subr.bf16.mxu1 %v8068_v17  ;;  %v8080_v9 = vpack.c.bf16 %v6023_v19, %v6021_v3  ;;  %v12045_v3 = vld [vmem:[#allocation68_spill] sm:$0xff]  ;;  %v8863_v19 = vmov 0.0  }
 0x826   :  { %6375 = vmatprep.mubr.f32.mxu0 %v8863_v19 }
 0x827   :  { %5929 = vmatmul.mubr.f32.gmra.mrb[72].mxu1 %v11027_v47  ;;  %v6022_v47 = vld [vmem:[#allocation5 + $0x2330] sm:$0xff] }
 0x828   :  { %5934 = vmatprep.mubr.f32.mxu1 %v11061_v10  ;;  %8071 = vmatpush1.bf16.msra.mxu1 %v8070_v11  ;;  %v6027_v10 = vld [vmem:[#allocation5 + $0x2358] sm:$0xff]  ;;  %v8082_v34 = vpack.c.bf16 %v6022_v47, %v6020_v54  ;;  %v6036_v11 = vld [vmem:[#allocation5 + $0x23a0] sm:$0xff]  ;;  %v6385_v47 = vld [vmem:[%s11470_s5 + $0x18] sm:$0xff] }
 0x829   :  { %8073 = vmatprep.subr.bf16.mxu1 %v8072_v28  ;;  %v8084_v35 = vpack.c.bf16 %v6027_v10, %v6025_v33  ;;  %v6041_v28 = vld [vmem:[#allocation5 + $0x23c8] sm:$0xff]  ;;  %v6384_v54 = vld [vmem:[%s11470_s5 + $0x10] sm:$0xff]  ;;  %v6402_v33 = vld [vmem:[%s11470_s5 + $0xa0] sm:$0xff] }
 0x82a   :  { %v6403_v10 = vld [vmem:[%s11470_s5 + $0xa8] sm:$0xff] }
 0x82b   :  { %5935 = vmatmul.mubr.f32.gmra.mrb[74].mxu1 %v11051_v61  ;;  %v6026_v61 = vld [vmem:[#allocation5 + $0x2350] sm:$0xff] }
 0x82c   :  { %5940 = vmatprep.mubr.f32.mxu1 %v11085_v42  ;;  %8075 = vmatpush1.bf16.msra.mxu1 %v8074_v0  ;;  %v6031_v42 = vld [vmem:[#allocation5 + $0x2378] sm:$0xff]  ;;  %v8086_v46 = vpack.c.bf16 %v6026_v61, %v6024_v56  ;;  %v6386_v56 = vld [vmem:[%s11470_s5 + $0x20] sm:$0xff] }
 0x82d   :  { %8077 = vmatprep.subr.bf16.mxu1 %v8076_v60  ;;  %v8088_v7 = vpack.c.bf16 %v6031_v42, %v6029_v20  ;;  %v6387_v61 = vld [vmem:[%s11470_s5 + $0x28] sm:$0xff]  ;;  %v6404_v20 = vld [vmem:[%s11470_s5 + $0xb0] sm:$0xff]  ;;  %v6405_v42 = vld [vmem:[%s11470_s5 + $0xb8] sm:$0xff] }
 0x82f   :  { %5941 = vmatmul.mubr.f32.gmra.mrb[76].mxu1 %v11075_v45  ;;  %v6030_v45 = vld [vmem:[#allocation5 + $0x2370] sm:$0xff] }
 0x830   :  { %5946 = vmatprep.mubr.f32.mxu1 %v11109_v5  ;;  %8079 = vmatpush1.bf16.msra.mxu1 %v8078_v53  ;;  %v6035_v5 = vld [vmem:[#allocation5 + $0x2398] sm:$0xff]  ;;  %v8090_v23 = vpack.c.bf16 %v6030_v45, %v6028_v18  ;;  %v6388_v18 = vld [vmem:[%s11470_s5 + $0x30] sm:$0xff]  ;;  %v6389_v45 = vld [vmem:[%s11470_s5 + $0x38] sm:$0xff] }
 0x831   :  { %8081 = vmatprep.subr.bf16.mxu1 %v8080_v9  ;;  %v8092_v17 = vpack.c.bf16 %v6035_v5, %v6033_v32  ;;  %v6406_v32 = vld [vmem:[%s11470_s5 + $0xc0] sm:$0xff]  ;;  %v6407_v5 = vld [vmem:[%s11470_s5 + $0xc8] sm:$0xff] }
 0x833   :  { %5947 = vmatmul.mubr.f32.gmra.mrb[78].mxu1 %v11099_v27  ;;  %v6034_v27 = vld [vmem:[#allocation5 + $0x2390] sm:$0xff] }
 0x834   :  { %5952 = vmatprep.mubr.f32.mxu1 %v11133_v31  ;;  %8083 = vmatpush1.bf16.msra.mxu1 %v8082_v34  ;;  %v6039_v31 = vld [vmem:[#allocation5 + $0x23b8] sm:$0xff]  ;;  %v8094_v55 = vpack.c.bf16 %v6034_v27, %v6032_v25  ;;  %v8142_v34 = vpack.c.bf16 %v6385_v47, %v6384_v54  ;;  %v6390_v25 = vld [vmem:[%s11470_s5 + $0x40] sm:$0xff] }
 0x835   :  { %8085 = vmatprep.subr.bf16.mxu1 %v8084_v35  ;;  %v8096_v41 = vpack.c.bf16 %v6039_v31, %v6037_v26  ;;  %v8144_v35 = vpack.c.bf16 %v6403_v10, %v6402_v33  ;;  %v6391_v27 = vld [vmem:[%s11470_s5 + $0x48] sm:$0xff]  ;;  %v6408_v26 = vld [vmem:[%s11470_s5 + $0xd0] sm:$0xff]  ;;  %v6409_v31 = vld [vmem:[%s11470_s5 + $0xd8] sm:$0xff] }
 0x837   :  { %5953 = vmatmul.mubr.f32.gmra.mrb[80].mxu1 %v11123_v4  ;;  %v6038_v4 = vld [vmem:[#allocation5 + $0x23b0] sm:$0xff] }
 0x838   :  { %5958 = vmatprep.mubr.f32.mxu1 %v11157_v59  ;;  %8087 = vmatpush1.bf16.msra.mxu1 %v8086_v46  ;;  %v6043_v59 = vld [vmem:[#allocation5 + $0x23d8] sm:$0xff]  ;;  %v8098_v14 = vpack.c.bf16 %v6038_v4, %v6036_v11  ;;  %v8146_v46 = vpack.c.bf16 %v6387_v61, %v6386_v56  ;;  %v6392_v11 = vld [vmem:[%s11470_s5 + $0x50] sm:$0xff]  ;;  %v6393_v4 = vld [vmem:[%s11470_s5 + $0x58] sm:$0xff] }
 0x839   :  { %8089 = vmatprep.subr.bf16.mxu1 %v8088_v7  ;;  %v8100_v48 = vpack.c.bf16 %v6043_v59, %v6041_v28  ;;  %v8148_v7 = vpack.c.bf16 %v6405_v42, %v6404_v20  ;;  %v6410_v28 = vld [vmem:[%s11470_s5 + $0xe0] sm:$0xff]  ;;  %v6411_v59 = vld [vmem:[%s11470_s5 + $0xe8] sm:$0xff] }
 0x83b   :  { %5959 = vmatmul.mubr.f32.gmra.mrb[82].mxu1 %v11147_v21  ;;  %v6042_v21 = vld [vmem:[#allocation5 + $0x23d0] sm:$0xff] }
 0x83c   :  { %5964 = vmatprep.mubr.f32.mxu1 %v11181_v36  ;;  %8091 = vmatpush1.bf16.msra.mxu1 %v8090_v23  ;;  %v6047_v36 = vld [vmem:[#allocation5 + $0x23f8] sm:$0xff]  ;;  %v8102_v0 = vpack.c.bf16 %v6042_v21, %v6040_v58  ;;  %v8150_v23 = vpack.c.bf16 %v6389_v45, %v6388_v18  ;;  %v6394_v58 = vld [vmem:[%s11470_s5 + $0x60] sm:$0xff] }
 0x83d   :  { %8093 = vmatprep.subr.bf16.mxu1 %v8092_v17  ;;  %v8104_v60 = vpack.c.bf16 %v6047_v36, %v6045_v22  ;;  %v8152_v17 = vpack.c.bf16 %v6407_v5, %v6406_v32  ;;  %v6395_v21 = vld [vmem:[%s11470_s5 + $0x68] sm:$0xff]  ;;  %v6412_v22 = vld [vmem:[%s11470_s5 + $0xf0] sm:$0xff]  ;;  %v6413_v36 = vld [vmem:[%s11470_s5 + $0xf8] sm:$0xff] }
 0x83f   :  { %5965 = vmatmul.mubr.f32.gmra.mrb[84].mxu1 %v11171_v13  ;;  %v6046_v13 = vld [vmem:[#allocation5 + $0x23f0] sm:$0xff] }
 0x840   :  { %5970 = vmatprep.mubr.f32.mxu1 %v11205_v12  ;;  %8095 = vmatpush1.bf16.msra.mxu1 %v8094_v55  ;;  %v12044_v12 = vld [vmem:[#allocation64_spill] sm:$0xff]  ;;  %v8106_v63 = vpack.c.bf16 %v6046_v13, %v6044_v29  ;;  %v8154_v55 = vpack.c.bf16 %v6391_v27, %v6390_v25  ;;  %v12059_v13 = vld [vmem:[#allocation27_spill] sm:$0xff] }
 0x841   :  { %8097 = vmatprep.subr.bf16.mxu1 %v8096_v41  ;;  %v8156_v41 = vpack.c.bf16 %v6409_v31, %v6408_v26  ;;  %v6234_v29 = vld [vmem:[#allocation7 + $0x5] ss:$8 sm:$0x3] }
 0x843   :  { %5971 = vmatmul.mubr.f32.gmra.mrb[86].mxu1 %v11194_v38  ;;  %v12046_v38 = vld [vmem:[#allocation71_spill] sm:$0xff] }
 0x844   :  { %5976 = vmatprep.mubr.f32.mxu1 %v11229_v6  ;;  %8099 = vmatpush1.bf16.msra.mxu1 %v8098_v14  ;;  %v8158_v14 = vpack.c.bf16 %v6393_v4, %v6392_v11 }
 0x845   :  { %8101 = vmatprep.subr.bf16.mxu1 %v8100_v48  ;;  %v8160_v48 = vpack.c.bf16 %v6411_v59, %v6410_v28 }
 0x847   :  { %5977 = vmatmul.mubr.f32.gmra.mrb[88].mxu1 %v11217_v24  ;;  %v12057_v24 = vld [vmem:[#allocation34_spill] sm:$0xff] }
 0x848   :  { %8103 = vmatpush1.bf16.msra.mxu1 %v8102_v0  ;;  %6112 = vmatprep.mubr.f32.mxu1 %v12044_v12  ;;  %v12058_v6 = vrot.slane %v12057_v24, 1  ;;  %v8162_v0 = vpack.c.bf16 %v6395_v21, %v6394_v58  ;;  %v11394_v12 = vrot.slane %v6234_v29, %v12059_v13 }
 0x849   :  { %8105 = vmatprep.subr.bf16.mxu1 %v8104_v60  ;;  %v8164_v60 = vpack.c.bf16 %v6413_v36, %v6412_v22 }
 0x84c   :  { %8107 = vmatpush1.bf16.msra.mxu1 %v8106_v63 }
 0x84f   :  { %6113 = vmatmul.mubr.f32.vlgmr.msra.gmra.mrb[60].mxu1 %v12045_v3  ;;  %v12060_v3 = vld [vmem:[#allocation28_spill] sm:$0xff] }
 0x850   :  { %6118 = vmatprep.mubr.f32.mxu1 %v10944_v62  ;;  %v12047_v62 = vld [vmem:[#allocation74_spill] sm:$0xff] }
 0x853   :  { %6119 = vmatmul.mubr.f32.gmra.mrb[62].mxu1 %v10934_v43  ;;  %v12048_v43 = vld [vmem:[#allocation70_spill] sm:$0xff] }
 0x854   :  { %6124 = vmatprep.mubr.f32.mxu1 %v10968_v49  ;;  %v12049_v49 = vld [vmem:[#allocation73_spill] sm:$0xff] }
 0x857   :  { %6125 = vmatmul.mubr.f32.gmra.mrb[64].mxu1 %v10958_v1  ;;  %v12050_v1 = vld [vmem:[#allocation29_spill] sm:$0xff] }
 0x858   :  { %6130 = vmatprep.mubr.f32.mxu1 %v10992_v8  ;;  %v12051_v8 = vld [vmem:[#allocation67_spill] sm:$0xff] }
 0x85b   :  { %6131 = vmatmul.mubr.f32.gmra.mrb[66].mxu1 %v10982_v37  ;;  %v12052_v37 = vld [vmem:[#allocation76_spill] sm:$0xff] }
 0x85c   :  { %6136 = vmatprep.mubr.f32.mxu1 %v11016_v15  ;;  %v12053_v15 = vld [vmem:[#allocation75_spill] sm:$0xff] }
 0x85f   :  { %6137 = vmatmul.mubr.f32.gmra.mrb[68].mxu1 %v11006_v16  ;;  %v12054_v16 = vld [vmem:[#allocation77_spill] sm:$0xff] }
 0x860   :  { %6142 = vmatprep.mubr.f32.mxu1 %v11040_v52  ;;  %v12055_v52 = vld [vmem:[#allocation32_spill] sm:$0xff] }
 0x863   :  { %6143 = vmatmul.mubr.f32.gmra.mrb[70].mxu1 %v11030_v30  ;;  %v12056_v30 = vld [vmem:[#allocation78_spill] sm:$0xff] }
 0x864   :  { %6148 = vmatprep.mubr.f32.mxu1 %v12046_v38  ;;  %v11397_v38 = vrot.slane %v6234_v29, %v12060_v3 }
 0x867   :  { %6149 = vmatmul.mubr.f32.gmra.mrb[72].mxu1 %v12047_v62 }
 0x868   :  { %6154 = vmatprep.mubr.f32.mxu1 %v12048_v43 }
 0x86b   :  { %6155 = vmatmul.mubr.f32.gmra.mrb[74].mxu1 %v12049_v49 }
 0x86c   :  { %6160 = vmatprep.mubr.f32.mxu1 %v12050_v1 }
 0x86f   :  { %6161 = vmatmul.mubr.f32.gmra.mrb[76].mxu1 %v12051_v8 }
 0x870   :  { %6166 = vmatprep.mubr.f32.mxu1 %v12052_v37 }
 0x873   :  { %6167 = vmatmul.mubr.f32.gmra.mrb[78].mxu1 %v12053_v15 }
 0x874   :  { %6172 = vmatprep.mubr.f32.mxu1 %v12054_v16 }
 0x877   :  { %6173 = vmatmul.mubr.f32.gmra.mrb[80].mxu1 %v12055_v52 }
 0x878   :  { %6178 = vmatprep.mubr.f32.mxu1 %v11184_v57  ;;  %v6398_v57 = vld [vmem:[%s11470_s5 + $0x80] sm:$0xff] }
 0x87b   :  { %6179 = vmatmul.mubr.f32.gmra.mrb[82].mxu1 %v12056_v30 }
 0x87c   :  { %6184 = vmatprep.mubr.f32.mxu1 %v11208_v39 }
 0x87f   :  { %6185 = vmatmul.mubr.f32.gmra.mrb[84].mxu1 %v11197_v2  ;;  %v6399_v2 = vld [vmem:[%s11470_s5 + $0x88] sm:$0xff] }
 0x880   :  { %6190 = vmatprep.mubr.f32.mxu1 %v11234_v40  ;;  %v8136_v39 = vpack.c.bf16 %v6399_v2, %v6398_v57  ;;  %v6401_v40 = vld [vmem:[%s11470_s5 + $0x98] sm:$0xff] }
 0x882   :  { %8137 = vmatprep.subr.bf16.mxu1 %v8136_v39 }
 0x883   :  { %6191 = vmatmul.mubr.f32.gmra.mrb[86].mxu1 %v11222_v50  ;;  %v6400_v50 = vld [vmem:[%s11470_s5 + $0x90] sm:$0xff] }
 0x884   :  { %6822 = vmatprep.mubr.msk.f32.mxu1 %vm334_vm0, %v5509_v44  ;;  %v6383_v44 = vld [vmem:[%s11470_s5 + $0x8] sm:$0xff]  ;;  %v8140_v9 = vpack.c.bf16 %v6401_v40, %v6400_v50 }
 0x885   :  { %v8138_v53 = vpack.c.bf16 %v6383_v44, %v6382_v51 }
 0x887   :  { %6823 = vmatmul.mubr.msk.f32.gmra.mrb[88].mxu1 %vm334_vm0, %v12058_v6 }
 0x888   :  { %8139 = vmatpush3.bf16.msra.mxu1 %v8138_v53 }
 0x889   :  { %8141 = vmatprep.subr.bf16.mxu1 %v8140_v9 }
 0x88c   :  { %8143 = vmatpush3.bf16.msra.mxu1 %v8142_v34 }
 0x88d   :  { %8145 = vmatprep.subr.bf16.mxu1 %v8144_v35 }
 0x890   :  { %8147 = vmatpush3.bf16.msra.mxu1 %v8146_v46 }
 0x891   :  { %8149 = vmatprep.subr.bf16.mxu1 %v8148_v7 }
 0x894   :  { %8151 = vmatpush3.bf16.msra.mxu1 %v8150_v23 }
 0x895   :  { %8153 = vmatprep.subr.bf16.mxu1 %v8152_v17 }
 0x898   :  { %8155 = vmatpush3.bf16.msra.mxu1 %v8154_v55 }
 0x899   :  { %8157 = vmatprep.subr.bf16.mxu1 %v8156_v41 }
 0x89c   :  { %8159 = vmatpush3.bf16.msra.mxu1 %v8158_v14 }
 0x89d   :  { %8161 = vmatprep.subr.bf16.mxu1 %v8160_v48 }
 0x8a0   :  { %8163 = vmatpush3.bf16.msra.mxu1 %v8162_v0 }
 0x8a1   :  { %8165 = vmatprep.subr.bf16.mxu1 %v8164_v60 }
 0x922   :  { %v6114_v63 = vpop.f32.mrb[60].mxu1 }
 0x923   :  { %v6116_v62 = vpop.f32.mrb[61].mxu1  ;;  %v6246_v43 = vadd.f32 %v11394_v12, %v6114_v63 }
 0x924   :  { %v6247_v49 = vadd.f32 %v11397_v38, %v6116_v62 }
 0x925   :  { %v6276_v16 = vmax.f32 %v6246_v43, 0.0 }
 0x926   :  { %v6120_v1 = vpop.f32.mrb[62].mxu1  ;;  %v6277_v30 = vmax.f32 %v6247_v49, 0.0 }
 0x927   :  { %v6248_v8 = vadd.f32 %v11394_v12, %v6120_v1  ;;  %v6122_v37 = vpop.f32.mrb[63].mxu1 }
 0x928   :  { %v6249_v15 = vadd.f32 %v11397_v38, %v6122_v37 }
 0x929   :  { %v6278_v52 = vmax.f32 %v6248_v8, 0.0 }
 0x92a   :  { %v6279_v24 = vmax.f32 %v6249_v15, 0.0  ;;  %v6126_v6 = vpop.f32.mrb[64].mxu1 }
 0x92b   :  { %v8110_v57 = vpack.c.bf16 %v6278_v52, %v6276_v16  ;;  %v6128_v2 = vpop.f32.mrb[65].mxu1  ;;  %v6250_v39 = vadd.f32 %v11394_v12, %v6126_v6 }
 0x92c   :  { %v8108_v51 = vpack.c.bf16 %v6279_v24, %v6277_v30  ;;  %v6251_v44 = vadd.f32 %v11397_v38, %v6128_v2 }
 0x92d   :  { %v6280_v54 = vmax.f32 %v6250_v39, 0.0 }
 0x92e   :  { %v6132_v50 = vpop.f32.mrb[66].mxu1  ;;  %8109 = vmatprep.subr.bf16.mxu0 %v8108_v51  ;;  %v6281_v33 = vmax.f32 %v6251_v44, 0.0 }
 0x92f   :  { %v6252_v40 = vadd.f32 %v11394_v12, %v6132_v50  ;;  %v6134_v53 = vpop.f32.mrb[67].mxu1  ;;  %8111 = vmatpush1.bf16.msra.mxu0 %v8110_v57 }
 0x930   :  { %v6253_v9 = vadd.f32 %v11397_v38, %v6134_v53 }
 0x931   :  { %v6282_v47 = vmax.f32 %v6252_v40, 0.0 }
 0x932   :  { %v6283_v10 = vmax.f32 %v6253_v9, 0.0  ;;  %v6138_v34 = vpop.f32.mrb[68].mxu1 }
 0x933   :  { %v8114_v35 = vpack.c.bf16 %v6282_v47, %v6280_v54  ;;  %v6140_v56 = vpop.f32.mrb[69].mxu1  ;;  %v6254_v20 = vadd.f32 %v11394_v12, %v6138_v34 }
 0x934   :  { %v8112_v61 = vpack.c.bf16 %v6283_v10, %v6281_v33  ;;  %v6255_v42 = vadd.f32 %v11397_v38, %v6140_v56 }
 0x935   :  { %v6284_v32 = vmax.f32 %v6254_v20, 0.0 }
 0x936   :  { %v6144_v46 = vpop.f32.mrb[70].mxu1  ;;  %8113 = vmatprep.subr.bf16.mxu0 %v8112_v61  ;;  %v6285_v23 = vmax.f32 %v6255_v42, 0.0 }
 0x937   :  { %v6256_v7 = vadd.f32 %v11394_v12, %v6144_v46  ;;  %v6146_v18 = vpop.f32.mrb[71].mxu1  ;;  %8115 = vmatpush1.bf16.msra.mxu0 %v8114_v35 }
 0x938   :  { %v6257_v45 = vadd.f32 %v11397_v38, %v6146_v18 }
 0x939   :  { %v6286_v5 = vmax.f32 %v6256_v7, 0.0 }
 0x93a   :  { %v6287_v17 = vmax.f32 %v6257_v45, 0.0  ;;  %v6150_v25 = vpop.f32.mrb[72].mxu1 }
 0x93b   :  { %v8118_v27 = vpack.c.bf16 %v6286_v5, %v6284_v32  ;;  %v6152_v26 = vpop.f32.mrb[73].mxu1  ;;  %v6258_v55 = vadd.f32 %v11394_v12, %v6150_v25 }
 0x93c   :  { %v8116_v31 = vpack.c.bf16 %v6287_v17, %v6285_v23  ;;  %v6259_v41 = vadd.f32 %v11397_v38, %v6152_v26 }
 0x93d   :  { %v6288_v14 = vmax.f32 %v6258_v55, 0.0  ;;  %v6396_v55 = vld [vmem:[%s11470_s5 + $0x70] sm:$0xff] }
 0x93e   :  { %v6156_v11 = vpop.f32.mrb[74].mxu1  ;;  %8117 = vmatprep.subr.bf16.mxu0 %v8116_v31  ;;  %v6289_v58 = vmax.f32 %v6259_v41, 0.0  ;;  %v6306_v31 = vld [vmem:[#allocation8] sm:$0xff]  ;;  %v6397_v41 = vld [vmem:[%s11470_s5 + $0x78] sm:$0xff]  ;;  %s8866_s5 = smov [#allocation19]  }
 0x93f   :  { %v6260_v4 = vadd.f32 %v11394_v12, %v6156_v11  ;;  %v6158_v28 = vpop.f32.mrb[75].mxu1  ;;  %8119 = vmatpush1.bf16.msra.mxu0 %v8118_v27  ;;  %s6774_s28 = sshll.u32 %s8866_s5, 4  ;;  %s6775_s28 = int_to_ptr.vmem [resolvable:$true] %s6774_s28 }
 0x940   :  { %v6261_v59 = vadd.f32 %v11397_v38, %v6158_v28  ;;  %v6485_v28 = vld [vmem:[#allocation10 + $0x8] sm:$0xff]  ;;  %s8812_s1 = scalar_lea.vmem %s6775_s28, 128  ;;  %p8817_p11 = scmp.lt.s32.totalorder %s6775_s28, %s6775_s28 }
 0x941   :  { %v6290_v48 = vmax.f32 %v6260_v4, 0.0  ;;  %v6484_v4 = vld [vmem:[#allocation10] sm:$0xff]  ;;  %p8813_p10 = scmp.ne.s32.totalorder %s6775_s28, %s8812_s1  ;;  %p8818_p12 = scmp.lt.s32.totalorder %s8812_s1, %s8812_s1 }
 0x942   :  { %v6291_v21 = vmax.f32 %v6261_v59, 0.0  ;;  %v6162_v22 = vpop.f32.mrb[76].mxu1  ;;  %v8169_v59 = vpack.c.bf16 %v6485_v28, %v6484_v4 }
 0x943   :  { %v8122_v36 = vpack.c.bf16 %v6290_v48, %v6288_v14  ;;  %v6164_v0 = vpop.f32.mrb[77].mxu1  ;;  %v6262_v29 = vadd.f32 %v11394_v12, %v6162_v22  ;;  %v8864_v14 = vmov 0.0|0.0   ;;  %v6568_v48 = vld [vmem:[#allocation13] sm:$0xff]  ;;  %p8819_p13 = por %p8818_p12, %p8817_p11 }
 0x944   :  { %v8120_v60 = vpack.c.bf16 %v6291_v21, %v6289_v58  ;;  %v6263_v13 = vadd.f32 %v11397_v38, %v6164_v0  ;;  %v6569_v58 = vld [vmem:[#allocation13 + $0x8] sm:$0xff] }
 0x945   :  { %v6292_v49 = vmax.f32 %v6262_v29, 0.0  ;;  %v6571_v29 = vld [vmem:[#allocation13 + $0x18] sm:$0xff]  ;;  %p8820_p0 = pnand %p8819_p13, %p8813_p10 }
 0x946   :  { %v6168_v63 = vpop.f32.mrb[78].mxu1  ;;  %8121 = vmatprep.subr.bf16.mxu0 %v8120_v60  ;;  %v6293_v8 = vmax.f32 %v6263_v13, 0.0  ;;  %v6570_v60 = vld [vmem:[#allocation13 + $0x10] sm:$0xff] }
 0x947   :  { %v6264_v3 = vadd.f32 %v11394_v12, %v6168_v63  ;;  %v6170_v62 = vpop.f32.mrb[79].mxu1  ;;  %8123 = vmatpush1.bf16.msra.mxu0 %v8122_v36  ;;  %v8172_v36 = vpack.c.bf16 %v6569_v58, %v6568_v48  ;;  %v8175_v13 = vpack.c.bf16 %v6571_v29, %v6570_v60  ;;  %v6572_v63 = vld [vmem:[#allocation13 + $0x20] sm:$0xff] }
 0x948   :  { %v6265_v43 = vadd.f32 %v11397_v38, %v6170_v62 }
 0x949   :  { %v6294_v1 = vmax.f32 %v6264_v3, 0.0  ;;  %v6573_v3 = vld [vmem:[#allocation13 + $0x28] sm:$0xff] }
 0x94a   :  { %v6295_v37 = vmax.f32 %v6265_v43, 0.0  ;;  %v6174_v15 = vpop.f32.mrb[80].mxu1  ;;  %v8178_v62 = vpack.c.bf16 %v6573_v3, %v6572_v63  ;;  %v6574_v43 = vld [vmem:[#allocation13 + $0x30] sm:$0xff] }
 0x94b   :  { %v8126_v16 = vpack.c.bf16 %v6294_v1, %v6292_v49  ;;  %v6176_v52 = vpop.f32.mrb[81].mxu1  ;;  %v6266_v24 = vadd.f32 %v11394_v12, %v6174_v15  ;;  %v6575_v49 = vld [vmem:[#allocation13 + $0x38] sm:$0xff] }
 0x94c   :  { %v8124_v30 = vpack.c.bf16 %v6295_v37, %v6293_v8  ;;  %v6267_v6 = vadd.f32 %v11397_v38, %v6176_v52  ;;  %v8181_v1 = vpack.c.bf16 %v6575_v49, %v6574_v43  ;;  %v6658_v8 = vld [vmem:[#allocation16] sm:$0xff]  ;;  %v6659_v37 = vld [vmem:[#allocation16 + $0x8] sm:$0xff]  ;;  %v6660_v15 = vld [vmem:[#allocation16 + $0x10] sm:$0xff] }
 0x94d   :  { %v6296_v44 = vmax.f32 %v6266_v24, 0.0  ;;  %v6661_v52 = vld [vmem:[#allocation16 + $0x18] sm:$0xff]  ;;  %v6662_v24 = vld [vmem:[#allocation16 + $0x20] sm:$0xff] }
 0x94e   :  { %v6180_v57 = vpop.f32.mrb[82].mxu1  ;;  %8125 = vmatprep.subr.bf16.mxu0 %v8124_v30  ;;  %v6297_v40 = vmax.f32 %v6267_v6, 0.0  ;;  %v8187_v30 = vpack.c.bf16 %v6661_v52, %v6660_v15  ;;  %v6663_v6 = vld [vmem:[#allocation16 + $0x28] sm:$0xff] }
 0x94f   :  { %v6268_v2 = vadd.f32 %v11394_v12, %v6180_v57  ;;  %v6182_v51 = vpop.f32.mrb[83].mxu1  ;;  %8127 = vmatpush1.bf16.msra.mxu0 %v8126_v16  ;;  %v8184_v16 = vpack.c.bf16 %v6659_v37, %v6658_v8  ;;  %v8190_v57 = vpack.c.bf16 %v6663_v6, %v6662_v24 }
 0x950   :  { %v6269_v39 = vadd.f32 %v11397_v38, %v6182_v51  ;;  %v6665_v51 = vld [vmem:[#allocation16 + $0x38] sm:$0xff] }
 0x951   :  { %v6298_v50 = vmax.f32 %v6268_v2, 0.0  ;;  %v6664_v2 = vld [vmem:[#allocation16 + $0x30] sm:$0xff] }
 0x952   :  { %v6299_v53 = vmax.f32 %v6269_v39, 0.0  ;;  %v6186_v9 = vpop.f32.mrb[84].mxu1  ;;  %v8193_v39 = vpack.c.bf16 %v6665_v51, %v6664_v2 }
 0x953   :  { %v8130_v54 = vpack.c.bf16 %v6298_v50, %v6296_v44  ;;  %v6188_v47 = vpop.f32.mrb[85].mxu1  ;;  %v6270_v10 = vadd.f32 %v11394_v12, %v6186_v9  ;;  %v6666_v44 = vld [vmem:[#allocation16 + $0x40] sm:$0xff]  ;;  %v6667_v50 = vld [vmem:[#allocation16 + $0x48] sm:$0xff]  ;;  %v6669_v9 = vld [vmem:[#allocation16 + $0x58] sm:$0xff] }
 0x954   :  { %v8128_v33 = vpack.c.bf16 %v6299_v53, %v6297_v40  ;;  %v6271_v34 = vadd.f32 %v11397_v38, %v6188_v47  ;;  %v8196_v40 = vpack.c.bf16 %v6667_v50, %v6666_v44  ;;  %v6668_v53 = vld [vmem:[#allocation16 + $0x50] sm:$0xff]  ;;  %v6670_v47 = vld [vmem:[#allocation16 + $0x60] sm:$0xff] }
 0x955   :  { %v6300_v42 = vmax.f32 %v6270_v10, 0.0 }
 0x956   :  { %v6192_v35 = vpop.f32.mrb[86].mxu1  ;;  %8129 = vmatprep.subr.bf16.mxu0 %v8128_v33  ;;  %v6301_v7 = vmax.f32 %v6271_v34, 0.0  ;;  %v6671_v33 = vld [vmem:[#allocation16 + $0x68] sm:$0xff]  ;;  %v6825_v34 = vld [vmem:[#allocation11] ss:$0 sm:$0xff] }
 0x957   :  { %v6272_v56 = vadd.f32 %v11394_v12, %v6192_v35  ;;  %v6194_v61 = vpop.f32.mrb[87].mxu1  ;;  %8131 = vmatpush1.bf16.msra.mxu0 %v8130_v54  ;;  %v8199_v54 = vpack.c.bf16 %v6669_v9, %v6668_v53  ;;  %v8202_v10 = vpack.c.bf16 %v6671_v33, %v6670_v47 }
 0x958   :  { %v6273_v20 = vadd.f32 %v11397_v38, %v6194_v61 }
 0x959   :  { %v6302_v46 = vmax.f32 %v6272_v56, 0.0 }
 0x95a   :  { %v6303_v18 = vmax.f32 %v6273_v20, 0.0  ;;  %v6198_v45 = vpop.f32.mrb[88].mxu1 }
 0x95b   :  { %v8134_v32 = vpack.c.bf16 %v6302_v46, %v6300_v42  ;;  %v6200_v5 = vpop.f32.mrb[89].mxu1  ;;  %v6274_v25 = vadd.f32 %v11394_v12, %v6198_v45  ;;  %v6672_v42 = vld [vmem:[#allocation16 + $0x70] sm:$0xff]  ;;  %v6673_v46 = vld [vmem:[#allocation16 + $0x78] sm:$0xff] }
 0x95c   :  { %v8132_v23 = vpack.c.bf16 %v6303_v18, %v6301_v7  ;;  %v6275_v17 = vadd.f32 %v11397_v38, %v6200_v5  ;;  %v8166_v38 = vpack.c.bf16 %v6397_v41, %v6396_v55  ;;  %v8205_v7 = vpack.c.bf16 %v6673_v46, %v6672_v42  ;;  %v6827_v18 = vld [vmem:[#allocation14] ss:$0 sm:$0xff] }
 0x95d   :  { %v6304_v26 = vmax.f32 %v6274_v25, 0.0 }
 0x95e   :  { %v6305_v27 = vmax.f32 %v6275_v17, 0.0  ;;  %8133 = vmatprep.subr.bf16.mxu0 %v8132_v23  ;;  %8167 = vmatpush3.bf16.msra.mxu1 %v8166_v38  ;;  %v6829_v17 = vld [vmem:[#allocation17] ss:$0 sm:$0xff] }
 0x95f   :  { %8135 = vmatpush1.bf16.msra.mxu0 %v8134_v32  ;;  %8168 = vmatprep.subr.bf16.mxu1 %v8864_v14 }
 0x960   :  { %6339 = vmatprep.subr.mxu0 %v6305_v27 }
 0x963   :  { %6340 = vmatpush1.msra.mxu0 %v6304_v26 }
 0x964   :  { %6824 = vmatmul.mubr.msk.f32.vlgmr.msra.gmra.mrb[90].mxu0 %vm6307_vm3, %v6306_v31  ;;  %8183 = vmatprep.subr.bf16.mxu0 %v8864_v14 }
 0x965   :  { %6953 = vmatprep.mubr.msk.f32.mxu0 %vm8865_vm4, %v8863_v19  ;;  %8185 = vmatpush3.bf16.msra.mxu0 %v8184_v16 }
 0x966   :  { %8186 = vmatprep.subr.bf16.mxu0 %v8864_v14 }
 0x969   :  { %8188 = vmatpush3.bf16.msra.mxu0 %v8187_v30 }
 0x96a   :  { %8189 = vmatprep.subr.bf16.mxu0 %v8864_v14 }
 0x96d   :  { %8191 = vmatpush3.bf16.msra.mxu0 %v8190_v57 }
 0x96e   :  { %8192 = vmatprep.subr.bf16.mxu0 %v8864_v14 }
 0x971   :  { %8194 = vmatpush3.bf16.msra.mxu0 %v8193_v39 }
 0x972   :  { %8195 = vmatprep.subr.bf16.mxu0 %v8864_v14 }
 0x975   :  { %8197 = vmatpush3.bf16.msra.mxu0 %v8196_v40 }
 0x976   :  { %8198 = vmatprep.subr.bf16.mxu0 %v8864_v14 }
 0x979   :  { %8200 = vmatpush3.bf16.msra.mxu0 %v8199_v54 }
 0x97a   :  { %8201 = vmatprep.subr.bf16.mxu0 %v8864_v14 }
 0x97d   :  { %8203 = vmatpush3.bf16.msra.mxu0 %v8202_v10 }
 0x97e   :  { %8204 = vmatprep.subr.bf16.mxu0 %v8864_v14 }
 0x981   :  { %8206 = vmatpush3.bf16.msra.mxu0 %v8205_v7 }
 0xa37   :  { %v6377_v12 = vpop.f32.mrb[90].mxu0 }
 0xa38   :  { %v6379_v11 = vpop.f32.mrb[91].mxu0 }
 0xa39   :  { %6478 = vmatprep.mubr.f32.mxu1 %v6379_v11 }
 0xa3a   :  { %6479 = vmatmul.mubr.f32.vlgmr.msra.gmra.mrb[90].mxu1 %v6377_v12  ;;  %v12061_v12 = vlaneseq }
 0xa3b   :  { %8170 = vmatpush3.bf16.msra.mxu1 %v8169_v59  ;;  %6899 = vmatprep.mubr.msk.f32.mxu1 %vm8865_vm4, %v8863_v19 }
 0xa3c   :  { %8171 = vmatprep.subr.bf16.mxu1 %v8864_v14  ;;  %v6753_v11 = vand.u32 127, %v12061_v12 }
 0xa3e   :  { %vm6754_vm7 = vcmp.lt.s32.totalorder %v6753_v11, 4 }
 0xa3f   :  { %v6830_v4 = vsel %vm6754_vm7, 1.0, %v8863_v19 }
 0xb0d   :  { %v6863_v21 = vpop.f32.mrb[90].mxu1 }
 0xb0e   :  { %v6864_v22 = vpop.f32.mrb[91].mxu1 }
 0xb0f   :  { %v6865_v0 = vadd.f32 %v6864_v22, %v6863_v21 }
 0xb11   :  { %6900 = vmatmul.mubr.msk.f32.vlgmr.msra.gmra.mrb[92].mxu1 %vm6493_vm5, %v6865_v0 }
 0xb12   :  { %8173 = vmatpush3.bf16.msra.mxu1 %v8172_v36  ;;  %6918 = vmatprep.mubr.msk.f32.mxu1 %vm8865_vm4, %v8863_v19 }
 0xb13   :  { %8174 = vmatprep.subr.bf16.mxu1 %v8864_v14 }
 0xb16   :  { %8176 = vmatpush3.bf16.msra.mxu1 %v8175_v13 }
 0xb17   :  { %8177 = vmatprep.subr.bf16.mxu1 %v8864_v14 }
 0xb1a   :  { %8179 = vmatpush3.bf16.msra.mxu1 %v8178_v62 }
 0xb1b   :  { %8180 = vmatprep.subr.bf16.mxu1 %v8864_v14 }
 0xb1e   :  { %8182 = vmatpush3.bf16.msra.mxu1 %v8181_v1 }
 0xbe4   :  { %v6563_v35 = vpop.f32.mrb[92].mxu1 }
 0xbe5   :  { %v6564_v56 = vadd.f32 %v6825_v34, %v6563_v35  ;;  %v6901_v61 = vpop.f32.mrb[93].mxu1 }
 0xbe7   :  { %v6567_v20 = vmax.f32 %v6564_v56, 0.0 }
 0xbe9   :  { %6919 = vmatmul.mubr.msk.f32.vlgmr.msra.gmra.mrb[94].mxu1 %vm6583_vm6, %v6567_v20 }
 0xcbc   :  { %v6653_v45 = vpop.f32.mrb[94].mxu1 }
 0xcbd   :  { %v6654_v32 = vadd.f32 %v6827_v18, %v6653_v45  ;;  %v6920_v5 = vpop.f32.mrb[95].mxu1 }
 0xcbf   :  { %v6657_v23 = vmax.f32 %v6654_v32, 0.0 }
 0xcc1   :  { %6954 = vmatmul.mubr.f32.vlgmr.msra.gmra.mrb[92].mxu0 %v6657_v23 }
 0xd94   :  { %v6747_v25 = vpop.f32.mrb[92].mxu0 }
 0xd95   :  { %v6748_v27 = vadd.f32 %v6829_v17, %v6747_v25  ;;  %v6955_v26 = vpop.f32.mrb[93].mxu0 }
 0xd97   :  { %v6751_v31 = vmax.f32 %v6748_v27, 0.0 }
 0xd99   :  { %6757 = vmax.xlane.f32.xlu1 %v6751_v31 }
 0xe26   :  { %v6758_v55 = vpop.xlane.xlu1 %6757 }
 0xe27   :  { %v6759_v41 = vsub.f32 %v6751_v31, %v6758_v55 }
 0xe29   :  { %v6760_v38 = vmul.f32 1.442695, %v6759_v41 }
 0xe2b   :  { %8588 = vpow2.f32 %v6760_v38 }
 0xe35   :  { %v8589_v28 = vpop.eup %8588 }
 0xe36   :  { %v6762_v59 = vmul.f32 %v8589_v28, %v6830_v4 }
 0xe38   :  { %6763 = vadd.xlane.f32.xlu0 %v6762_v59 }
 0xec5   :  { %v6764_v14 = vpop.xlane.xlu0 %6763 }
 0xec6   :  { %8590 = vrcp.f32 %v6764_v14 }
 0xed0   :  { %v8591_v48 = vpop.eup %8590 }
 0xed1   :  { %v6766_v58 = vmul.f32 %v8591_v48, %v6762_v59 }
 0xed3   :  { %6767 = vst [vmem:[#allocation19] sm:$0xff] %v6766_v58 }
 0xed4   :  { %8823 = shalt.err (!%p8820_p0)
}
 0xed5   :  { %s8824_s9 = scalar_lea.hbm %s11477_s12, 128 }
 0xed6   :  { %p8825_p1 = scmp.ne.s32.totalorder %s11477_s12, %s8824_s9  ;;  %p8828_p2 = scmp.lt.u32.totalorder %s8824_s9, %s11477_s12 }
 0xed8   :  { %p8830_p3 = pnand %p8828_p2, %p8825_p1 }
 0xeda   :  { %8833 = shalt.err (!%p8830_p3)
}
 0xedb   :  { %6777 = dma.vmem_to_hbm [thread:$0]  %s6775_s28, 128, %s11477_s12, [#allocation4]  }
 0xedc   :  { %8846 = dma.done.wait [#allocation4], 128  }
 0xedd   :  { %8847 = vsyncadd [#allocation4], 4294967168 }
 0xede   :  { %6781 = vsyncpa [#allocation3], 1 }
 0xedf   :  { %6782 = vsyncpa [#allocation6], 1 }
 0xee0   :  { %6783 = vsyncpa [#allocation9], 1 }
 0xee1   :  { %6784 = vsyncpa [#allocation12], 1 }
 0xee2   :  { %6785 = vsyncpa [#allocation15], 1 }
 0xee3   :  { %6786 = vsyncpa [#allocation18], 1 }
 0xee4   :  { %6787 = vsyncpa [#allocation4], 1 }

</bundles_post_ra>
